<compile_context>
chip_gen: v5e
topology: v5e:2x2
jax: 0.10.0
libtpu: 0.0.40
codegen_flags: <defaults>
</compile_context>

<pallas_src>
import functools

import jax
import jax.numpy as jnp
from jax.experimental import pallas as pl
from jax.experimental.pallas import tpu as pltpu

EPS = 1e-5          # nn.BatchNorm2d default eps
TILE_M = 512        # row tile for the M = N*H*W axis (per review sweep range)


def _round_up(v, mult):
    return ((v + mult - 1) // mult) * mult


@functools.lru_cache(maxsize=1)
def _vmem_limit_bytes():
    # Per-generation scoped-VMEM cap: ~3/4 of physical (v7x: 64 MiB/TC).
    try:
        cap = int(pltpu.get_tpu_info().vmem_capacity_bytes)
        return min(cap * 3 // 4, 96 * 1024 * 1024)
    except Exception:
        return 48 * 1024 * 1024


def _cparams():
    return pltpu.CompilerParams(
        dimension_semantics=("parallel",),
        vmem_limit_bytes=_vmem_limit_bytes(),
    )


def _pick_tile_m(m, target=TILE_M):
    """Full M if it already fits the target tile, else a multiple of 8."""
    if m <= target:
        return m
    return max((target // 8) * 8, 8)


# ---------------------------------------------------------------------------
# Kernel A: packed-feature read -> BN1 -> ReLU -> conv1 (1x1), one MXU matmul
# with K = padded Cin.  Also emits per-tile partial sums for the BN2 stats.
# ---------------------------------------------------------------------------
def _bottleneck_kernel(scale_ref, shift_ref, w1_ref, x_ref, b_ref, st_ref,
                       *, m_total, need_mask):
    x = x_ref[...]                                            # (tm, K) f32
    t = jnp.maximum(x * scale_ref[...] + shift_ref[...], 0.0)  # BN1 + ReLU
    acc = jnp.dot(t.astype(jnp.bfloat16), w1_ref[...],         # one K=Cin dot
                  preferred_element_type=jnp.float32)          # (tm, Cmid)
    b_ref[...] = acc.astype(b_ref.dtype)

    # BN2 partial statistics (mask rows beyond M on a partial tail tile).
    if need_mask:
        row = jax.lax.broadcasted_iota(jnp.int32, acc.shape, 0)
        acc = jnp.where(row + pl.program_id(0) * acc.shape[0] < m_total,
                        acc, 0.0)
    st_ref[0, 0:1, :] = jnp.sum(acc, axis=0, keepdims=True)
    st_ref[0, 1:2, :] = jnp.sum(acc * acc, axis=0, keepdims=True)


def _bottleneck(buf, k, scale1, shift1, w1_bf16):
    m, _ = buf.shape
    cmid = w1_bf16.shape[1]
    tm = _pick_tile_m(m)
    nt = pl.cdiv(m, tm)
    kern = functools.partial(_bottleneck_kernel, m_total=m,
                             need_mask=(m % tm != 0))
    b2d, pstats = pl.pallas_call(
        kern,
        grid=(nt,),
        in_specs=[
            pl.BlockSpec((1, k), lambda i: (0, 0)),
            pl.BlockSpec((1, k), lambda i: (0, 0)),
            pl.BlockSpec((k, cmid), lambda i: (0, 0)),
            pl.BlockSpec((tm, k), lambda i: (i, 0)),   # lane-dense packed read
        ],
        out_specs=[
            pl.BlockSpec((tm, cmid), lambda i: (i, 0)),
            pl.BlockSpec((1, 2, cmid), lambda i: (i, 0, 0)),
        ],
        out_shape=[
            jax.ShapeDtypeStruct((m, cmid), jnp.float32),
            jax.ShapeDtypeStruct((nt, 2, cmid), jnp.float32),
        ],
        compiler_params=_cparams(),
    )(scale1.reshape(1, -1), shift1.reshape(1, -1), w1_bf16, buf)
    return b2d, pstats


# ---------------------------------------------------------------------------
# Kernel B: BN2 -> ReLU -> 3x3 conv (padding=1) as ONE (HW,Cmid)x(Cmid,9g)
# matmul (taps fill the MXU N dim) + nine statically shifted output-slab adds.
# Also emits per-image channel sums of the new features (BN1 stats later).
# ---------------------------------------------------------------------------
def _conv3x3_kernel(b_ref, scale_ref, shift_ref, w2r_ref, out_ref, st_ref,
                    acc_ref):
    _, h, w, cmid = b_ref.shape
    g = out_ref.shape[-1]

    scale = scale_ref[...].reshape(1, 1, cmid)
    shift = shift_ref[...].reshape(1, 1, cmid)
    z = jnp.maximum(b_ref[0] * scale + shift, 0.0)              # (H, W, Cmid)

    y = jnp.dot(z.reshape(h * w, cmid).astype(jnp.bfloat16),
                w2r_ref[...], preferred_element_type=jnp.float32)  # (HW, 9g)
    y3 = y.reshape(h, w, 9 * g)

    # Centre tap (dy=1, dx=1) covers every output pixel -> it initializes the
    # accumulator, so the scratch never needs a zero-fill.
    acc_ref[...] = y3[:, :, 4 * g:5 * g]
    for dy in range(3):
        for dx in range(3):
            if dy == 1 and dx == 1:
                continue
            t = dy * 3 + dx
            oy0, oy1 = max(0, 1 - dy), h - max(0, dy - 1)
            ox0, ox1 = max(0, 1 - dx), w - max(0, dx - 1)
            iy0, iy1 = oy0 + dy - 1, oy1 + dy - 1
            ix0, ix1 = ox0 + dx - 1, ox1 + dx - 1
            acc_ref[oy0:oy1, ox0:ox1, :] = (
                acc_ref[oy0:oy1, ox0:ox1, :]
                + y3[iy0:iy1, ix0:ix1, t * g:(t + 1) * g])

    acc = acc_ref[...]
    out_ref[0] = acc.astype(out_ref.dtype)

    s1 = jnp.sum(acc, axis=0)                                   # (W, g)
    sq = jnp.sum(acc * acc, axis=0)                             # (W, g)
    st_ref[0, 0:1, :] = jnp.sum(s1, axis=0, keepdims=True)      # (1, g)
    st_ref[0, 1:2, :] = jnp.sum(sq, axis=0, keepdims=True)


def _conv3x3(b4, scale2, shift2, w2r_bf16):
    # TODO(synk): for very large feature maps, tile over halo'd H-row tiles
    # (batch x row-tile parallel grid) to bound VMEM on v7x and keep both
    # TensorCores busy; whole-image blocks are ample at these sizes.
    n, h, w, cmid = b4.shape
    g = w2r_bf16.shape[-1] // 9
    new4, nstats = pl.pallas_call(
        _conv3x3_kernel,
        grid=(n,),
        in_specs=[
            pl.BlockSpec((1, h, w, cmid), lambda i: (i, 0, 0, 0)),
            pl.BlockSpec((1, cmid), lambda i: (0, 0)),
            pl.BlockSpec((1, cmid), lambda i: (0, 0)),
            pl.BlockSpec((cmid, 9 * g), lambda i: (0, 0)),
        ],
        out_specs=[
            pl.BlockSpec((1, h, w, g), lambda i: (i, 0, 0, 0)),
            pl.BlockSpec((1, 2, g), lambda i: (i, 0, 0)),
        ],
        out_shape=[
            jax.ShapeDtypeStruct((n, h, w, g), jnp.float32),
            jax.ShapeDtypeStruct((n, 2, g), jnp.float32),
        ],
        scratch_shapes=[pltpu.VMEM((h, w, g), jnp.float32)],
        compiler_params=_cparams(),
    )(b4, scale2.reshape(1, -1), shift2.reshape(1, -1), w2r_bf16)
    return new4, nstats


# ---------------------------------------------------------------------------
# Dense block forward (wrapper / glue)
# ---------------------------------------------------------------------------
def dense_block_forward(x_nchw, params):
    n, c_in, h, w = x_nchw.shape
    m = n * h * w
    c_total = c_in + sum(p["w2"].shape[-1] for p in params)
    c_pad = _round_up(c_total, 128)

    x = jnp.transpose(x_nchw, (0, 2, 3, 1)).astype(jnp.float32)   # NHWC
    x2d = x.reshape(m, c_in)

    # Packed (M, C_pad) feature buffer: columns [0, c_total) hold the running
    # torch.cat(features, 1); padding columns stay zero.
    buf = jnp.zeros((m, c_pad), jnp.float32)
    buf = jax.lax.dynamic_update_slice(buf, x2d, (0, 0))

    # Per-feature (mean, var): channel stats of the concat equal the concat of
    # per-feature channel stats, so each channel's stats are computed once.
    stats = [(jnp.mean(x2d, axis=0), jnp.var(x2d, axis=0))]

    cin_l = c_in
    for layer in params:
        cmid = layer["w1"].shape[1]
        g = layer["w2"].shape[-1]
        k_l = min(_round_up(cin_l, 128), c_pad)
        pad = k_l - cin_l

        # BN1 (training-mode batch stats) folded into per-channel scale/shift;
        # padded channels get scale=shift=0 and zero weight rows (exact zeros).
        mean1 = jnp.concatenate([s[0] for s in stats])
        var1 = jnp.concatenate([s[1] for s in stats])
        scale1 = layer["gamma1"] * jax.lax.rsqrt(var1 + EPS)
        shift1 = layer["beta1"] - mean1 * scale1
        scale1 = jnp.pad(scale1, (0, pad))
        shift1 = jnp.pad(shift1, (0, pad))
        w1 = jnp.pad(layer["w1"], ((0, pad), (0, 0))).astype(jnp.bfloat16)

        # Kernel A: packed read -> BN1 -> ReLU -> 1x1 conv (+ BN2 partials).
        b2d, pstats = _bottleneck(buf, k_l, scale1, shift1, w1)

        # BN2 batch statistics from the fused per-tile partial sums.
        tot = pstats.sum(axis=0)
        mean2 = tot[0] / m
        var2 = jnp.maximum(tot[1] / m - mean2 * mean2, 0.0)
        scale2 = layer["gamma2"] * jax.lax.rsqrt(var2 + EPS)
        shift2 = layer["beta2"] - mean2 * scale2

        # 3x3 weights repacked: the nine taps become MXU output columns.
        w2r = jnp.transpose(layer["w2"], (2, 0, 1, 3)).reshape(cmid, 9 * g)
        w2r = w2r.astype(jnp.bfloat16)

        # Kernel B: BN2 -> ReLU -> 3x3 conv (one matmul + shifted adds).
        new4, nstats = _conv3x3(b2d.reshape(n, h, w, cmid), scale2, shift2,
                                w2r)

        # TODO(synk): input_output_aliases on the packed buffer would avoid
        # this (cheap, O(M*g)) wrapper-side copy of the new channels.
        buf = jax.lax.dynamic_update_slice(buf, new4.reshape(m, g),
                                           (0, cin_l))

        # TODO(synk): F.dropout(p=drop_rate) would need the pltpu PRNG;
        # drop_rate = 0 here so it is the identity.
        nsum = nstats.sum(axis=0)
        nmean = nsum[0] / m
        nvar = jnp.maximum(nsum[1] / m - nmean * nmean, 0.0)
        stats.append((nmean, nvar))
        cin_l += g

    out = buf[:, :c_total].reshape(n, h, w, c_total)   # == torch.cat(feats, 1)
    return jnp.transpose(out, (0, 3, 1, 2))            # back to NCHW


# ---------------------------------------------------------------------------
# Pure-JAX f32 reference (same training-mode BN semantics) for the self-check.
# ---------------------------------------------------------------------------
def _reference_forward(x_nchw, params):
    hi = jax.lax.Precision.HIGHEST
    feats = [x_nchw.astype(jnp.float32)]
    for layer in params:
        cat = jnp.concatenate(feats, axis=1)
        mean = cat.mean(axis=(0, 2, 3))[None, :, None, None]
        var = cat.var(axis=(0, 2, 3))[None, :, None, None]
        t = (cat - mean) * jax.lax.rsqrt(var + EPS)
        t = jnp.maximum(t * layer["gamma1"][None, :, None, None]
                        + layer["beta1"][None, :, None, None], 0.0)
        b = jnp.einsum("nchw,ck->nkhw", t, layer["w1"], precision=hi)
        mean2 = b.mean(axis=(0, 2, 3))[None, :, None, None]
        var2 = b.var(axis=(0, 2, 3))[None, :, None, None]
        t2 = (b - mean2) * jax.lax.rsqrt(var2 + EPS)
        t2 = jnp.maximum(t2 * layer["gamma2"][None, :, None, None]
                         + layer["beta2"][None, :, None, None], 0.0)
        w_oihw = jnp.transpose(layer["w2"], (3, 2, 0, 1))
        new = jax.lax.conv_general_dilated(
            t2, w_oihw, window_strides=(1, 1), padding=((1, 1), (1, 1)),
            dimension_numbers=("NCHW", "OIHW", "NCHW"), precision=hi)
        feats.append(new)
    return jnp.concatenate(feats, axis=1)


# ---------------------------------------------------------------------------
# Deterministic synthetic parameters (shapes from _DenseLayer2D.__init__)
# ---------------------------------------------------------------------------
def init_params(key, num_layers, num_input_features, bn_size, growth_rate):
    params = []
    nf = num_input_features
    cmid = bn_size * growth_rate
    for _ in range(num_layers):
        key, k0, k1, k2, k3, k4, k5 = jax.random.split(key, 7)
        params.append(dict(
            gamma1=jax.random.uniform(k0, (nf,), jnp.float32, 0.5, 1.5),
            beta1=0.1 * jax.random.normal(k1, (nf,), jnp.float32),
            # conv1 weight: torch (cmid, nf, 1, 1) -> stored as (nf, cmid)
            w1=jax.random.normal(k2, (nf, cmid), jnp.float32) / jnp.sqrt(nf),
            gamma2=jax.random.uniform(k3, (cmid,), jnp.float32, 0.5, 1.5),
            beta2=0.1 * jax.random.normal(k4, (cmid,), jnp.float32),
            # conv2 weight: torch (growth, cmid, 3, 3) -> stored (3,3,cmid,growth)
            w2=jax.random.normal(k5, (3, 3, cmid, growth_rate), jnp.float32)
               / jnp.sqrt(9.0 * cmid),
        ))
        nf += growth_rate
    return params


if __name__ == "__main__":
    key = jax.random.PRNGKey(0)
    kx, kp = jax.random.split(key)

    N, C, H, W = 2, 8, 16, 16
    num_layers, bn_size, growth_rate = 3, 4, 8

    x = jax.random.normal(kx, (N, C, H, W), jnp.float32)
    params = init_params(kp, num_layers, C, bn_size, growth_rate)

    out = jax.jit(dense_block_forward)(x, params)
    out = jax.block_until_ready(out)

    expected = (N, C + num_layers * growth_rate, H, W)
    assert out.shape == expected, (out.shape, expected)
    assert bool(jnp.all(jnp.isfinite(out)))

    ref = _reference_forward(x, params)
    # bf16 at the MXU boundary (+ BN stats derived from those outputs) is the
    # only intended deviation from the f32 reference.
    max_err = float(jnp.max(jnp.abs(out - ref)))
    assert bool(jnp.allclose(out, ref, rtol=1e-1, atol=1e-1)), max_err

    print("KERNEL_OK")
</pallas_src>

<mosaic_0001>
module attributes {stable_mosaic.version = 11 : i64} {
  func.func @_bottleneck_kernel(%arg0: i32, %arg1: memref<1x128xf32, #tpu.memory_space<vmem>>, %arg2: memref<1x128xf32, #tpu.memory_space<vmem>>, %arg3: memref<128x32xbf16, #tpu.memory_space<vmem>>, %arg4: memref<512x128xf32, #tpu.memory_space<vmem>>, %arg5: memref<512x32xf32, #tpu.memory_space<vmem>>, %arg6: memref<1x2x32xf32, #tpu.memory_space<vmem>>) attributes {dimension_semantics = [#tpu.dimension_semantics<parallel>], iteration_bounds = array<i64: 1>, scalar_prefetch = 0 : i64, scratch_operands = 0 : i64, tpu.core_type = #tpu.core_type<tc>, window_params = [{pipeline_mode = #tpu.pipeline_mode<synchronous>, transform_indices = @transform_0, window_bounds = array<i64: 1, 128>}, {pipeline_mode = #tpu.pipeline_mode<synchronous>, transform_indices = @transform_1, window_bounds = array<i64: 1, 128>}, {pipeline_mode = #tpu.pipeline_mode<synchronous>, transform_indices = @transform_2, window_bounds = array<i64: 128, 32>}, {transform_indices = @transform_3, window_bounds = array<i64: 512, 128>}, {transform_indices = @transform_4, window_bounds = array<i64: 512, 32>}, {transform_indices = @transform_5, window_bounds = array<i64: 1, 2, 32>}]} {
    %c0 = arith.constant 0 : index
    %c0_0 = arith.constant 0 : index
    %0 = vector.load %arg4[%c0, %c0_0] : memref<512x128xf32, #tpu.memory_space<vmem>>, vector<512x128xf32>
    %c0_1 = arith.constant 0 : index
    %c0_2 = arith.constant 0 : index
    %1 = vector.load %arg1[%c0_1, %c0_2] : memref<1x128xf32, #tpu.memory_space<vmem>>, vector<1x128xf32>
    %2 = vector.broadcast %1 : vector<1x128xf32> to vector<512x128xf32>
    %3 = arith.mulf %0, %2 : vector<512x128xf32>
    %c0_3 = arith.constant 0 : index
    %c0_4 = arith.constant 0 : index
    %4 = vector.load %arg2[%c0_3, %c0_4] : memref<1x128xf32, #tpu.memory_space<vmem>>, vector<1x128xf32>
    %5 = vector.broadcast %4 : vector<1x128xf32> to vector<512x128xf32>
    %6 = arith.addf %3, %5 : vector<512x128xf32>
    %cst = arith.constant 0.000000e+00 : f32
    %7 = vector.broadcast %cst : f32 to vector<512x128xf32>
    %8 = arith.maximumf %6, %7 : vector<512x128xf32>
    %9 = arith.truncf %8 : vector<512x128xf32> to vector<512x128xbf16>
    %c0_5 = arith.constant 0 : index
    %c0_6 = arith.constant 0 : index
    %10 = vector.load %arg3[%c0_5, %c0_6] : memref<128x32xbf16, #tpu.memory_space<vmem>>, vector<128x32xbf16>
    %cst_7 = arith.constant dense<0.000000e+00> : vector<512x32xf32>
    %11 = tpu.matmul %9, %10, %cst_7 {dimension_numbers = #tpu.dot_dimension_numbers<[1], [0], [0], [1], [0, 0, 1, 1], [], []>} : vector<512x128xbf16>, vector<128x32xbf16>, vector<512x32xf32> -> vector<512x32xf32>
    %c0_8 = arith.constant 0 : index
    %c0_9 = arith.constant 0 : index
    %12 = vector.load %arg5[%c0_8, %c0_9] : memref<512x32xf32, #tpu.memory_space<vmem>>, vector<512x32xf32>
    tpu.vector_store %arg5[%c0_8, %c0_9], %11 {strides = array<i32>} : memref<512x32xf32, #tpu.memory_space<vmem>>, vector<512x32xf32>,
    %cst_10 = arith.constant dense<0.000000e+00> : vector<32xf32>
    %13 = vector.multi_reduction <add>, %11, %cst_10 [0] : vector<512x32xf32> to vector<32xf32>
    %14 = vector.shape_cast %13 : vector<32xf32> to vector<1x32xf32>
    %c0_11 = arith.constant 0 : index
    %c0_12 = arith.constant 0 : index
    %c0_13 = arith.constant 0 : index
    %15 = vector.load %arg6[%c0_11, %c0_12, %c0_13] : memref<1x2x32xf32, #tpu.memory_space<vmem>>, vector<1x1x32xf32>
    %16 = vector.shape_cast %15 : vector<1x1x32xf32> to vector<1x32xf32>
    %17 = vector.shape_cast %14 : vector<1x32xf32> to vector<1x1x32xf32>
    tpu.vector_store %arg6[%c0_11, %c0_12, %c0_13], %17 {strides = array<i32>} : memref<1x2x32xf32, #tpu.memory_space<vmem>>, vector<1x1x32xf32>,
    %18 = arith.mulf %11, %11 : vector<512x32xf32>
    %cst_14 = arith.constant dense<0.000000e+00> : vector<32xf32>
    %19 = vector.multi_reduction <add>, %18, %cst_14 [0] : vector<512x32xf32> to vector<32xf32>
    %20 = vector.shape_cast %19 : vector<32xf32> to vector<1x32xf32>
    %c0_15 = arith.constant 0 : index
    %c1 = arith.constant 1 : index
    %c0_16 = arith.constant 0 : index
    %21 = vector.load %arg6[%c0_15, %c1, %c0_16] : memref<1x2x32xf32, #tpu.memory_space<vmem>>, vector<1x1x32xf32>
    %22 = vector.shape_cast %21 : vector<1x1x32xf32> to vector<1x32xf32>
    %23 = vector.shape_cast %20 : vector<1x32xf32> to vector<1x1x32xf32>
    tpu.vector_store %arg6[%c0_15, %c1, %c0_16], %23 {strides = array<i32>} : memref<1x2x32xf32, #tpu.memory_space<vmem>>, vector<1x1x32xf32>,
    return
  }
  func.func @transform_0(%arg0: i32) -> (i32, i32) {
    %c0_i32 = arith.constant 0 : i32
    %c0_i32_0 = arith.constant 0 : i32
    %c0_i32_1 = arith.constant 0 : i32
    return %c0_i32, %c0_i32_0 : i32, i32
  }
  func.func @transform_1(%arg0: i32) -> (i32, i32) {
    %c0_i32 = arith.constant 0 : i32
    %c0_i32_0 = arith.constant 0 : i32
    %c0_i32_1 = arith.constant 0 : i32
    return %c0_i32, %c0_i32_0 : i32, i32
  }
  func.func @transform_2(%arg0: i32) -> (i32, i32) {
    %c0_i32 = arith.constant 0 : i32
    %c0_i32_0 = arith.constant 0 : i32
    %c0_i32_1 = arith.constant 0 : i32
    return %c0_i32, %c0_i32_0 : i32, i32
  }
  func.func @transform_3(%arg0: i32) -> (i32, i32) {
    %c0_i32 = arith.constant 0 : i32
    %c0_i32_0 = arith.constant 0 : i32
    return %arg0, %c0_i32 : i32, i32
  }
  func.func @transform_4(%arg0: i32) -> (i32, i32) {
    %c0_i32 = arith.constant 0 : i32
    %c0_i32_0 = arith.constant 0 : i32
    return %arg0, %c0_i32 : i32, i32
  }
  func.func @transform_5(%arg0: i32) -> (i32, i32, i32) {
    %c0_i32 = arith.constant 0 : i32
    %c0_i32_0 = arith.constant 0 : i32
    %c0_i32_1 = arith.constant 0 : i32
    return %arg0, %c0_i32, %c0_i32_0 : i32, i32, i32
  }
}

module attributes {stable_mosaic.version = 11 : i64} {
  func.func @_conv3x3_kernel(%arg0: i32, %arg1: memref<1x16x16x32xf32, #tpu.memory_space<vmem>>, %arg2: memref<1x32xf32, #tpu.memory_space<vmem>>, %arg3: memref<1x32xf32, #tpu.memory_space<vmem>>, %arg4: memref<32x72xbf16, #tpu.memory_space<vmem>>, %arg5: memref<1x16x16x8xf32, #tpu.memory_space<vmem>>, %arg6: memref<1x2x8xf32, #tpu.memory_space<vmem>>, %arg7: memref<16x16x8xf32, #tpu.memory_space<vmem>>) attributes {dimension_semantics = [#tpu.dimension_semantics<parallel>], iteration_bounds = array<i64: 2>, scalar_prefetch = 0 : i64, scratch_operands = 1 : i64, tpu.core_type = #tpu.core_type<tc>, window_params = [{transform_indices = @transform_0, window_bounds = array<i64: 1, 16, 16, 32>}, {pipeline_mode = #tpu.pipeline_mode<synchronous>, transform_indices = @transform_1, window_bounds = array<i64: 1, 32>}, {pipeline_mode = #tpu.pipeline_mode<synchronous>, transform_indices = @transform_2, window_bounds = array<i64: 1, 32>}, {pipeline_mode = #tpu.pipeline_mode<synchronous>, transform_indices = @transform_3, window_bounds = array<i64: 32, 72>}, {transform_indices = @transform_4, window_bounds = array<i64: 1, 16, 16, 8>}, {transform_indices = @transform_5, window_bounds = array<i64: 1, 2, 8>}]} {
    %c0 = arith.constant 0 : index
    %c0_0 = arith.constant 0 : index
    %0 = vector.load %arg2[%c0, %c0_0] : memref<1x32xf32, #tpu.memory_space<vmem>>, vector<1x32xf32>
    %1 = vector.shape_cast %0 : vector<1x32xf32> to vector<1x1x32xf32>
    %c0_1 = arith.constant 0 : index
    %c0_2 = arith.constant 0 : index
    %2 = vector.load %arg3[%c0_1, %c0_2] : memref<1x32xf32, #tpu.memory_space<vmem>>, vector<1x32xf32>
    %3 = vector.shape_cast %2 : vector<1x32xf32> to vector<1x1x32xf32>
    %c0_3 = arith.constant 0 : index
    %c0_4 = arith.constant 0 : index
    %c0_5 = arith.constant 0 : index
    %c0_6 = arith.constant 0 : index
    %4 = vector.load %arg1[%c0_3, %c0_4, %c0_5, %c0_6] : memref<1x16x16x32xf32, #tpu.memory_space<vmem>>, vector<1x16x16x32xf32>
    %5 = vector.shape_cast %4 : vector<1x16x16x32xf32> to vector<16x16x32xf32>
    %6 = vector.broadcast %1 : vector<1x1x32xf32> to vector<16x16x32xf32>
    %7 = arith.mulf %5, %6 : vector<16x16x32xf32>
    %8 = vector.broadcast %3 : vector<1x1x32xf32> to vector<16x16x32xf32>
    %9 = arith.addf %7, %8 : vector<16x16x32xf32>
    %cst = arith.constant 0.000000e+00 : f32
    %10 = vector.broadcast %cst : f32 to vector<16x16x32xf32>
    %11 = arith.maximumf %9, %10 : vector<16x16x32xf32>
    %12 = vector.shape_cast %11 : vector<16x16x32xf32> to vector<256x32xf32>
    %13 = arith.truncf %12 : vector<256x32xf32> to vector<256x32xbf16>
    %c0_7 = arith.constant 0 : index
    %c0_8 = arith.constant 0 : index
    %14 = vector.load %arg4[%c0_7, %c0_8] : memref<32x72xbf16, #tpu.memory_space<vmem>>, vector<32x72xbf16>
    %cst_9 = arith.constant dense<0.000000e+00> : vector<256x72xf32>
    %15 = tpu.matmul %13, %14, %cst_9 {dimension_numbers = #tpu.dot_dimension_numbers<[1], [0], [0], [1], [0, 0, 1, 1], [], []>} : vector<256x32xbf16>, vector<32x72xbf16>, vector<256x72xf32> -> vector<256x72xf32>
    %16 = vector.shape_cast %15 : vector<256x72xf32> to vector<16x16x72xf32>
    %17 = vector.extract_strided_slice %16 {offsets = [0, 0, 32], sizes = [16, 16, 8], strides = [1, 1, 1]} : vector<16x16x72xf32> to vector<16x16x8xf32>
    %c0_10 = arith.constant 0 : index
    %c0_11 = arith.constant 0 : index
    %c0_12 = arith.constant 0 : index
    %18 = vector.load %arg7[%c0_10, %c0_11, %c0_12] : memref<16x16x8xf32, #tpu.memory_space<vmem>>, vector<16x16x8xf32>
    tpu.vector_store %arg7[%c0_10, %c0_11, %c0_12], %17 {strides = array<i32>} : memref<16x16x8xf32, #tpu.memory_space<vmem>>, vector<16x16x8xf32>,
    %c1 = arith.constant 1 : index
    %c1_13 = arith.constant 1 : index
    %c0_14 = arith.constant 0 : index
    %19 = vector.load %arg7[%c1, %c1_13, %c0_14] : memref<16x16x8xf32, #tpu.memory_space<vmem>>, vector<15x15x8xf32>
    %20 = vector.extract_strided_slice %16 {offsets = [0, 0, 0], sizes = [15, 15, 8], strides = [1, 1, 1]} : vector<16x16x72xf32> to vector<15x15x8xf32>
    %21 = arith.addf %19, %20 : vector<15x15x8xf32>
    %c1_15 = arith.constant 1 : index
    %c1_16 = arith.constant 1 : index
    %c0_17 = arith.constant 0 : index
    %22 = vector.load %arg7[%c1_15, %c1_16, %c0_17] : memref<16x16x8xf32, #tpu.memory_space<vmem>>, vector<15x15x8xf32>
    tpu.vector_store %arg7[%c1_15, %c1_16, %c0_17], %21 {strides = array<i32>} : memref<16x16x8xf32, #tpu.memory_space<vmem>>, vector<15x15x8xf32>,
    %c1_18 = arith.constant 1 : index
    %c0_19 = arith.constant 0 : index
    %c0_20 = arith.constant 0 : index
    %23 = vector.load %arg7[%c1_18, %c0_19, %c0_20] : memref<16x16x8xf32, #tpu.memory_space<vmem>>, vector<15x16x8xf32>
    %24 = vector.extract_strided_slice %16 {offsets = [0, 0, 8], sizes = [15, 16, 8], strides = [1, 1, 1]} : vector<16x16x72xf32> to vector<15x16x8xf32>
    %25 = arith.addf %23, %24 : vector<15x16x8xf32>
    %c1_21 = arith.constant 1 : index
    %c0_22 = arith.constant 0 : index
    %c0_23 = arith.constant 0 : index
    %26 = vector.load %arg7[%c1_21, %c0_22, %c0_23] : memref<16x16x8xf32, #tpu.memory_space<vmem>>, vector<15x16x8xf32>
    tpu.vector_store %arg7[%c1_21, %c0_22, %c0_23], %25 {strides = array<i32>} : memref<16x16x8xf32, #tpu.memory_space<vmem>>, vector<15x16x8xf32>,
    %c1_24 = arith.constant 1 : index
    %c0_25 = arith.constant 0 : index
    %c0_26 = arith.constant 0 : index
    %27 = vector.load %arg7[%c1_24, %c0_25, %c0_26] : memref<16x16x8xf32, #tpu.memory_space<vmem>>, vector<15x15x8xf32>
    %28 = vector.extract_strided_slice %16 {offsets = [0, 1, 16], sizes = [15, 15, 8], strides = [1, 1, 1]} : vector<16x16x72xf32> to vector<15x15x8xf32>
    %29 = arith.addf %27, %28 : vector<15x15x8xf32>
    %c1_27 = arith.constant 1 : index
    %c0_28 = arith.constant 0 : index
    %c0_29 = arith.constant 0 : index
    %30 = vector.load %arg7[%c1_27, %c0_28, %c0_29] : memref<16x16x8xf32, #tpu.memory_space<vmem>>, vector<15x15x8xf32>
    tpu.vector_store %arg7[%c1_27, %c0_28, %c0_29], %29 {strides = array<i32>} : memref<16x16x8xf32, #tpu.memory_space<vmem>>, vector<15x15x8xf32>,
    %c0_30 = arith.constant 0 : index
    %c1_31 = arith.constant 1 : index
    %c0_32 = arith.constant 0 : index
    %31 = vector.load %arg7[%c0_30, %c1_31, %c0_32] : memref<16x16x8xf32, #tpu.memory_space<vmem>>, vector<16x15x8xf32>
    %32 = vector.extract_strided_slice %16 {offsets = [0, 0, 24], sizes = [16, 15, 8], strides = [1, 1, 1]} : vector<16x16x72xf32> to vector<16x15x8xf32>
    %33 = arith.addf %31, %32 : vector<16x15x8xf32>
    %c0_33 = arith.constant 0 : index
    %c1_34 = arith.constant 1 : index
    %c0_35 = arith.constant 0 : index
    %34 = vector.load %arg7[%c0_33, %c1_34, %c0_35] : memref<16x16x8xf32, #tpu.memory_space<vmem>>, vector<16x15x8xf32>
    tpu.vector_store %arg7[%c0_33, %c1_34, %c0_35], %33 {strides = array<i32>} : memref<16x16x8xf32, #tpu.memory_space<vmem>>, vector<16x15x8xf32>,
    %c0_36 = arith.constant 0 : index
    %c0_37 = arith.constant 0 : index
    %c0_38 = arith.constant 0 : index
    %35 = vector.load %arg7[%c0_36, %c0_37, %c0_38] : memref<16x16x8xf32, #tpu.memory_space<vmem>>, vector<16x15x8xf32>
    %36 = vector.extract_strided_slice %16 {offsets = [0, 1, 40], sizes = [16, 15, 8], strides = [1, 1, 1]} : vector<16x16x72xf32> to vector<16x15x8xf32>
    %37 = arith.addf %35, %36 : vector<16x15x8xf32>
    %c0_39 = arith.constant 0 : index
    %c0_40 = arith.constant 0 : index
    %c0_41 = arith.constant 0 : index
    %38 = vector.load %arg7[%c0_39, %c0_40, %c0_41] : memref<16x16x8xf32, #tpu.memory_space<vmem>>, vector<16x15x8xf32>
    tpu.vector_store %arg7[%c0_39, %c0_40, %c0_41], %37 {strides = array<i32>} : memref<16x16x8xf32, #tpu.memory_space<vmem>>, vector<16x15x8xf32>,
    %c0_42 = arith.constant 0 : index
    %c1_43 = arith.constant 1 : index
    %c0_44 = arith.constant 0 : index
    %39 = vector.load %arg7[%c0_42, %c1_43, %c0_44] : memref<16x16x8xf32, #tpu.memory_space<vmem>>, vector<15x15x8xf32>
    %40 = vector.extract_strided_slice %16 {offsets = [1, 0, 48], sizes = [15, 15, 8], strides = [1, 1, 1]} : vector<16x16x72xf32> to vector<15x15x8xf32>
    %41 = arith.addf %39, %40 : vector<15x15x8xf32>
    %c0_45 = arith.constant 0 : index
    %c1_46 = arith.constant 1 : index
    %c0_47 = arith.constant 0 : index
    %42 = vector.load %arg7[%c0_45, %c1_46, %c0_47] : memref<16x16x8xf32, #tpu.memory_space<vmem>>, vector<15x15x8xf32>
    tpu.vector_store %arg7[%c0_45, %c1_46, %c0_47], %41 {strides = array<i32>} : memref<16x16x8xf32, #tpu.memory_space<vmem>>, vector<15x15x8xf32>,
    %c0_48 = arith.constant 0 : index
    %c0_49 = arith.constant 0 : index
    %c0_50 = arith.constant 0 : index
    %43 = vector.load %arg7[%c0_48, %c0_49, %c0_50] : memref<16x16x8xf32, #tpu.memory_space<vmem>>, vector<15x16x8xf32>
    %44 = vector.extract_strided_slice %16 {offsets = [1, 0, 56], sizes = [15, 16, 8], strides = [1, 1, 1]} : vector<16x16x72xf32> to vector<15x16x8xf32>
    %45 = arith.addf %43, %44 : vector<15x16x8xf32>
    %c0_51 = arith.constant 0 : index
    %c0_52 = arith.constant 0 : index
    %c0_53 = arith.constant 0 : index
    %46 = vector.load %arg7[%c0_51, %c0_52, %c0_53] : memref<16x16x8xf32, #tpu.memory_space<vmem>>, vector<15x16x8xf32>
    tpu.vector_store %arg7[%c0_51, %c0_52, %c0_53], %45 {strides = array<i32>} : memref<16x16x8xf32, #tpu.memory_space<vmem>>, vector<15x16x8xf32>,
    %c0_54 = arith.constant 0 : index
    %c0_55 = arith.constant 0 : index
    %c0_56 = arith.constant 0 : index
    %47 = vector.load %arg7[%c0_54, %c0_55, %c0_56] : memref<16x16x8xf32, #tpu.memory_space<vmem>>, vector<15x15x8xf32>
    %48 = vector.extract_strided_slice %16 {offsets = [1, 1, 64], sizes = [15, 15, 8], strides = [1, 1, 1]} : vector<16x16x72xf32> to vector<15x15x8xf32>
    %49 = arith.addf %47, %48 : vector<15x15x8xf32>
    %c0_57 = arith.constant 0 : index
    %c0_58 = arith.constant 0 : index
    %c0_59 = arith.constant 0 : index
    %50 = vector.load %arg7[%c0_57, %c0_58, %c0_59] : memref<16x16x8xf32, #tpu.memory_space<vmem>>, vector<15x15x8xf32>
    tpu.vector_store %arg7[%c0_57, %c0_58, %c0_59], %49 {strides = array<i32>} : memref<16x16x8xf32, #tpu.memory_space<vmem>>, vector<15x15x8xf32>,
    %c0_60 = arith.constant 0 : index
    %c0_61 = arith.constant 0 : index
    %c0_62 = arith.constant 0 : index
    %51 = vector.load %arg7[%c0_60, %c0_61, %c0_62] : memref<16x16x8xf32, #tpu.memory_space<vmem>>, vector<16x16x8xf32>
    %c0_63 = arith.constant 0 : index
    %c0_64 = arith.constant 0 : index
    %c0_65 = arith.constant 0 : index
    %c0_66 = arith.constant 0 : index
    %52 = vector.load %arg5[%c0_63, %c0_64, %c0_65, %c0_66] : memref<1x16x16x8xf32, #tpu.memory_space<vmem>>, vector<1x16x16x8xf32>
    %53 = vector.shape_cast %52 : vector<1x16x16x8xf32> to vector<16x16x8xf32>
    %54 = vector.shape_cast %51 : vector<16x16x8xf32> to vector<1x16x16x8xf32>
    tpu.vector_store %arg5[%c0_63, %c0_64, %c0_65, %c0_66], %54 {strides = array<i32>} : memref<1x16x16x8xf32, #tpu.memory_space<vmem>>, vector<1x16x16x8xf32>,
    %cst_67 = arith.constant dense<0.000000e+00> : vector<16x8xf32>
    %55 = vector.multi_reduction <add>, %51, %cst_67 [0] : vector<16x16x8xf32> to vector<16x8xf32>
    %56 = arith.mulf %51, %51 : vector<16x16x8xf32>
    %cst_68 = arith.constant dense<0.000000e+00> : vector<16x8xf32>
    %57 = vector.multi_reduction <add>, %56, %cst_68 [0] : vector<16x16x8xf32> to vector<16x8xf32>
    %cst_69 = arith.constant dense<0.000000e+00> : vector<8xf32>
    %58 = vector.multi_reduction <add>, %55, %cst_69 [0] : vector<16x8xf32> to vector<8xf32>
    %59 = vector.shape_cast %58 : vector<8xf32> to vector<1x8xf32>
    %c0_70 = arith.constant 0 : index
    %c0_71 = arith.constant 0 : index
    %c0_72 = arith.constant 0 : index
    %60 = vector.load %arg6[%c0_70, %c0_71, %c0_72] : memref<1x2x8xf32, #tpu.memory_space<vmem>>, vector<1x1x8xf32>
    %61 = vector.shape_cast %60 : vector<1x1x8xf32> to vector<1x8xf32>
    %62 = vector.shape_cast %59 : vector<1x8xf32> to vector<1x1x8xf32>
    tpu.vector_store %arg6[%c0_70, %c0_71, %c0_72], %62 {strides = array<i32>} : memref<1x2x8xf32, #tpu.memory_space<vmem>>, vector<1x1x8xf32>,
    %cst_73 = arith.constant dense<0.000000e+00> : vector<8xf32>
    %63 = vector.multi_reduction <add>, %57, %cst_73 [0] : vector<16x8xf32> to vector<8xf32>
    %64 = vector.shape_cast %63 : vector<8xf32> to vector<1x8xf32>
    %c0_74 = arith.constant 0 : index
    %c1_75 = arith.constant 1 : index
    %c0_76 = arith.constant 0 : index
    %65 = vector.load %arg6[%c0_74, %c1_75, %c0_76] : memref<1x2x8xf32, #tpu.memory_space<vmem>>, vector<1x1x8xf32>
    %66 = vector.shape_cast %65 : vector<1x1x8xf32> to vector<1x8xf32>
    %67 = vector.shape_cast %64 : vector<1x8xf32> to vector<1x1x8xf32>
    tpu.vector_store %arg6[%c0_74, %c1_75, %c0_76], %67 {strides = array<i32>} : memref<1x2x8xf32, #tpu.memory_space<vmem>>, vector<1x1x8xf32>,
    return
  }
  func.func @transform_0(%arg0: i32) -> (i32, i32, i32, i32) {
    %c0_i32 = arith.constant 0 : i32
    %c0_i32_0 = arith.constant 0 : i32
    %c0_i32_1 = arith.constant 0 : i32
    %c0_i32_2 = arith.constant 0 : i32
    return %arg0, %c0_i32, %c0_i32_0, %c0_i32_1 : i32, i32, i32, i32
  }
  func.func @transform_1(%arg0: i32) -> (i32, i32) {
    %c0_i32 = arith.constant 0 : i32
    %c0_i32_0 = arith.constant 0 : i32
    %c0_i32_1 = arith.constant 0 : i32
    return %c0_i32, %c0_i32_0 : i32, i32
  }
  func.func @transform_2(%arg0: i32) -> (i32, i32) {
    %c0_i32 = arith.constant 0 : i32
    %c0_i32_0 = arith.constant 0 : i32
    %c0_i32_1 = arith.constant 0 : i32
    return %c0_i32, %c0_i32_0 : i32, i32
  }
  func.func @transform_3(%arg0: i32) -> (i32, i32) {
    %c0_i32 = arith.constant 0 : i32
    %c0_i32_0 = arith.constant 0 : i32
    %c0_i32_1 = arith.constant 0 : i32
    return %c0_i32, %c0_i32_0 : i32, i32
  }
  func.func @transform_4(%arg0: i32) -> (i32, i32, i32, i32) {
    %c0_i32 = arith.constant 0 : i32
    %c0_i32_0 = arith.constant 0 : i32
    %c0_i32_1 = arith.constant 0 : i32
    %c0_i32_2 = arith.constant 0 : i32
    return %arg0, %c0_i32, %c0_i32_0, %c0_i32_1 : i32, i32, i32, i32
  }
  func.func @transform_5(%arg0: i32) -> (i32, i32, i32) {
    %c0_i32 = arith.constant 0 : i32
    %c0_i32_0 = arith.constant 0 : i32
    %c0_i32_1 = arith.constant 0 : i32
    return %arg0, %c0_i32, %c0_i32_0 : i32, i32, i32
  }
}

module attributes {stable_mosaic.version = 11 : i64} {
  func.func @_conv3x3_kernel(%arg0: i32, %arg1: memref<1x16x16x32xf32, #tpu.memory_space<vmem>>, %arg2: memref<1x32xf32, #tpu.memory_space<vmem>>, %arg3: memref<1x32xf32, #tpu.memory_space<vmem>>, %arg4: memref<32x72xbf16, #tpu.memory_space<vmem>>, %arg5: memref<1x16x16x8xf32, #tpu.memory_space<vmem>>, %arg6: memref<1x2x8xf32, #tpu.memory_space<vmem>>, %arg7: memref<16x16x8xf32, #tpu.memory_space<vmem>>) attributes {dimension_semantics = [#tpu.dimension_semantics<parallel>], iteration_bounds = array<i64: 2>, scalar_prefetch = 0 : i64, scratch_operands = 1 : i64, tpu.core_type = #tpu.core_type<tc>, window_params = [{transform_indices = @transform_0, window_bounds = array<i64: 1, 16, 16, 32>}, {pipeline_mode = #tpu.pipeline_mode<synchronous>, transform_indices = @transform_1, window_bounds = array<i64: 1, 32>}, {pipeline_mode = #tpu.pipeline_mode<synchronous>, transform_indices = @transform_2, window_bounds = array<i64: 1, 32>}, {pipeline_mode = #tpu.pipeline_mode<synchronous>, transform_indices = @transform_3, window_bounds = array<i64: 32, 72>}, {transform_indices = @transform_4, window_bounds = array<i64: 1, 16, 16, 8>}, {transform_indices = @transform_5, window_bounds = array<i64: 1, 2, 8>}]} {
    %c0 = arith.constant 0 : index
    %c0_0 = arith.constant 0 : index
    %0 = vector.load %arg2[%c0, %c0_0] : memref<1x32xf32, #tpu.memory_space<vmem>>, vector<1x32xf32>
    %1 = vector.shape_cast %0 : vector<1x32xf32> to vector<1x1x32xf32>
    %c0_1 = arith.constant 0 : index
    %c0_2 = arith.constant 0 : index
    %2 = vector.load %arg3[%c0_1, %c0_2] : memref<1x32xf32, #tpu.memory_space<vmem>>, vector<1x32xf32>
    %3 = vector.shape_cast %2 : vector<1x32xf32> to vector<1x1x32xf32>
    %c0_3 = arith.constant 0 : index
    %c0_4 = arith.constant 0 : index
    %c0_5 = arith.constant 0 : index
    %c0_6 = arith.constant 0 : index
    %4 = vector.load %arg1[%c0_3, %c0_4, %c0_5, %c0_6] : memref<1x16x16x32xf32, #tpu.memory_space<vmem>>, vector<1x16x16x32xf32>
    %5 = vector.shape_cast %4 : vector<1x16x16x32xf32> to vector<16x16x32xf32>
    %6 = vector.broadcast %1 : vector<1x1x32xf32> to vector<16x16x32xf32>
    %7 = arith.mulf %5, %6 : vector<16x16x32xf32>
    %8 = vector.broadcast %3 : vector<1x1x32xf32> to vector<16x16x32xf32>
    %9 = arith.addf %7, %8 : vector<16x16x32xf32>
    %cst = arith.constant 0.000000e+00 : f32
    %10 = vector.broadcast %cst : f32 to vector<16x16x32xf32>
    %11 = arith.maximumf %9, %10 : vector<16x16x32xf32>
    %12 = vector.shape_cast %11 : vector<16x16x32xf32> to vector<256x32xf32>
    %13 = arith.truncf %12 : vector<256x32xf32> to vector<256x32xbf16>
    %c0_7 = arith.constant 0 : index
    %c0_8 = arith.constant 0 : index
    %14 = vector.load %arg4[%c0_7, %c0_8] : memref<32x72xbf16, #tpu.memory_space<vmem>>, vector<32x72xbf16>
    %cst_9 = arith.constant dense<0.000000e+00> : vector<256x72xf32>
    %15 = tpu.matmul %13, %14, %cst_9 {dimension_numbers = #tpu.dot_dimension_numbers<[1], [0], [0], [1], [0, 0, 1, 1], [], []>} : vector<256x32xbf16>, vector<32x72xbf16>, vector<256x72xf32> -> vector<256x72xf32>
    %16 = vector.shape_cast %15 : vector<256x72xf32> to vector<16x16x72xf32>
    %17 = vector.extract_strided_slice %16 {offsets = [0, 0, 32], sizes = [16, 16, 8], strides = [1, 1, 1]} : vector<16x16x72xf32> to vector<16x16x8xf32>
    %c0_10 = arith.constant 0 : index
    %c0_11 = arith.constant 0 : index
    %c0_12 = arith.constant 0 : index
    %18 = vector.load %arg7[%c0_10, %c0_11, %c0_12] : memref<16x16x8xf32, #tpu.memory_space<vmem>>, vector<16x16x8xf32>
    tpu.vector_store %arg7[%c0_10, %c0_11, %c0_12], %17 {strides = array<i32>} : memref<16x16x8xf32, #tpu.memory_space<vmem>>, vector<16x16x8xf32>,
    %c1 = arith.constant 1 : index
    %c1_13 = arith.constant 1 : index
    %c0_14 = arith.constant 0 : index
    %19 = vector.load %arg7[%c1, %c1_13, %c0_14] : memref<16x16x8xf32, #tpu.memory_space<vmem>>, vector<15x15x8xf32>
    %20 = vector.extract_strided_slice %16 {offsets = [0, 0, 0], sizes = [15, 15, 8], strides = [1, 1, 1]} : vector<16x16x72xf32> to vector<15x15x8xf32>
    %21 = arith.addf %19, %20 : vector<15x15x8xf32>
    %c1_15 = arith.constant 1 : index
    %c1_16 = arith.constant 1 : index
    %c0_17 = arith.constant 0 : index
    %22 = vector.load %arg7[%c1_15, %c1_16, %c0_17] : memref<16x16x8xf32, #tpu.memory_space<vmem>>, vector<15x15x8xf32>
    tpu.vector_store %arg7[%c1_15, %c1_16, %c0_17], %21 {strides = array<i32>} : memref<16x16x8xf32, #tpu.memory_space<vmem>>, vector<15x15x8xf32>,
    %c1_18 = arith.constant 1 : index
    %c0_19 = arith.constant 0 : index
    %c0_20 = arith.constant 0 : index
    %23 = vector.load %arg7[%c1_18, %c0_19, %c0_20] : memref<16x16x8xf32, #tpu.memory_space<vmem>>, vector<15x16x8xf32>
    %24 = vector.extract_strided_slice %16 {offsets = [0, 0, 8], sizes = [15, 16, 8], strides = [1, 1, 1]} : vector<16x16x72xf32> to vector<15x16x8xf32>
    %25 = arith.addf %23, %24 : vector<15x16x8xf32>
    %c1_21 = arith.constant 1 : index
    %c0_22 = arith.constant 0 : index
    %c0_23 = arith.constant 0 : index
    %26 = vector.load %arg7[%c1_21, %c0_22, %c0_23] : memref<16x16x8xf32, #tpu.memory_space<vmem>>, vector<15x16x8xf32>
    tpu.vector_store %arg7[%c1_21, %c0_22, %c0_23], %25 {strides = array<i32>} : memref<16x16x8xf32, #tpu.memory_space<vmem>>, vector<15x16x8xf32>,
    %c1_24 = arith.constant 1 : index
    %c0_25 = arith.constant 0 : index
    %c0_26 = arith.constant 0 : index
    %27 = vector.load %arg7[%c1_24, %c0_25, %c0_26] : memref<16x16x8xf32, #tpu.memory_space<vmem>>, vector<15x15x8xf32>
    %28 = vector.extract_strided_slice %16 {offsets = [0, 1, 16], sizes = [15, 15, 8], strides = [1, 1, 1]} : vector<16x16x72xf32> to vector<15x15x8xf32>
    %29 = arith.addf %27, %28 : vector<15x15x8xf32>
    %c1_27 = arith.constant 1 : index
    %c0_28 = arith.constant 0 : index
    %c0_29 = arith.constant 0 : index
    %30 = vector.load %arg7[%c1_27, %c0_28, %c0_29] : memref<16x16x8xf32, #tpu.memory_space<vmem>>, vector<15x15x8xf32>
    tpu.vector_store %arg7[%c1_27, %c0_28, %c0_29], %29 {strides = array<i32>} : memref<16x16x8xf32, #tpu.memory_space<vmem>>, vector<15x15x8xf32>,
    %c0_30 = arith.constant 0 : index
    %c1_31 = arith.constant 1 : index
    %c0_32 = arith.constant 0 : index
    %31 = vector.load %arg7[%c0_30, %c1_31, %c0_32] : memref<16x16x8xf32, #tpu.memory_space<vmem>>, vector<16x15x8xf32>
    %32 = vector.extract_strided_slice %16 {offsets = [0, 0, 24], sizes = [16, 15, 8], strides = [1, 1, 1]} : vector<16x16x72xf32> to vector<16x15x8xf32>
    %33 = arith.addf %31, %32 : vector<16x15x8xf32>
    %c0_33 = arith.constant 0 : index
    %c1_34 = arith.constant 1 : index
    %c0_35 = arith.constant 0 : index
    %34 = vector.load %arg7[%c0_33, %c1_34, %c0_35] : memref<16x16x8xf32, #tpu.memory_space<vmem>>, vector<16x15x8xf32>
    tpu.vector_store %arg7[%c0_33, %c1_34, %c0_35], %33 {strides = array<i32>} : memref<16x16x8xf32, #tpu.memory_space<vmem>>, vector<16x15x8xf32>,
    %c0_36 = arith.constant 0 : index
    %c0_37 = arith.constant 0 : index
    %c0_38 = arith.constant 0 : index
    %35 = vector.load %arg7[%c0_36, %c0_37, %c0_38] : memref<16x16x8xf32, #tpu.memory_space<vmem>>, vector<16x15x8xf32>
    %36 = vector.extract_strided_slice %16 {offsets = [0, 1, 40], sizes = [16, 15, 8], strides = [1, 1, 1]} : vector<16x16x72xf32> to vector<16x15x8xf32>
    %37 = arith.addf %35, %36 : vector<16x15x8xf32>
    %c0_39 = arith.constant 0 : index
    %c0_40 = arith.constant 0 : index
    %c0_41 = arith.constant 0 : index
    %38 = vector.load %arg7[%c0_39, %c0_40, %c0_41] : memref<16x16x8xf32, #tpu.memory_space<vmem>>, vector<16x15x8xf32>
    tpu.vector_store %arg7[%c0_39, %c0_40, %c0_41], %37 {strides = array<i32>} : memref<16x16x8xf32, #tpu.memory_space<vmem>>, vector<16x15x8xf32>,
    %c0_42 = arith.constant 0 : index
    %c1_43 = arith.constant 1 : index
    %c0_44 = arith.constant 0 : index
    %39 = vector.load %arg7[%c0_42, %c1_43, %c0_44] : memref<16x16x8xf32, #tpu.memory_space<vmem>>, vector<15x15x8xf32>
    %40 = vector.extract_strided_slice %16 {offsets = [1, 0, 48], sizes = [15, 15, 8], strides = [1, 1, 1]} : vector<16x16x72xf32> to vector<15x15x8xf32>
    %41 = arith.addf %39, %40 : vector<15x15x8xf32>
    %c0_45 = arith.constant 0 : index
    %c1_46 = arith.constant 1 : index
    %c0_47 = arith.constant 0 : index
    %42 = vector.load %arg7[%c0_45, %c1_46, %c0_47] : memref<16x16x8xf32, #tpu.memory_space<vmem>>, vector<15x15x8xf32>
    tpu.vector_store %arg7[%c0_45, %c1_46, %c0_47], %41 {strides = array<i32>} : memref<16x16x8xf32, #tpu.memory_space<vmem>>, vector<15x15x8xf32>,
    %c0_48 = arith.constant 0 : index
    %c0_49 = arith.constant 0 : index
    %c0_50 = arith.constant 0 : index
    %43 = vector.load %arg7[%c0_48, %c0_49, %c0_50] : memref<16x16x8xf32, #tpu.memory_space<vmem>>, vector<15x16x8xf32>
    %44 = vector.extract_strided_slice %16 {offsets = [1, 0, 56], sizes = [15, 16, 8], strides = [1, 1, 1]} : vector<16x16x72xf32> to vector<15x16x8xf32>
    %45 = arith.addf %43, %44 : vector<15x16x8xf32>
    %c0_51 = arith.constant 0 : index
    %c0_52 = arith.constant 0 : index
    %c0_53 = arith.constant 0 : index
    %46 = vector.load %arg7[%c0_51, %c0_52, %c0_53] : memref<16x16x8xf32, #tpu.memory_space<vmem>>, vector<15x16x8xf32>
    tpu.vector_store %arg7[%c0_51, %c0_52, %c0_53], %45 {strides = array<i32>} : memref<16x16x8xf32, #tpu.memory_space<vmem>>, vector<15x16x8xf32>,
    %c0_54 = arith.constant 0 : index
    %c0_55 = arith.constant 0 : index
    %c0_56 = arith.constant 0 : index
    %47 = vector.load %arg7[%c0_54, %c0_55, %c0_56] : memref<16x16x8xf32, #tpu.memory_space<vmem>>, vector<15x15x8xf32>
    %48 = vector.extract_strided_slice %16 {offsets = [1, 1, 64], sizes = [15, 15, 8], strides = [1, 1, 1]} : vector<16x16x72xf32> to vector<15x15x8xf32>
    %49 = arith.addf %47, %48 : vector<15x15x8xf32>
    %c0_57 = arith.constant 0 : index
    %c0_58 = arith.constant 0 : index
    %c0_59 = arith.constant 0 : index
    %50 = vector.load %arg7[%c0_57, %c0_58, %c0_59] : memref<16x16x8xf32, #tpu.memory_space<vmem>>, vector<15x15x8xf32>
    tpu.vector_store %arg7[%c0_57, %c0_58, %c0_59], %49 {strides = array<i32>} : memref<16x16x8xf32, #tpu.memory_space<vmem>>, vector<15x15x8xf32>,
    %c0_60 = arith.constant 0 : index
    %c0_61 = arith.constant 0 : index
    %c0_62 = arith.constant 0 : index
    %51 = vector.load %arg7[%c0_60, %c0_61, %c0_62] : memref<16x16x8xf32, #tpu.memory_space<vmem>>, vector<16x16x8xf32>
    %c0_63 = arith.constant 0 : index
    %c0_64 = arith.constant 0 : index
    %c0_65 = arith.constant 0 : index
    %c0_66 = arith.constant 0 : index
    %52 = vector.load %arg5[%c0_63, %c0_64, %c0_65, %c0_66] : memref<1x16x16x8xf32, #tpu.memory_space<vmem>>, vector<1x16x16x8xf32>
    %53 = vector.shape_cast %52 : vector<1x16x16x8xf32> to vector<16x16x8xf32>
    %54 = vector.shape_cast %51 : vector<16x16x8xf32> to vector<1x16x16x8xf32>
    tpu.vector_store %arg5[%c0_63, %c0_64, %c0_65, %c0_66], %54 {strides = array<i32>} : memref<1x16x16x8xf32, #tpu.memory_space<vmem>>, vector<1x16x16x8xf32>,
    %cst_67 = arith.constant dense<0.000000e+00> : vector<16x8xf32>
    %55 = vector.multi_reduction <add>, %51, %cst_67 [0] : vector<16x16x8xf32> to vector<16x8xf32>
    %56 = arith.mulf %51, %51 : vector<16x16x8xf32>
    %cst_68 = arith.constant dense<0.000000e+00> : vector<16x8xf32>
    %57 = vector.multi_reduction <add>, %56, %cst_68 [0] : vector<16x16x8xf32> to vector<16x8xf32>
    %cst_69 = arith.constant dense<0.000000e+00> : vector<8xf32>
    %58 = vector.multi_reduction <add>, %55, %cst_69 [0] : vector<16x8xf32> to vector<8xf32>
    %59 = vector.shape_cast %58 : vector<8xf32> to vector<1x8xf32>
    %c0_70 = arith.constant 0 : index
    %c0_71 = arith.constant 0 : index
    %c0_72 = arith.constant 0 : index
    %60 = vector.load %arg6[%c0_70, %c0_71, %c0_72] : memref<1x2x8xf32, #tpu.memory_space<vmem>>, vector<1x1x8xf32>
    %61 = vector.shape_cast %60 : vector<1x1x8xf32> to vector<1x8xf32>
    %62 = vector.shape_cast %59 : vector<1x8xf32> to vector<1x1x8xf32>
    tpu.vector_store %arg6[%c0_70, %c0_71, %c0_72], %62 {strides = array<i32>} : memref<1x2x8xf32, #tpu.memory_space<vmem>>, vector<1x1x8xf32>,
    %cst_73 = arith.constant dense<0.000000e+00> : vector<8xf32>
    %63 = vector.multi_reduction <add>, %57, %cst_73 [0] : vector<16x8xf32> to vector<8xf32>
    %64 = vector.shape_cast %63 : vector<8xf32> to vector<1x8xf32>
    %c0_74 = arith.constant 0 : index
    %c1_75 = arith.constant 1 : index
    %c0_76 = arith.constant 0 : index
    %65 = vector.load %arg6[%c0_74, %c1_75, %c0_76] : memref<1x2x8xf32, #tpu.memory_space<vmem>>, vector<1x1x8xf32>
    %66 = vector.shape_cast %65 : vector<1x1x8xf32> to vector<1x8xf32>
    %67 = vector.shape_cast %64 : vector<1x8xf32> to vector<1x1x8xf32>
    tpu.vector_store %arg6[%c0_74, %c1_75, %c0_76], %67 {strides = array<i32>} : memref<1x2x8xf32, #tpu.memory_space<vmem>>, vector<1x1x8xf32>,
    return
  }
  func.func @transform_0(%arg0: i32) -> (i32, i32, i32, i32) {
    %c0_i32 = arith.constant 0 : i32
    %c0_i32_0 = arith.constant 0 : i32
    %c0_i32_1 = arith.constant 0 : i32
    %c0_i32_2 = arith.constant 0 : i32
    return %arg0, %c0_i32, %c0_i32_0, %c0_i32_1 : i32, i32, i32, i32
  }
  func.func @transform_1(%arg0: i32) -> (i32, i32) {
    %c0_i32 = arith.constant 0 : i32
    %c0_i32_0 = arith.constant 0 : i32
    %c0_i32_1 = arith.constant 0 : i32
    return %c0_i32, %c0_i32_0 : i32, i32
  }
  func.func @transform_2(%arg0: i32) -> (i32, i32) {
    %c0_i32 = arith.constant 0 : i32
    %c0_i32_0 = arith.constant 0 : i32
    %c0_i32_1 = arith.constant 0 : i32
    return %c0_i32, %c0_i32_0 : i32, i32
  }
  func.func @transform_3(%arg0: i32) -> (i32, i32) {
    %c0_i32 = arith.constant 0 : i32
    %c0_i32_0 = arith.constant 0 : i32
    %c0_i32_1 = arith.constant 0 : i32
    return %c0_i32, %c0_i32_0 : i32, i32
  }
  func.func @transform_4(%arg0: i32) -> (i32, i32, i32, i32) {
    %c0_i32 = arith.constant 0 : i32
    %c0_i32_0 = arith.constant 0 : i32
    %c0_i32_1 = arith.constant 0 : i32
    %c0_i32_2 = arith.constant 0 : i32
    return %arg0, %c0_i32, %c0_i32_0, %c0_i32_1 : i32, i32, i32, i32
  }
  func.func @transform_5(%arg0: i32) -> (i32, i32, i32) {
    %c0_i32 = arith.constant 0 : i32
    %c0_i32_0 = arith.constant 0 : i32
    %c0_i32_1 = arith.constant 0 : i32
    return %arg0, %c0_i32, %c0_i32_0 : i32, i32, i32
  }
}

</mosaic_0001>

<bundles_post_ra>
// kernel: dense_block_forward.6
= control target key start
LH: loop header
LB: loop body
LE: loop exit
PB: predicated region body
PF: predicated region fallthrough
CT: control target
= control target key end

     0   :  { %vm548_vm0 = vcmask 261120   ;;  %vm746_vm1 = vcmask 253952   ;;  %s2088_s2 = inlined_call_operand.vmem [shape: bf16[128,32], index: 2, kind: input, shape index: {}]   ;;  %s2089_s0 = inlined_call_operand.vmem [shape: f32[1,128], index: 0, kind: input, shape index: {}]   ;;  %s2090_s1 = inlined_call_operand.vmem [shape: f32[1,128], index: 1, kind: input, shape index: {}]   ;;  %s2091_s3 = inlined_call_operand.vmem [shape: f32[512,128], index: 3, kind: input, shape index: {}]   ;;  %s2092_s4 = inlined_call_operand.vmem [shape: f32[512,32], index: 4, kind: output, shape index: {0}]   ;;  %s2093_s5 = inlined_call_operand.vmem [shape: f32[1,2,32], index: 5, kind: output, shape index: {1}]  }
   0x1   :  { %v993_v0 = vld [vmem:[%s2088_s2 + $0x38] sm:$0xff]  ;;  %v992_v1 = vld [vmem:[%s2088_s2 + $0x30] sm:$0xff]  ;;  %v991_v2 = vld [vmem:[%s2088_s2 + $0x28] sm:$0xff] }
   0x2   :  { %379 = vmatpush.bf16.msra.mxu0 %v993_v0  ;;  %994 = vmatpush.bf16.msra.mxu1 %v993_v0  ;;  %v990_v3 = vld [vmem:[%s2088_s2 + $0x20] sm:$0xff]  ;;  %v989_v5 = vld [vmem:[%s2088_s2 + $0x18] sm:$0xff]  ;;  %v20_v7 = vld [vmem:[%s2091_s3 + $0x8] sm:$0xff] }
   0x3   :  { %995 = vmatpush.bf16.msra.mxu2 %v993_v0  ;;  %996 = vmatpush.bf16.msra.mxu3 %v993_v0  ;;  %v1065_v4 = vld [vmem:[%s2089_s0] ss:$0 sm:$0xff]  ;;  %v36_v9 = vld [vmem:[%s2091_s3 + $0x88] sm:$0xff]  ;;  %v988_v15 = vld [vmem:[%s2088_s2 + $0x10] sm:$0xff] }
   0x4   :  { %v19_v6 = vld [vmem:[%s2091_s3] sm:$0xff]  ;;  %v88_v11 = vmul.f32 %v1065_v4, %v20_v7  ;;  %v104_v14 = vmul.f32 %v1065_v4, %v36_v9  ;;  %v987_v20 = vld [vmem:[%s2088_s2 + $0x8] sm:$0xff]  ;;  %v21_v27 = vld [vmem:[%s2091_s3 + $0x10] sm:$0xff] }
   0x5   :  { %v35_v8 = vld [vmem:[%s2091_s3 + $0x80] sm:$0xff]  ;;  %v87_v10 = vmul.f32 %v1065_v4, %v19_v6  ;;  %v22_v29 = vld [vmem:[%s2091_s3 + $0x18] sm:$0xff]  ;;  %v89_v30 = vmul.f32 %v1065_v4, %v21_v27  ;;  %v37_v31 = vld [vmem:[%s2091_s3 + $0x90] sm:$0xff] }
   0x6   :  { %380 = vmatpush.bf16.msra.mxu0 %v992_v1  ;;  %997 = vmatpush.bf16.msra.mxu1 %v992_v1  ;;  %v1087_v12 = vld [vmem:[%s2090_s1] ss:$0 sm:$0xff]  ;;  %v103_v13 = vmul.f32 %v1065_v4, %v35_v8  ;;  %v38_v32 = vld [vmem:[%s2091_s3 + $0x98] sm:$0xff]  ;;  %v90_v33 = vmul.f32 %v1065_v4, %v22_v29  ;;  %v105_v34 = vmul.f32 %v1065_v4, %v37_v31  ;;  %v52_v45 = vld [vmem:[%s2091_s3 + $0x108] sm:$0xff] }
   0x7   :  { %998 = vmatpush.bf16.msra.mxu2 %v992_v1  ;;  %999 = vmatpush.bf16.msra.mxu3 %v992_v1  ;;  %v155_v16 = vadd.f32 %v1087_v12, %v87_v10  ;;  %v156_v17 = vadd.f32 %v1087_v12, %v88_v11  ;;  %v172_v19 = vadd.f32 %v1087_v12, %v104_v14  ;;  %v986_v25 = vld [vmem:[%s2088_s2] sm:$0xff]  ;;  %v24_v50 = vld [vmem:[%s2091_s3 + $0x28] sm:$0xff]  ;;  %v53_v8 = vld [vmem:[%s2091_s3 + $0x110] sm:$0xff] }
   0x8   :  { %v171_v18 = vadd.f32 %v1087_v12, %v103_v13  ;;  %v106_v35 = vmul.f32 %v1065_v4, %v38_v32  ;;  %v157_v36 = vadd.f32 %v1087_v12, %v89_v30  ;;  %v158_v37 = vadd.f32 %v1087_v12, %v90_v33  ;;  %v51_v44 = vld [vmem:[%s2091_s3 + $0x100] sm:$0xff]  ;;  %v40_v59 = vld [vmem:[%s2091_s3 + $0xa8] sm:$0xff]  ;;  %v54_v9 = vld [vmem:[%s2091_s3 + $0x118] sm:$0xff] }
   0x9   :  { %v219_v21 = vmax.f32 %v155_v16, 0.0  ;;  %v220_v22 = vmax.f32 %v156_v17, 0.0  ;;  %v236_v24 = vmax.f32 %v172_v19, 0.0  ;;  %v173_v38 = vadd.f32 %v1087_v12, %v105_v34  ;;  %v23_v49 = vld [vmem:[%s2091_s3 + $0x20] sm:$0xff]  ;;  %v25_v14 = vld [vmem:[%s2091_s3 + $0x30] sm:$0xff] }
   0xa   :  { %381 = vmatpush.bf16.msra.mxu0 %v991_v2  ;;  %1000 = vmatpush.bf16.msra.mxu1 %v991_v2  ;;  %v235_v23 = vmax.f32 %v171_v18, 0.0  ;;  %v174_v39 = vadd.f32 %v1087_v12, %v106_v35  ;;  %v221_v40 = vmax.f32 %v157_v36, 0.0  ;;  %v222_v41 = vmax.f32 %v158_v37, 0.0  ;;  %v39_v58 = vld [vmem:[%s2091_s3 + $0xa0] sm:$0xff]  ;;  %v56_v37 = vld [vmem:[%s2091_s3 + $0x128] sm:$0xff] }
   0xb   :  { %1001 = vmatpush.bf16.msra.mxu2 %v991_v2  ;;  %1002 = vmatpush.bf16.msra.mxu3 %v991_v2  ;;  %v283_v26 = vpack.c.bf16 %v220_v22, %v219_v21  ;;  %v237_v42 = vmax.f32 %v173_v38, 0.0  ;;  %v119_v46 = vmul.f32 %v1065_v4, %v51_v44  ;;  %v120_v47 = vmul.f32 %v1065_v4, %v52_v45  ;;  %v55_v36 = vld [vmem:[%s2091_s3 + $0x120] sm:$0xff] }
   0xc   :  { %v291_v28 = vpack.c.bf16 %v236_v24, %v235_v23  ;;  %v238_v43 = vmax.f32 %v174_v39, 0.0  ;;  %v284_v48 = vpack.c.bf16 %v222_v41, %v221_v40  ;;  %v91_v56 = vmul.f32 %v1065_v4, %v23_v49  ;;  %v41_v23 = vld [vmem:[%s2091_s3 + $0xb0] sm:$0xff]  ;;  %v42_v24 = vld [vmem:[%s2091_s3 + $0xb8] sm:$0xff]  ;;  %v67_v38 = vld [vmem:[%s2091_s3 + $0x180] sm:$0xff] }
   0xd   :  { %v187_v52 = vadd.f32 %v1087_v12, %v119_v46  ;;  %v188_v53 = vadd.f32 %v1087_v12, %v120_v47  ;;  %v92_v57 = vmul.f32 %v1065_v4, %v24_v50  ;;  %v107_v61 = vmul.f32 %v1065_v4, %v39_v58  ;;  %v68_v41 = vld [vmem:[%s2091_s3 + $0x188] sm:$0xff]  ;;  %v27_v45 = vld [vmem:[%s2091_s3 + $0x40] sm:$0xff] }
   0xe   :  { %382 = vmatpush.bf16.msra.mxu0 %v990_v3  ;;  %1003 = vmatpush.bf16.msra.mxu1 %v990_v3  ;;  %v292_v51 = vpack.c.bf16 %v238_v43, %v237_v42  ;;  %v108_v62 = vmul.f32 %v1065_v4, %v40_v59  ;;  %v159_v63 = vadd.f32 %v1087_v12, %v91_v56  ;;  %v28_v46 = vld [vmem:[%s2091_s3 + $0x48] sm:$0xff]  ;;  %v43_v58 = vld [vmem:[%s2091_s3 + $0xc0] sm:$0xff] }
   0xf   :  { %1004 = vmatpush.bf16.msra.mxu2 %v990_v3  ;;  %1005 = vmatpush.bf16.msra.mxu3 %v990_v3  ;;  %v251_v54 = vmax.f32 %v187_v52, 0.0  ;;  %v252_v55 = vmax.f32 %v188_v53, 0.0  ;;  %v160_v0 = vadd.f32 %v1087_v12, %v92_v57  ;;  %v175_v1 = vadd.f32 %v1087_v12, %v107_v61  ;;  %v44_v59 = vld [vmem:[%s2091_s3 + $0xc8] sm:$0xff] }
  0x10   :  { %v176_v2 = vadd.f32 %v1087_v12, %v108_v62  ;;  %v223_v3 = vmax.f32 %v159_v63, 0.0  ;;  %v121_v10 = vmul.f32 %v1065_v4, %v53_v8  ;;  %v122_v11 = vmul.f32 %v1065_v4, %v54_v9  ;;  %v57_v9 = vld [vmem:[%s2091_s3 + $0x130] sm:$0xff] }
  0x11   :  { %v299_v60 = vpack.c.bf16 %v252_v55, %v251_v54  ;;  %v239_v6 = vmax.f32 %v175_v1, 0.0  ;;  %v93_v21 = vmul.f32 %v1065_v4, %v25_v14  ;;  %v110_v27 = vmul.f32 %v1065_v4, %v42_v24 }
  0x12   :  { %383 = vmatpush.bf16.msra.mxu0 %v989_v5  ;;  %1006 = vmatpush.bf16.msra.mxu1 %v989_v5  ;;  %v240_v7 = vmax.f32 %v176_v2, 0.0  ;;  %v189_v17 = vadd.f32 %v1087_v12, %v121_v10  ;;  %v190_v18 = vadd.f32 %v1087_v12, %v122_v11  ;;  %v123_v39 = vmul.f32 %v1065_v4, %v55_v36  ;;  %v58_v10 = vld [vmem:[%s2091_s3 + $0x138] sm:$0xff]  ;;  %v69_v11 = vld [vmem:[%s2091_s3 + $0x190] sm:$0xff] }
  0x13   :  { %1007 = vmatpush.bf16.msra.mxu2 %v989_v5  ;;  %1008 = vmatpush.bf16.msra.mxu3 %v989_v5  ;;  %v224_v5 = vmax.f32 %v160_v0, 0.0  ;;  %v178_v31 = vadd.f32 %v1087_v12, %v110_v27  ;;  %v124_v40 = vmul.f32 %v1065_v4, %v56_v37  ;;  %v135_v42 = vmul.f32 %v1065_v4, %v67_v38 }
  0x14   :  { %v293_v16 = vpack.c.bf16 %v240_v7, %v239_v6  ;;  %v253_v19 = vmax.f32 %v189_v17, 0.0  ;;  %v136_v44 = vmul.f32 %v1065_v4, %v68_v41  ;;  %v95_v55 = vmul.f32 %v1065_v4, %v27_v45 }
  0x15   :  { %v285_v13 = vpack.c.bf16 %v224_v5, %v223_v3  ;;  %v242_v35 = vmax.f32 %v178_v31, 0.0  ;;  %v192_v49 = vadd.f32 %v1087_v12, %v124_v40  ;;  %v203_v50 = vadd.f32 %v1087_v12, %v135_v42 }
  0x16   :  { %384 = vmatpush.bf16.msra.mxu0 %v988_v15  ;;  %1009 = vmatpush.bf16.msra.mxu1 %v988_v15  ;;  %v96_v56 = vmul.f32 %v1065_v4, %v28_v46  ;;  %v111_v61 = vmul.f32 %v1065_v4, %v43_v58  ;;  %v112_v62 = vmul.f32 %v1065_v4, %v44_v59  ;;  %v59_v46 = vld [vmem:[%s2091_s3 + $0x140] sm:$0xff] }
  0x17   :  { %1010 = vmatpush.bf16.msra.mxu2 %v988_v15  ;;  %1011 = vmatpush.bf16.msra.mxu3 %v988_v15  ;;  %v26_v15 = vld [vmem:[%s2091_s3 + $0x38] sm:$0xff]  ;;  %v256_v53 = vmax.f32 %v192_v49, 0.0  ;;  %v267_v54 = vmax.f32 %v203_v50, 0.0  ;;  %v163_v0 = vadd.f32 %v1087_v12, %v95_v55  ;;  %v126_v14 = vmul.f32 %v1065_v4, %v58_v10  ;;  %v31_v55 = vld [vmem:[%s2091_s3 + $0x60] sm:$0xff] }
  0x18   :  { %v94_v22 = vmul.f32 %v1065_v4, %v26_v15  ;;  %v164_v1 = vadd.f32 %v1087_v12, %v96_v56  ;;  %v179_v2 = vadd.f32 %v1087_v12, %v111_v61  ;;  %v180_v3 = vadd.f32 %v1087_v12, %v112_v62  ;;  %v70_v15 = vld [vmem:[%s2091_s3 + $0x198] sm:$0xff]  ;;  %v32_v56 = vld [vmem:[%s2091_s3 + $0x68] sm:$0xff] }
  0x19   :  { %v227_v5 = vmax.f32 %v163_v0, 0.0  ;;  %v127_v49 = vmul.f32 %v1065_v4, %v59_v46 }
  0x1a   :  { %385 = vmatpush.bf16.msra.mxu0 %v987_v20  ;;  %1012 = vmatpush.bf16.msra.mxu1 %v987_v20  ;;  %v162_v29 = vadd.f32 %v1087_v12, %v94_v22  ;;  %v228_v6 = vmax.f32 %v164_v1, 0.0  ;;  %v243_v7 = vmax.f32 %v179_v2, 0.0  ;;  %v244_v8 = vmax.f32 %v180_v3, 0.0 }
  0x1b   :  { %1013 = vmatpush.bf16.msra.mxu2 %v987_v20  ;;  %1014 = vmatpush.bf16.msra.mxu3 %v987_v20  ;;  %v254_v20 = vmax.f32 %v190_v18, 0.0  ;;  %v138_v18 = vmul.f32 %v1065_v4, %v70_v15  ;;  %v195_v58 = vadd.f32 %v1087_v12, %v127_v49  ;;  %v99_v1 = vmul.f32 %v1065_v4, %v31_v55 }
  0x1c   :  { %v226_v33 = vmax.f32 %v162_v29, 0.0  ;;  %v287_v17 = vpack.c.bf16 %v228_v6, %v227_v5  ;;  %v100_v2 = vmul.f32 %v1065_v4, %v32_v56  ;;  %v47_v5 = vld [vmem:[%s2091_s3 + $0xe0] sm:$0xff]  ;;  %v48_v6 = vld [vmem:[%s2091_s3 + $0xe8] sm:$0xff] }
  0x1d   :  { %v259_v62 = vmax.f32 %v195_v58, 0.0  ;;  %v63_v56 = vld [vmem:[%s2091_s3 + $0x160] sm:$0xff] }
  0x1e   :  { %386 = vmatpush.bf16.msra.mxu0 %v986_v25  ;;  %1015 = vmatpush.bf16.msra.mxu1 %v986_v25  ;;  %v75_v58 = vld [vmem:[%s2091_s3 + $0x1c0] sm:$0xff] }
  0x1f   :  { %1016 = vmatpush.bf16.msra.mxu2 %v986_v25  ;;  %1017 = vmatpush.bf16.msra.mxu3 %v986_v25  ;;  %v300_v25 = vpack.c.bf16 %v254_v20, %v253_v19  ;;  %v29_v19 = vld [vmem:[%s2091_s3 + $0x50] sm:$0xff]  ;;  %v30_v20 = vld [vmem:[%s2091_s3 + $0x58] sm:$0xff] }
  0x20   :  { %v97_v29 = vmul.f32 %v1065_v4, %v29_v19 }
  0x21   :  { %387 = vmatmul.bf16.vlgmr.msra.gmra.mxu0 %v283_v26  ;;  %427 = vmatmul.bf16.vlgmr.msra.gmra.mxu1 %v291_v28  ;;  %v109_v26 = vmul.f32 %v1065_v4, %v41_v23  ;;  %v161_v28 = vadd.f32 %v1087_v12, %v93_v21  ;;  %v295_v21 = vpack.c.bf16 %v244_v8, %v243_v7 }
  0x22   :  { %467 = vmatmul.bf16.vlgmr.msra.gmra.mxu2 %v299_v60  ;;  %v194_v23 = vadd.f32 %v1087_v12, %v126_v14  ;;  %v165_v38 = vadd.f32 %v1087_v12, %v97_v29  ;;  %v115_v8 = vmul.f32 %v1065_v4, %v47_v5  ;;  %v33_v29 = vld [vmem:[%s2091_s3 + $0x70] sm:$0xff] }
  0x23   :  { %v177_v30 = vadd.f32 %v1087_v12, %v109_v26  ;;  %v225_v32 = vmax.f32 %v161_v28, 0.0 }
  0x24   :  { %v258_v27 = vmax.f32 %v194_v23, 0.0  ;;  %v229_v42 = vmax.f32 %v165_v38, 0.0  ;;  %v183_v14 = vadd.f32 %v1087_v12, %v115_v8 }
  0x25   :  { %v241_v34 = vmax.f32 %v177_v30, 0.0  ;;  %v286_v43 = vpack.c.bf16 %v226_v33, %v225_v32  ;;  %v98_v30 = vmul.f32 %v1065_v4, %v30_v20  ;;  %v45_v32 = vld [vmem:[%s2091_s3 + $0xd0] sm:$0xff]  ;;  %v46_v33 = vld [vmem:[%s2091_s3 + $0xd8] sm:$0xff] }
  0x26   :  { %v114_v36 = vmul.f32 %v1065_v4, %v46_v33  ;;  %v61_v20 = vld [vmem:[%s2091_s3 + $0x150] sm:$0xff] }
  0x27   :  { %v294_v47 = vpack.c.bf16 %v242_v35, %v241_v34  ;;  %v113_v35 = vmul.f32 %v1065_v4, %v45_v32  ;;  %v129_v23 = vmul.f32 %v1065_v4, %v61_v20 }
  0x28   :  { %v182_v41 = vadd.f32 %v1087_v12, %v114_v36 }
  0x29   :  { %v181_v40 = vadd.f32 %v1087_v12, %v113_v35  ;;  %v197_v32 = vadd.f32 %v1087_v12, %v129_v23 }
  0x2a   :  { %v246_v45 = vmax.f32 %v182_v41, 0.0 }
  0x2b   :  { %v261_v36 = vmax.f32 %v197_v32, 0.0 }
  0x31   :  { %392 = vmatmul.bf16.gmra.mxu0 %v284_v48  ;;  %432 = vmatmul.bf16.gmra.mxu1 %v292_v51  ;;  %v191_v48 = vadd.f32 %v1087_v12, %v123_v39  ;;  %v204_v51 = vadd.f32 %v1087_v12, %v136_v44  ;;  %v166_v39 = vadd.f32 %v1087_v12, %v98_v30  ;;  %v245_v44 = vmax.f32 %v181_v40, 0.0  ;;  %v34_v30 = vld [vmem:[%s2091_s3 + $0x78] sm:$0xff] }
  0x32   :  { %472 = vmatmul.bf16.gmra.mxu2 %v300_v25  ;;  %v206_v25 = vadd.f32 %v1087_v12, %v138_v18  ;;  %v247_v18 = vmax.f32 %v183_v14, 0.0  ;;  %v102_v40 = vmul.f32 %v1065_v4, %v34_v30  ;;  %v65_v14 = vld [vmem:[%s2091_s3 + $0x170] sm:$0xff] }
  0x33   :  { %v255_v52 = vmax.f32 %v191_v48, 0.0  ;;  %v268_v57 = vmax.f32 %v204_v51, 0.0  ;;  %v71_v48 = vld [vmem:[%s2091_s3 + $0x1a0] sm:$0xff]  ;;  %v72_v51 = vld [vmem:[%s2091_s3 + $0x1a8] sm:$0xff] }
  0x34   :  { %v270_v31 = vmax.f32 %v206_v25, 0.0  ;;  %v74_v25 = vld [vmem:[%s2091_s3 + $0x1b8] sm:$0xff]  ;;  %v170_v49 = vadd.f32 %v1087_v12, %v102_v40 }
  0x35   :  { %v301_v60 = vpack.c.bf16 %v256_v53, %v255_v52  ;;  %v307_v63 = vpack.c.bf16 %v268_v57, %v267_v54  ;;  %v139_v52 = vmul.f32 %v1065_v4, %v71_v48  ;;  %v140_v54 = vmul.f32 %v1065_v4, %v72_v51 }
  0x36   :  { %v296_v57 = vpack.c.bf16 %v246_v45, %v245_v44 }
  0x37   :  { %507 = vmatmul.bf16.vlgmr.msra.gmra.mxu3 %v307_v63  ;;  %v208_v61 = vadd.f32 %v1087_v12, %v140_v54 }
  0x39   :  { %v272_v3 = vmax.f32 %v208_v61, 0.0  ;;  %v76_v61 = vld [vmem:[%s2091_s3 + $0x1c8] sm:$0xff] }
  0x41   :  { %397 = vmatmul.bf16.gmra.mxu0 %v285_v13  ;;  %437 = vmatmul.bf16.gmra.mxu1 %v293_v16  ;;  %v125_v13 = vmul.f32 %v1065_v4, %v57_v9  ;;  %v137_v16 = vmul.f32 %v1065_v4, %v69_v11  ;;  %v116_v9 = vmul.f32 %v1065_v4, %v48_v6 }
  0x42   :  { %477 = vmatmul.bf16.gmra.mxu2 %v301_v60  ;;  %v207_v60 = vadd.f32 %v1087_v12, %v139_v52  ;;  %v167_v11 = vadd.f32 %v1087_v12, %v99_v1 }
  0x43   :  { %v193_v22 = vadd.f32 %v1087_v12, %v125_v13  ;;  %v205_v24 = vadd.f32 %v1087_v12, %v137_v16  ;;  %v168_v13 = vadd.f32 %v1087_v12, %v100_v2  ;;  %v184_v15 = vadd.f32 %v1087_v12, %v116_v9 }
  0x44   :  { %v271_v0 = vmax.f32 %v207_v60, 0.0  ;;  %v231_v16 = vmax.f32 %v167_v11, 0.0 }
  0x45   :  { %v257_v26 = vmax.f32 %v193_v22, 0.0  ;;  %v269_v28 = vmax.f32 %v205_v24, 0.0  ;;  %v248_v19 = vmax.f32 %v184_v15, 0.0  ;;  %v73_v22 = vld [vmem:[%s2091_s3 + $0x1b0] sm:$0xff]  ;;  %v66_v15 = vld [vmem:[%s2091_s3 + $0x178] sm:$0xff] }
  0x46   :  { %v309_v10 = vpack.c.bf16 %v272_v3, %v271_v0  ;;  %v144_v0 = vmul.f32 %v1065_v4, %v76_v61 }
  0x47   :  { %v302_v34 = vpack.c.bf16 %v258_v27, %v257_v26  ;;  %v308_v37 = vpack.c.bf16 %v270_v31, %v269_v28  ;;  %v141_v26 = vmul.f32 %v1065_v4, %v73_v22  ;;  %v142_v28 = vmul.f32 %v1065_v4, %v74_v25 }
  0x48   :  { %v297_v31 = vpack.c.bf16 %v248_v19, %v247_v18  ;;  %v212_v6 = vadd.f32 %v1087_v12, %v144_v0  ;;  %v134_v18 = vmul.f32 %v1065_v4, %v66_v15  ;;  %v78_v19 = vld [vmem:[%s2091_s3 + $0x1d8] sm:$0xff] }
  0x49   :  { %512 = vmatmul.bf16.gmra.mxu3 %v308_v37  ;;  %v210_v35 = vadd.f32 %v1087_v12, %v142_v28 }
  0x4a   :  { %v202_v23 = vadd.f32 %v1087_v12, %v134_v18 }
  0x4b   :  { %v274_v41 = vmax.f32 %v210_v35, 0.0 }
  0x51   :  { %402 = vmatmul.bf16.gmra.mxu0 %v286_v43  ;;  %442 = vmatmul.bf16.gmra.mxu1 %v294_v47  ;;  %v230_v43 = vmax.f32 %v166_v39, 0.0  ;;  %v60_v47 = vld [vmem:[%s2091_s3 + $0x148] sm:$0xff]  ;;  %v101_v39 = vmul.f32 %v1065_v4, %v33_v29  ;;  %v266_v29 = vmax.f32 %v202_v23, 0.0 }
  0x52   :  { %482 = vmatmul.bf16.gmra.mxu2 %v302_v34  ;;  %v128_v50 = vmul.f32 %v1065_v4, %v60_v47  ;;  %v209_v34 = vadd.f32 %v1087_v12, %v141_v26 }
  0x53   :  { %v288_v53 = vpack.c.bf16 %v230_v43, %v229_v42  ;;  %v49_v42 = vld [vmem:[%s2091_s3 + $0xf0] sm:$0xff]  ;;  %v50_v43 = vld [vmem:[%s2091_s3 + $0xf8] sm:$0xff]  ;;  %v169_v48 = vadd.f32 %v1087_v12, %v101_v39 }
  0x54   :  { %v196_v59 = vadd.f32 %v1087_v12, %v128_v50  ;;  %v273_v38 = vmax.f32 %v209_v34, 0.0  ;;  %v117_v45 = vmul.f32 %v1065_v4, %v49_v42  ;;  %v118_v46 = vmul.f32 %v1065_v4, %v50_v43 }
  0x55   :  { %v233_v52 = vmax.f32 %v169_v48, 0.0 }
  0x56   :  { %v260_v63 = vmax.f32 %v196_v59, 0.0  ;;  %v310_v47 = vpack.c.bf16 %v274_v41, %v273_v38  ;;  %v185_v50 = vadd.f32 %v1087_v12, %v117_v45  ;;  %v186_v51 = vadd.f32 %v1087_v12, %v118_v46  ;;  %v80_v45 = vld [vmem:[%s2091_s3 + $0x1e8] sm:$0xff] }
  0x57   :  { %v131_v59 = vmul.f32 %v1065_v4, %v63_v56 }
  0x58   :  { %v303_v7 = vpack.c.bf16 %v260_v63, %v259_v62  ;;  %v249_v54 = vmax.f32 %v185_v50, 0.0  ;;  %v250_v55 = vmax.f32 %v186_v51, 0.0  ;;  %v143_v62 = vmul.f32 %v1065_v4, %v75_v58 }
  0x59   :  { %517 = vmatmul.bf16.gmra.mxu3 %v309_v10  ;;  %v199_v2 = vadd.f32 %v1087_v12, %v131_v59  ;;  %v276_v10 = vmax.f32 %v212_v6, 0.0  ;;  %v82_v6 = vld [vmem:[%s2091_s3 + $0x1f8] sm:$0xff] }
  0x5a   :  { %v298_v1 = vpack.c.bf16 %v250_v55, %v249_v54  ;;  %v211_v5 = vadd.f32 %v1087_v12, %v143_v62 }
  0x5c   :  { %v275_v9 = vmax.f32 %v211_v5, 0.0  ;;  %v81_v5 = vld [vmem:[%s2091_s3 + $0x1f0] sm:$0xff] }
  0x61   :  { %407 = vmatmul.bf16.gmra.mxu0 %v287_v17  ;;  %447 = vmatmul.bf16.gmra.mxu1 %v295_v21  ;;  %v232_v17 = vmax.f32 %v168_v13, 0.0  ;;  %v62_v21 = vld [vmem:[%s2091_s3 + $0x158] sm:$0xff]  ;;  %v311_v13 = vpack.c.bf16 %v276_v10, %v275_v9 }
  0x62   :  { %487 = vmatmul.bf16.gmra.mxu2 %v303_v7  ;;  %v130_v24 = vmul.f32 %v1065_v4, %v62_v21  ;;  %v263_v7 = vmax.f32 %v199_v2, 0.0  ;;  %v146_v21 = vmul.f32 %v1065_v4, %v78_v19 }
  0x63   :  { %v289_v27 = vpack.c.bf16 %v232_v17, %v231_v16  ;;  %v77_v16 = vld [vmem:[%s2091_s3 + $0x1d0] sm:$0xff]  ;;  %v133_v17 = vmul.f32 %v1065_v4, %v65_v14 }
  0x64   :  { %v198_v33 = vadd.f32 %v1087_v12, %v130_v24  ;;  %v145_v20 = vmul.f32 %v1065_v4, %v77_v16 }
  0x65   :  { %v201_v22 = vadd.f32 %v1087_v12, %v133_v17 }
  0x66   :  { %v262_v37 = vmax.f32 %v198_v33, 0.0  ;;  %v213_v24 = vadd.f32 %v1087_v12, %v145_v20 }
  0x67   :  { %v265_v28 = vmax.f32 %v201_v22, 0.0 }
  0x68   :  { %v304_v44 = vpack.c.bf16 %v262_v37, %v261_v36  ;;  %v277_v30 = vmax.f32 %v213_v24, 0.0 }
  0x69   :  { %522 = vmatmul.bf16.gmra.mxu3 %v310_v47  ;;  %v306_v32 = vpack.c.bf16 %v266_v29, %v265_v28  ;;  %v148_v47 = vmul.f32 %v1065_v4, %v80_v45 }
  0x71   :  { %412 = vmatmul.bf16.gmra.mxu0 %v288_v53  ;;  %452 = vmatmul.bf16.gmra.mxu1 %v296_v57  ;;  %v234_v53 = vmax.f32 %v170_v49, 0.0  ;;  %v64_v57 = vld [vmem:[%s2091_s3 + $0x168] sm:$0xff]  ;;  %v216_v49 = vadd.f32 %v1087_v12, %v148_v47 }
  0x72   :  { %492 = vmatmul.bf16.gmra.mxu2 %v304_v44  ;;  %v132_v60 = vmul.f32 %v1065_v4, %v64_v57  ;;  %v79_v44 = vld [vmem:[%s2091_s3 + $0x1e0] sm:$0xff] }
  0x73   :  { %v290_v63 = vpack.c.bf16 %v234_v53, %v233_v52  ;;  %v147_v46 = vmul.f32 %v1065_v4, %v79_v44  ;;  %v280_v56 = vmax.f32 %v216_v49, 0.0 }
  0x74   :  { %v200_v3 = vadd.f32 %v1087_v12, %v132_v60 }
  0x75   :  { %v215_v48 = vadd.f32 %v1087_v12, %v147_v46 }
  0x76   :  { %v264_v8 = vmax.f32 %v200_v3, 0.0 }
  0x77   :  { %v279_v55 = vmax.f32 %v215_v48, 0.0 }
  0x78   :  { %v305_v11 = vpack.c.bf16 %v264_v8, %v263_v7  ;;  %v149_v7 = vmul.f32 %v1065_v4, %v81_v5  ;;  %v150_v8 = vmul.f32 %v1065_v4, %v82_v6 }
  0x79   :  { %527 = vmatmul.bf16.gmra.mxu3 %v311_v13  ;;  %v313_v59 = vpack.c.bf16 %v280_v56, %v279_v55 }
  0x7a   :  { %v217_v9 = vadd.f32 %v1087_v12, %v149_v7  ;;  %v218_v10 = vadd.f32 %v1087_v12, %v150_v8 }
  0x7c   :  { %v281_v4 = vmax.f32 %v217_v9, 0.0  ;;  %v282_v18 = vmax.f32 %v218_v10, 0.0 }
  0x7e   :  { %v314_v20 = vpack.c.bf16 %v282_v18, %v281_v4 }
  0x81   :  { %417 = vmatmul.bf16.gmra.mxu0 %v289_v27  ;;  %457 = vmatmul.bf16.gmra.mxu1 %v297_v31  ;;  %v214_v27 = vadd.f32 %v1087_v12, %v146_v21 }
  0x82   :  { %497 = vmatmul.bf16.gmra.mxu2 %v305_v11 }
  0x83   :  { %v278_v31 = vmax.f32 %v214_v27, 0.0 }
  0x85   :  { %v312_v33 = vpack.c.bf16 %v278_v31, %v277_v30 }
  0x89   :  { %532 = vmatmul.bf16.gmra.mxu3 %v312_v33 }
  0x91   :  { %422 = vmatmul.bf16.gmra.mxu0 %v290_v63  ;;  %462 = vmatmul.bf16.gmra.mxu1 %v298_v1 }
  0x92   :  { %502 = vmatmul.bf16.gmra.mxu2 %v306_v32 }
  0x99   :  { %537 = vmatmul.bf16.gmra.mxu3 %v313_v59 }
  0x9e   :  { %v388_v25 = vpop.f32.mrf.mxu0  ;;  %v1383_v26 = vpop.f32.mrf.mxu1 }
  0x9f   :  { %549 = vst.msk [vmem:[%s2092_s4] sm:$0xff] %vm548_vm0, %v388_v25  ;;  %v748_v34 = vmul.f32 %v388_v25, %v388_v25  ;;  %v613_v37 = vsel %vm548_vm0, %v388_v25, 0.0 }
  0xa0   :  { %565 = vst.msk [vmem:[%s2092_s4 + $0x80] sm:$0xff] %vm548_vm0, %v1383_v26 }
  0xa1   :  { %v812_v41 = vsel %vm548_vm0, %v748_v34, 0.0 }
  0xa5   :  { %v1440_v0 = vpop.f32.mrf.mxu2 }
  0xa6   :  { %v390_v35 = vpop.f32.mrf.mxu0  ;;  %v1395_v36 = vpop.f32.mrf.mxu1  ;;  %581 = vst.msk [vmem:[%s2092_s4 + $0x100] sm:$0xff] %vm548_vm0, %v1440_v0 }
  0xa7   :  { %550 = vst.msk [vmem:[%s2092_s4 + $0x8] sm:$0xff] %vm548_vm0, %v390_v35  ;;  %v614_v38 = vsel %vm548_vm0, %v390_v35, 0.0  ;;  %v749_v39 = vmul.f32 %v390_v35, %v390_v35 }
  0xa8   :  { %v615_v40 = vadd.f32 %v614_v38, %v613_v37  ;;  %566 = vst.msk [vmem:[%s2092_s4 + $0x88] sm:$0xff] %vm548_vm0, %v1395_v36 }
  0xa9   :  { %v813_v42 = vsel %vm548_vm0, %v749_v39, 0.0  ;;  %542 = vmatmul.bf16.gmra.mxu3 %v314_v20 }
  0xaa   :  { %v814_v43 = vadd.f32 %v813_v42, %v812_v41 }
  0xad   :  { %v1470_v16 = vpop.f32.mrf.mxu2 }
  0xae   :  { %v393_v50 = vpop.f32.mrf.mxu0  ;;  %v1420_v51 = vpop.f32.mrf.mxu1  ;;  %582 = vst.msk [vmem:[%s2092_s4 + $0x108] sm:$0xff] %vm548_vm0, %v1470_v16 }
  0xaf   :  { %551 = vst.msk [vmem:[%s2092_s4 + $0x10] sm:$0xff] %vm548_vm0, %v393_v50  ;;  %v616_v52 = vsel %vm548_vm0, %v393_v50, 0.0  ;;  %v750_v53 = vmul.f32 %v393_v50, %v393_v50 }
  0xb0   :  { %v617_v54 = vadd.f32 %v616_v52, %v615_v40  ;;  %567 = vst.msk [vmem:[%s2092_s4 + $0x90] sm:$0xff] %vm548_vm0, %v1420_v51 }
  0xb1   :  { %v815_v57 = vsel %vm548_vm0, %v750_v53, 0.0 }
  0xb2   :  { %v816_v58 = vadd.f32 %v815_v57, %v814_v43 }
  0xb5   :  { %v1493_v23 = vpop.f32.mrf.mxu2 }
  0xb6   :  { %v395_v60 = vpop.f32.mrf.mxu0  ;;  %v1433_v61 = vpop.f32.mrf.mxu1  ;;  %583 = vst.msk [vmem:[%s2092_s4 + $0x110] sm:$0xff] %vm548_vm0, %v1493_v23 }
  0xb7   :  { %552 = vst.msk [vmem:[%s2092_s4 + $0x18] sm:$0xff] %vm548_vm0, %v395_v60  ;;  %v618_v62 = vsel %vm548_vm0, %v395_v60, 0.0  ;;  %v751_v63 = vmul.f32 %v395_v60, %v395_v60 }
  0xb8   :  { %v619_v1 = vadd.f32 %v618_v62, %v617_v54  ;;  %568 = vst.msk [vmem:[%s2092_s4 + $0x98] sm:$0xff] %vm548_vm0, %v1433_v61 }
  0xb9   :  { %v817_v2 = vsel %vm548_vm0, %v751_v63, 0.0 }
  0xba   :  { %v818_v3 = vadd.f32 %v817_v2, %v816_v58  ;;  %v1531_v31 = vpop.f32.mrf.mxu3 }
  0xbb   :  { %597 = vst.msk [vmem:[%s2092_s4 + $0x180] sm:$0xff] %vm548_vm0, %v1531_v31 }
  0xbd   :  { %v1511_v27 = vpop.f32.mrf.mxu2 }
  0xbe   :  { %v398_v11 = vpop.f32.mrf.mxu0  ;;  %v1463_v13 = vpop.f32.mrf.mxu1  ;;  %584 = vst.msk [vmem:[%s2092_s4 + $0x118] sm:$0xff] %vm548_vm0, %v1511_v27 }
  0xbf   :  { %553 = vst.msk [vmem:[%s2092_s4 + $0x20] sm:$0xff] %vm548_vm0, %v398_v11  ;;  %v620_v14 = vsel %vm548_vm0, %v398_v11, 0.0  ;;  %v752_v15 = vmul.f32 %v398_v11, %v398_v11 }
  0xc0   :  { %v1472_v17 = vadd.f32 %v620_v14, %v619_v1  ;;  %569 = vst.msk [vmem:[%s2092_s4 + $0xa0] sm:$0xff] %vm548_vm0, %v1463_v13 }
  0xc1   :  { %v819_v12 = vsel %vm548_vm0, %v752_v15, 0.0 }
  0xc2   :  { %v1485_v19 = vadd.f32 %v819_v12, %v818_v3  ;;  %v1556_v35 = vpop.f32.mrf.mxu3 }
  0xc3   :  { %598 = vst.msk [vmem:[%s2092_s4 + $0x188] sm:$0xff] %vm548_vm0, %v1556_v35 }
  0xc5   :  { %v1529_v30 = vpop.f32.mrf.mxu2 }
  0xc6   :  { %v400_v21 = vpop.f32.mrf.mxu0  ;;  %v1487_v22 = vpop.f32.mrf.mxu1  ;;  %585 = vst.msk [vmem:[%s2092_s4 + $0x120] sm:$0xff] %vm548_vm0, %v1529_v30 }
  0xc7   :  { %554 = vst.msk [vmem:[%s2092_s4 + $0x28] sm:$0xff] %vm548_vm0, %v400_v21  ;;  %v753_v52 = vmul.f32 %v400_v21, %v400_v21  ;;  %v622_v55 = vsel %vm548_vm0, %v400_v21, 0.0 }
  0xc8   :  { %570 = vst.msk [vmem:[%s2092_s4 + $0xa8] sm:$0xff] %vm548_vm0, %v1487_v22  ;;  %v623_v60 = vadd.f32 %v622_v55, %v1472_v17 }
  0xc9   :  { %v821_v57 = vsel %vm548_vm0, %v753_v52, 0.0 }
  0xca   :  { %v822_v2 = vadd.f32 %v821_v57, %v1485_v19 }
  0xcc   :  { %v1581_v40 = vpop.f32.mrf.mxu3 }
  0xcd   :  { %v1554_v34 = vpop.f32.mrf.mxu2  ;;  %599 = vst.msk [vmem:[%s2092_s4 + $0x190] sm:$0xff] %vm548_vm0, %v1581_v40 }
  0xce   :  { %v403_v24 = vpop.f32.mrf.mxu0  ;;  %v1505_v25 = vpop.f32.mrf.mxu1  ;;  %586 = vst.msk [vmem:[%s2092_s4 + $0x128] sm:$0xff] %vm548_vm0, %v1554_v34 }
  0xcf   :  { %555 = vst.msk [vmem:[%s2092_s4 + $0x30] sm:$0xff] %vm548_vm0, %v403_v24  ;;  %v754_v56 = vmul.f32 %v403_v24, %v403_v24  ;;  %v624_v58 = vsel %vm548_vm0, %v403_v24, 0.0 }
  0xd0   :  { %571 = vst.msk [vmem:[%s2092_s4 + $0xb0] sm:$0xff] %vm548_vm0, %v1505_v25  ;;  %v625_v3 = vadd.f32 %v624_v58, %v623_v60 }
  0xd1   :  { %v823_v62 = vsel %vm548_vm0, %v754_v56, 0.0 }
  0xd2   :  { %v824_v14 = vadd.f32 %v823_v62, %v822_v2 }
  0xd4   :  { %v1606_v44 = vpop.f32.mrf.mxu3 }
  0xd5   :  { %v1579_v39 = vpop.f32.mrf.mxu2  ;;  %600 = vst.msk [vmem:[%s2092_s4 + $0x198] sm:$0xff] %vm548_vm0, %v1606_v44 }
  0xd6   :  { %v405_v28 = vpop.f32.mrf.mxu0  ;;  %v1523_v29 = vpop.f32.mrf.mxu1  ;;  %587 = vst.msk [vmem:[%s2092_s4 + $0x130] sm:$0xff] %vm548_vm0, %v1579_v39 }
  0xd7   :  { %556 = vst.msk [vmem:[%s2092_s4 + $0x38] sm:$0xff] %vm548_vm0, %v405_v28  ;;  %v755_v59 = vmul.f32 %v405_v28, %v405_v28  ;;  %v626_v63 = vsel %vm548_vm0, %v405_v28, 0.0 }
  0xd8   :  { %572 = vst.msk [vmem:[%s2092_s4 + $0xb8] sm:$0xff] %vm548_vm0, %v1523_v29  ;;  %v627_v15 = vadd.f32 %v626_v63, %v625_v3 }
  0xd9   :  { %v825_v7 = vsel %vm548_vm0, %v755_v59, 0.0 }
  0xda   :  { %v826_v18 = vadd.f32 %v825_v7, %v824_v14 }
  0xdc   :  { %v1631_v48 = vpop.f32.mrf.mxu3 }
  0xdd   :  { %v1604_v43 = vpop.f32.mrf.mxu2  ;;  %601 = vst.msk [vmem:[%s2092_s4 + $0x1a0] sm:$0xff] %vm548_vm0, %v1631_v48 }
  0xde   :  { %v408_v32 = vpop.f32.mrf.mxu0  ;;  %v1548_v33 = vpop.f32.mrf.mxu1  ;;  %588 = vst.msk [vmem:[%s2092_s4 + $0x138] sm:$0xff] %vm548_vm0, %v1604_v43 }
  0xdf   :  { %557 = vst.msk [vmem:[%s2092_s4 + $0x40] sm:$0xff] %vm548_vm0, %v408_v32  ;;  %v756_v1 = vmul.f32 %v408_v32, %v408_v32  ;;  %v628_v8 = vsel %vm548_vm0, %v408_v32, 0.0 }
  0xe0   :  { %573 = vst.msk [vmem:[%s2092_s4 + $0xc0] sm:$0xff] %vm548_vm0, %v1548_v33  ;;  %v629_v19 = vadd.f32 %v628_v8, %v627_v15 }
  0xe1   :  { %v827_v17 = vsel %vm548_vm0, %v756_v1, 0.0 }
  0xe2   :  { %v828_v28 = vadd.f32 %v827_v17, %v826_v18 }
  0xe4   :  { %v1656_v54 = vpop.f32.mrf.mxu3 }
  0xe5   :  { %v1629_v47 = vpop.f32.mrf.mxu2  ;;  %602 = vst.msk [vmem:[%s2092_s4 + $0x1a8] sm:$0xff] %vm548_vm0, %v1656_v54 }
  0xe6   :  { %v410_v37 = vpop.f32.mrf.mxu0  ;;  %v1573_v38 = vpop.f32.mrf.mxu1  ;;  %589 = vst.msk [vmem:[%s2092_s4 + $0x140] sm:$0xff] %vm548_vm0, %v1629_v47 }
  0xe7   :  { %558 = vst.msk [vmem:[%s2092_s4 + $0x48] sm:$0xff] %vm548_vm0, %v410_v37  ;;  %v757_v9 = vmul.f32 %v410_v37, %v410_v37  ;;  %v630_v4 = vsel %vm548_vm0, %v410_v37, 0.0 }
  0xe8   :  { %574 = vst.msk [vmem:[%s2092_s4 + $0xc8] sm:$0xff] %vm548_vm0, %v1573_v38  ;;  %v631_v32 = vadd.f32 %v630_v4, %v629_v19 }
  0xe9   :  { %v829_v20 = vsel %vm548_vm0, %v757_v9, 0.0 }
  0xea   :  { %v830_v56 = vadd.f32 %v829_v20, %v828_v28 }
  0xec   :  { %v1690_v11 = vpop.f32.mrf.mxu3 }
  0xed   :  { %v1654_v53 = vpop.f32.mrf.mxu2  ;;  %603 = vst.msk [vmem:[%s2092_s4 + $0x1b0] sm:$0xff] %vm548_vm0, %v1690_v11 }
  0xee   :  { %v413_v41 = vpop.f32.mrf.mxu0  ;;  %v1598_v42 = vpop.f32.mrf.mxu1  ;;  %590 = vst.msk [vmem:[%s2092_s4 + $0x148] sm:$0xff] %vm548_vm0, %v1654_v53 }
  0xef   :  { %559 = vst.msk [vmem:[%s2092_s4 + $0x50] sm:$0xff] %vm548_vm0, %v413_v41  ;;  %v758_v12 = vmul.f32 %v413_v41, %v413_v41  ;;  %v632_v21 = vsel %vm548_vm0, %v413_v41, 0.0 }
  0xf0   :  { %575 = vst.msk [vmem:[%s2092_s4 + $0xd0] sm:$0xff] %vm548_vm0, %v1598_v42  ;;  %v633_v57 = vadd.f32 %v632_v21, %v631_v32  ;;  %v764_v21 = vmul.f32 %v1383_v26, %v1383_v26 }
  0xf1   :  { %v831_v37 = vsel %vm548_vm0, %v758_v12, 0.0 }
  0xf4   :  { %v1723_v1 = vpop.f32.mrf.mxu3 }
  0xf5   :  { %v1688_v10 = vpop.f32.mrf.mxu2  ;;  %604 = vst.msk [vmem:[%s2092_s4 + $0x1b8] sm:$0xff] %vm548_vm0, %v1723_v1 }
  0xf6   :  { %v415_v45 = vpop.f32.mrf.mxu0  ;;  %v1623_v46 = vpop.f32.mrf.mxu1  ;;  %591 = vst.msk [vmem:[%s2092_s4 + $0x150] sm:$0xff] %vm548_vm0, %v1688_v10 }
  0xf7   :  { %560 = vst.msk [vmem:[%s2092_s4 + $0x58] sm:$0xff] %vm548_vm0, %v415_v45  ;;  %v759_v24 = vmul.f32 %v415_v45, %v415_v45  ;;  %v634_v52 = vsel %vm548_vm0, %v415_v45, 0.0  ;;  %v832_v45 = vadd.f32 %v831_v37, %v830_v56  ;;  %v644_v56 = vsel %vm548_vm0, %v1383_v26, 0.0 }
  0xf8   :  { %576 = vst.msk [vmem:[%s2092_s4 + $0xd8] sm:$0xff] %vm548_vm0, %v1623_v46  ;;  %v635_v2 = vadd.f32 %v634_v52, %v633_v57  ;;  %v765_v57 = vmul.f32 %v1395_v36, %v1395_v36  ;;  %v843_v26 = vsel %vm548_vm0, %v764_v21, 0.0 }
  0xf9   :  { %v833_v60 = vsel %vm548_vm0, %v759_v24, 0.0 }
  0xfa   :  { %v834_v8 = vadd.f32 %v833_v60, %v832_v45  ;;  %v766_v45 = vmul.f32 %v1420_v51, %v1420_v51 }
  0xfc   :  { %v1756_v37 = vpop.f32.mrf.mxu3 }
  0xfd   :  { %v1721_v41 = vpop.f32.mrf.mxu2  ;;  %605 = vst.msk [vmem:[%s2092_s4 + $0x1c0] sm:$0xff] %vm548_vm0, %v1756_v37 }
  0xfe   :  { %v418_v49 = vpop.f32.mrf.mxu0  ;;  %v1648_v50 = vpop.f32.mrf.mxu1  ;;  %592 = vst.msk [vmem:[%s2092_s4 + $0x158] sm:$0xff] %vm548_vm0, %v1721_v41 }
  0xff   :  { %561 = vst.msk [vmem:[%s2092_s4 + $0x60] sm:$0xff] %vm548_vm0, %v418_v49  ;;  %v760_v55 = vmul.f32 %v418_v49, %v418_v49  ;;  %v636_v62 = vsel %vm548_vm0, %v418_v49, 0.0 }
 0x100   :  { %577 = vst.msk [vmem:[%s2092_s4 + $0xe0] sm:$0xff] %vm548_vm0, %v1648_v50  ;;  %v637_v9 = vadd.f32 %v636_v62, %v635_v2 }
 0x101   :  { %v835_v49 = vsel %vm548_vm0, %v760_v55, 0.0 }
 0x105   :  { %v1754_v32 = vpop.f32.mrf.mxu2 }
 0x106   :  { %v420_v5 = vpop.f32.mrf.mxu0  ;;  %v1680_v6 = vpop.f32.mrf.mxu1  ;;  %593 = vst.msk [vmem:[%s2092_s4 + $0x160] sm:$0xff] %vm548_vm0, %v1754_v32 }
 0x107   :  { %562 = vst.msk [vmem:[%s2092_s4 + $0x68] sm:$0xff] %vm548_vm0, %v420_v5  ;;  %v761_v63 = vmul.f32 %v420_v5, %v420_v5  ;;  %v638_v3 = vsel %vm548_vm0, %v420_v5, 0.0  ;;  %v836_v5 = vadd.f32 %v835_v49, %v834_v8  ;;  %v767_v8 = vmul.f32 %v1433_v61, %v1433_v61 }
 0x108   :  { %578 = vst.msk [vmem:[%s2092_s4 + $0xe8] sm:$0xff] %vm548_vm0, %v1680_v6  ;;  %v639_v17 = vadd.f32 %v638_v3, %v637_v9  ;;  %v845_v3 = vsel %vm548_vm0, %v765_v57, 0.0 }
 0x109   :  { %v837_v14 = vsel %vm548_vm0, %v761_v63, 0.0  ;;  %v646_v63 = vsel %vm548_vm0, %v1395_v36, 0.0  ;;  %v650_v36 = vsel %vm548_vm0, %v1433_v61, 0.0  ;;  %v652_v61 = vsel %vm548_vm0, %v1463_v13, 0.0 }
 0x10a   :  { %v838_v12 = vadd.f32 %v837_v14, %v836_v5  ;;  %v768_v5 = vmul.f32 %v1463_v13, %v1463_v13 }
 0x10e   :  { %v423_v58 = vpop.f32.mrf.mxu0  ;;  %v1713_v59 = vpop.f32.mrf.mxu1 }
 0x10f   :  { %563 = vst.msk [vmem:[%s2092_s4 + $0x70] sm:$0xff] %vm548_vm0, %v423_v58  ;;  %v762_v7 = vmul.f32 %v423_v58, %v423_v58  ;;  %v640_v15 = vsel %vm548_vm0, %v423_v58, 0.0 }
 0x110   :  { %579 = vst.msk [vmem:[%s2092_s4 + $0xf0] sm:$0xff] %vm548_vm0, %v1713_v59  ;;  %v641_v18 = vadd.f32 %v640_v15, %v639_v17  ;;  %v847_v15 = vsel %vm548_vm0, %v766_v45, 0.0  ;;  %v1793_v17 = vpop.f32.mrf.mxu2  ;;  %v772_v45 = vmul.f32 %v1548_v33, %v1548_v33 }
 0x111   :  { %v839_v4 = vsel %vm548_vm0, %v762_v7, 0.0  ;;  %v648_v7 = vsel %vm548_vm0, %v1420_v51, 0.0  ;;  %594 = vst.msk [vmem:[%s2092_s4 + $0x168] sm:$0xff] %vm548_vm0, %v1793_v17  ;;  %v849_v51 = vsel %vm548_vm0, %v767_v8, 0.0  ;;  %v773_v8 = vmul.f32 %v1573_v38, %v1573_v38 }
 0x112   :  { %v840_v52 = vadd.f32 %v839_v4, %v838_v12  ;;  %v1795_v4 = vpop.f32.mrf.mxu3 }
 0x113   :  { %606 = vst.msk [vmem:[%s2092_s4 + $0x1c8] sm:$0xff] %vm548_vm0, %v1795_v4 }
 0x116   :  { %v425_v19 = vpop.f32.mrf.mxu0  ;;  %v1745_v20 = vpop.f32.mrf.mxu1 }
 0x117   :  { %564 = vst.msk [vmem:[%s2092_s4 + $0x78] sm:$0xff] %vm548_vm0, %v425_v19  ;;  %v642_v24 = vsel %vm548_vm0, %v425_v19, 0.0  ;;  %v763_v28 = vmul.f32 %v425_v19, %v425_v19  ;;  %v769_v19 = vmul.f32 %v1487_v22, %v1487_v22 }
 0x118   :  { %v643_v55 = vadd.f32 %v642_v24, %v641_v18  ;;  %580 = vst.msk [vmem:[%s2092_s4 + $0xf8] sm:$0xff] %vm548_vm0, %v1745_v20 }
 0x119   :  { %v841_v58 = vsel %vm548_vm0, %v763_v28, 0.0  ;;  %v851_v28 = vsel %vm548_vm0, %v768_v5, 0.0  ;;  %v853_v57 = vsel %vm548_vm0, %v769_v19, 0.0  ;;  %v774_v5 = vmul.f32 %v1598_v42, %v1598_v42 }
 0x11a   :  { %v645_v60 = vadd.f32 %v644_v56, %v643_v55  ;;  %v842_v62 = vadd.f32 %v841_v58, %v840_v52  ;;  %v654_v52 = vsel %vm548_vm0, %v1487_v22, 0.0  ;;  %v770_v55 = vmul.f32 %v1505_v25, %v1505_v25 }
 0x11b   :  { %v656_v58 = vsel %vm548_vm0, %v1505_v25, 0.0  ;;  %v658_v22 = vsel %vm548_vm0, %v1523_v29, 0.0 }
 0x11c   :  { %v647_v2 = vadd.f32 %v646_v63, %v645_v60  ;;  %v844_v49 = vadd.f32 %v843_v26, %v842_v62  ;;  %v771_v60 = vmul.f32 %v1523_v29, %v1523_v29  ;;  %v855_v63 = vsel %vm548_vm0, %v770_v55, 0.0 }
 0x11d   :  { %v660_v29 = vsel %vm548_vm0, %v1548_v33, 0.0 }
 0x11e   :  { %v649_v9 = vadd.f32 %v648_v7, %v647_v2  ;;  %v846_v14 = vadd.f32 %v845_v3, %v844_v49  ;;  %v1827_v2 = vpop.f32.mrf.mxu2  ;;  %v1829_v49 = vpop.f32.mrf.mxu3  ;;  %v857_v25 = vsel %vm548_vm0, %v771_v60, 0.0 }
 0x11f   :  { %595 = vst.msk [vmem:[%s2092_s4 + $0x170] sm:$0xff] %vm548_vm0, %v1827_v2 }
 0x120   :  { %v651_v12 = vadd.f32 %v650_v36, %v649_v9  ;;  %v848_v18 = vadd.f32 %v847_v15, %v846_v14  ;;  %607 = vst.msk [vmem:[%s2092_s4 + $0x1d0] sm:$0xff] %vm548_vm0, %v1829_v49  ;;  %v859_v15 = vsel %vm548_vm0, %v772_v45, 0.0  ;;  %v662_v36 = vsel %vm548_vm0, %v1573_v38, 0.0 }
 0x121   :  { %v666_v38 = vsel %vm548_vm0, %v1623_v46, 0.0 }
 0x122   :  { %v653_v21 = vadd.f32 %v652_v61, %v651_v12  ;;  %v850_v24 = vadd.f32 %v849_v51, %v848_v18  ;;  %v861_v18 = vsel %vm548_vm0, %v773_v8, 0.0  ;;  %v664_v51 = vsel %vm548_vm0, %v1598_v42, 0.0 }
 0x123   :  { %v775_v61 = vmul.f32 %v1623_v46, %v1623_v46  ;;  %v668_v46 = vsel %vm548_vm0, %v1648_v50, 0.0  ;;  %v780_v8 = vmul.f32 %v1440_v0, %v1440_v0 }
 0x124   :  { %v655_v13 = vadd.f32 %v654_v52, %v653_v21  ;;  %v852_v56 = vadd.f32 %v851_v28, %v850_v24  ;;  %v863_v24 = vsel %vm548_vm0, %v774_v5, 0.0  ;;  %v776_v28 = vmul.f32 %v1648_v50, %v1648_v50 }
 0x125   :  { %v865_v42 = vsel %vm548_vm0, %v775_v61, 0.0  ;;  %v781_v5 = vmul.f32 %v1470_v16, %v1470_v16  ;;  %v782_v61 = vmul.f32 %v1493_v23, %v1493_v23 }
 0x126   :  { %v854_v62 = vadd.f32 %v853_v57, %v852_v56  ;;  %v657_v26 = vadd.f32 %v656_v58, %v655_v13  ;;  %v1861_v52 = vpop.f32.mrf.mxu2  ;;  %v1863_v55 = vpop.f32.mrf.mxu3  ;;  %v777_v57 = vmul.f32 %v1680_v6, %v1680_v6 }
 0x127   :  { %596 = vst.msk [vmem:[%s2092_s4 + $0x178] sm:$0xff] %vm548_vm0, %v1861_v52 }
 0x128   :  { %v659_v3 = vadd.f32 %v658_v22, %v657_v26  ;;  %v856_v7 = vadd.f32 %v855_v63, %v854_v62  ;;  %608 = vst.msk [vmem:[%s2092_s4 + $0x1d8] sm:$0xff] %vm548_vm0, %v1863_v55  ;;  %v867_v62 = vsel %vm548_vm0, %v776_v28, 0.0  ;;  %v670_v26 = vsel %vm548_vm0, %v1680_v6, 0.0 }
 0x129   :  { %v778_v63 = vmul.f32 %v1713_v59, %v1713_v59  ;;  %v869_v45 = vsel %vm548_vm0, %v777_v57, 0.0 }
 0x12a   :  { %v661_v9 = vadd.f32 %v660_v29, %v659_v3  ;;  %v858_v14 = vadd.f32 %v857_v25, %v856_v7  ;;  %v672_v3 = vsel %vm548_vm0, %v1713_v59, 0.0  ;;  %v779_v7 = vmul.f32 %v1745_v20, %v1745_v20 }
 0x12b   :  { %v871_v6 = vsel %vm548_vm0, %v778_v63, 0.0  ;;  %v676_v59 = vsel %vm548_vm0, %v1440_v0, 0.0  ;;  %v680_v0 = vsel %vm548_vm0, %v1493_v23, 0.0 }
 0x12c   :  { %v663_v33 = vadd.f32 %v662_v36, %v661_v9  ;;  %v860_v12 = vadd.f32 %v859_v15, %v858_v14  ;;  %v674_v9 = vsel %vm548_vm0, %v1745_v20, 0.0 }
 0x12e   :  { %v665_v19 = vadd.f32 %v664_v51, %v663_v33  ;;  %v862_v21 = vadd.f32 %v861_v18, %v860_v12  ;;  %v1895_v14 = vpop.f32.mrf.mxu3  ;;  %v873_v33 = vsel %vm548_vm0, %v779_v7, 0.0  ;;  %v875_v18 = vsel %vm548_vm0, %v780_v8, 0.0 }
 0x12f   :  { %609 = vst.msk [vmem:[%s2092_s4 + $0x1e0] sm:$0xff] %vm548_vm0, %v1895_v14  ;;  %v678_v51 = vsel %vm548_vm0, %v1470_v16, 0.0  ;;  %v682_v16 = vsel %vm548_vm0, %v1511_v27, 0.0 }
 0x130   :  { %v667_v13 = vadd.f32 %v666_v38, %v665_v19  ;;  %v864_v56 = vadd.f32 %v863_v24, %v862_v21  ;;  %v877_v24 = vsel %vm548_vm0, %v781_v5, 0.0  ;;  %v783_v38 = vmul.f32 %v1511_v27, %v1511_v27 }
 0x131   :  { %v785_v27 = vmul.f32 %v1554_v34, %v1554_v34 }
 0x132   :  { %v669_v58 = vadd.f32 %v668_v46, %v667_v13  ;;  %v866_v60 = vadd.f32 %v865_v42, %v864_v56  ;;  %v879_v56 = vsel %vm548_vm0, %v782_v61, 0.0  ;;  %v784_v42 = vmul.f32 %v1529_v30, %v1529_v30 }
 0x133   :  { %v881_v23 = vsel %vm548_vm0, %v783_v38, 0.0  ;;  %v885_v7 = vsel %vm548_vm0, %v785_v27, 0.0  ;;  %v702_v27 = vsel %vm548_vm0, %v1793_v17, 0.0 }
 0x134   :  { %v868_v50 = vadd.f32 %v867_v62, %v866_v60  ;;  %v671_v22 = vadd.f32 %v670_v26, %v669_v58  ;;  %v684_v60 = vsel %vm548_vm0, %v1529_v30, 0.0  ;;  %v883_v63 = vsel %vm548_vm0, %v784_v42, 0.0 }
 0x135   :  { %v688_v30 = vsel %vm548_vm0, %v1579_v39, 0.0 }
 0x136   :  { %v870_v25 = vadd.f32 %v869_v45, %v868_v50  ;;  %v673_v29 = vadd.f32 %v672_v3, %v671_v22  ;;  %v1922_v46 = vpop.f32.mrf.mxu3  ;;  %v686_v50 = vsel %vm548_vm0, %v1554_v34, 0.0  ;;  %v786_v22 = vmul.f32 %v1579_v39, %v1579_v39 }
 0x137   :  { %610 = vst.msk [vmem:[%s2092_s4 + $0x1e8] sm:$0xff] %vm548_vm0, %v1922_v46  ;;  %v690_v34 = vsel %vm548_vm0, %v1604_v43, 0.0  ;;  %v692_v39 = vsel %vm548_vm0, %v1629_v47, 0.0 }
 0x138   :  { %v872_v15 = vadd.f32 %v871_v6, %v870_v25  ;;  %v675_v36 = vadd.f32 %v674_v9, %v673_v29  ;;  %v787_v25 = vmul.f32 %v1604_v43, %v1604_v43  ;;  %v887_v6 = vsel %vm548_vm0, %v786_v22, 0.0 }
 0x139   :  { %v788_v9 = vmul.f32 %v1629_v47, %v1629_v47  ;;  %v795_v22 = vmul.f32 %v1861_v52, %v1861_v52 }
 0x13a   :  { %v677_v12 = vadd.f32 %v676_v59, %v675_v36  ;;  %v874_v20 = vadd.f32 %v873_v33, %v872_v15  ;;  %v889_v5 = vsel %vm548_vm0, %v787_v25, 0.0  ;;  %v789_v33 = vmul.f32 %v1654_v53, %v1654_v53 }
 0x13c   :  { %v679_v19 = vadd.f32 %v678_v51, %v677_v12  ;;  %v876_v21 = vadd.f32 %v875_v18, %v874_v20  ;;  %v891_v20 = vsel %vm548_vm0, %v788_v9, 0.0  ;;  %v694_v18 = vsel %vm548_vm0, %v1654_v53, 0.0 }
 0x13d   :  { %v790_v51 = vmul.f32 %v1688_v10, %v1688_v10  ;;  %v698_v53 = vsel %vm548_vm0, %v1721_v41, 0.0 }
 0x13e   :  { %v681_v28 = vadd.f32 %v680_v0, %v679_v19  ;;  %v878_v13 = vadd.f32 %v877_v24, %v876_v21  ;;  %v1949_v59 = vpop.f32.mrf.mxu3  ;;  %v893_v19 = vsel %vm548_vm0, %v789_v33, 0.0  ;;  %v696_v21 = vsel %vm548_vm0, %v1688_v10, 0.0 }
 0x13f   :  { %611 = vst.msk [vmem:[%s2092_s4 + $0x1f0] sm:$0xff] %vm548_vm0, %v1949_v59  ;;  %v791_v24 = vmul.f32 %v1721_v41, %v1721_v41  ;;  %v700_v10 = vsel %vm548_vm0, %v1754_v32, 0.0 }
 0x140   :  { %v683_v57 = vadd.f32 %v682_v16, %v681_v28  ;;  %v880_v58 = vadd.f32 %v879_v56, %v878_v13  ;;  %v895_v28 = vsel %vm548_vm0, %v790_v51, 0.0  ;;  %v792_v13 = vmul.f32 %v1754_v32, %v1754_v32 }
 0x141   :  { %v800_v51 = vmul.f32 %v1631_v48, %v1631_v48 }
 0x142   :  { %v685_v62 = vadd.f32 %v684_v60, %v683_v57  ;;  %v882_v26 = vadd.f32 %v881_v23, %v880_v58  ;;  %v897_v57 = vsel %vm548_vm0, %v791_v24, 0.0  ;;  %v793_v58 = vmul.f32 %v1793_v17, %v1793_v17 }
 0x143   :  { %v899_v60 = vsel %vm548_vm0, %v792_v13, 0.0 }
 0x144   :  { %v687_v45 = vadd.f32 %v686_v50, %v685_v62  ;;  %v884_v3 = vadd.f32 %v883_v63, %v882_v26  ;;  %v794_v62 = vmul.f32 %v1827_v2, %v1827_v2  ;;  %v901_v63 = vsel %vm548_vm0, %v793_v58, 0.0 }
 0x145   :  { %v704_v50 = vsel %vm548_vm0, %v1827_v2, 0.0  ;;  %v797_v2 = vmul.f32 %v1556_v35, %v1556_v35 }
 0x146   :  { %v886_v29 = vadd.f32 %v885_v7, %v884_v3  ;;  %v689_v8 = vadd.f32 %v688_v30, %v687_v45  ;;  %v1976_v42 = vpop.f32.mrf.mxu3  ;;  %v796_v7 = vmul.f32 %v1531_v31, %v1531_v31  ;;  %v903_v17 = vsel %vm548_vm0, %v794_v62, 0.0 }
 0x147   :  { %612 = vst.msk [vmem:[%s2092_s4 + $0x1f8] sm:$0xff] %vm548_vm0, %v1976_v42  ;;  %v706_v30 = vsel %vm548_vm0, %v1861_v52, 0.0  ;;  %v798_v52 = vmul.f32 %v1581_v40, %v1581_v40  ;;  %v909_v33 = vsel %vm548_vm0, %v797_v2, 0.0  ;;  %v805_v62 = vmul.f32 %v1795_v4, %v1795_v4 }
 0x148   :  { %v691_v15 = vadd.f32 %v690_v34, %v689_v8  ;;  %v888_v36 = vadd.f32 %v887_v6, %v886_v29  ;;  %v708_v8 = vsel %vm548_vm0, %v1531_v31, 0.0  ;;  %v905_v6 = vsel %vm548_vm0, %v795_v22, 0.0 }
 0x149   :  { %v712_v31 = vsel %vm548_vm0, %v1581_v40, 0.0  ;;  %v716_v40 = vsel %vm548_vm0, %v1631_v48, 0.0  ;;  %v720_v48 = vsel %vm548_vm0, %v1690_v11, 0.0 }
 0x14a   :  { %v693_v43 = vadd.f32 %v692_v39, %v691_v15  ;;  %v890_v12 = vadd.f32 %v889_v5, %v888_v36  ;;  %v907_v15 = vsel %vm548_vm0, %v796_v7, 0.0  ;;  %v710_v36 = vsel %vm548_vm0, %v1556_v35, 0.0 }
 0x14b   :  { %v714_v35 = vsel %vm548_vm0, %v1606_v44, 0.0  ;;  %v807_v7 = vmul.f32 %v1863_v55, %v1863_v55 }
 0x14c   :  { %v695_v47 = vadd.f32 %v694_v18, %v693_v43  ;;  %v892_v61 = vadd.f32 %v891_v20, %v890_v12  ;;  %v799_v43 = vmul.f32 %v1606_v44, %v1606_v44  ;;  %v911_v18 = vsel %vm548_vm0, %v798_v52, 0.0 }
 0x14d   :  { %v718_v44 = vsel %vm548_vm0, %v1656_v54, 0.0  ;;  %v810_v52 = vmul.f32 %v1949_v59, %v1949_v59 }
 0x14e   :  { %v697_v0 = vadd.f32 %v696_v21, %v695_v47  ;;  %v894_v38 = vadd.f32 %v893_v19, %v892_v61  ;;  %v913_v19 = vsel %vm548_vm0, %v799_v43, 0.0  ;;  %v801_v21 = vmul.f32 %v1656_v54, %v1656_v54 }
 0x14f   :  { %v722_v54 = vsel %vm548_vm0, %v1723_v1, 0.0 }
 0x150   :  { %v699_v56 = vadd.f32 %v698_v53, %v697_v0  ;;  %v896_v16 = vadd.f32 %v895_v28, %v894_v38  ;;  %v915_v38 = vsel %vm548_vm0, %v800_v51, 0.0  ;;  %v802_v28 = vmul.f32 %v1690_v11, %v1690_v11 }
 0x151   :  { %v724_v11 = vsel %vm548_vm0, %v1756_v37, 0.0 }
 0x152   :  { %v898_v41 = vadd.f32 %v897_v57, %v896_v16  ;;  %v701_v23 = vadd.f32 %v700_v10, %v699_v56  ;;  %v917_v56 = vsel %vm548_vm0, %v801_v21, 0.0  ;;  %v803_v16 = vmul.f32 %v1723_v1, %v1723_v1 }
 0x153   :  { %v919_v58 = vsel %vm548_vm0, %v802_v28, 0.0  ;;  %v726_v1 = vsel %vm548_vm0, %v1795_v4, 0.0  ;;  %v730_v4 = vsel %vm548_vm0, %v1863_v55, 0.0  ;;  %v734_v55 = vsel %vm548_vm0, %v1922_v46, 0.0 }
 0x154   :  { %v900_v32 = vadd.f32 %v899_v60, %v898_v41  ;;  %v703_v26 = vadd.f32 %v702_v27, %v701_v23  ;;  %v804_v41 = vmul.f32 %v1756_v37, %v1756_v37  ;;  %v921_v27 = vsel %vm548_vm0, %v803_v16, 0.0 }
 0x155   :  { %v728_v37 = vsel %vm548_vm0, %v1829_v49, 0.0 }
 0x156   :  { %v902_v45 = vadd.f32 %v901_v63, %v900_v32  ;;  %v705_v3 = vadd.f32 %v704_v50, %v703_v26  ;;  %v923_v63 = vsel %vm548_vm0, %v804_v41, 0.0  ;;  %v806_v50 = vmul.f32 %v1829_v49, %v1829_v49 }
 0x157   :  { %v732_v49 = vsel %vm548_vm0, %v1895_v14, 0.0 }
 0x158   :  { %v904_v25 = vadd.f32 %v903_v17, %v902_v45  ;;  %v707_v29 = vadd.f32 %v706_v30, %v705_v3  ;;  %v925_v3 = vsel %vm548_vm0, %v805_v62, 0.0 }
 0x15a   :  { %v709_v34 = vadd.f32 %v708_v8, %v707_v29  ;;  %v906_v9 = vadd.f32 %v905_v6, %v904_v25  ;;  %v927_v25 = vsel %vm548_vm0, %v806_v50, 0.0  ;;  %v808_v29 = vmul.f32 %v1895_v14, %v1895_v14 }
 0x15b   :  { %v929_v6 = vsel %vm548_vm0, %v807_v7, 0.0  ;;  %v736_v14 = vsel %vm548_vm0, %v1949_v59, 0.0 }
 0x15c   :  { %v711_v5 = vadd.f32 %v710_v36, %v709_v34  ;;  %v908_v39 = vadd.f32 %v907_v15, %v906_v9  ;;  %v809_v34 = vmul.f32 %v1922_v46, %v1922_v46  ;;  %v931_v36 = vsel %vm548_vm0, %v808_v29, 0.0 }
 0x15d   :  { %v738_v46 = vsel %vm548_vm0, %v1976_v42, 0.0 }
 0x15e   :  { %v713_v12 = vadd.f32 %v712_v31, %v711_v5  ;;  %v910_v20 = vadd.f32 %v909_v33, %v908_v39  ;;  %v933_v33 = vsel %vm548_vm0, %v809_v34, 0.0  ;;  %v811_v31 = vmul.f32 %v1976_v42, %v1976_v42 }
 0x160   :  { %v715_v47 = vadd.f32 %v714_v35, %v713_v12  ;;  %v912_v61 = vadd.f32 %v911_v18, %v910_v20  ;;  %v935_v20 = vsel %vm548_vm0, %v810_v52, 0.0  ;;  %v937_v51 = vsel %vm548_vm0, %v811_v31, 0.0 }
 0x162   :  { %v717_v24 = vadd.f32 %v716_v40, %v715_v47  ;;  %v914_v0 = vadd.f32 %v913_v19, %v912_v61 }
 0x164   :  { %v719_v53 = vadd.f32 %v718_v44, %v717_v24  ;;  %v916_v13 = vadd.f32 %v915_v38, %v914_v0 }
 0x166   :  { %v918_v57 = vadd.f32 %v917_v56, %v916_v13  ;;  %v721_v10 = vadd.f32 %v720_v48, %v719_v53 }
 0x168   :  { %v723_v23 = vadd.f32 %v722_v54, %v721_v10  ;;  %v920_v60 = vadd.f32 %v919_v58, %v918_v57 }
 0x16a   :  { %v725_v32 = vadd.f32 %v724_v11, %v723_v23  ;;  %v922_v26 = vadd.f32 %v921_v27, %v920_v60 }
 0x16c   :  { %v727_v22 = vadd.f32 %v726_v1, %v725_v32  ;;  %v924_v45 = vadd.f32 %v923_v63, %v922_v26 }
 0x16e   :  { %v729_v17 = vadd.f32 %v728_v37, %v727_v22  ;;  %v926_v30 = vadd.f32 %v925_v3, %v924_v45 }
 0x170   :  { %v731_v8 = vadd.f32 %v730_v4, %v729_v17  ;;  %v928_v2 = vadd.f32 %v927_v25, %v926_v30 }
 0x172   :  { %v930_v9 = vadd.f32 %v929_v6, %v928_v2  ;;  %v733_v15 = vadd.f32 %v732_v49, %v731_v8 }
 0x174   :  { %v932_v5 = vadd.f32 %v931_v36, %v930_v9  ;;  %v735_v39 = vadd.f32 %v734_v55, %v733_v15 }
 0x176   :  { %v934_v43 = vadd.f32 %v933_v33, %v932_v5  ;;  %v737_v12 = vadd.f32 %v736_v14, %v735_v39 }
 0x178   :  { %v936_v18 = vadd.f32 %v935_v20, %v934_v43  ;;  %v739_v35 = vadd.f32 %v738_v46, %v737_v12 }
 0x17a   :  { %v740_v47 = vrot.slane %v739_v35, 4  ;;  %v938_v61 = vadd.f32 %v937_v51, %v936_v18 }
 0x17c   :  { %v741_v19 = vadd.f32 %v740_v47, %v739_v35  ;;  %v939_v40 = vrot.slane %v938_v61, 4 }
 0x17e   :  { %v742_v21 = vrot.slane %v741_v19, 2  ;;  %v940_v59 = vadd.f32 %v939_v40, %v938_v61 }
 0x180   :  { %v743_v24 = vadd.f32 %v742_v21, %v741_v19  ;;  %v941_v0 = vrot.slane %v940_v59, 2 }
 0x182   :  { %v744_v38 = vrot.slane %v743_v24, 1  ;;  %v942_v44 = vadd.f32 %v941_v0, %v940_v59 }
 0x184   :  { %v745_v28 = vadd.f32 %v744_v38, %v743_v24  ;;  %v943_v53 = vrot.slane %v942_v44, 1 }
 0x186   :  { %747 = vst.msk [vmem:[%s2093_s5] sm:$0x1] %vm746_vm1, %v745_v28  ;;  %v944_v42 = vadd.f32 %v943_v53, %v942_v44 }
 0x188   :  { %945 = vst.msk [vmem:[%s2093_s5 + $0x1] sm:$0x1] %vm746_vm1, %v944_v42 }

// kernel: dense_block_forward.7
= control target key start
LH: loop header
LB: loop body
LE: loop exit
PB: predicated region body
PF: predicated region fallthrough
CT: control target
= control target key end

     0   :  { %s2566_s18 = smov 0   ;;  %s4100_s0 = inlined_call_operand.vmem [shape: f32[2,16,16,32], index: 0, kind: input, shape index: {}]   ;;  %s4101_s1 = inlined_call_operand.vmem [shape: f32[1,32], index: 1, kind: input, shape index: {}]   ;;  %s4102_s2 = inlined_call_operand.vmem [shape: f32[1,32], index: 2, kind: input, shape index: {}]   ;;  %s4103_s3 = inlined_call_operand.vmem [shape: bf16[32,72], index: 3, kind: input, shape index: {}]   ;;  %s4104_s4 = inlined_call_operand.vmem [shape: f32[2,16,16,8], index: 4, kind: output, shape index: {0}]   ;;  %s4105_s5 = inlined_call_operand.vmem [shape: f32[2,2,8], index: 5, kind: output, shape index: {1}]  }
   0x1 LB: > { %s2456_s19 = sadd.s32 4294967295, %s2526_s18   ;;  %p2460_p0 = scmp.ge.s32.totalorder %s2526_s18, 1  ;;  %s2526_s18 = sphi %s2566_s18, %s16_s18  }
   0x2   : > { %p190_p1 = scmp.lt.s32.totalorder %s2526_s18, 3 }
   0x4   : > { %p191_p2 = pnand %p2460_p0, %p190_p1 }
   0x6   : > { %194 = sbr.rel (%p191_p2) target bundleno = 952 (0x3b8), region = 36 }
   0xb   : > { %v2495_v0 = vld [vmem:[%s4103_s3 + $0x8] sm:$0xff]  ;;  %p222_p3 = scmp.lt.s32.totalorder %s2456_s19, 1  ;;  %v2494_v1 = vld [vmem:[%s4103_s3] sm:$0xff]  ;;  %vm405_vm0 = vcmask 261120   ;;  %s2528_s7 = smov 96   ;;  %vm1006_vm1 = vcmask 1046528  }
   0xc   : > { %460 = vmatpush.bf16.msra.mxu0 %v2495_v0  ;;  %2496 = vmatpush.bf16.msra.mxu1 %v2495_v0  ;;  %v2585_v2 = vld [vmem:[%s4101_s1] ss:$0 sm:$0xff]  ;;  %s2529_s8 = smov 120   ;;  %s2530_s9 = smov 112   ;;  %vm671_vm2 = vcmask 64512   ;;  %vm766_vm3 = vcmask 63488  }
   0xd   : > { %s4220_s19 = smov (!%p222_p3, %s2456_s19), 1  ;;  %2497 = vmatpush.bf16.msra.mxu2 %v2495_v0  ;;  %2498 = vmatpush.bf16.msra.mxu3 %v2495_v0  ;;  %v2598_v3 = vld [vmem:[%s4102_s2] ss:$0 sm:$0xff]  ;;  %s2531_s10 = smov 104   ;;  %vm2358_vm4 = vcmask 57344  }
   0xe   : > { %s2492_s26 = sshll.u32 %s4220_s19, 8  ;;  %s2532_s11 = smov 88  }
   0xf   : > { %s2593_s29 = scalar_lea.vmem %s4100_s0, %s2492_s26  ;;  %s2533_s12 = smov 80  }
  0x10   : > { %461 = vmatpush.bf16.msra.mxu0 %v2494_v1  ;;  %2499 = vmatpush.bf16.msra.mxu1 %v2494_v1  ;;  %v239_v4 = vld [vmem:[%s2593_s29] sm:$0xff]  ;;  %v240_v5 = vld [vmem:[%s2593_s29 + $0x8] sm:$0xff]  ;;  %v241_v34 = vld [vmem:[%s2593_s29 + $0x10] sm:$0xff]  ;;  %s2534_s13 = smov 72   ;;  %s3611_s16 = scalar_lea.vmem %s4104_s4, %s2492_s26 }
  0x11   : > { %v247_v6 = vld [vmem:[%s2593_s29 + $0x40] sm:$0xff]  ;;  %2500 = vmatpush.bf16.msra.mxu2 %v2494_v1  ;;  %2501 = vmatpush.bf16.msra.mxu3 %v2494_v1  ;;  %v274_v7 = vmul.f32 %v2585_v2, %v239_v4  ;;  %v275_v8 = vmul.f32 %v2585_v2, %v240_v5  ;;  %v248_v9 = vld [vmem:[%s2593_s29 + $0x48] sm:$0xff]  ;;  %v242_v35 = vld [vmem:[%s2593_s29 + $0x18] sm:$0xff]  ;;  %v276_v44 = vmul.f32 %v2585_v2, %v241_v34  ;;  %s2535_s17 = smov 64   ;;  %s2465_s20 = sshll.u32 %s4220_s19, 1 }
  0x12   : > { %v282_v10 = vmul.f32 %v2585_v2, %v247_v6  ;;  %v255_v11 = vld [vmem:[%s2593_s29 + $0x80] sm:$0xff]  ;;  %v256_v12 = vld [vmem:[%s2593_s29 + $0x88] sm:$0xff]  ;;  %v283_v13 = vmul.f32 %v2585_v2, %v248_v9  ;;  %v249_v38 = vld [vmem:[%s2593_s29 + $0x50] sm:$0xff]  ;;  %v277_v45 = vmul.f32 %v2585_v2, %v242_v35  ;;  %s235_s23 = scalar_lea.vmem %s4105_s5, %s2465_s20 }
  0x13   : > { %v290_v14 = vmul.f32 %v2585_v2, %v255_v11  ;;  %v291_v15 = vmul.f32 %v2585_v2, %v256_v12  ;;  %v263_v16 = vld [vmem:[%s2593_s29 + $0xc0] sm:$0xff]  ;;  %v264_v17 = vld [vmem:[%s2593_s29 + $0xc8] sm:$0xff]  ;;  %v309_v18 = vadd.f32 %v2598_v3, %v274_v7  ;;  %v310_v19 = vadd.f32 %v2598_v3, %v275_v8  ;;  %v250_v39 = vld [vmem:[%s2593_s29 + $0x58] sm:$0xff] }
  0x14   : > { %v317_v20 = vadd.f32 %v2598_v3, %v282_v10  ;;  %v298_v21 = vmul.f32 %v2585_v2, %v263_v16  ;;  %v318_v22 = vadd.f32 %v2598_v3, %v283_v13  ;;  %v299_v25 = vmul.f32 %v2585_v2, %v264_v17  ;;  %v265_v43 = vld [vmem:[%s2593_s29 + $0xd0] sm:$0xff]  ;;  %v266_v46 = vld [vmem:[%s2593_s29 + $0xd8] sm:$0xff]  ;;  %v251_v13 = vld [vmem:[%s2593_s29 + $0x60] sm:$0xff] }
  0x15   : > { %v325_v23 = vadd.f32 %v2598_v3, %v290_v14  ;;  %v326_v24 = vadd.f32 %v2598_v3, %v291_v15  ;;  %v341_v26 = vmax.f32 %v309_v18, 0.0  ;;  %v342_v27 = vmax.f32 %v310_v19, 0.0  ;;  %v257_v47 = vld [vmem:[%s2593_s29 + $0x90] sm:$0xff]  ;;  %v258_v48 = vld [vmem:[%s2593_s29 + $0x98] sm:$0xff]  ;;  %v243_v14 = vld [vmem:[%s2593_s29 + $0x20] sm:$0xff] }
  0x16   : > { %v349_v28 = vmax.f32 %v317_v20, 0.0  ;;  %v333_v29 = vadd.f32 %v2598_v3, %v298_v21  ;;  %v350_v30 = vmax.f32 %v318_v22, 0.0  ;;  %v334_v33 = vadd.f32 %v2598_v3, %v299_v25  ;;  %v244_v15 = vld [vmem:[%s2593_s29 + $0x28] sm:$0xff]  ;;  %v259_v17 = vld [vmem:[%s2593_s29 + $0xa0] sm:$0xff] }
  0x17   : > { %v357_v31 = vmax.f32 %v325_v23, 0.0  ;;  %v358_v32 = vmax.f32 %v326_v24, 0.0  ;;  %v373_v36 = vpack.c.bf16 %v342_v27, %v341_v26  ;;  %v284_v50 = vmul.f32 %v2585_v2, %v249_v38  ;;  %v252_v16 = vld [vmem:[%s2593_s29 + $0x68] sm:$0xff]  ;;  %v267_v21 = vld [vmem:[%s2593_s29 + $0xe0] sm:$0xff] }
  0x18   : > { %v365_v37 = vmax.f32 %v333_v29, 0.0  ;;  %v377_v40 = vpack.c.bf16 %v350_v30, %v349_v28  ;;  %v366_v42 = vmax.f32 %v334_v33, 0.0  ;;  %v285_v51 = vmul.f32 %v2585_v2, %v250_v39  ;;  %v260_v18 = vld [vmem:[%s2593_s29 + $0xa8] sm:$0xff] }
  0x19   : > { %v381_v41 = vpack.c.bf16 %v358_v32, %v357_v31  ;;  %2474 = vmatmul.msk.bf16.vlgmr.msra.gmra.mxu0 %vm405_vm0, %v373_v36  ;;  %v300_v52 = vmul.f32 %v2585_v2, %v265_v43  ;;  %v301_v53 = vmul.f32 %v2585_v2, %v266_v46  ;;  %v292_v54 = vmul.f32 %v2585_v2, %v257_v47  ;;  %v268_v22 = vld [vmem:[%s2593_s29 + $0xe8] sm:$0xff] }
  0x1a   : > { %2478 = vmatmul.msk.bf16.vlgmr.msra.gmra.mxu1 %vm405_vm0, %v377_v40  ;;  %v385_v49 = vpack.c.bf16 %v366_v42, %v365_v37  ;;  %v293_v55 = vmul.f32 %v2585_v2, %v258_v48  ;;  %v311_v56 = vadd.f32 %v2598_v3, %v276_v44  ;;  %v312_v57 = vadd.f32 %v2598_v3, %v277_v45 }
  0x1b   : > { %2482 = vmatmul.msk.bf16.vlgmr.msra.gmra.mxu2 %vm405_vm0, %v381_v41  ;;  %v319_v58 = vadd.f32 %v2598_v3, %v284_v50  ;;  %v320_v59 = vadd.f32 %v2598_v3, %v285_v51  ;;  %v327_v60 = vadd.f32 %v2598_v3, %v292_v54  ;;  %v335_v62 = vadd.f32 %v2598_v3, %v300_v52  ;;  %v261_v50 = vld [vmem:[%s2593_s29 + $0xb0] sm:$0xff]  ;;  %v262_v51 = vld [vmem:[%s2593_s29 + $0xb8] sm:$0xff] }
  0x1c   : > { %2486 = vmatmul.msk.bf16.vlgmr.msra.gmra.mxu3 %vm405_vm0, %v385_v49  ;;  %v328_v61 = vadd.f32 %v2598_v3, %v293_v55  ;;  %v336_v63 = vadd.f32 %v2598_v3, %v301_v53  ;;  %v343_v0 = vmax.f32 %v311_v56, 0.0  ;;  %v344_v1 = vmax.f32 %v312_v57, 0.0 }
  0x1d   : > { %v351_v4 = vmax.f32 %v319_v58, 0.0  ;;  %v352_v5 = vmax.f32 %v320_v59, 0.0  ;;  %v359_v6 = vmax.f32 %v327_v60, 0.0  ;;  %v367_v8 = vmax.f32 %v335_v62, 0.0  ;;  %v253_v58 = vld [vmem:[%s2593_s29 + $0x70] sm:$0xff]  ;;  %v254_v59 = vld [vmem:[%s2593_s29 + $0x78] sm:$0xff] }
  0x1e   : > { %v360_v7 = vmax.f32 %v328_v61, 0.0  ;;  %v368_v9 = vmax.f32 %v336_v63, 0.0  ;;  %v374_v10 = vpack.c.bf16 %v344_v1, %v343_v0  ;;  %v286_v20 = vmul.f32 %v2585_v2, %v251_v13 }
  0x1f   : > { %v378_v11 = vpack.c.bf16 %v352_v5, %v351_v4  ;;  %v278_v23 = vmul.f32 %v2585_v2, %v243_v14  ;;  %v279_v24 = vmul.f32 %v2585_v2, %v244_v15  ;;  %v287_v25 = vmul.f32 %v2585_v2, %v252_v16  ;;  %v245_v5 = vld [vmem:[%s2593_s29 + $0x30] sm:$0xff] }
  0x20   : > { %v382_v12 = vpack.c.bf16 %v360_v7, %v359_v6  ;;  %v386_v19 = vpack.c.bf16 %v368_v9, %v367_v8  ;;  %v294_v26 = vmul.f32 %v2585_v2, %v259_v17  ;;  %v295_v27 = vmul.f32 %v2585_v2, %v260_v18  ;;  %v246_v6 = vld [vmem:[%s2593_s29 + $0x38] sm:$0xff] }
  0x21   : > { %v302_v28 = vmul.f32 %v2585_v2, %v267_v21  ;;  %v303_v29 = vmul.f32 %v2585_v2, %v268_v22  ;;  %v313_v30 = vadd.f32 %v2598_v3, %v278_v23  ;;  %v314_v31 = vadd.f32 %v2598_v3, %v279_v24 }
  0x22   : > { %v321_v32 = vadd.f32 %v2598_v3, %v286_v20  ;;  %v322_v33 = vadd.f32 %v2598_v3, %v287_v25  ;;  %v329_v34 = vadd.f32 %v2598_v3, %v294_v26  ;;  %v330_v35 = vadd.f32 %v2598_v3, %v295_v27 }
  0x23   : > { %v337_v36 = vadd.f32 %v2598_v3, %v302_v28  ;;  %v338_v37 = vadd.f32 %v2598_v3, %v303_v29  ;;  %v345_v38 = vmax.f32 %v313_v30, 0.0  ;;  %v346_v39 = vmax.f32 %v314_v31, 0.0 }
  0x24   : > { %v353_v40 = vmax.f32 %v321_v32, 0.0  ;;  %v354_v41 = vmax.f32 %v322_v33, 0.0  ;;  %v361_v42 = vmax.f32 %v329_v34, 0.0  ;;  %v362_v43 = vmax.f32 %v330_v35, 0.0 }
  0x25   : > { %v369_v44 = vmax.f32 %v337_v36, 0.0  ;;  %v370_v45 = vmax.f32 %v338_v37, 0.0  ;;  %v375_v46 = vpack.c.bf16 %v346_v39, %v345_v38  ;;  %v296_v52 = vmul.f32 %v2585_v2, %v261_v50 }
  0x26   : > { %v379_v47 = vpack.c.bf16 %v354_v41, %v353_v40  ;;  %v383_v48 = vpack.c.bf16 %v362_v43, %v361_v42  ;;  %v297_v53 = vmul.f32 %v2585_v2, %v262_v51  ;;  %v288_v61 = vmul.f32 %v2585_v2, %v253_v58 }
  0x27   : > { %v387_v49 = vpack.c.bf16 %v370_v45, %v369_v44  ;;  %v331_v54 = vadd.f32 %v2598_v3, %v296_v52  ;;  %v289_v62 = vmul.f32 %v2585_v2, %v254_v59  ;;  %v280_v7 = vmul.f32 %v2585_v2, %v245_v5 }
  0x28   : > { %v332_v55 = vadd.f32 %v2598_v3, %v297_v53  ;;  %v323_v63 = vadd.f32 %v2598_v3, %v288_v61  ;;  %v281_v8 = vmul.f32 %v2585_v2, %v246_v6 }
  0x29   : > { %2475 = vmatmul.msk.bf16.gmra.mxu0 %vm405_vm0, %v374_v10  ;;  %v363_v56 = vmax.f32 %v331_v54, 0.0  ;;  %v324_v0 = vadd.f32 %v2598_v3, %v289_v62  ;;  %v269_v10 = vld [vmem:[%s2593_s29 + $0xf0] sm:$0xff] }
  0x2a   : > { %2479 = vmatmul.msk.bf16.gmra.mxu1 %vm405_vm0, %v378_v11  ;;  %v364_v57 = vmax.f32 %v332_v55, 0.0  ;;  %v355_v1 = vmax.f32 %v323_v63, 0.0  ;;  %v270_v11 = vld [vmem:[%s2593_s29 + $0xf8] sm:$0xff]  ;;  %v316_v13 = vadd.f32 %v2598_v3, %v281_v8  ;;  %v304_v14 = vmul.f32 %v2585_v2, %v269_v10 }
  0x2b   : > { %2483 = vmatmul.msk.bf16.gmra.mxu2 %vm405_vm0, %v382_v12  ;;  %v356_v4 = vmax.f32 %v324_v0, 0.0  ;;  %v315_v12 = vadd.f32 %v2598_v3, %v280_v7  ;;  %v305_v15 = vmul.f32 %v2585_v2, %v270_v11 }
  0x2c   : > { %2487 = vmatmul.msk.bf16.gmra.mxu3 %vm405_vm0, %v386_v19  ;;  %v384_v60 = vpack.c.bf16 %v364_v57, %v363_v56  ;;  %v348_v17 = vmax.f32 %v316_v13, 0.0  ;;  %v339_v18 = vadd.f32 %v2598_v3, %v304_v14 }
  0x2d   : > { %v380_v9 = vpack.c.bf16 %v356_v4, %v355_v1  ;;  %v347_v16 = vmax.f32 %v315_v12, 0.0  ;;  %v340_v19 = vadd.f32 %v2598_v3, %v305_v15 }
  0x2e   : > { %v371_v21 = vmax.f32 %v339_v18, 0.0 }
  0x2f   : > { %v376_v20 = vpack.c.bf16 %v348_v17, %v347_v16  ;;  %v372_v22 = vmax.f32 %v340_v19, 0.0 }
  0x31   : > { %v388_v23 = vpack.c.bf16 %v372_v22, %v371_v21 }
  0x39   : > { %2476 = vmatmul.msk.bf16.gmra.mxu0 %vm405_vm0, %v375_v46 }
  0x3a   : > { %2480 = vmatmul.msk.bf16.gmra.mxu1 %vm405_vm0, %v379_v47 }
  0x3b   : > { %2484 = vmatmul.msk.bf16.gmra.mxu2 %vm405_vm0, %v383_v48 }
  0x3c   : > { %2488 = vmatmul.msk.bf16.gmra.mxu3 %vm405_vm0, %v387_v49 }
  0x49   : > { %2477 = vmatmul.msk.bf16.gmra.mxu0 %vm405_vm0, %v376_v20 }
  0x4a   : > { %2481 = vmatmul.msk.bf16.gmra.mxu1 %vm405_vm0, %v380_v9 }
  0x4b   : > { %2485 = vmatmul.msk.bf16.gmra.mxu2 %vm405_vm0, %v384_v60 }
  0x4c   : > { %2489 = vmatmul.msk.bf16.gmra.mxu3 %vm405_vm0, %v388_v23 }
  0x96   : > { %v2712_v24 = vpop.f32.mrf.mxu0 }
  0x97   : > { %v2714_v25 = vpop.f32.mrf.mxu1  ;;  %575 = vrot.lane.b32.xlu0 %v2712_v24, %s2528_s7  ;;  %v1007_v34 = vrot.slane %v2712_v24, 1 }
  0x98   : > { %842 = vrot.lane.b32.xlu1 %v2714_v25, %s2529_s8  ;;  %591 = vrot.lane.b32.xlu2 %v2714_v25, %s2528_s7  ;;  %v1019_v28 = vrot.slane %v2714_v25, 1 }
  0x9e   : > { %v2722_v2 = vpop.f32.mrf.mxu2  ;;  %v2750_v31 = vpop.f32.mrf.mxu0 }
  0x9f   : > { %v2724_v3 = vpop.f32.mrf.mxu3  ;;  %v2726_v26 = vpop.f32.mrf.mxu1  ;;  %v2767_v33 = vrot.slane %v2750_v31, 1 }
  0xa0   : > { %607 = vrot.lane.b32.xlu1 %v2722_v2, %s2528_s7  ;;  %826 = vrot.lane.b32.xlu2 %v2712_v24, %s2529_s8  ;;  %v2735_v27 = vrot.slane %v2726_v26, 1 }
  0xa1   : > { %623 = vrot.lane.b32.xlu0 %v2724_v3, %s2528_s7  ;;  %v2774_v36 = vsel %vm1006_vm1, %v1007_v34, %v2767_v33 }
  0xa2   : > { %4159 = vst [vmem:[#allocation3_spill] sm:$0xff] %v2735_v27  ;;  %v2740_v29 = vsel %vm1006_vm1, %v1019_v28, %v2735_v27 }
  0xa3   : > { %4160 = vst [vmem:[#allocation4_spill] sm:$0xff] %v2740_v29 }
  0xa6   : > { %v2758_v32 = vpop.f32.mrf.mxu2  ;;  %v2770_v35 = vpop.f32.mrf.mxu0 }
  0xa7   : > { %v2748_v30 = vpop.f32.mrf.mxu3  ;;  %v2782_v37 = vpop.f32.mrf.mxu1  ;;  %v1010_v48 = vrot.slane %v2770_v35, 1 }
  0xa8   : > { %1068 = vrot.lane.b32.xlu1 %v2740_v29, %s2530_s9  ;;  %874 = vrot.lane.b32.xlu2 %v2724_v3, %s2529_s8  ;;  %v1022_v42 = vrot.slane %v2782_v37, 1 }
  0xa9   : > { %858 = vrot.lane.b32.xlu0 %v2722_v2, %s2529_s8 }
  0xae   : > { %v2798_v39 = vpop.f32.mrf.mxu2  ;;  %v2806_v40 = vpop.f32.mrf.mxu0 }
  0xaf   : > { %v2790_v38 = vpop.f32.mrf.mxu3  ;;  %v2808_v41 = vpop.f32.mrf.mxu1  ;;  %v2831_v45 = vrot.slane %v2806_v40, 1 }
  0xb0   : > { %625 = vrot.lane.b32.xlu1 %v2748_v30, %s2528_s7  ;;  %844 = vrot.lane.b32.xlu2 %v2726_v26, %s2529_s8  ;;  %v2818_v43 = vrot.slane %v2808_v41, 1 }
  0xb1   : > { %577 = vrot.lane.b32.xlu0 %v2750_v31, %s2528_s7  ;;  %4163 = vst [vmem:[#allocation7_spill] sm:$0xff] %v2831_v45  ;;  %v2845_v49 = vsel %vm1006_vm1, %v1010_v48, %v2831_v45 }
  0xb2   : > { %4161 = vst [vmem:[#allocation5_spill] sm:$0xff] %v2818_v43  ;;  %v2822_v44 = vsel %vm1006_vm1, %v1022_v42, %v2818_v43 }
  0xb3   : > { %4162 = vst [vmem:[#allocation6_spill] sm:$0xff] %v2822_v44 }
  0xb4   : > { %4164 = vst [vmem:[#allocation8_spill] sm:$0xff] %v2845_v49 }
  0xb6   : > { %v2847_v50 = vpop.f32.mrf.mxu2  ;;  %v2857_v52 = vpop.f32.mrf.mxu0 }
  0xb7   : > { %v2833_v46 = vpop.f32.mrf.mxu3  ;;  %v2859_v53 = vpop.f32.mrf.mxu1  ;;  %v1013_v9 = vrot.slane %v2857_v52, 1 }
  0xb8   : > { %860 = vrot.lane.b32.xlu1 %v2758_v32, %s2529_s8  ;;  %1070 = vrot.lane.b32.xlu2 %v2735_v27, %s2530_s9  ;;  %v1025_v7 = vrot.slane %v2859_v53, 1 }
  0xb9   : > { %593 = vrot.lane.b32.xlu0 %v2726_v26, %s2528_s7 }
  0xbe   : > { %v2882_v59 = vpop.f32.mrf.mxu2  ;;  %v2898_v1 = vpop.f32.mrf.mxu0 }
  0xbf   : > { %v2869_v55 = vpop.f32.mrf.mxu3  ;;  %v2896_v0 = vpop.f32.mrf.mxu1  ;;  %v2918_v10 = vrot.slane %v2898_v1, 1 }
  0xc0   : > { %1052 = vrot.lane.b32.xlu2 %v2774_v36, %s2530_s9  ;;  %579 = vrot.lane.b32.xlu1 %v2770_v35, %s2528_s7  ;;  %v2914_v8 = vrot.slane %v2896_v0, 1 }
  0xc1   : > { %828 = vrot.lane.b32.xlu0 %v2750_v31, %s2529_s8  ;;  %4166 = vst [vmem:[#allocation10_spill] sm:$0xff] %v2918_v10  ;;  %v2934_v14 = vsel %vm1006_vm1, %v1013_v9, %v2918_v10 }
  0xc2   : > { %4165 = vst [vmem:[#allocation9_spill] sm:$0xff] %v2914_v8  ;;  %v2924_v12 = vsel %vm1006_vm1, %v1025_v7, %v2914_v8 }
  0xc3   : > { %4167 = vst [vmem:[#allocation11_spill] sm:$0xff] %v2924_v12 }
  0xc4   : > { %4168 = vst [vmem:[#allocation12_spill] sm:$0xff] %v2934_v14 }
  0xc6   : > { %v2894_v63 = vpop.f32.mrf.mxu2  ;;  %v2949_v20 = vpop.f32.mrf.mxu0 }
  0xc7   : > { %v2926_v13 = vpop.f32.mrf.mxu1  ;;  %v2941_v18 = vpop.f32.mrf.mxu3 }
  0xc8   : > { %609 = vrot.lane.b32.xlu2 %v2758_v32, %s2528_s7  ;;  %595 = vrot.lane.b32.xlu1 %v2782_v37, %s2528_s7 }
  0xc9   : > { %1054 = vrot.lane.b32.xlu0 %v2767_v33, %s2530_s9 }
  0xce   : > { %v2920_v11 = vpop.f32.mrf.mxu2 }
  0xcf   : > { %v2953_v21 = vpop.f32.mrf.mxu1 }
  0xd0   : > { %627 = vrot.lane.b32.xlu2 %v2790_v38, %s2528_s7  ;;  %830 = vrot.lane.b32.xlu1 %v2770_v35, %s2529_s8 }
  0xd1   : > { %876 = vrot.lane.b32.xlu0 %v2748_v30, %s2529_s8 }
  0xd6   : > { %v2947_v19 = vpop.f32.mrf.mxu2 }
  0xd8   : > { %862 = vrot.lane.b32.xlu2 %v2798_v39, %s2529_s8  ;;  %878 = vrot.lane.b32.xlu1 %v2790_v38, %s2529_s8 }
  0xd9   : > { %846 = vrot.lane.b32.xlu0 %v2782_v37, %s2529_s8 }
  0xe0   : > { %597 = vrot.lane.b32.xlu2 %v2808_v41, %s2528_s7  ;;  %581 = vrot.lane.b32.xlu1 %v2806_v40, %s2528_s7 }
  0xe1   : > { %611 = vrot.lane.b32.xlu0 %v2798_v39, %s2528_s7 }
  0xe8   : > { %832 = vrot.lane.b32.xlu2 %v2806_v40, %s2529_s8  ;;  %848 = vrot.lane.b32.xlu1 %v2808_v41, %s2529_s8 }
  0xe9   : > { %1072 = vrot.lane.b32.xlu0 %v2822_v44, %s2530_s9 }
  0xf0   : > { %1074 = vrot.lane.b32.xlu1 %v2818_v43, %s2530_s9  ;;  %1058 = vrot.lane.b32.xlu2 %v2831_v45, %s2530_s9 }
  0xf1   : > { %629 = vrot.lane.b32.xlu0 %v2833_v46, %s2528_s7 }
  0xf2   : > { %v592_v47 = vpop.permute.xlu2 %591 }
  0xf3   : > { %680 = vst.msk [vmem:[#allocation2 + $0x40] sm:$0xff] %vm671_vm2, %v592_v47 }
  0xf8   : > { %880 = vrot.lane.b32.xlu2 %v2833_v46, %s2529_s8  ;;  %1056 = vrot.lane.b32.xlu1 %v2845_v49, %s2530_s9 }
  0xf9   : > { %864 = vrot.lane.b32.xlu0 %v2847_v50, %s2529_s8 }
  0xfa   : > { %v2855_v51 = vpop.permute.xlu2 %826 }
 0x100   : > { %613 = vrot.lane.b32.xlu1 %v2847_v50, %s2528_s7  ;;  %583 = vrot.lane.b32.xlu2 %v2857_v52, %s2528_s7 }
 0x101   : > { %599 = vrot.lane.b32.xlu0 %v2859_v53, %s2528_s7 }
 0x102   : > { %v2867_v54 = vpop.permute.xlu2 %874 }
 0x108   : > { %631 = vrot.lane.b32.xlu1 %v2869_v55, %s2528_s7  ;;  %850 = vrot.lane.b32.xlu2 %v2859_v53, %s2529_s8 }
 0x109   : > { %834 = vrot.lane.b32.xlu0 %v2857_v52, %s2529_s8  ;;  %v576_v56 = vpop.permute.xlu0 %575 }
 0x10a   : > { %v2877_v57 = vpop.permute.xlu1 %842  ;;  %v2879_v58 = vpop.permute.xlu2 %844  ;;  %672 = vst.msk [vmem:[#allocation2] sm:$0xff] %vm671_vm2, %v576_v56 }
 0x110   : > { %866 = vrot.lane.b32.xlu1 %v2882_v59, %s2529_s8  ;;  %615 = vrot.lane.b32.xlu2 %v2882_v59, %s2528_s7 }
 0x111   : > { %882 = vrot.lane.b32.xlu0 %v2869_v55, %s2529_s8 }
 0x112   : > { %v608_v60 = vpop.permute.xlu1 %607  ;;  %v2890_v61 = vpop.permute.xlu2 %1070 }
 0x113   : > { %688 = vst.msk [vmem:[#allocation2 + $0x80] sm:$0xff] %vm671_vm2, %v608_v60  ;;  %v624_v62 = vpop.permute.xlu0 %623 }
 0x114   : > { %696 = vst.msk [vmem:[#allocation2 + $0xc0] sm:$0xff] %vm671_vm2, %v624_v62 }
 0x118   : > { %601 = vrot.lane.b32.xlu1 %v2896_v0, %s2528_s7  ;;  %585 = vrot.lane.b32.xlu2 %v2898_v1, %s2528_s7 }
 0x119   : > { %852 = vrot.lane.b32.xlu0 %v2896_v0, %s2529_s8 }
 0x11a   : > { %v2906_v4 = vpop.permute.xlu1 %1068  ;;  %v2908_v5 = vpop.permute.xlu2 %1052 }
 0x11b   : > { %v2910_v6 = vpop.permute.xlu0 %858 }
 0x120   : > { %836 = vrot.lane.b32.xlu1 %v2898_v1, %s2529_s8  ;;  %1076 = vrot.lane.b32.xlu2 %v2924_v12, %s2530_s9 }
 0x121   : > { %1060 = vrot.lane.b32.xlu0 %v2934_v14, %s2530_s9 }
 0x122   : > { %v626_v15 = vpop.permute.xlu1 %625  ;;  %v610_v16 = vpop.permute.xlu2 %609 }
 0x123   : > { %697 = vst.msk [vmem:[#allocation2 + $0xc8] sm:$0xff] %vm671_vm2, %v626_v15  ;;  %v578_v17 = vpop.permute.xlu0 %577 }
 0x124   : > { %673 = vst.msk [vmem:[#allocation2 + $0x8] sm:$0xff] %vm671_vm2, %v578_v17  ;;  %v2975_v17 = vpop.f32.mrf.mxu0 }
 0x125   : > { %689 = vst.msk [vmem:[#allocation2 + $0x88] sm:$0xff] %vm671_vm2, %v610_v16 }
 0x128   : > { %633 = vrot.lane.b32.xlu2 %v2941_v18, %s2528_s7  ;;  %1062 = vrot.lane.b32.xlu1 %v2918_v10, %s2530_s9 }
 0x129   : > { %617 = vrot.lane.b32.xlu0 %v2894_v63, %s2528_s7 }
 0x12a   : > { %v727_v22 = vld [vmem:[#allocation2 + $0xc1] sm:$0xff]  ;;  %v728_v23 = vld [vmem:[#allocation2 + $0xc9] sm:$0x7f]  ;;  %v2955_v28 = vpop.permute.xlu1 %860  ;;  %v628_v34 = vpop.permute.xlu2 %627 }
 0x12b   : > { %v757_v42 = vadd.f32 %v727_v22, %v2920_v11  ;;  %v758_v47 = vadd.f32 %v728_v23, %v2947_v19  ;;  %v594_v48 = vpop.permute.xlu0 %593  ;;  %698 = vst.msk [vmem:[#allocation2 + $0xd0] sm:$0xff] %vm671_vm2, %v628_v34 }
 0x12c   : > { %v719_v56 = vld [vmem:[#allocation2 + $0x81] sm:$0xff]  ;;  %v720_v60 = vld [vmem:[#allocation2 + $0x89] sm:$0x7f]  ;;  %681 = vst.msk [vmem:[#allocation2 + $0x48] sm:$0xff] %vm671_vm2, %v594_v48 }
 0x12d   : > { %788 = vst.msk [vmem:[#allocation2 + $0xc1] sm:$0xff] %vm671_vm2, %v757_v42  ;;  %v749_v62 = vadd.f32 %v719_v56, %v2926_v13  ;;  %v750_v7 = vadd.f32 %v720_v60, %v2953_v21 }
 0x12e   : > { %789 = vst.msk [vmem:[#allocation2 + $0xc9] sm:$0x7f] %vm766_vm3, %v758_v47  ;;  %v2984_v47 = vpop.f32.mrf.mxu3 }
 0x12f   : > { %780 = vst.msk [vmem:[#allocation2 + $0x81] sm:$0xff] %vm671_vm2, %v749_v62 }
 0x130   : > { %781 = vst.msk [vmem:[#allocation2 + $0x89] sm:$0x7f] %vm766_vm3, %v750_v7  ;;  %868 = vrot.lane.b32.xlu2 %v2894_v63, %s2529_s8  ;;  %884 = vrot.lane.b32.xlu1 %v2941_v18, %s2529_s8 }
 0x131   : > { %587 = vrot.lane.b32.xlu0 %v2949_v20, %s2528_s7 }
 0x132   : > { %v2973_v9 = vpop.permute.xlu2 %862  ;;  %v580_v15 = vpop.permute.xlu1 %579 }
 0x133   : > { %v711_v16 = vld [vmem:[#allocation2 + $0x41] sm:$0xff]  ;;  %v712_v22 = vld [vmem:[#allocation2 + $0x49] sm:$0x7f]  ;;  %v2977_v23 = vpop.permute.xlu0 %828  ;;  %674 = vst.msk [vmem:[#allocation2 + $0x10] sm:$0xff] %vm671_vm2, %v580_v15 }
 0x134   : > { %v741_v34 = vadd.f32 %v711_v16, %v2949_v20  ;;  %v742_v42 = vadd.f32 %v712_v22, %v2975_v17 }
 0x136   : > { %772 = vst.msk [vmem:[#allocation2 + $0x41] sm:$0xff] %vm671_vm2, %v741_v34 }
 0x137   : > { %773 = vst.msk [vmem:[#allocation2 + $0x49] sm:$0x7f] %vm766_vm3, %v742_v42 }
 0x138   : > { %603 = vrot.lane.b32.xlu2 %v2926_v13, %s2528_s7  ;;  %854 = vrot.lane.b32.xlu1 %v2926_v13, %s2529_s8 }
 0x139   : > { %635 = vrot.lane.b32.xlu0 %v2984_v47, %s2528_s7 }
 0x13a   : > { %v598_v48 = vpop.permute.xlu2 %597  ;;  %v596_v56 = vpop.permute.xlu1 %595 }
 0x13b   : > { %v2992_v60 = vpop.permute.xlu0 %1054  ;;  %683 = vst.msk [vmem:[#allocation2 + $0x58] sm:$0xff] %vm671_vm2, %v598_v48 }
 0x13c   : > { %682 = vst.msk [vmem:[#allocation2 + $0x50] sm:$0xff] %vm671_vm2, %v596_v56 }
 0x140   : > { %619 = vrot.lane.b32.xlu1 %v2920_v11, %s2528_s7  ;;  %838 = vrot.lane.b32.xlu2 %v2949_v20, %s2529_s8 }
 0x141   : > { %870 = vrot.lane.b32.xlu0 %v2920_v11, %s2529_s8 }
 0x142   : > { %v714_v62 = vld [vmem:[#allocation2 + $0x59] sm:$0x7f]  ;;  %v3002_v7 = vpop.permute.xlu1 %830  ;;  %v3004_v15 = vpop.permute.xlu2 %832 }
 0x143   : > { %v744_v16 = vadd.f32 %v714_v62, %v2726_v26  ;;  %v713_v22 = vld [vmem:[#allocation2 + $0x51] sm:$0xff]  ;;  %v3007_v34 = vpop.permute.xlu0 %876 }
 0x144   : > { %v743_v42 = vadd.f32 %v713_v22, %v2714_v25  ;;  %v3025_v22 = vrot.slane %v2953_v21, 1 }
 0x145   : > { %775 = vst.msk [vmem:[#allocation2 + $0x59] sm:$0x7f] %vm766_vm3, %v744_v16  ;;  %v1028_v16 = vrot.slane %v2926_v13, 1 }
 0x146   : > { %774 = vst.msk [vmem:[#allocation2 + $0x51] sm:$0xff] %vm671_vm2, %v743_v42 }
 0x147   : > { %4169 = vst [vmem:[#allocation13_spill] sm:$0xff] %v3025_v22  ;;  %v3032_v44 = vsel %vm1006_vm1, %v1028_v16, %v3025_v22  ;;  %v3050_v16 = vpop.f32.mrf.mxu3 }
 0x148   : > { %856 = vrot.lane.b32.xlu2 %v2953_v21, %s2529_s8  ;;  %589 = vrot.lane.b32.xlu1 %v2975_v17, %s2528_s7  ;;  %4170 = vst [vmem:[#allocation14_spill] sm:$0xff] %v3032_v44 }
 0x149   : > { %605 = vrot.lane.b32.xlu0 %v2953_v21, %s2528_s7  ;;  %4172 = vst [vmem:[#allocation16_spill] sm:$0xff] %v3050_v16 }
 0x14a   : > { %v3018_v48 = vpop.permute.xlu1 %878  ;;  %v3020_v56 = vpop.permute.xlu2 %1058 }
 0x14b   : > { %v3022_v62 = vpop.permute.xlu0 %846 }
 0x14d   : > { %v804_v42 = vld [vmem:[#allocation2 + $0x50] sm:$0xff]  ;;  %v805_v43 = vld [vmem:[#allocation2 + $0x58] sm:$0xff] }
 0x14e   : > { %v924_v12 = vadd.f32 %v2877_v57, %v804_v42  ;;  %v925_v29 = vadd.f32 %v2879_v58, %v805_v43  ;;  %v3046_v58 = vrot.slane %v2975_v17, 1 }
 0x150   : > { %954 = vst.msk [vmem:[#allocation2 + $0x50] sm:$0xff] %vm671_vm2, %v924_v12  ;;  %1082 = vrot.lane.b32.xlu2 %v3025_v22, %s2530_s9  ;;  %1080 = vrot.lane.b32.xlu1 %v3032_v44, %s2530_s9  ;;  %v1016_v12 = vrot.slane %v2949_v20, 1 }
 0x151   : > { %955 = vst.msk [vmem:[#allocation2 + $0x58] sm:$0xff] %vm671_vm2, %v925_v29  ;;  %840 = vrot.lane.b32.xlu0 %v2975_v17, %s2529_s8 }
 0x152   : > { %v582_v57 = vpop.permute.xlu1 %581  ;;  %v3042_v42 = vpop.permute.xlu2 %880  ;;  %4171 = vst [vmem:[#allocation15_spill] sm:$0xff] %v3046_v58  ;;  %v3054_v29 = vsel %vm1006_vm1, %v1016_v12, %v3046_v58 }
 0x153   : > { %v612_v43 = vpop.permute.xlu0 %611  ;;  %675 = vst.msk [vmem:[#allocation2 + $0x18] sm:$0xff] %vm671_vm2, %v582_v57 }
 0x154   : > { %690 = vst.msk [vmem:[#allocation2 + $0x90] sm:$0xff] %vm671_vm2, %v612_v43 }
 0x155   : > { %4173 = vst [vmem:[#allocation17_spill] sm:$0xff] %v3054_v29 }
 0x157   : > { %v984_v44 = vld [vmem:[#allocation2 + $0x50] sm:$0xff] }
 0x158   : > { %v985_v22 = vld [vmem:[#allocation2 + $0x58] sm:$0x7f]  ;;  %v1150_v27 = vadd.f32 %v2906_v4, %v984_v44  ;;  %637 = vrot.lane.b32.xlu1 %v3050_v16, %s2528_s7  ;;  %1064 = vrot.lane.b32.xlu2 %v3054_v29, %s2530_s9 }
 0x159   : > { %v1151_v57 = vadd.f32 %v2890_v61, %v985_v22  ;;  %1066 = vrot.lane.b32.xlu0 %v3046_v58, %s2530_s9  ;;  %v3087_v22 = vrot.slane %v2847_v50, 1  ;;  %v1031_v58 = vrot.slane %v2722_v2, 1 }
 0x15a   : > { %1180 = vst.msk [vmem:[#allocation2 + $0x50] sm:$0xff] %vm671_vm2, %v1150_v27  ;;  %v705_v43 = vld [vmem:[#allocation2 + $0x11] sm:$0xff]  ;;  %v706_v10 = vld [vmem:[#allocation2 + $0x19] sm:$0x7f]  ;;  %v3065_v12 = vpop.permute.xlu1 %848  ;;  %v584_v49 = vpop.permute.xlu2 %583 }
 0x15b   : > { %1181 = vst.msk [vmem:[#allocation2 + $0x58] sm:$0x7f] %vm766_vm3, %v1151_v57  ;;  %v735_v44 = vadd.f32 %v705_v43, %v2712_v24  ;;  %v736_v4 = vadd.f32 %v706_v10, %v2750_v31  ;;  %v3070_v14 = vpop.permute.xlu0 %1072  ;;  %v3091_v43 = vrot.slane %v2758_v32, 1 }
 0x15c   : > { %676 = vst.msk [vmem:[#allocation2 + $0x20] sm:$0xff] %vm671_vm2, %v584_v49  ;;  %v1034_v49 = vrot.slane %v2798_v39, 1 }
 0x15d   : > { %765 = vst.msk [vmem:[#allocation2 + $0x11] sm:$0xff] %vm671_vm2, %v735_v44 }
 0x15e   : > { %767 = vst.msk [vmem:[#allocation2 + $0x19] sm:$0x7f] %vm766_vm3, %v736_v4  ;;  %v3099_v29 = vsel %vm1006_vm1, %v1034_v49, %v3087_v22 }
 0x15f   : > { %4174 = vst [vmem:[#allocation18_spill] sm:$0xff] %v3091_v43 }
 0x160   : > { %872 = vrot.lane.b32.xlu1 %v2947_v19, %s2529_s8  ;;  %621 = vrot.lane.b32.xlu2 %v2947_v19, %s2528_s7  ;;  %4175 = vst [vmem:[#allocation19_spill] sm:$0xff] %v3099_v29 }
 0x161   : > { %1078 = vrot.lane.b32.xlu0 %v2914_v8, %s2530_s9 }
 0x162   : > { %v3081_v27 = vpop.permute.xlu1 %1074  ;;  %v3083_v61 = vpop.permute.xlu2 %850 }
 0x163   : > { %v630_v10 = vpop.permute.xlu0 %629 }
 0x164   : > { %v796_v57 = vld [vmem:[#allocation2 + $0x10] sm:$0xff]  ;;  %699 = vst.msk [vmem:[#allocation2 + $0xd8] sm:$0xff] %vm671_vm2, %v630_v10  ;;  %v3106_v10 = vsel %vm1006_vm1, %v1031_v58, %v3091_v43  ;;  %v3119_v58 = vrot.slane %v2894_v63, 1 }
 0x165   : > { %v797_v44 = vld [vmem:[#allocation2 + $0x18] sm:$0xff]  ;;  %v916_v4 = vadd.f32 %v2855_v51, %v796_v57  ;;  %4176 = vst [vmem:[#allocation20_spill] sm:$0xff] %v3106_v10 }
 0x166   : > { %v917_v8 = vadd.f32 %v2977_v23, %v797_v44  ;;  %4177 = vst [vmem:[#allocation21_spill] sm:$0xff] %v3119_v58 }
 0x167   : > { %946 = vst.msk [vmem:[#allocation2 + $0x10] sm:$0xff] %vm671_vm2, %v916_v4 }
 0x168   : > { %947 = vst.msk [vmem:[#allocation2 + $0x18] sm:$0xff] %vm671_vm2, %v917_v8  ;;  %1086 = vrot.lane.b32.xlu1 %v3091_v43, %s2530_s9  ;;  %1088 = vrot.lane.b32.xlu2 %v3099_v29, %s2530_s9  ;;  %v1037_v8 = vrot.slane %v2882_v59, 1 }
 0x169   : > { %1084 = vrot.lane.b32.xlu0 %v3106_v10, %s2530_s9 }
 0x16a   : > { %v3112_v51 = vpop.permute.xlu1 %1056  ;;  %v616_v23 = vpop.permute.xlu2 %615 }
 0x16b   : > { %v729_v49 = vld [vmem:[#allocation2 + $0xd1] sm:$0xff]  ;;  %v730_v57 = vld [vmem:[#allocation2 + $0xd9] sm:$0x7f]  ;;  %v3114_v44 = vpop.permute.xlu0 %864  ;;  %692 = vst.msk [vmem:[#allocation2 + $0xa0] sm:$0xff] %vm671_vm2, %v616_v23  ;;  %v3128_v23 = vsel %vm1006_vm1, %v1037_v8, %v3119_v58 }
 0x16c   : > { %v759_v4 = vadd.f32 %v729_v49, %v2724_v3  ;;  %v760_v43 = vadd.f32 %v730_v57, %v2748_v30  ;;  %4178 = vst [vmem:[#allocation22_spill] sm:$0xff] %v3128_v23 }
 0x16e   : > { %v976_v29 = vld [vmem:[#allocation2 + $0x10] sm:$0xff]  ;;  %790 = vst.msk [vmem:[#allocation2 + $0xd1] sm:$0xff] %vm671_vm2, %v759_v4 }
 0x16f   : > { %v977_v10 = vld [vmem:[#allocation2 + $0x18] sm:$0x7f]  ;;  %v1142_v45 = vadd.f32 %v2908_v5, %v976_v29  ;;  %791 = vst.msk [vmem:[#allocation2 + $0xd9] sm:$0x7f] %vm766_vm3, %v760_v43 }
 0x170   : > { %v1143_v16 = vadd.f32 %v2992_v60, %v977_v10  ;;  %1092 = vrot.lane.b32.xlu1 %v3128_v23, %s2530_s9  ;;  %1094 = vrot.lane.b32.xlu2 %v3119_v58, %s2530_s9  ;;  %v3141_v60 = vrot.slane %v2748_v30, 1  ;;  %v3145_v10 = vrot.slane %v2947_v19, 1 }
 0x171   : > { %1172 = vst.msk [vmem:[#allocation2 + $0x10] sm:$0xff] %vm671_vm2, %v1142_v45  ;;  %1090 = vrot.lane.b32.xlu0 %v3087_v22, %s2530_s9  ;;  %v1040_v45 = vrot.slane %v2920_v11, 1 }
 0x172   : > { %1173 = vst.msk [vmem:[#allocation2 + $0x18] sm:$0x7f] %vm766_vm3, %v1143_v16  ;;  %v614_v5 = vpop.permute.xlu1 %613  ;;  %v586_v29 = vpop.permute.xlu2 %585  ;;  %v1043_v16 = vrot.slane %v2724_v3, 1 }
 0x173   : > { %v600_v43 = vpop.permute.xlu0 %599  ;;  %691 = vst.msk [vmem:[#allocation2 + $0x98] sm:$0xff] %vm671_vm2, %v614_v5 }
 0x174   : > { %4179 = vst [vmem:[#allocation23_spill] sm:$0xff] %v3141_v60  ;;  %v3154_v5 = vsel %vm1006_vm1, %v1043_v16, %v3141_v60 }
 0x175   : > { %684 = vst.msk [vmem:[#allocation2 + $0x60] sm:$0xff] %vm671_vm2, %v600_v43  ;;  %v820_v49 = vld [vmem:[#allocation2 + $0xd0] sm:$0xff]  ;;  %v3161_v43 = vsel %vm1006_vm1, %v1040_v45, %v3145_v10 }
 0x176   : > { %4180 = vst [vmem:[#allocation24_spill] sm:$0xff] %v3145_v10  ;;  %v821_v57 = vld [vmem:[#allocation2 + $0xd8] sm:$0xff]  ;;  %v940_v8 = vadd.f32 %v2867_v54, %v820_v49 }
 0x177   : > { %677 = vst.msk [vmem:[#allocation2 + $0x28] sm:$0xff] %vm671_vm2, %v586_v29  ;;  %v941_v4 = vadd.f32 %v3007_v34, %v821_v57 }
 0x178   : > { %4181 = vst [vmem:[#allocation25_spill] sm:$0xff] %v3154_v5  ;;  %1098 = vrot.lane.b32.xlu1 %v3145_v10, %s2530_s9  ;;  %1100 = vrot.lane.b32.xlu2 %v3154_v5, %s2530_s9 }
 0x179   : > { %970 = vst.msk [vmem:[#allocation2 + $0xd0] sm:$0xff] %vm671_vm2, %v940_v8  ;;  %1096 = vrot.lane.b32.xlu0 %v3161_v43, %s2530_s9  ;;  %v1046_v8 = vrot.slane %v2790_v38, 1 }
 0x17a   : > { %4182 = vst [vmem:[#allocation26_spill] sm:$0xff] %v3161_v43  ;;  %v721_v54 = vld [vmem:[#allocation2 + $0x91] sm:$0xff]  ;;  %v722_v34 = vld [vmem:[#allocation2 + $0x99] sm:$0x7f]  ;;  %v632_v29 = vpop.permute.xlu1 %631  ;;  %v3168_v49 = vpop.permute.xlu2 %1076 }
 0x17b   : > { %971 = vst.msk [vmem:[#allocation2 + $0xd8] sm:$0xff] %vm671_vm2, %v941_v4  ;;  %v751_v16 = vadd.f32 %v721_v54, %v2722_v2  ;;  %v752_v57 = vadd.f32 %v722_v34, %v2758_v32  ;;  %v3173_v45 = vpop.permute.xlu0 %834  ;;  %v3177_v4 = vrot.slane %v2833_v46, 1 }
 0x17c   : > { %700 = vst.msk [vmem:[#allocation2 + $0xe0] sm:$0xff] %vm671_vm2, %v632_v29 }
 0x17d   : > { %4183 = vst [vmem:[#allocation27_spill] sm:$0xff] %v3177_v4  ;;  %v3186_v54 = vsel %vm1006_vm1, %v1046_v8, %v3177_v4 }
 0x17e   : > { %v707_v10 = vld [vmem:[#allocation2 + $0x21] sm:$0xff]  ;;  %v708_v5 = vld [vmem:[#allocation2 + $0x29] sm:$0x7f]  ;;  %782 = vst.msk [vmem:[#allocation2 + $0x91] sm:$0xff] %vm671_vm2, %v751_v16 }
 0x17f   : > { %v737_v23 = vadd.f32 %v707_v10, %v2770_v35  ;;  %v738_v43 = vadd.f32 %v708_v5, %v2806_v40  ;;  %783 = vst.msk [vmem:[#allocation2 + $0x99] sm:$0x7f] %vm766_vm3, %v752_v57 }
 0x180   : > { %4184 = vst [vmem:[#allocation28_spill] sm:$0xff] %v3186_v54  ;;  %1104 = vrot.lane.b32.xlu1 %v3186_v54, %s2530_s9  ;;  %1106 = vrot.lane.b32.xlu2 %v3177_v4, %s2530_s9 }
 0x181   : > { %768 = vst.msk [vmem:[#allocation2 + $0x21] sm:$0xff] %vm671_vm2, %v737_v23  ;;  %1102 = vrot.lane.b32.xlu0 %v3141_v60, %s2530_s9  ;;  %v3201_v23 = vrot.slane %v2941_v18, 1 }
 0x182   : > { %769 = vst.msk [vmem:[#allocation2 + $0x29] sm:$0x7f] %vm766_vm3, %v738_v43  ;;  %v3195_v10 = vpop.permute.xlu1 %866  ;;  %v634_v5 = vpop.permute.xlu2 %633  ;;  %v1049_v43 = vrot.slane %v2869_v55, 1 }
 0x183   : > { %v3197_v34 = vpop.permute.xlu0 %882  ;;  %701 = vst.msk [vmem:[#allocation2 + $0xe8] sm:$0xff] %vm671_vm2, %v634_v5 }
 0x184   : > { %4185 = vst [vmem:[#allocation29_spill] sm:$0xff] %v3201_v23  ;;  %v3214_v58 = vsel %vm1006_vm1, %v1049_v43, %v3201_v23 }
 0x185   : > { %v812_v29 = vld [vmem:[#allocation2 + $0x90] sm:$0xff] }
 0x186   : > { %v813_v16 = vld [vmem:[#allocation2 + $0x98] sm:$0xff]  ;;  %v932_v57 = vadd.f32 %v2910_v6, %v812_v29 }
 0x187   : > { %v933_v8 = vadd.f32 %v2955_v28, %v813_v16 }
 0x188   : > { %v798_v54 = vld [vmem:[#allocation2 + $0x20] sm:$0xff]  ;;  %962 = vst.msk [vmem:[#allocation2 + $0x90] sm:$0xff] %vm671_vm2, %v932_v57  ;;  %1110 = vrot.lane.b32.xlu1 %v3201_v23, %s2530_s9  ;;  %1234 = vrot.lane.b32.xlu2 %v2712_v24, %s2531_s10 }
 0x189   : > { %v799_v4 = vld [vmem:[#allocation2 + $0x28] sm:$0xff]  ;;  %v918_v60 = vadd.f32 %v3002_v7, %v798_v54  ;;  %963 = vst.msk [vmem:[#allocation2 + $0x98] sm:$0xff] %vm671_vm2, %v933_v8  ;;  %1108 = vrot.lane.b32.xlu0 %v3214_v58, %s2530_s9 }
 0x18a   : > { %v919_v5 = vadd.f32 %v3004_v15, %v799_v4  ;;  %v731_v6 = vld [vmem:[#allocation2 + $0xe1] sm:$0xff]  ;;  %v732_v28 = vld [vmem:[#allocation2 + $0xe9] sm:$0x7f]  ;;  %v602_v7 = vpop.permute.xlu1 %601  ;;  %v3222_v15 = vpop.permute.xlu2 %868 }
 0x18b   : > { %948 = vst.msk [vmem:[#allocation2 + $0x20] sm:$0xff] %vm671_vm2, %v918_v60  ;;  %v761_v4 = vadd.f32 %v731_v6, %v2790_v38  ;;  %v762_v54 = vadd.f32 %v732_v28, %v2833_v46  ;;  %v3227_v43 = vpop.permute.xlu0 %852 }
 0x18c   : > { %949 = vst.msk [vmem:[#allocation2 + $0x28] sm:$0xff] %vm671_vm2, %v919_v5 }
 0x18d   : > { %685 = vst.msk [vmem:[#allocation2 + $0x68] sm:$0xff] %vm671_vm2, %v602_v7 }
 0x18e   : > { %792 = vst.msk [vmem:[#allocation2 + $0xe1] sm:$0xff] %vm671_vm2, %v761_v4 }
 0x18f   : > { %793 = vst.msk [vmem:[#allocation2 + $0xe9] sm:$0x7f] %vm766_vm3, %v762_v54 }
 0x190   : > { %1238 = vrot.lane.b32.xlu1 %v2770_v35, %s2531_s10  ;;  %1240 = vrot.lane.b32.xlu2 %v2806_v40, %s2531_s10 }
 0x191   : > { %1236 = vrot.lane.b32.xlu0 %v2750_v31, %s2531_s10 }
 0x192   : > { %v978_v24 = vld [vmem:[#allocation2 + $0x20] sm:$0xff]  ;;  %v3239_v5 = vpop.permute.xlu1 %836  ;;  %v604_v6 = vpop.permute.xlu2 %603 }
 0x193   : > { %v979_v60 = vld [vmem:[#allocation2 + $0x28] sm:$0x7f]  ;;  %v1144_v29 = vadd.f32 %v3112_v51, %v978_v24  ;;  %v3244_v4 = vpop.permute.xlu0 %1060  ;;  %686 = vst.msk [vmem:[#allocation2 + $0x70] sm:$0xff] %vm671_vm2, %v604_v6  ;;  %v802_v24 = vld [vmem:[#allocation2 + $0x40] sm:$0xff] }
 0x194   : > { %v1145_v16 = vadd.f32 %v3020_v56, %v979_v60  ;;  %v715_v57 = vld [vmem:[#allocation2 + $0x61] sm:$0xff]  ;;  %v716_v8 = vld [vmem:[#allocation2 + $0x69] sm:$0x7f] }
 0x195   : > { %1174 = vst.msk [vmem:[#allocation2 + $0x20] sm:$0xff] %vm671_vm2, %v1144_v29  ;;  %v745_v28 = vadd.f32 %v715_v57, %v2782_v37  ;;  %v746_v7 = vadd.f32 %v716_v8, %v2808_v41  ;;  %v822_v51 = vld [vmem:[#allocation2 + $0xe0] sm:$0xff] }
 0x196   : > { %1175 = vst.msk [vmem:[#allocation2 + $0x28] sm:$0x7f] %vm766_vm3, %v1145_v16  ;;  %v823_v54 = vld [vmem:[#allocation2 + $0xe8] sm:$0xff]  ;;  %v942_v31 = vadd.f32 %v3018_v48, %v822_v51 }
 0x197   : > { %776 = vst.msk [vmem:[#allocation2 + $0x61] sm:$0xff] %vm671_vm2, %v745_v28  ;;  %v943_v56 = vadd.f32 %v3042_v42, %v823_v54 }
 0x198   : > { %777 = vst.msk [vmem:[#allocation2 + $0x69] sm:$0x7f] %vm766_vm3, %v746_v7  ;;  %1244 = vrot.lane.b32.xlu1 %v2898_v1, %s2531_s10  ;;  %1246 = vrot.lane.b32.xlu2 %v2949_v20, %s2531_s10 }
 0x199   : > { %973 = vst.msk [vmem:[#allocation2 + $0xe8] sm:$0xff] %vm671_vm2, %v943_v56  ;;  %1242 = vrot.lane.b32.xlu0 %v2857_v52, %s2531_s10 }
 0x19a   : > { %972 = vst.msk [vmem:[#allocation2 + $0xe0] sm:$0xff] %vm671_vm2, %v942_v31  ;;  %v3260_v48 = vpop.permute.xlu1 %1062  ;;  %v839_v42 = vpop.permute.xlu2 %838 }
 0x19b   : > { %v618_v60 = vpop.permute.xlu0 %617  ;;  %v922_v29 = vadd.f32 %v839_v42, %v802_v24 }
 0x19c   : > { %693 = vst.msk [vmem:[#allocation2 + $0xa8] sm:$0xff] %vm671_vm2, %v618_v60 }
 0x19d   : > { %952 = vst.msk [vmem:[#allocation2 + $0x40] sm:$0xff] %vm671_vm2, %v922_v29 }
 0x19e   : > { %v806_v16 = vld [vmem:[#allocation2 + $0x60] sm:$0xff] }
 0x19f   : > { %v807_v57 = vld [vmem:[#allocation2 + $0x68] sm:$0xff]  ;;  %v926_v8 = vadd.f32 %v3022_v62, %v806_v16 }
 0x1a0   : > { %v927_v6 = vadd.f32 %v3065_v12, %v807_v57  ;;  %1250 = vrot.lane.b32.xlu1 %v2714_v25, %s2531_s10  ;;  %1252 = vrot.lane.b32.xlu2 %v2726_v26, %s2531_s10  ;;  %v811_v62 = vld [vmem:[#allocation2 + $0x88] sm:$0xff]  ;;  %v810_v57 = vld [vmem:[#allocation2 + $0x80] sm:$0xff] }
 0x1a1   : > { %956 = vst.msk [vmem:[#allocation2 + $0x60] sm:$0xff] %vm671_vm2, %v926_v8  ;;  %1248 = vrot.lane.b32.xlu0 %v2975_v17, %s2531_s10 }
 0x1a2   : > { %957 = vst.msk [vmem:[#allocation2 + $0x68] sm:$0xff] %vm671_vm2, %v927_v6  ;;  %v3274_v28 = vpop.permute.xlu1 %884  ;;  %v857_v7 = vpop.permute.xlu2 %856 }
 0x1a3   : > { %v723_v51 = vld [vmem:[#allocation2 + $0xa1] sm:$0xff]  ;;  %v724_v54 = vld [vmem:[#allocation2 + $0xa9] sm:$0x7f]  ;;  %v931_v12 = vadd.f32 %v857_v7, %v811_v62  ;;  %v588_v31 = vpop.permute.xlu0 %587 }
 0x1a4   : > { %v753_v56 = vadd.f32 %v723_v51, %v2798_v39  ;;  %v754_v42 = vadd.f32 %v724_v54, %v2847_v50  ;;  %678 = vst.msk [vmem:[#allocation2 + $0x30] sm:$0xff] %vm671_vm2, %v588_v31 }
 0x1a5   : > { %961 = vst.msk [vmem:[#allocation2 + $0x88] sm:$0xff] %vm671_vm2, %v931_v12 }
 0x1a6   : > { %784 = vst.msk [vmem:[#allocation2 + $0xa1] sm:$0xff] %vm671_vm2, %v753_v56 }
 0x1a7   : > { %785 = vst.msk [vmem:[#allocation2 + $0xa9] sm:$0x7f] %vm766_vm3, %v754_v42  ;;  %v982_v42 = vld [vmem:[#allocation2 + $0x40] sm:$0xff] }
 0x1a8   : > { %v986_v24 = vld [vmem:[#allocation2 + $0x60] sm:$0xff]  ;;  %1256 = vrot.lane.b32.xlu1 %v2808_v41, %s2531_s10  ;;  %1258 = vrot.lane.b32.xlu2 %v2859_v53, %s2531_s10 }
 0x1a9   : > { %v1152_v60 = vadd.f32 %v3070_v14, %v986_v24  ;;  %v987_v29 = vld [vmem:[#allocation2 + $0x68] sm:$0x7f]  ;;  %1254 = vrot.lane.b32.xlu0 %v2782_v37, %s2531_s10 }
 0x1aa   : > { %v1153_v16 = vadd.f32 %v3081_v27, %v987_v29  ;;  %v855_v8 = vpop.permute.xlu1 %854  ;;  %v1083_v6 = vpop.permute.xlu2 %1082 }
 0x1ab   : > { %1182 = vst.msk [vmem:[#allocation2 + $0x60] sm:$0xff] %vm671_vm2, %v1152_v60  ;;  %v930_v14 = vadd.f32 %v855_v8, %v810_v57  ;;  %v636_v62 = vpop.permute.xlu0 %635 }
 0x1ac   : > { %1183 = vst.msk [vmem:[#allocation2 + $0x68] sm:$0x7f] %vm766_vm3, %v1153_v16  ;;  %v991_v7 = vld [vmem:[#allocation2 + $0x88] sm:$0x7f] }
 0x1ad   : > { %702 = vst.msk [vmem:[#allocation2 + $0xf0] sm:$0xff] %vm671_vm2, %v636_v62  ;;  %v814_v51 = vld [vmem:[#allocation2 + $0xa0] sm:$0xff]  ;;  %v1157_v54 = vadd.f32 %v1083_v6, %v991_v7 }
 0x1ae   : > { %960 = vst.msk [vmem:[#allocation2 + $0x80] sm:$0xff] %vm671_vm2, %v930_v14  ;;  %v815_v27 = vld [vmem:[#allocation2 + $0xa8] sm:$0xff]  ;;  %v934_v12 = vadd.f32 %v2973_v9, %v814_v51 }
 0x1af   : > { %v935_v31 = vadd.f32 %v3114_v44, %v815_v27  ;;  %1187 = vst.msk [vmem:[#allocation2 + $0x88] sm:$0x7f] %vm766_vm3, %v1157_v54  ;;  %v818_v44 = vld [vmem:[#allocation2 + $0xc0] sm:$0xff] }
 0x1b0   : > { %964 = vst.msk [vmem:[#allocation2 + $0xa0] sm:$0xff] %vm671_vm2, %v934_v12  ;;  %1262 = vrot.lane.b32.xlu1 %v2926_v13, %s2531_s10  ;;  %1264 = vrot.lane.b32.xlu2 %v2953_v21, %s2531_s10 }
 0x1b1   : > { %965 = vst.msk [vmem:[#allocation2 + $0xa8] sm:$0xff] %vm671_vm2, %v935_v31  ;;  %1260 = vrot.lane.b32.xlu0 %v2896_v0, %s2531_s10 }
 0x1b2   : > { %v620_v56 = vpop.permute.xlu1 %619  ;;  %v1065_v9 = vpop.permute.xlu2 %1064 }
 0x1b3   : > { %694 = vst.msk [vmem:[#allocation2 + $0xb0] sm:$0xff] %vm671_vm2, %v620_v56  ;;  %v871_v24 = vpop.permute.xlu0 %870  ;;  %v1148_v60 = vadd.f32 %v1065_v9, %v982_v42 }
 0x1b4   : > { %v938_v29 = vadd.f32 %v871_v24, %v818_v44 }
 0x1b5   : > { %1178 = vst.msk [vmem:[#allocation2 + $0x40] sm:$0xff] %vm671_vm2, %v1148_v60 }
 0x1b6   : > { %968 = vst.msk [vmem:[#allocation2 + $0xc0] sm:$0xff] %vm671_vm2, %v938_v29  ;;  %v803_v29 = vld [vmem:[#allocation2 + $0x48] sm:$0xff] }
 0x1b8   : > { %1268 = vrot.lane.b32.xlu1 %v2758_v32, %s2531_s10  ;;  %1270 = vrot.lane.b32.xlu2 %v2798_v39, %s2531_s10 }
 0x1b9   : > { %1266 = vrot.lane.b32.xlu0 %v2722_v2, %s2531_s10 }
 0x1ba   : > { %v590_v16 = vpop.permute.xlu1 %589  ;;  %v622_v57 = vpop.permute.xlu2 %621 }
 0x1bb   : > { %v606_v8 = vpop.permute.xlu0 %605  ;;  %679 = vst.msk [vmem:[#allocation2 + $0x38] sm:$0xff] %vm671_vm2, %v590_v16 }
 0x1bc   : > { %687 = vst.msk [vmem:[#allocation2 + $0x78] sm:$0xff] %vm671_vm2, %v606_v8 }
 0x1bd   : > { %695 = vst.msk [vmem:[#allocation2 + $0xb8] sm:$0xff] %vm671_vm2, %v622_v57  ;;  %v990_v57 = vld [vmem:[#allocation2 + $0x80] sm:$0xff] }
 0x1c0   : > { %1274 = vrot.lane.b32.xlu1 %v2882_v59, %s2531_s10  ;;  %1276 = vrot.lane.b32.xlu2 %v2894_v63, %s2531_s10 }
 0x1c1   : > { %1272 = vrot.lane.b32.xlu0 %v2847_v50, %s2531_s10 }
 0x1c2   : > { %v709_v6 = vld [vmem:[#allocation2 + $0x31] sm:$0xff]  ;;  %v710_v14 = vld [vmem:[#allocation2 + $0x39] sm:$0x7f]  ;;  %v1081_v62 = vpop.permute.xlu1 %1080  ;;  %v1089_v7 = vpop.permute.xlu2 %1088 }
 0x1c3   : > { %v717_v51 = vld [vmem:[#allocation2 + $0x71] sm:$0xff]  ;;  %v718_v54 = vld [vmem:[#allocation2 + $0x79] sm:$0x7f]  ;;  %v739_v27 = vadd.f32 %v709_v6, %v2857_v52  ;;  %v841_v12 = vpop.permute.xlu0 %840  ;;  %v740_v42 = vadd.f32 %v710_v14, %v2898_v1  ;;  %v1156_v8 = vadd.f32 %v1081_v62, %v990_v57  ;;  %v994_v6 = vld [vmem:[#allocation2 + $0xa0] sm:$0xff] }
 0x1c4   : > { %v747_v31 = vadd.f32 %v717_v51, %v2859_v53  ;;  %v748_v56 = vadd.f32 %v718_v54, %v2896_v0  ;;  %v725_v9 = vld [vmem:[#allocation2 + $0xb1] sm:$0xff]  ;;  %v726_v44 = vld [vmem:[#allocation2 + $0xb9] sm:$0x7f]  ;;  %v923_v16 = vadd.f32 %v841_v12, %v803_v29  ;;  %v1160_v14 = vadd.f32 %v1089_v7, %v994_v6 }
 0x1c5   : > { %770 = vst.msk [vmem:[#allocation2 + $0x31] sm:$0xff] %vm671_vm2, %v739_v27  ;;  %v755_v24 = vadd.f32 %v725_v9, %v2882_v59  ;;  %v756_v60 = vadd.f32 %v726_v44, %v2894_v63 }
 0x1c6   : > { %778 = vst.msk [vmem:[#allocation2 + $0x71] sm:$0xff] %vm671_vm2, %v747_v31 }
 0x1c7   : > { %779 = vst.msk [vmem:[#allocation2 + $0x79] sm:$0x7f] %vm766_vm3, %v748_v56 }
 0x1c8   : > { %771 = vst.msk [vmem:[#allocation2 + $0x39] sm:$0x7f] %vm766_vm3, %v740_v42  ;;  %1280 = vrot.lane.b32.xlu1 %v2947_v19, %s2531_s10  ;;  %1282 = vrot.lane.b32.xlu2 %v2724_v3, %s2531_s10 }
 0x1c9   : > { %786 = vst.msk [vmem:[#allocation2 + $0xb1] sm:$0xff] %vm671_vm2, %v755_v24  ;;  %1278 = vrot.lane.b32.xlu0 %v2920_v11, %s2531_s10 }
 0x1ca   : > { %787 = vst.msk [vmem:[#allocation2 + $0xb9] sm:$0x7f] %vm766_vm3, %v756_v60  ;;  %v638_v51 = vpop.permute.xlu1 %637  ;;  %v3341_v54 = vpop.permute.xlu2 %1094  ;;  %v819_v60 = vld [vmem:[#allocation2 + $0xc8] sm:$0xff] }
 0x1cb   : > { %953 = vst.msk [vmem:[#allocation2 + $0x48] sm:$0xff] %vm671_vm2, %v923_v16  ;;  %v1067_v62 = vpop.permute.xlu0 %1066  ;;  %v1000_v16 = vld [vmem:[#allocation2 + $0xd0] sm:$0xff] }
 0x1cc   : > { %v800_v27 = vld [vmem:[#allocation2 + $0x30] sm:$0xff]  ;;  %1186 = vst.msk [vmem:[#allocation2 + $0x80] sm:$0xff] %vm671_vm2, %v1156_v8 }
 0x1cd   : > { %v808_v12 = vld [vmem:[#allocation2 + $0x70] sm:$0xff]  ;;  %v920_v31 = vadd.f32 %v3173_v45, %v800_v27  ;;  %1190 = vst.msk [vmem:[#allocation2 + $0xa0] sm:$0xff] %vm671_vm2, %v1160_v14 }
 0x1ce   : > { %v809_v7 = vld [vmem:[#allocation2 + $0x78] sm:$0xff]  ;;  %v928_v56 = vadd.f32 %v3083_v61, %v808_v12  ;;  %703 = vst.msk [vmem:[#allocation2 + $0xf8] sm:$0xff] %vm671_vm2, %v638_v51 }
 0x1cf   : > { %v929_v42 = vadd.f32 %v3227_v43, %v809_v7  ;;  %v801_v9 = vld [vmem:[#allocation2 + $0x38] sm:$0xff]  ;;  %950 = vst.msk [vmem:[#allocation2 + $0x30] sm:$0xff] %vm671_vm2, %v920_v31 }
 0x1d0   : > { %958 = vst.msk [vmem:[#allocation2 + $0x70] sm:$0xff] %vm671_vm2, %v928_v56  ;;  %v921_v44 = vadd.f32 %v3239_v5, %v801_v9  ;;  %1286 = vrot.lane.b32.xlu1 %v2790_v38, %s2531_s10  ;;  %1288 = vrot.lane.b32.xlu2 %v2833_v46, %s2531_s10  ;;  %v816_v45 = vld [vmem:[#allocation2 + $0xb0] sm:$0xff] }
 0x1d1   : > { %959 = vst.msk [vmem:[#allocation2 + $0x78] sm:$0xff] %vm671_vm2, %v929_v42  ;;  %v817_v61 = vld [vmem:[#allocation2 + $0xb8] sm:$0xff]  ;;  %1284 = vrot.lane.b32.xlu0 %v2748_v30, %s2531_s10  ;;  %v936_v43 = vadd.f32 %v3195_v10, %v816_v45 }
 0x1d2   : > { %951 = vst.msk [vmem:[#allocation2 + $0x38] sm:$0xff] %vm671_vm2, %v921_v44  ;;  %v937_v24 = vadd.f32 %v3222_v15, %v817_v61  ;;  %v983_v5 = vld [vmem:[#allocation2 + $0x48] sm:$0x7f]  ;;  %v873_v29 = vpop.permute.xlu1 %872  ;;  %v1101_v57 = vpop.permute.xlu2 %1100 }
 0x1d3   : > { %v1149_v8 = vadd.f32 %v1067_v62, %v983_v5  ;;  %v939_v6 = vadd.f32 %v873_v29, %v819_v60  ;;  %v1079_v14 = vpop.permute.xlu0 %1078  ;;  %v1166_v51 = vadd.f32 %v1101_v57, %v1000_v16  ;;  %966 = vst.msk [vmem:[#allocation2 + $0xb0] sm:$0xff] %vm671_vm2, %v936_v43  ;;  %v1003_v60 = vld [vmem:[#allocation2 + $0xe8] sm:$0x7f] }
 0x1d4   : > { %967 = vst.msk [vmem:[#allocation2 + $0xb8] sm:$0xff] %vm671_vm2, %v937_v24 }
 0x1d5   : > { %v733_v27 = vld [vmem:[#allocation2 + $0xf1] sm:$0xff]  ;;  %v734_v12 = vld [vmem:[#allocation2 + $0xf9] sm:$0x7f]  ;;  %1179 = vst.msk [vmem:[#allocation2 + $0x48] sm:$0x7f] %vm766_vm3, %v1149_v8 }
 0x1d6   : > { %v980_v10 = vld [vmem:[#allocation2 + $0x30] sm:$0xff]  ;;  %v763_v15 = vadd.f32 %v733_v27, %v2869_v55  ;;  %969 = vst.msk [vmem:[#allocation2 + $0xc8] sm:$0xff] %vm671_vm2, %v939_v6  ;;  %v764_v62 = vadd.f32 %v734_v12, %v2941_v18 }
 0x1d7   : > { %v988_v31 = vld [vmem:[#allocation2 + $0x70] sm:$0xff]  ;;  %v1146_v7 = vadd.f32 %v3244_v4, %v980_v10  ;;  %1196 = vst.msk [vmem:[#allocation2 + $0xd0] sm:$0xff] %vm671_vm2, %v1166_v51  ;;  %v993_v4 = vld [vmem:[#allocation2 + $0x98] sm:$0x7f] }
 0x1d8   : > { %v1154_v56 = vadd.f32 %v3168_v49, %v988_v31  ;;  %794 = vst.msk [vmem:[#allocation2 + $0xf1] sm:$0xff] %vm671_vm2, %v763_v15  ;;  %v989_v42 = vld [vmem:[#allocation2 + $0x78] sm:$0x7f]  ;;  %1292 = vrot.lane.b32.xlu1 %v2941_v18, %s2531_s10  ;;  %1294 = vrot.lane.b32.xlu2 %v2984_v47, %s2531_s10  ;;  %v992_v49 = vld [vmem:[#allocation2 + $0x90] sm:$0xff] }
 0x1d9   : > { %1176 = vst.msk [vmem:[#allocation2 + $0x30] sm:$0xff] %vm671_vm2, %v1146_v7  ;;  %v1155_v9 = vadd.f32 %v1079_v14, %v989_v42  ;;  %1290 = vrot.lane.b32.xlu0 %v2869_v55, %s2531_s10  ;;  %v981_v61 = vld [vmem:[#allocation2 + $0x38] sm:$0x7f]  ;;  %v4186_v14 = vld [vmem:[#allocation16_spill] sm:$0xff] }
 0x1da   : > { %1184 = vst.msk [vmem:[#allocation2 + $0x70] sm:$0xff] %vm671_vm2, %v1154_v56  ;;  %v1087_v44 = vpop.permute.xlu1 %1086  ;;  %v1107_v45 = vpop.permute.xlu2 %1106  ;;  %v1147_v8 = vadd.f32 %v3260_v48, %v981_v61  ;;  %v996_v27 = vld [vmem:[#allocation2 + $0xb0] sm:$0xff]  ;;  %v1202_v7 = vld [vmem:[#allocation2 + $0x1] sm:$0xff] }
 0x1db   : > { %795 = vst.msk [vmem:[#allocation2 + $0xf9] sm:$0x7f] %vm766_vm3, %v764_v62  ;;  %v997_v43 = vld [vmem:[#allocation2 + $0xb8] sm:$0x7f]  ;;  %v1159_v24 = vadd.f32 %v1087_v44, %v993_v4  ;;  %v1085_v5 = vpop.permute.xlu0 %1084  ;;  %v1169_v57 = vadd.f32 %v1107_v45, %v1003_v60  ;;  %v4188_v56 = vld [vmem:[#allocation12_spill] sm:$0xff]  ;;  %v998_v45 = vld [vmem:[#allocation2 + $0xc0] sm:$0xff] }
 0x1dc   : > { %v1163_v29 = vadd.f32 %v3341_v54, %v997_v43  ;;  %1185 = vst.msk [vmem:[#allocation2 + $0x78] sm:$0x7f] %vm766_vm3, %v1155_v9  ;;  %v1158_v16 = vadd.f32 %v1085_v5, %v992_v49  ;;  %v1205_v4 = vld [vmem:[#allocation2 + $0x19] sm:$0x7f]  ;;  %v4190_v5 = vld [vmem:[#allocation17_spill] sm:$0xff]  ;;  %v4191_v60 = vld [vmem:[#allocation15_spill] sm:$0xff] }
 0x1dd   : > { %1189 = vst.msk [vmem:[#allocation2 + $0x98] sm:$0x7f] %vm766_vm3, %v1159_v24  ;;  %v999_v42 = vld [vmem:[#allocation2 + $0xc8] sm:$0x7f] }
 0x1de   : > { %1193 = vst.msk [vmem:[#allocation2 + $0xb8] sm:$0x7f] %vm766_vm3, %v1163_v29  ;;  %v4192_v29 = vld [vmem:[#allocation10_spill] sm:$0xff] }
 0x1df   : > { %1188 = vst.msk [vmem:[#allocation2 + $0x90] sm:$0xff] %vm671_vm2, %v1158_v16  ;;  %v824_v6 = vld [vmem:[#allocation2 + $0xf0] sm:$0xff]  ;;  %v1002_v16 = vld [vmem:[#allocation2 + $0xe0] sm:$0xff] }
 0x1e0   : > { %1199 = vst.msk [vmem:[#allocation2 + $0xe8] sm:$0x7f] %vm766_vm3, %v1169_v57  ;;  %1429 = vrot.lane.b32.xlu1 %v2774_v36, %s2532_s11  ;;  %1431 = vrot.lane.b32.xlu2 %v2767_v33, %s2532_s11  ;;  %v944_v54 = vadd.f32 %v3197_v34, %v824_v6  ;;  %v995_v36 = vld [vmem:[#allocation2 + $0xa8] sm:$0x7f]  ;;  %v4187_v34 = vld [vmem:[#allocation7_spill] sm:$0xff] }
 0x1e1   : > { %1296 = vrot.lane.b32.xlu0 %v4186_v14, %s2531_s10  ;;  %1177 = vst.msk [vmem:[#allocation2 + $0x38] sm:$0x7f] %vm766_vm3, %v1147_v8 }
 0x1e2   : > { %v825_v48 = vld [vmem:[#allocation2 + $0xf8] sm:$0xff]  ;;  %v1093_v51 = vpop.permute.xlu1 %1092  ;;  %v1235_v12 = vpop.permute.xlu2 %1234  ;;  %974 = vst.msk [vmem:[#allocation2 + $0xf0] sm:$0xff] %vm671_vm2, %v944_v54 }
 0x1e3   : > { %v945_v10 = vadd.f32 %v3274_v28, %v825_v48  ;;  %v1162_v15 = vadd.f32 %v1093_v51, %v996_v27  ;;  %v1091_v31 = vpop.permute.xlu0 %1090  ;;  %v1330_v62 = vadd.f32 %v1235_v12, %v1202_v7  ;;  %v4189_v28 = vld [vmem:[#allocation8_spill] sm:$0xff]  ;;  %v1001_v48 = vld [vmem:[#allocation2 + $0xd8] sm:$0x7f] }
 0x1e4   : > { %v1161_v33 = vadd.f32 %v1091_v31, %v995_v36  ;;  %v4195_v36 = vld [vmem:[#allocation4_spill] sm:$0xff] }
 0x1e5   : > { %975 = vst.msk [vmem:[#allocation2 + $0xf8] sm:$0xff] %vm671_vm2, %v945_v10  ;;  %v4193_v10 = vld [vmem:[#allocation3_spill] sm:$0xff] }
 0x1e6   : > { %1192 = vst.msk [vmem:[#allocation2 + $0xb0] sm:$0xff] %vm671_vm2, %v1162_v15  ;;  %v4194_v15 = vld [vmem:[#allocation6_spill] sm:$0xff] }
 0x1e7   : > { %1191 = vst.msk [vmem:[#allocation2 + $0xa8] sm:$0x7f] %vm766_vm3, %v1161_v33 }
 0x1e8   : > { %1362 = vst.msk [vmem:[#allocation2 + $0x1] sm:$0xff] %vm671_vm2, %v1330_v62  ;;  %1435 = vrot.lane.b32.xlu1 %v4187_v34, %s2532_s11  ;;  %1437 = vrot.lane.b32.xlu2 %v4188_v56, %s2532_s11  ;;  %v1208_v8 = vld [vmem:[#allocation2 + $0x31] sm:$0xff]  ;;  %v1211_v62 = vld [vmem:[#allocation2 + $0x49] sm:$0x7f] }
 0x1e9   : > { %1433 = vrot.lane.b32.xlu0 %v4189_v28, %s2532_s11 }
 0x1ea   : > { %v1099_v9 = vpop.permute.xlu1 %1098  ;;  %v1241_v44 = vpop.permute.xlu2 %1240 }
 0x1eb   : > { %v1165_v49 = vadd.f32 %v1099_v9, %v999_v42  ;;  %v1097_v61 = vpop.permute.xlu0 %1096  ;;  %v1333_v43 = vadd.f32 %v1241_v44, %v1205_v4  ;;  %v1004_v9 = vld [vmem:[#allocation2 + $0xf0] sm:$0xff] }
 0x1ec   : > { %v1164_v24 = vadd.f32 %v1097_v61, %v998_v45  ;;  %v1005_v31 = vld [vmem:[#allocation2 + $0xf8] sm:$0x7f]  ;;  %v4196_v45 = vld [vmem:[#allocation11_spill] sm:$0xff]  ;;  %v4197_v61 = vld [vmem:[#allocation9_spill] sm:$0xff] }
 0x1ed   : > { %1195 = vst.msk [vmem:[#allocation2 + $0xc8] sm:$0x7f] %vm766_vm3, %v1165_v49 }
 0x1ee   : > { %1194 = vst.msk [vmem:[#allocation2 + $0xc0] sm:$0xff] %vm671_vm2, %v1164_v24  ;;  %v1204_v24 = vld [vmem:[#allocation2 + $0x11] sm:$0xff] }
 0x1ef   : > { %1365 = vst.msk [vmem:[#allocation2 + $0x19] sm:$0x7f] %vm766_vm3, %v1333_v43  ;;  %v4198_v43 = vld [vmem:[#allocation5_spill] sm:$0xff] }
 0x1f0   : > { %1441 = vrot.lane.b32.xlu1 %v4190_v5, %s2532_s11  ;;  %1443 = vrot.lane.b32.xlu2 %v4191_v60, %s2532_s11 }
 0x1f1   : > { %1439 = vrot.lane.b32.xlu0 %v4192_v29, %s2532_s11 }
 0x1f2   : > { %v1105_v57 = vpop.permute.xlu1 %1104  ;;  %v1247_v6 = vpop.permute.xlu2 %1246 }
 0x1f3   : > { %v1168_v54 = vadd.f32 %v1105_v57, %v1002_v16  ;;  %v1103_v51 = vpop.permute.xlu0 %1102  ;;  %v1336_v27 = vadd.f32 %v1247_v6, %v1208_v8  ;;  %v1214_v57 = vld [vmem:[#allocation2 + $0x61] sm:$0xff] }
 0x1f4   : > { %v1167_v12 = vadd.f32 %v1103_v51, %v1001_v48 }
 0x1f5   : > { %1198 = vst.msk [vmem:[#allocation2 + $0xe0] sm:$0xff] %vm671_vm2, %v1168_v54  ;;  %v1203_v54 = vld [vmem:[#allocation2 + $0x9] sm:$0x7f] }
 0x1f6   : > { %1197 = vst.msk [vmem:[#allocation2 + $0xd8] sm:$0x7f] %vm766_vm3, %v1167_v12  ;;  %v4199_v12 = vld [vmem:[#allocation13_spill] sm:$0xff] }
 0x1f7   : > { %1368 = vst.msk [vmem:[#allocation2 + $0x31] sm:$0xff] %vm671_vm2, %v1336_v27 }
 0x1f8   : > { %1447 = vrot.lane.b32.xlu1 %v4193_v10, %s2532_s11  ;;  %1449 = vrot.lane.b32.xlu2 %v4194_v15, %s2532_s11 }
 0x1f9   : > { %1445 = vrot.lane.b32.xlu0 %v4195_v36, %s2532_s11 }
 0x1fa   : > { %v1111_v7 = vpop.permute.xlu1 %1110  ;;  %v1253_v33 = vpop.permute.xlu2 %1252 }
 0x1fb   : > { %v1171_v42 = vadd.f32 %v1111_v7, %v1005_v31  ;;  %v1109_v4 = vpop.permute.xlu0 %1108  ;;  %v1339_v44 = vadd.f32 %v1253_v33, %v1211_v62  ;;  %v4200_v31 = vld [vmem:[#allocation20_spill] sm:$0xff]  ;;  %v4201_v7 = vld [vmem:[#allocation14_spill] sm:$0xff] }
 0x1fc   : > { %v1170_v49 = vadd.f32 %v1109_v4, %v1004_v9  ;;  %v1207_v33 = vld [vmem:[#allocation2 + $0x29] sm:$0x7f] }
 0x1fd   : > { %1201 = vst.msk [vmem:[#allocation2 + $0xf8] sm:$0x7f] %vm766_vm3, %v1171_v42  ;;  %v1217_v42 = vld [vmem:[#allocation2 + $0x79] sm:$0x7f] }
 0x1fe   : > { %1200 = vst.msk [vmem:[#allocation2 + $0xf0] sm:$0xff] %vm671_vm2, %v1170_v49 }
 0x1ff   : > { %1371 = vst.msk [vmem:[#allocation2 + $0x49] sm:$0x7f] %vm766_vm3, %v1339_v44  ;;  %v1206_v44 = vld [vmem:[#allocation2 + $0x21] sm:$0xff] }
 0x200   : > { %1453 = vrot.lane.b32.xlu1 %v4196_v45, %s2532_s11  ;;  %1455 = vrot.lane.b32.xlu2 %v4197_v61, %s2532_s11 }
 0x201   : > { %1451 = vrot.lane.b32.xlu0 %v4198_v43, %s2532_s11 }
 0x202   : > { %v1239_v16 = vpop.permute.xlu1 %1238  ;;  %v1259_v8 = vpop.permute.xlu2 %1258 }
 0x203   : > { %v1332_v6 = vadd.f32 %v1239_v16, %v1204_v24  ;;  %v1237_v48 = vpop.permute.xlu0 %1236  ;;  %v1342_v51 = vadd.f32 %v1259_v8, %v1214_v57  ;;  %v4202_v57 = vld [vmem:[#allocation19_spill] sm:$0xff]  ;;  %v4203_v8 = vld [vmem:[#allocation18_spill] sm:$0xff] }
 0x204   : > { %v1331_v27 = vadd.f32 %v1237_v48, %v1203_v54  ;;  %v1210_v54 = vld [vmem:[#allocation2 + $0x41] sm:$0xff]  ;;  %v1220_v48 = vld [vmem:[#allocation2 + $0x91] sm:$0xff] }
 0x205   : > { %1364 = vst.msk [vmem:[#allocation2 + $0x11] sm:$0xff] %vm671_vm2, %v1332_v6 }
 0x206   : > { %1363 = vst.msk [vmem:[#allocation2 + $0x9] sm:$0x7f] %vm766_vm3, %v1331_v27 }
 0x207   : > { %1374 = vst.msk [vmem:[#allocation2 + $0x61] sm:$0xff] %vm671_vm2, %v1342_v51 }
 0x208   : > { %1459 = vrot.lane.b32.xlu1 %v4199_v12, %s2532_s11  ;;  %1461 = vrot.lane.b32.xlu2 %v4200_v31, %s2532_s11 }
 0x209   : > { %1457 = vrot.lane.b32.xlu0 %v4201_v7, %s2532_s11 }
 0x20a   : > { %v1245_v62 = vpop.permute.xlu1 %1244  ;;  %v1265_v9 = vpop.permute.xlu2 %1264 }
 0x20b   : > { %v1335_v4 = vadd.f32 %v1245_v62, %v1207_v33  ;;  %v1243_v49 = vpop.permute.xlu0 %1242  ;;  %v1345_v24 = vadd.f32 %v1265_v9, %v1217_v42  ;;  %v1209_v33 = vld [vmem:[#allocation2 + $0x39] sm:$0x7f] }
 0x20c   : > { %v1334_v16 = vadd.f32 %v1243_v49, %v1206_v44  ;;  %v4205_v44 = vld [vmem:[#allocation26_spill] sm:$0xff] }
 0x20d   : > { %1367 = vst.msk [vmem:[#allocation2 + $0x29] sm:$0x7f] %vm766_vm3, %v1335_v4  ;;  %v4204_v4 = vld [vmem:[#allocation21_spill] sm:$0xff]  ;;  %v4206_v49 = vld [vmem:[#allocation22_spill] sm:$0xff] }
 0x20e   : > { %1366 = vst.msk [vmem:[#allocation2 + $0x21] sm:$0xff] %vm671_vm2, %v1334_v16 }
 0x20f   : > { %1377 = vst.msk [vmem:[#allocation2 + $0x79] sm:$0x7f] %vm766_vm3, %v1345_v24  ;;  %v1213_v24 = vld [vmem:[#allocation2 + $0x59] sm:$0x7f] }
 0x210   : > { %1465 = vrot.lane.b32.xlu1 %v4202_v57, %s2532_s11  ;;  %1467 = vrot.lane.b32.xlu2 %v3087_v22, %s2532_s11 }
 0x211   : > { %1463 = vrot.lane.b32.xlu0 %v4203_v8, %s2532_s11 }
 0x212   : > { %v1251_v6 = vpop.permute.xlu1 %1250  ;;  %v1271_v51 = vpop.permute.xlu2 %1270 }
 0x213   : > { %v1338_v27 = vadd.f32 %v1251_v6, %v1210_v54  ;;  %v1249_v62 = vpop.permute.xlu0 %1248  ;;  %v1348_v42 = vadd.f32 %v1271_v51, %v1220_v48  ;;  %v1223_v6 = vld [vmem:[#allocation2 + $0xa9] sm:$0x7f]  ;;  %v1212_v51 = vld [vmem:[#allocation2 + $0x51] sm:$0xff] }
 0x214   : > { %v1337_v9 = vadd.f32 %v1249_v62, %v1209_v33 }
 0x215   : > { %1370 = vst.msk [vmem:[#allocation2 + $0x41] sm:$0xff] %vm671_vm2, %v1338_v27 }
 0x216   : > { %1369 = vst.msk [vmem:[#allocation2 + $0x39] sm:$0x7f] %vm766_vm3, %v1337_v9  ;;  %v4208_v9 = vld [vmem:[#allocation23_spill] sm:$0xff] }
 0x217   : > { %1380 = vst.msk [vmem:[#allocation2 + $0x91] sm:$0xff] %vm671_vm2, %v1348_v42  ;;  %v4207_v42 = vld [vmem:[#allocation25_spill] sm:$0xff] }
 0x218   : > { %1471 = vrot.lane.b32.xlu1 %v4204_v4, %s2532_s11  ;;  %1473 = vrot.lane.b32.xlu2 %v4205_v44, %s2532_s11  ;;  %v1226_v44 = vld [vmem:[#allocation2 + $0xc1] sm:$0xff] }
 0x219   : > { %1469 = vrot.lane.b32.xlu0 %v4206_v49, %s2532_s11  ;;  %v4209_v49 = vld [vmem:[#allocation24_spill] sm:$0xff] }
 0x21a   : > { %v1257_v16 = vpop.permute.xlu1 %1256  ;;  %v1277_v54 = vpop.permute.xlu2 %1276 }
 0x21b   : > { %v1341_v48 = vadd.f32 %v1257_v16, %v1213_v24  ;;  %v1255_v27 = vpop.permute.xlu0 %1254  ;;  %v1351_v33 = vadd.f32 %v1277_v54, %v1223_v6  ;;  %v1216_v16 = vld [vmem:[#allocation2 + $0x71] sm:$0xff] }
 0x21c   : > { %v1340_v62 = vadd.f32 %v1255_v27, %v1212_v51  ;;  %v1215_v51 = vld [vmem:[#allocation2 + $0x69] sm:$0x7f] }
 0x21d   : > { %1373 = vst.msk [vmem:[#allocation2 + $0x59] sm:$0x7f] %vm766_vm3, %v1341_v48 }
 0x21e   : > { %1372 = vst.msk [vmem:[#allocation2 + $0x51] sm:$0xff] %vm671_vm2, %v1340_v62 }
 0x21f   : > { %1383 = vst.msk [vmem:[#allocation2 + $0xa9] sm:$0x7f] %vm766_vm3, %v1351_v33  ;;  %v4210_v33 = vld [vmem:[#allocation27_spill] sm:$0xff] }
 0x220   : > { %1477 = vrot.lane.b32.xlu1 %v4207_v42, %s2532_s11  ;;  %1479 = vrot.lane.b32.xlu2 %v4208_v9, %s2532_s11  ;;  %v1229_v9 = vld [vmem:[#allocation2 + $0xd9] sm:$0x7f] }
 0x221   : > { %1475 = vrot.lane.b32.xlu0 %v4209_v49, %s2532_s11  ;;  %v4211_v49 = vld [vmem:[#allocation28_spill] sm:$0xff] }
 0x222   : > { %v1263_v24 = vpop.permute.xlu1 %1262  ;;  %v1283_v6 = vpop.permute.xlu2 %1282 }
 0x223   : > { %v1344_v54 = vadd.f32 %v1263_v24, %v1216_v16  ;;  %v1261_v48 = vpop.permute.xlu0 %1260  ;;  %v1354_v27 = vadd.f32 %v1283_v6, %v1226_v44  ;;  %v1219_v24 = vld [vmem:[#allocation2 + $0x89] sm:$0x7f]  ;;  %v3482_v6 = vrot.slane %v4186_v14, 1 }
 0x224   : > { %v1343_v62 = vadd.f32 %v1261_v48, %v1215_v51  ;;  %v1218_v51 = vld [vmem:[#allocation2 + $0x81] sm:$0xff] }
 0x225   : > { %1376 = vst.msk [vmem:[#allocation2 + $0x71] sm:$0xff] %vm671_vm2, %v1344_v54 }
 0x226   : > { %1375 = vst.msk [vmem:[#allocation2 + $0x69] sm:$0x7f] %vm766_vm3, %v1343_v62  ;;  %v1426_v62 = vrot.slane %v2984_v47, 1 }
 0x227   : > { %1386 = vst.msk [vmem:[#allocation2 + $0xc1] sm:$0xff] %vm671_vm2, %v1354_v27 }
 0x228   : > { %1483 = vrot.lane.b32.xlu1 %v4210_v33, %s2532_s11  ;;  %1485 = vrot.lane.b32.xlu2 %v3214_v58, %s2532_s11 }
 0x229   : > { %1481 = vrot.lane.b32.xlu0 %v4211_v49, %s2532_s11  ;;  %v3490_v49 = vsel %vm1006_vm1, %v1426_v62, %v3482_v6 }
 0x22a   : > { %v1269_v16 = vpop.permute.xlu1 %1268  ;;  %v1289_v44 = vpop.permute.xlu2 %1288 }
 0x22b   : > { %v1347_v54 = vadd.f32 %v1269_v16, %v1219_v24  ;;  %v1267_v48 = vpop.permute.xlu0 %1266  ;;  %v1357_v27 = vadd.f32 %v1289_v44, %v1229_v9  ;;  %v1222_v24 = vld [vmem:[#allocation2 + $0xa1] sm:$0xff]  ;;  %v1232_v16 = vld [vmem:[#allocation2 + $0xf1] sm:$0xff] }
 0x22c   : > { %v1346_v33 = vadd.f32 %v1267_v48, %v1218_v51 }
 0x22d   : > { %1379 = vst.msk [vmem:[#allocation2 + $0x89] sm:$0x7f] %vm766_vm3, %v1347_v54  ;;  %v1221_v54 = vld [vmem:[#allocation2 + $0x99] sm:$0x7f] }
 0x22e   : > { %1378 = vst.msk [vmem:[#allocation2 + $0x81] sm:$0xff] %vm671_vm2, %v1346_v33 }
 0x22f   : > { %1389 = vst.msk [vmem:[#allocation2 + $0xd9] sm:$0x7f] %vm766_vm3, %v1357_v27 }
 0x230   : > { %1489 = vrot.lane.b32.xlu1 %v3490_v49, %s2532_s11  ;;  %1491 = vrot.lane.b32.xlu2 %v3482_v6, %s2532_s11 }
 0x231   : > { %1487 = vrot.lane.b32.xlu0 %v3201_v23, %s2532_s11  ;;  %v1403_v23 = vld [vmem:[#allocation2 + $0x48] sm:$0x7f] }
 0x232   : > { %v1275_v9 = vpop.permute.xlu1 %1274  ;;  %v1295_v44 = vpop.permute.xlu2 %1294 }
 0x233   : > { %v1350_v33 = vadd.f32 %v1275_v9, %v1222_v24  ;;  %v1273_v51 = vpop.permute.xlu0 %1272  ;;  %v1360_v48 = vadd.f32 %v1295_v44, %v1232_v16  ;;  %v1225_v9 = vld [vmem:[#allocation2 + $0xb9] sm:$0x7f]  ;;  %v1395_v24 = vld [vmem:[#allocation2 + $0x8] sm:$0x7f] }
 0x234   : > { %v1349_v27 = vadd.f32 %v1273_v51, %v1221_v54  ;;  %v1224_v54 = vld [vmem:[#allocation2 + $0xb1] sm:$0xff] }
 0x235   : > { %1382 = vst.msk [vmem:[#allocation2 + $0xa1] sm:$0xff] %vm671_vm2, %v1350_v33 }
 0x236   : > { %1381 = vst.msk [vmem:[#allocation2 + $0x99] sm:$0x7f] %vm766_vm3, %v1349_v27 }
 0x237   : > { %1392 = vst.msk [vmem:[#allocation2 + $0xf1] sm:$0xff] %vm671_vm2, %v1360_v48 }
 0x238   : > { %1621 = vrot.lane.b32.xlu1 %v2806_v40, %s2533_s12  ;;  %1623 = vrot.lane.b32.xlu2 %v2857_v52, %s2533_s12 }
 0x239   : > { %1619 = vrot.lane.b32.xlu0 %v2770_v35, %s2533_s12 }
 0x23a   : > { %v1281_v62 = vpop.permute.xlu1 %1280  ;;  %v1432_v16 = vpop.permute.xlu2 %1431 }
 0x23b   : > { %v1353_v44 = vadd.f32 %v1281_v62, %v1225_v9  ;;  %v1279_v33 = vpop.permute.xlu0 %1278  ;;  %v1526_v51 = vadd.f32 %v1432_v16, %v1395_v24  ;;  %v1228_v62 = vld [vmem:[#allocation2 + $0xd1] sm:$0xff]  ;;  %v1398_v9 = vld [vmem:[#allocation2 + $0x20] sm:$0xff] }
 0x23c   : > { %v1352_v27 = vadd.f32 %v1279_v33, %v1224_v54  ;;  %v1227_v33 = vld [vmem:[#allocation2 + $0xc9] sm:$0x7f] }
 0x23d   : > { %1385 = vst.msk [vmem:[#allocation2 + $0xb9] sm:$0x7f] %vm766_vm3, %v1353_v44 }
 0x23e   : > { %1384 = vst.msk [vmem:[#allocation2 + $0xb1] sm:$0xff] %vm671_vm2, %v1352_v27 }
 0x23f   : > { %1558 = vst.msk [vmem:[#allocation2 + $0x8] sm:$0x7f] %vm766_vm3, %v1526_v51 }
 0x240   : > { %1627 = vrot.lane.b32.xlu1 %v2949_v20, %s2533_s12  ;;  %1629 = vrot.lane.b32.xlu2 %v2975_v17, %s2533_s12 }
 0x241   : > { %1625 = vrot.lane.b32.xlu0 %v2898_v1, %s2533_s12 }
 0x242   : > { %v1287_v48 = vpop.permute.xlu1 %1286  ;;  %v1438_v24 = vpop.permute.xlu2 %1437 }
 0x243   : > { %v1356_v16 = vadd.f32 %v1287_v48, %v1228_v62  ;;  %v1285_v44 = vpop.permute.xlu0 %1284  ;;  %v1529_v54 = vadd.f32 %v1438_v24, %v1398_v9  ;;  %v1231_v48 = vld [vmem:[#allocation2 + $0xe9] sm:$0x7f]  ;;  %v1401_v62 = vld [vmem:[#allocation2 + $0x38] sm:$0x7f] }
 0x244   : > { %v1355_v27 = vadd.f32 %v1285_v44, %v1227_v33 }
 0x245   : > { %1388 = vst.msk [vmem:[#allocation2 + $0xd1] sm:$0xff] %vm671_vm2, %v1356_v16  ;;  %v1230_v16 = vld [vmem:[#allocation2 + $0xe1] sm:$0xff] }
 0x246   : > { %1387 = vst.msk [vmem:[#allocation2 + $0xc9] sm:$0x7f] %vm766_vm3, %v1355_v27 }
 0x247   : > { %1561 = vst.msk [vmem:[#allocation2 + $0x20] sm:$0xff] %vm671_vm2, %v1529_v54 }
 0x248   : > { %1633 = vrot.lane.b32.xlu1 %v2726_v26, %s2533_s12  ;;  %1635 = vrot.lane.b32.xlu2 %v2782_v37, %s2533_s12 }
 0x249   : > { %1631 = vrot.lane.b32.xlu0 %v2714_v25, %s2533_s12 }
 0x24a   : > { %v1293_v51 = vpop.permute.xlu1 %1292  ;;  %v1444_v9 = vpop.permute.xlu2 %1443 }
 0x24b   : > { %v1359_v24 = vadd.f32 %v1293_v51, %v1231_v48  ;;  %v1291_v33 = vpop.permute.xlu0 %1290  ;;  %v1532_v44 = vadd.f32 %v1444_v9, %v1401_v62  ;;  %v1394_v51 = vld [vmem:[#allocation2] sm:$0xff]  ;;  %v1404_v48 = vld [vmem:[#allocation2 + $0x50] sm:$0xff] }
 0x24c   : > { %v1358_v27 = vadd.f32 %v1291_v33, %v1230_v16  ;;  %v1233_v33 = vld [vmem:[#allocation2 + $0xf9] sm:$0x7f] }
 0x24d   : > { %1391 = vst.msk [vmem:[#allocation2 + $0xe9] sm:$0x7f] %vm766_vm3, %v1359_v24 }
 0x24e   : > { %1390 = vst.msk [vmem:[#allocation2 + $0xe1] sm:$0xff] %vm671_vm2, %v1358_v27 }
 0x24f   : > { %1564 = vst.msk [vmem:[#allocation2 + $0x38] sm:$0x7f] %vm766_vm3, %v1532_v44 }
 0x250   : > { %1639 = vrot.lane.b32.xlu1 %v2859_v53, %s2533_s12  ;;  %1641 = vrot.lane.b32.xlu2 %v2896_v0, %s2533_s12 }
 0x251   : > { %1637 = vrot.lane.b32.xlu0 %v2808_v41, %s2533_s12 }
 0x252   : > { %v1430_v54 = vpop.permute.xlu1 %1429  ;;  %v1450_v62 = vpop.permute.xlu2 %1449 }
 0x253   : > { %v1525_v9 = vadd.f32 %v1430_v54, %v1394_v51  ;;  %v1297_v24 = vpop.permute.xlu0 %1296  ;;  %v1535_v16 = vadd.f32 %v1450_v62, %v1404_v48  ;;  %v1397_v54 = vld [vmem:[#allocation2 + $0x18] sm:$0x7f]  ;;  %v1407_v51 = vld [vmem:[#allocation2 + $0x68] sm:$0x7f] }
 0x254   : > { %v1361_v27 = vadd.f32 %v1297_v24, %v1233_v33  ;;  %v1396_v33 = vld [vmem:[#allocation2 + $0x10] sm:$0xff] }
 0x255   : > { %1557 = vst.msk [vmem:[#allocation2] sm:$0xff] %vm671_vm2, %v1525_v9 }
 0x256   : > { %1393 = vst.msk [vmem:[#allocation2 + $0xf9] sm:$0x7f] %vm766_vm3, %v1361_v27 }
 0x257   : > { %1567 = vst.msk [vmem:[#allocation2 + $0x50] sm:$0xff] %vm671_vm2, %v1535_v16 }
 0x258   : > { %1645 = vrot.lane.b32.xlu1 %v2953_v21, %s2533_s12  ;;  %1647 = vrot.lane.b32.xlu2 %v2722_v2, %s2533_s12 }
 0x259   : > { %1643 = vrot.lane.b32.xlu0 %v2926_v13, %s2533_s12 }
 0x25a   : > { %v1436_v44 = vpop.permute.xlu1 %1435  ;;  %v1456_v48 = vpop.permute.xlu2 %1455 }
 0x25b   : > { %v1528_v62 = vadd.f32 %v1436_v44, %v1397_v54  ;;  %v1434_v9 = vpop.permute.xlu0 %1433  ;;  %v1538_v24 = vadd.f32 %v1456_v48, %v1407_v51  ;;  %v1400_v44 = vld [vmem:[#allocation2 + $0x30] sm:$0xff]  ;;  %v1410_v54 = vld [vmem:[#allocation2 + $0x80] sm:$0xff]  ;;  %v1399_v48 = vld [vmem:[#allocation2 + $0x28] sm:$0x7f] }
 0x25c   : > { %v1527_v27 = vadd.f32 %v1434_v9, %v1396_v33 }
 0x25d   : > { %1560 = vst.msk [vmem:[#allocation2 + $0x18] sm:$0x7f] %vm766_vm3, %v1528_v62 }
 0x25e   : > { %1559 = vst.msk [vmem:[#allocation2 + $0x10] sm:$0xff] %vm671_vm2, %v1527_v27 }
 0x25f   : > { %1570 = vst.msk [vmem:[#allocation2 + $0x68] sm:$0x7f] %vm766_vm3, %v1538_v24 }
 0x260   : > { %1651 = vrot.lane.b32.xlu1 %v2798_v39, %s2533_s12  ;;  %1653 = vrot.lane.b32.xlu2 %v2847_v50, %s2533_s12 }
 0x261   : > { %1649 = vrot.lane.b32.xlu0 %v2758_v32, %s2533_s12 }
 0x262   : > { %v1442_v16 = vpop.permute.xlu1 %1441  ;;  %v1462_v51 = vpop.permute.xlu2 %1461 }
 0x263   : > { %v1440_v33 = vpop.permute.xlu0 %1439  ;;  %v1531_v62 = vadd.f32 %v1442_v16, %v1400_v44  ;;  %v1541_v9 = vadd.f32 %v1462_v51, %v1410_v54  ;;  %v1413_v16 = vld [vmem:[#allocation2 + $0x98] sm:$0x7f]  ;;  %v1402_v51 = vld [vmem:[#allocation2 + $0x40] sm:$0xff] }
 0x264   : > { %v1530_v27 = vadd.f32 %v1440_v33, %v1399_v48 }
 0x265   : > { %1563 = vst.msk [vmem:[#allocation2 + $0x30] sm:$0xff] %vm671_vm2, %v1531_v62 }
 0x266   : > { %1562 = vst.msk [vmem:[#allocation2 + $0x28] sm:$0x7f] %vm766_vm3, %v1530_v27  ;;  %v1406_v27 = vld [vmem:[#allocation2 + $0x60] sm:$0xff] }
 0x267   : > { %1573 = vst.msk [vmem:[#allocation2 + $0x80] sm:$0xff] %vm671_vm2, %v1541_v9 }
 0x268   : > { %1657 = vrot.lane.b32.xlu1 %v2894_v63, %s2533_s12  ;;  %1659 = vrot.lane.b32.xlu2 %v2920_v11, %s2533_s12 }
 0x269   : > { %1655 = vrot.lane.b32.xlu0 %v2882_v59, %s2533_s12 }
 0x26a   : > { %v1448_v24 = vpop.permute.xlu1 %1447  ;;  %v1468_v44 = vpop.permute.xlu2 %1467 }
 0x26b   : > { %v1446_v54 = vpop.permute.xlu0 %1445  ;;  %v1534_v48 = vadd.f32 %v1448_v24, %v1403_v23  ;;  %v1544_v33 = vadd.f32 %v1468_v44, %v1413_v16  ;;  %v1416_v23 = vld [vmem:[#allocation2 + $0xb0] sm:$0xff]  ;;  %v1405_v16 = vld [vmem:[#allocation2 + $0x58] sm:$0x7f] }
 0x26c   : > { %v1533_v62 = vadd.f32 %v1446_v54, %v1402_v51 }
 0x26d   : > { %1566 = vst.msk [vmem:[#allocation2 + $0x48] sm:$0x7f] %vm766_vm3, %v1534_v48 }
 0x26e   : > { %1565 = vst.msk [vmem:[#allocation2 + $0x40] sm:$0xff] %vm671_vm2, %v1533_v62  ;;  %v1409_v62 = vld [vmem:[#allocation2 + $0x78] sm:$0x7f] }
 0x26f   : > { %1576 = vst.msk [vmem:[#allocation2 + $0x98] sm:$0x7f] %vm766_vm3, %v1544_v33 }
 0x270   : > { %1663 = vrot.lane.b32.xlu1 %v2724_v3, %s2533_s12  ;;  %1665 = vrot.lane.b32.xlu2 %v2748_v30, %s2533_s12 }
 0x271   : > { %1661 = vrot.lane.b32.xlu0 %v2947_v19, %s2533_s12 }
 0x272   : > { %v1454_v9 = vpop.permute.xlu1 %1453  ;;  %v1474_v24 = vpop.permute.xlu2 %1473 }
 0x273   : > { %v1452_v44 = vpop.permute.xlu0 %1451  ;;  %v1537_v54 = vadd.f32 %v1454_v9, %v1406_v27  ;;  %v1547_v51 = vadd.f32 %v1474_v24, %v1416_v23  ;;  %v1419_v9 = vld [vmem:[#allocation2 + $0xc8] sm:$0x7f]  ;;  %v1408_v23 = vld [vmem:[#allocation2 + $0x70] sm:$0xff] }
 0x274   : > { %v1536_v48 = vadd.f32 %v1452_v44, %v1405_v16 }
 0x275   : > { %1569 = vst.msk [vmem:[#allocation2 + $0x60] sm:$0xff] %vm671_vm2, %v1537_v54 }
 0x276   : > { %1568 = vst.msk [vmem:[#allocation2 + $0x58] sm:$0x7f] %vm766_vm3, %v1536_v48  ;;  %v1412_v48 = vld [vmem:[#allocation2 + $0x90] sm:$0xff] }
 0x277   : > { %1579 = vst.msk [vmem:[#allocation2 + $0xb0] sm:$0xff] %vm671_vm2, %v1547_v51 }
 0x278   : > { %1669 = vrot.lane.b32.xlu1 %v2833_v46, %s2533_s12  ;;  %1671 = vrot.lane.b32.xlu2 %v2869_v55, %s2533_s12 }
 0x279   : > { %1667 = vrot.lane.b32.xlu0 %v2790_v38, %s2533_s12 }
 0x27a   : > { %v1460_v33 = vpop.permute.xlu1 %1459  ;;  %v1480_v27 = vpop.permute.xlu2 %1479 }
 0x27b   : > { %v1458_v24 = vpop.permute.xlu0 %1457  ;;  %v1540_v16 = vadd.f32 %v1460_v33, %v1409_v62  ;;  %v1550_v44 = vadd.f32 %v1480_v27, %v1419_v9  ;;  %v1422_v33 = vld [vmem:[#allocation2 + $0xe0] sm:$0xff]  ;;  %v1411_v9 = vld [vmem:[#allocation2 + $0x88] sm:$0x7f] }
 0x27c   : > { %v1539_v54 = vadd.f32 %v1458_v24, %v1408_v23 }
 0x27d   : > { %1572 = vst.msk [vmem:[#allocation2 + $0x78] sm:$0x7f] %vm766_vm3, %v1540_v16 }
 0x27e   : > { %1571 = vst.msk [vmem:[#allocation2 + $0x70] sm:$0xff] %vm671_vm2, %v1539_v54  ;;  %v1415_v54 = vld [vmem:[#allocation2 + $0xa8] sm:$0x7f] }
 0x27f   : > { %1582 = vst.msk [vmem:[#allocation2 + $0xc8] sm:$0x7f] %vm766_vm3, %v1550_v44 }
 0x280   : > { %1675 = vrot.lane.b32.xlu1 %v2984_v47, %s2533_s12  ;;  %1677 = vrot.lane.b32.xlu2 %v4186_v14, %s2533_s12 }
 0x281   : > { %1673 = vrot.lane.b32.xlu0 %v2941_v18, %s2533_s12 }
 0x282   : > { %v1466_v51 = vpop.permute.xlu1 %1465  ;;  %v1486_v62 = vpop.permute.xlu2 %1485 }
 0x283   : > { %v1464_v27 = vpop.permute.xlu0 %1463  ;;  %v1543_v23 = vadd.f32 %v1466_v51, %v1412_v48  ;;  %v1553_v24 = vadd.f32 %v1486_v62, %v1422_v33  ;;  %v1425_v51 = vld [vmem:[#allocation2 + $0xf8] sm:$0x7f]  ;;  %v1414_v62 = vld [vmem:[#allocation2 + $0xa0] sm:$0xff] }
 0x284   : > { %v1542_v16 = vadd.f32 %v1464_v27, %v1411_v9 }
 0x285   : > { %1575 = vst.msk [vmem:[#allocation2 + $0x90] sm:$0xff] %vm671_vm2, %v1543_v23 }
 0x286   : > { %1574 = vst.msk [vmem:[#allocation2 + $0x88] sm:$0x7f] %vm766_vm3, %v1542_v16  ;;  %v1417_v16 = vld [vmem:[#allocation2 + $0xb8] sm:$0x7f] }
 0x287   : > { %1585 = vst.msk [vmem:[#allocation2 + $0xe0] sm:$0xff] %vm671_vm2, %v1553_v24 }
 0x288   : > { %1801 = vrot.lane.b32.xlu1 %v2806_v40, %s2534_s13  ;;  %1803 = vrot.lane.b32.xlu2 %v2857_v52, %s2534_s13  ;;  %v1418_v40 = vld [vmem:[#allocation2 + $0xc0] sm:$0xff] }
 0x289   : > { %1799 = vrot.lane.b32.xlu0 %v2770_v35, %s2534_s13 }
 0x28a   : > { %v1472_v44 = vpop.permute.xlu1 %1471  ;;  %v1492_v48 = vpop.permute.xlu2 %1491 }
 0x28b   : > { %v1470_v33 = vpop.permute.xlu0 %1469  ;;  %v1546_v9 = vadd.f32 %v1472_v44, %v1415_v54  ;;  %v1556_v27 = vadd.f32 %v1492_v48, %v1425_v51  ;;  %v1591_v54 = vld [vmem:[#allocation2 + $0x11] sm:$0xff] }
 0x28c   : > { %v1545_v23 = vadd.f32 %v1470_v33, %v1414_v62  ;;  %v1421_v48 = vld [vmem:[#allocation2 + $0xd8] sm:$0x7f]  ;;  %v1594_v33 = vld [vmem:[#allocation2 + $0x29] sm:$0x7f] }
 0x28d   : > { %1578 = vst.msk [vmem:[#allocation2 + $0xa8] sm:$0x7f] %vm766_vm3, %v1546_v9 }
 0x28e   : > { %1577 = vst.msk [vmem:[#allocation2 + $0xa0] sm:$0xff] %vm671_vm2, %v1545_v23 }
 0x28f   : > { %1588 = vst.msk [vmem:[#allocation2 + $0xf8] sm:$0x7f] %vm766_vm3, %v1556_v27  ;;  %v1420_v27 = vld [vmem:[#allocation2 + $0xd0] sm:$0xff] }
 0x290   : > { %1807 = vrot.lane.b32.xlu1 %v2949_v20, %s2534_s13  ;;  %1809 = vrot.lane.b32.xlu2 %v2975_v17, %s2534_s13 }
 0x291   : > { %1805 = vrot.lane.b32.xlu0 %v2898_v1, %s2534_s13 }
 0x292   : > { %v1478_v35 = vpop.permute.xlu1 %1477  ;;  %v1624_v52 = vpop.permute.xlu2 %1623 }
 0x293   : > { %v1476_v24 = vpop.permute.xlu0 %1475  ;;  %v1549_v44 = vadd.f32 %v1478_v35, %v1418_v40  ;;  %v1711_v51 = vadd.f32 %v1624_v52, %v1591_v54  ;;  %v1597_v52 = vld [vmem:[#allocation2 + $0x41] sm:$0xff] }
 0x294   : > { %v1548_v20 = vadd.f32 %v1476_v24, %v1417_v16  ;;  %v1423_v16 = vld [vmem:[#allocation2 + $0xe8] sm:$0x7f] }
 0x295   : > { %1581 = vst.msk [vmem:[#allocation2 + $0xc0] sm:$0xff] %vm671_vm2, %v1549_v44 }
 0x296   : > { %v3614_v17 = vld [vmem:[#allocation2 + $0xf8] sm:$0xff]  ;;  %1580 = vst.msk [vmem:[#allocation2 + $0xb8] sm:$0x7f] %vm766_vm3, %v1548_v20 }
 0x297   : > { %2192 = vst.msk [vmem:[%s3611_s16 + $0xf8] sm:$0xff] %vm671_vm2, %v3614_v17 }
 0x298   : > { %1741 = vst.msk [vmem:[#allocation2 + $0x11] sm:$0xff] %vm671_vm2, %v1711_v51  ;;  %1813 = vrot.lane.b32.xlu1 %v2726_v26, %s2534_s13  ;;  %1815 = vrot.lane.b32.xlu2 %v2782_v37, %s2534_s13  ;;  %v1424_v26 = vld [vmem:[#allocation2 + $0xf0] sm:$0xff] }
 0x299   : > { %1811 = vrot.lane.b32.xlu0 %v2714_v25, %s2534_s13 }
 0x29a   : > { %v1484_v1 = vpop.permute.xlu1 %1483  ;;  %v1630_v62 = vpop.permute.xlu2 %1629 }
 0x29b   : > { %v1482_v9 = vpop.permute.xlu0 %1481  ;;  %v1552_v23 = vadd.f32 %v1484_v1, %v1421_v48  ;;  %v1714_v35 = vadd.f32 %v1630_v62, %v1594_v33  ;;  %v1589_v1 = vld [vmem:[#allocation2 + $0x1] sm:$0xff]  ;;  %v1600_v33 = vld [vmem:[#allocation2 + $0x59] sm:$0x7f] }
 0x29c   : > { %v1551_v40 = vadd.f32 %v1482_v9, %v1420_v27 }
 0x29d   : > { %1584 = vst.msk [vmem:[#allocation2 + $0xd8] sm:$0x7f] %vm766_vm3, %v1552_v23 }
 0x29e   : > { %1583 = vst.msk [vmem:[#allocation2 + $0xd0] sm:$0xff] %vm671_vm2, %v1551_v40  ;;  %v1592_v40 = vld [vmem:[#allocation2 + $0x19] sm:$0x7f] }
 0x29f   : > { %1744 = vst.msk [vmem:[#allocation2 + $0x29] sm:$0x7f] %vm766_vm3, %v1714_v35 }
 0x2a0   : > { %1819 = vrot.lane.b32.xlu1 %v2859_v53, %s2534_s13  ;;  %1821 = vrot.lane.b32.xlu2 %v2896_v0, %s2534_s13  ;;  %v1590_v53 = vld [vmem:[#allocation2 + $0x9] sm:$0x7f] }
 0x2a1   : > { %1817 = vrot.lane.b32.xlu0 %v2808_v41, %s2534_s13 }
 0x2a2   : > { %v1490_v25 = vpop.permute.xlu1 %1489  ;;  %v1636_v37 = vpop.permute.xlu2 %1635 }
 0x2a3   : > { %v1488_v24 = vpop.permute.xlu0 %1487  ;;  %v1555_v44 = vadd.f32 %v1490_v25, %v1424_v26  ;;  %v1717_v54 = vadd.f32 %v1636_v37, %v1597_v52 }
 0x2a4   : > { %v1554_v20 = vadd.f32 %v1488_v24, %v1423_v16  ;;  %v1595_v16 = vld [vmem:[#allocation2 + $0x31] sm:$0xff] }
 0x2a5   : > { %1587 = vst.msk [vmem:[#allocation2 + $0xf0] sm:$0xff] %vm671_vm2, %v1555_v44 }
 0x2a6   : > { %1586 = vst.msk [vmem:[#allocation2 + $0xe8] sm:$0x7f] %vm766_vm3, %v1554_v20 }
 0x2a7   : > { %1747 = vst.msk [vmem:[#allocation2 + $0x41] sm:$0xff] %vm671_vm2, %v1717_v54 }
 0x2a8   : > { %1825 = vrot.lane.b32.xlu1 %v2953_v21, %s2534_s13  ;;  %1827 = vrot.lane.b32.xlu2 %v2722_v2, %s2534_s13  ;;  %v1603_v21 = vld [vmem:[#allocation2 + $0x71] sm:$0xff] }
 0x2a9   : > { %1823 = vrot.lane.b32.xlu0 %v2926_v13, %s2534_s13  ;;  %v1593_v13 = vld [vmem:[#allocation2 + $0x21] sm:$0xff] }
 0x2aa   : > { %v1622_v41 = vpop.permute.xlu1 %1621  ;;  %v1642_v0 = vpop.permute.xlu2 %1641 }
 0x2ab   : > { %v1620_v51 = vpop.permute.xlu0 %1619  ;;  %v1710_v48 = vadd.f32 %v1622_v41, %v1590_v53  ;;  %v1720_v27 = vadd.f32 %v1642_v0, %v1600_v33  ;;  %v1598_v0 = vld [vmem:[#allocation2 + $0x49] sm:$0x7f] }
 0x2ac   : > { %v3645_v62 = vld [vmem:[#allocation2 + $0xf0] sm:$0xff]  ;;  %v1709_v9 = vadd.f32 %v1620_v51, %v1589_v1 }
 0x2ad   : > { %2191 = vst.msk [vmem:[%s3611_s16 + $0xf0] sm:$0xff] %vm671_vm2, %v3645_v62 }
 0x2ae   : > { %1739 = vst.msk [vmem:[#allocation2 + $0x1] sm:$0xff] %vm671_vm2, %v1709_v9 }
 0x2af   : > { %1740 = vst.msk [vmem:[#allocation2 + $0x9] sm:$0x7f] %vm766_vm3, %v1710_v48 }
 0x2b0   : > { %1750 = vst.msk [vmem:[#allocation2 + $0x59] sm:$0x7f] %vm766_vm3, %v1720_v27  ;;  %1831 = vrot.lane.b32.xlu1 %v2798_v39, %s2534_s13  ;;  %1833 = vrot.lane.b32.xlu2 %v2847_v50, %s2534_s13  ;;  %v1596_v39 = vld [vmem:[#allocation2 + $0x39] sm:$0x7f]  ;;  %v1606_v50 = vld [vmem:[#allocation2 + $0x89] sm:$0x7f] }
 0x2b1   : > { %1829 = vrot.lane.b32.xlu0 %v2758_v32, %s2534_s13  ;;  %v1601_v27 = vld [vmem:[#allocation2 + $0x61] sm:$0xff] }
 0x2b2   : > { %v1628_v2 = vpop.permute.xlu1 %1627  ;;  %v1648_v23 = vpop.permute.xlu2 %1647 }
 0x2b3   : > { %v1626_v35 = vpop.permute.xlu0 %1625  ;;  %v1713_v25 = vadd.f32 %v1628_v2, %v1593_v13  ;;  %v1723_v26 = vadd.f32 %v1648_v23, %v1603_v21 }
 0x2b4   : > { %v1712_v37 = vadd.f32 %v1626_v35, %v1592_v40  ;;  %v1604_v40 = vld [vmem:[#allocation2 + $0x79] sm:$0x7f] }
 0x2b5   : > { %1743 = vst.msk [vmem:[#allocation2 + $0x21] sm:$0xff] %vm671_vm2, %v1713_v25 }
 0x2b6   : > { %1742 = vst.msk [vmem:[#allocation2 + $0x19] sm:$0x7f] %vm766_vm3, %v1712_v37 }
 0x2b7   : > { %1753 = vst.msk [vmem:[#allocation2 + $0x71] sm:$0xff] %vm671_vm2, %v1723_v26 }
 0x2b8   : > { %1837 = vrot.lane.b32.xlu1 %v2894_v63, %s2534_s13  ;;  %1839 = vrot.lane.b32.xlu2 %v2920_v11, %s2534_s13  ;;  %v1599_v63 = vld [vmem:[#allocation2 + $0x51] sm:$0xff]  ;;  %v1609_v11 = vld [vmem:[#allocation2 + $0xa1] sm:$0xff] }
 0x2b9   : > { %1835 = vrot.lane.b32.xlu0 %v2882_v59, %s2534_s13 }
 0x2ba   : > { %v1634_v32 = vpop.permute.xlu1 %1633  ;;  %v1654_v52 = vpop.permute.xlu2 %1653 }
 0x2bb   : > { %v1632_v24 = vpop.permute.xlu0 %1631  ;;  %v1716_v44 = vadd.f32 %v1634_v32, %v1596_v39  ;;  %v1726_v54 = vadd.f32 %v1654_v52, %v1606_v50  ;;  %v1607_v50 = vld [vmem:[#allocation2 + $0x91] sm:$0xff] }
 0x2bc   : > { %v1715_v20 = vadd.f32 %v1632_v24, %v1595_v16 }
 0x2bd   : > { %1746 = vst.msk [vmem:[#allocation2 + $0x39] sm:$0x7f] %vm766_vm3, %v1716_v44 }
 0x2be   : > { %1745 = vst.msk [vmem:[#allocation2 + $0x31] sm:$0xff] %vm671_vm2, %v1715_v20  ;;  %v1610_v20 = vld [vmem:[#allocation2 + $0xa9] sm:$0x7f] }
 0x2bf   : > { %1756 = vst.msk [vmem:[#allocation2 + $0x89] sm:$0x7f] %vm766_vm3, %v1726_v54 }
 0x2c0   : > { %1843 = vrot.lane.b32.xlu1 %v2724_v3, %s2534_s13  ;;  %1845 = vrot.lane.b32.xlu2 %v2748_v30, %s2534_s13  ;;  %v1602_v30 = vld [vmem:[#allocation2 + $0x69] sm:$0x7f] }
 0x2c1   : > { %1841 = vrot.lane.b32.xlu0 %v2947_v19, %s2534_s13  ;;  %v1612_v19 = vld [vmem:[#allocation2 + $0xb9] sm:$0x7f] }
 0x2c2   : > { %v1640_v59 = vpop.permute.xlu1 %1639  ;;  %v1660_v41 = vpop.permute.xlu2 %1659 }
 0x2c3   : > { %v1638_v53 = vpop.permute.xlu0 %1637  ;;  %v1719_v51 = vadd.f32 %v1640_v59, %v1599_v63  ;;  %v1729_v1 = vadd.f32 %v1660_v41, %v1609_v11 }
 0x2c4   : > { %v1718_v48 = vadd.f32 %v1638_v53, %v1598_v0  ;;  %v1613_v0 = vld [vmem:[#allocation2 + $0xc1] sm:$0xff] }
 0x2c5   : > { %1749 = vst.msk [vmem:[#allocation2 + $0x51] sm:$0xff] %vm671_vm2, %v1719_v51 }
 0x2c6   : > { %1748 = vst.msk [vmem:[#allocation2 + $0x49] sm:$0x7f] %vm766_vm3, %v1718_v48 }
 0x2c7   : > { %1759 = vst.msk [vmem:[#allocation2 + $0xa1] sm:$0xff] %vm671_vm2, %v1729_v1 }
 0x2c8   : > { %1849 = vrot.lane.b32.xlu1 %v2833_v46, %s2534_s13  ;;  %1851 = vrot.lane.b32.xlu2 %v2869_v55, %s2534_s13  ;;  %v1605_v46 = vld [vmem:[#allocation2 + $0x81] sm:$0xff]  ;;  %v1615_v55 = vld [vmem:[#allocation2 + $0xd1] sm:$0xff] }
 0x2c9   : > { %1847 = vrot.lane.b32.xlu0 %v2790_v38, %s2534_s13 }
 0x2ca   : > { %v1646_v3 = vpop.permute.xlu1 %1645  ;;  %v1666_v33 = vpop.permute.xlu2 %1665 }
 0x2cb   : > { %v1644_v9 = vpop.permute.xlu0 %1643  ;;  %v1722_v2 = vadd.f32 %v1646_v3, %v1602_v30  ;;  %v1732_v13 = vadd.f32 %v1666_v33, %v1612_v19  ;;  %v1777_v3 = vld [vmem:[#allocation2 + $0x40] sm:$0xff]  ;;  %v1616_v19 = vld [vmem:[#allocation2 + $0xd9] sm:$0x7f] }
 0x2cc   : > { %v1721_v21 = vadd.f32 %v1644_v9, %v1601_v27 }
 0x2cd   : > { %1752 = vst.msk [vmem:[#allocation2 + $0x69] sm:$0x7f] %vm766_vm3, %v1722_v2 }
 0x2ce   : > { %1751 = vst.msk [vmem:[#allocation2 + $0x61] sm:$0xff] %vm671_vm2, %v1721_v21  ;;  %v1769_v21 = vld [vmem:[#allocation2] sm:$0xff] }
 0x2cf   : > { %1762 = vst.msk [vmem:[#allocation2 + $0xb9] sm:$0x7f] %vm766_vm3, %v1732_v13 }
 0x2d0   : > { %1979 = vrot.lane.b32.xlu1 %v4189_v28, %s2535_s17  ;;  %1981 = vrot.lane.b32.xlu2 %v4187_v34, %s2535_s17  ;;  %v1608_v34 = vld [vmem:[#allocation2 + $0x99] sm:$0x7f]  ;;  %v1618_v28 = vld [vmem:[#allocation2 + $0xe9] sm:$0x7f] }
 0x2d1   : > { %1853 = vrot.lane.b32.xlu0 %v2941_v18, %s2534_s13 }
 0x2d2   : > { %v1652_v38 = vpop.permute.xlu1 %1651  ;;  %v1672_v23 = vpop.permute.xlu2 %1671 }
 0x2d3   : > { %v1650_v35 = vpop.permute.xlu0 %1649  ;;  %v1725_v25 = vadd.f32 %v1652_v38, %v1605_v46  ;;  %v1735_v26 = vadd.f32 %v1672_v23, %v1615_v55 }
 0x2d4   : > { %v1724_v37 = vadd.f32 %v1650_v35, %v1604_v40  ;;  %v1772_v40 = vld [vmem:[#allocation2 + $0x18] sm:$0xff] }
 0x2d5   : > { %1755 = vst.msk [vmem:[#allocation2 + $0x81] sm:$0xff] %vm671_vm2, %v1725_v25 }
 0x2d6   : > { %1754 = vst.msk [vmem:[#allocation2 + $0x79] sm:$0x7f] %vm766_vm3, %v1724_v37 }
 0x2d7   : > { %1765 = vst.msk [vmem:[#allocation2 + $0xd1] sm:$0xff] %vm671_vm2, %v1735_v26 }
 0x2d8   : > { %1985 = vrot.lane.b32.xlu1 %v4192_v29, %s2535_s17  ;;  %1987 = vrot.lane.b32.xlu2 %v4190_v5, %s2535_s17  ;;  %v1611_v5 = vld [vmem:[#allocation2 + $0xb1] sm:$0xff] }
 0x2d9   : > { %1983 = vrot.lane.b32.xlu0 %v4188_v56, %s2535_s17  ;;  %v1771_v29 = vld [vmem:[#allocation2 + $0x10] sm:$0xff] }
 0x2da   : > { %v1658_v18 = vpop.permute.xlu1 %1657  ;;  %v1678_v32 = vpop.permute.xlu2 %1677 }
 0x2db   : > { %v1656_v39 = vpop.permute.xlu0 %1655  ;;  %v1728_v52 = vadd.f32 %v1658_v18, %v1608_v34  ;;  %v1738_v24 = vadd.f32 %v1678_v32, %v1618_v28  ;;  %v1776_v18 = vld [vmem:[#allocation2 + $0x38] sm:$0xff] }
 0x2dc   : > { %v1727_v16 = vadd.f32 %v1656_v39, %v1607_v50  ;;  %v1786_v34 = vld [vmem:[#allocation2 + $0x88] sm:$0xff]  ;;  %v1775_v39 = vld [vmem:[#allocation2 + $0x30] sm:$0xff] }
 0x2dd   : > { %1758 = vst.msk [vmem:[#allocation2 + $0x99] sm:$0x7f] %vm766_vm3, %v1728_v52 }
 0x2de   : > { %1757 = vst.msk [vmem:[#allocation2 + $0x91] sm:$0xff] %vm671_vm2, %v1727_v16  ;;  %v4215_v16 = vld [vmem:[#allocation24_spill] sm:$0xff] }
 0x2df   : > { %1768 = vst.msk [vmem:[#allocation2 + $0xe9] sm:$0x7f] %vm766_vm3, %v1738_v24 }
 0x2e0   : > { %1991 = vrot.lane.b32.xlu1 %v4195_v36, %s2535_s17  ;;  %1993 = vrot.lane.b32.xlu2 %v4193_v10, %s2535_s17  ;;  %v1614_v10 = vld [vmem:[#allocation2 + $0xc9] sm:$0x7f] }
 0x2e1   : > { %1989 = vrot.lane.b32.xlu0 %v4191_v60, %s2535_s17  ;;  %v1774_v36 = vld [vmem:[#allocation2 + $0x28] sm:$0xff] }
 0x2e2   : > { %v1664_v56 = vpop.permute.xlu1 %1663  ;;  %v1804_v44 = vpop.permute.xlu2 %1803 }
 0x2e3   : > { %v1662_v54 = vpop.permute.xlu0 %1661  ;;  %v1731_v59 = vadd.f32 %v1664_v56, %v1611_v5  ;;  %v1891_v63 = vadd.f32 %v1804_v44, %v1771_v29  ;;  %v1779_v5 = vld [vmem:[#allocation2 + $0x50] sm:$0xff]  ;;  %v1789_v29 = vld [vmem:[#allocation2 + $0xa0] sm:$0xff] }
 0x2e4   : > { %v1730_v11 = vadd.f32 %v1662_v54, %v1610_v20  ;;  %v1778_v20 = vld [vmem:[#allocation2 + $0x48] sm:$0xff] }
 0x2e5   : > { %1761 = vst.msk [vmem:[#allocation2 + $0xb1] sm:$0xff] %vm671_vm2, %v1731_v59 }
 0x2e6   : > { %1760 = vst.msk [vmem:[#allocation2 + $0xa9] sm:$0x7f] %vm766_vm3, %v1730_v11 }
 0x2e7   : > { %1921 = vst.msk [vmem:[#allocation2 + $0x10] sm:$0xff] %vm671_vm2, %v1891_v63 }
 0x2e8   : > { %1997 = vrot.lane.b32.xlu1 %v4198_v43, %s2535_s17  ;;  %1999 = vrot.lane.b32.xlu2 %v4196_v45, %s2535_s17  ;;  %v1617_v45 = vld [vmem:[#allocation2 + $0xe1] sm:$0xff] }
 0x2e9   : > { %1995 = vrot.lane.b32.xlu0 %v4194_v15, %s2535_s17 }
 0x2ea   : > { %v1670_v60 = vpop.permute.xlu1 %1669  ;;  %v1810_v41 = vpop.permute.xlu2 %1809 }
 0x2eb   : > { %v1668_v53 = vpop.permute.xlu0 %1667  ;;  %v1734_v51 = vadd.f32 %v1670_v60, %v1614_v10  ;;  %v1894_v1 = vadd.f32 %v1810_v41, %v1774_v36  ;;  %v4217_v60 = vld [vmem:[#allocation28_spill] sm:$0xff] }
 0x2ec   : > { %v1733_v48 = vadd.f32 %v1668_v53, %v1613_v0  ;;  %v1782_v36 = vld [vmem:[#allocation2 + $0x68] sm:$0xff]  ;;  %v1792_v41 = vld [vmem:[#allocation2 + $0xb8] sm:$0xff] }
 0x2ed   : > { %1764 = vst.msk [vmem:[#allocation2 + $0xc9] sm:$0x7f] %vm766_vm3, %v1734_v51  ;;  %v1781_v51 = vld [vmem:[#allocation2 + $0x60] sm:$0xff] }
 0x2ee   : > { %1763 = vst.msk [vmem:[#allocation2 + $0xc1] sm:$0xff] %vm671_vm2, %v1733_v48 }
 0x2ef   : > { %1924 = vst.msk [vmem:[#allocation2 + $0x28] sm:$0xff] %vm671_vm2, %v1894_v1 }
 0x2f0   : > { %2003 = vrot.lane.b32.xlu1 %v4201_v7, %s2535_s17  ;;  %2005 = vrot.lane.b32.xlu2 %v4199_v12, %s2535_s17  ;;  %v1770_v12 = vld [vmem:[#allocation2 + $0x8] sm:$0xff]  ;;  %v1780_v7 = vld [vmem:[#allocation2 + $0x58] sm:$0xff] }
 0x2f1   : > { %2001 = vrot.lane.b32.xlu0 %v4197_v61, %s2535_s17 }
 0x2f2   : > { %v1676_v15 = vpop.permute.xlu1 %1675  ;;  %v1816_v43 = vpop.permute.xlu2 %1815 }
 0x2f3   : > { %v1674_v30 = vpop.permute.xlu0 %1673  ;;  %v1737_v33 = vadd.f32 %v1676_v15, %v1617_v45  ;;  %v1897_v9 = vadd.f32 %v1816_v43, %v1777_v3  ;;  %v1785_v43 = vld [vmem:[#allocation2 + $0x80] sm:$0xff]  ;;  %v1795_v3 = vld [vmem:[#allocation2 + $0xd0] sm:$0xff] }
 0x2f4   : > { %v1736_v27 = vadd.f32 %v1674_v30, %v1616_v19 }
 0x2f5   : > { %1767 = vst.msk [vmem:[#allocation2 + $0xe1] sm:$0xff] %vm671_vm2, %v1737_v33  ;;  %v1784_v33 = vld [vmem:[#allocation2 + $0x78] sm:$0xff] }
 0x2f6   : > { %1766 = vst.msk [vmem:[#allocation2 + $0xd9] sm:$0x7f] %vm766_vm3, %v1736_v27 }
 0x2f7   : > { %1927 = vst.msk [vmem:[#allocation2 + $0x40] sm:$0xff] %vm671_vm2, %v1897_v9 }
 0x2f8   : > { %2009 = vrot.lane.b32.xlu1 %v4203_v8, %s2535_s17  ;;  %2011 = vrot.lane.b32.xlu2 %v4202_v57, %s2535_s17  ;;  %v1773_v57 = vld [vmem:[#allocation2 + $0x20] sm:$0xff]  ;;  %v1783_v8 = vld [vmem:[#allocation2 + $0x70] sm:$0xff] }
 0x2f9   : > { %2007 = vrot.lane.b32.xlu0 %v4200_v31, %s2535_s17 }
 0x2fa   : > { %v1802_v61 = vpop.permute.xlu1 %1801  ;;  %v1822_v2 = vpop.permute.xlu2 %1821 }
 0x2fb   : > { %v1800_v13 = vpop.permute.xlu0 %1799  ;;  %v1890_v38 = vadd.f32 %v1802_v61, %v1770_v12  ;;  %v1900_v46 = vadd.f32 %v1822_v2, %v1780_v7 }
 0x2fc   : > { %v1889_v55 = vadd.f32 %v1800_v13, %v1769_v21  ;;  %v1787_v13 = vld [vmem:[#allocation2 + $0x90] sm:$0xff] }
 0x2fd   : > { %1920 = vst.msk [vmem:[#allocation2 + $0x8] sm:$0xff] %vm671_vm2, %v1890_v38 }
 0x2fe   : > { %1919 = vst.msk [vmem:[#allocation2] sm:$0xff] %vm671_vm2, %v1889_v55 }
 0x2ff   : > { %1930 = vst.msk [vmem:[#allocation2 + $0x58] sm:$0xff] %vm671_vm2, %v1900_v46 }
 0x300   : > { %1855 = vrot.lane.b32.xlu1 %v2984_v47, %s2534_s13  ;;  %1857 = vrot.lane.b32.xlu2 %v4186_v14, %s2534_s13  ;;  %v4212_v47 = vld [vmem:[#allocation26_spill] sm:$0xff] }
 0x301   : > { %2013 = vrot.lane.b32.xlu0 %v3087_v22, %s2535_s17  ;;  %v4213_v22 = vld [vmem:[#allocation22_spill] sm:$0xff] }
 0x302   : > { %v1808_v31 = vpop.permute.xlu1 %1807  ;;  %v1828_v23 = vpop.permute.xlu2 %1827 }
 0x303   : > { %v1806_v35 = vpop.permute.xlu0 %1805  ;;  %v1893_v25 = vadd.f32 %v1808_v31, %v1773_v57  ;;  %v1903_v26 = vadd.f32 %v1828_v23, %v1783_v8  ;;  %v1791_v31 = vld [vmem:[#allocation2 + $0xb0] sm:$0xff]  ;;  %v1790_v23 = vld [vmem:[#allocation2 + $0xa8] sm:$0xff] }
 0x304   : > { %v1892_v37 = vadd.f32 %v1806_v35, %v1772_v40  ;;  %v1950_v12 = vld [vmem:[#allocation2 + $0x8] sm:$0x7f] }
 0x305   : > { %1923 = vst.msk [vmem:[#allocation2 + $0x20] sm:$0xff] %vm671_vm2, %v1893_v25 }
 0x306   : > { %1922 = vst.msk [vmem:[#allocation2 + $0x18] sm:$0xff] %vm671_vm2, %v1892_v37 }
 0x307   : > { %1933 = vst.msk [vmem:[#allocation2 + $0x70] sm:$0xff] %vm671_vm2, %v1903_v26 }
 0x308   : > { %2017 = vrot.lane.b32.xlu1 %v4204_v4, %s2535_s17  ;;  %2019 = vrot.lane.b32.xlu2 %v4212_v47, %s2535_s17  ;;  %v4214_v4 = vld [vmem:[#allocation23_spill] sm:$0xff] }
 0x309   : > { %2015 = vrot.lane.b32.xlu0 %v4213_v22, %s2535_s17  ;;  %v1794_v22 = vld [vmem:[#allocation2 + $0xc8] sm:$0xff] }
 0x30a   : > { %v1814_v14 = vpop.permute.xlu1 %1813  ;;  %v1834_v28 = vpop.permute.xlu2 %1833 }
 0x30b   : > { %v1812_v32 = vpop.permute.xlu0 %1811  ;;  %v1896_v50 = vadd.f32 %v1814_v14, %v1776_v18  ;;  %v1906_v52 = vadd.f32 %v1834_v28, %v1786_v34  ;;  %v1793_v28 = vld [vmem:[#allocation2 + $0xc0] sm:$0xff] }
 0x30c   : > { %v1895_v24 = vadd.f32 %v1812_v32, %v1775_v39  ;;  %v1953_v40 = vld [vmem:[#allocation2 + $0x20] sm:$0xff] }
 0x30d   : > { %1926 = vst.msk [vmem:[#allocation2 + $0x38] sm:$0xff] %vm671_vm2, %v1896_v50 }
 0x30e   : > { %1925 = vst.msk [vmem:[#allocation2 + $0x30] sm:$0xff] %vm671_vm2, %v1895_v24 }
 0x30f   : > { %1936 = vst.msk [vmem:[#allocation2 + $0x88] sm:$0xff] %vm671_vm2, %v1906_v52 }
 0x310   : > { %2023 = vrot.lane.b32.xlu1 %v4207_v42, %s2535_s17  ;;  %2025 = vrot.lane.b32.xlu2 %v4214_v4, %s2535_s17  ;;  %v4216_v42 = vld [vmem:[#allocation27_spill] sm:$0xff] }
 0x311   : > { %2021 = vrot.lane.b32.xlu0 %v4215_v16, %s2535_s17  ;;  %v1949_v4 = vld [vmem:[#allocation2] sm:$0xff] }
 0x312   : > { %v1820_v56 = vpop.permute.xlu1 %1819  ;;  %v1840_v44 = vpop.permute.xlu2 %1839 }
 0x313   : > { %v1818_v54 = vpop.permute.xlu0 %1817  ;;  %v1899_v59 = vadd.f32 %v1820_v56, %v1779_v5  ;;  %v1909_v63 = vadd.f32 %v1840_v44, %v1789_v29  ;;  %v1796_v5 = vld [vmem:[#allocation2 + $0xd8] sm:$0xff] }
 0x314   : > { %v1898_v11 = vadd.f32 %v1818_v54, %v1778_v20  ;;  %v1956_v14 = vld [vmem:[#allocation2 + $0x38] sm:$0x7f] }
 0x315   : > { %1929 = vst.msk [vmem:[#allocation2 + $0x50] sm:$0xff] %vm671_vm2, %v1899_v59 }
 0x316   : > { %1928 = vst.msk [vmem:[#allocation2 + $0x48] sm:$0xff] %vm671_vm2, %v1898_v11  ;;  %v1952_v11 = vld [vmem:[#allocation2 + $0x18] sm:$0x7f] }
 0x317   : > { %1939 = vst.msk [vmem:[#allocation2 + $0xa0] sm:$0xff] %vm671_vm2, %v1909_v63 }
 0x318   : > { %2029 = vrot.lane.b32.xlu1 %v4216_v42, %s2535_s17  ;;  %2031 = vrot.lane.b32.xlu2 %v3214_v58, %s2535_s17  ;;  %v4218_v58 = vld [vmem:[#allocation29_spill] sm:$0xff] }
 0x319   : > { %2027 = vrot.lane.b32.xlu0 %v4217_v60, %s2535_s17 }
 0x31a   : > { %v1826_v10 = vpop.permute.xlu1 %1825  ;;  %v1846_v53 = vpop.permute.xlu2 %1845 }
 0x31b   : > { %v1824_v0 = vpop.permute.xlu0 %1823  ;;  %v1902_v1 = vadd.f32 %v1826_v10, %v1782_v36  ;;  %v1912_v48 = vadd.f32 %v1846_v53, %v1792_v41  ;;  %v1951_v10 = vld [vmem:[#allocation2 + $0x10] sm:$0xff] }
 0x31c   : > { %v1901_v15 = vadd.f32 %v1824_v0, %v1781_v51  ;;  %v1959_v44 = vld [vmem:[#allocation2 + $0x50] sm:$0xff] }
 0x31d   : > { %1932 = vst.msk [vmem:[#allocation2 + $0x68] sm:$0xff] %vm671_vm2, %v1902_v1 }
 0x31e   : > { %1931 = vst.msk [vmem:[#allocation2 + $0x60] sm:$0xff] %vm671_vm2, %v1901_v15  ;;  %v1955_v15 = vld [vmem:[#allocation2 + $0x30] sm:$0xff] }
 0x31f   : > { %1942 = vst.msk [vmem:[#allocation2 + $0xb8] sm:$0xff] %vm671_vm2, %v1912_v48 }
 0x320   : > { %2035 = vrot.lane.b32.xlu1 %v3490_v49, %s2535_s17  ;;  %2037 = vrot.lane.b32.xlu2 %v3482_v6, %s2535_s17  ;;  %v1788_v6 = vld [vmem:[#allocation2 + $0x98] sm:$0xff] }
 0x321   : > { %2033 = vrot.lane.b32.xlu0 %v4218_v58, %s2535_s17 }
 0x322   : > { %v1832_v45 = vpop.permute.xlu1 %1831  ;;  %v1852_v30 = vpop.permute.xlu2 %1851 }
 0x323   : > { %v1830_v19 = vpop.permute.xlu0 %1829  ;;  %v1905_v9 = vadd.f32 %v1832_v45, %v1785_v43  ;;  %v1915_v27 = vadd.f32 %v1852_v30, %v1795_v3  ;;  %v1954_v43 = vld [vmem:[#allocation2 + $0x28] sm:$0x7f] }
 0x324   : > { %v1904_v61 = vadd.f32 %v1830_v19, %v1784_v33  ;;  %v1962_v0 = vld [vmem:[#allocation2 + $0x68] sm:$0x7f] }
 0x325   : > { %1935 = vst.msk [vmem:[#allocation2 + $0x80] sm:$0xff] %vm671_vm2, %v1905_v9 }
 0x326   : > { %1934 = vst.msk [vmem:[#allocation2 + $0x78] sm:$0xff] %vm671_vm2, %v1904_v61 }
 0x327   : > { %1945 = vst.msk [vmem:[#allocation2 + $0xd0] sm:$0xff] %vm671_vm2, %v1915_v27 }
 0x32a   : > { %v1838_v49 = vpop.permute.xlu1 %1837  ;;  %v1982_v7 = vpop.permute.xlu2 %1981 }
 0x32b   : > { %v1836_v2 = vpop.permute.xlu0 %1835  ;;  %v1908_v21 = vadd.f32 %v1838_v49, %v1788_v6  ;;  %v2070_v38 = vadd.f32 %v1982_v7, %v1950_v12  ;;  %v1958_v12 = vld [vmem:[#allocation2 + $0x48] sm:$0x7f] }
 0x32c   : > { %v1907_v46 = vadd.f32 %v1836_v2, %v1787_v13  ;;  %v1965_v33 = vld [vmem:[#allocation2 + $0x80] sm:$0xff] }
 0x32d   : > { %1938 = vst.msk [vmem:[#allocation2 + $0x98] sm:$0xff] %vm671_vm2, %v1908_v21  ;;  %v1957_v13 = vld [vmem:[#allocation2 + $0x40] sm:$0xff] }
 0x32e   : > { %1937 = vst.msk [vmem:[#allocation2 + $0x90] sm:$0xff] %vm671_vm2, %v1907_v46 }
 0x32f   : > { %2100 = vst.msk [vmem:[#allocation2 + $0x8] sm:$0x7f] %vm766_vm3, %v2070_v38 }
 0x332   : > { %v1844_v55 = vpop.permute.xlu1 %1843  ;;  %v1988_v57 = vpop.permute.xlu2 %1987 }
 0x333   : > { %v1842_v8 = vpop.permute.xlu0 %1841  ;;  %v1911_v35 = vadd.f32 %v1844_v55, %v1791_v31  ;;  %v2073_v26 = vadd.f32 %v1988_v57, %v1953_v40  ;;  %v1798_v57 = vld [vmem:[#allocation2 + $0xe8] sm:$0xff] }
 0x334   : > { %v1910_v25 = vadd.f32 %v1842_v8, %v1790_v23 }
 0x335   : > { %1941 = vst.msk [vmem:[#allocation2 + $0xb0] sm:$0xff] %vm671_vm2, %v1911_v35 }
 0x336   : > { %v3792_v37 = vld [vmem:[#allocation2 + $0x8] sm:$0xff]  ;;  %1940 = vst.msk [vmem:[#allocation2 + $0xa8] sm:$0xff] %vm671_vm2, %v1910_v25 }
 0x337   : > { %2162 = vst.msk [vmem:[%s3611_s16 + $0x8] sm:$0xff] %vm671_vm2, %v3792_v37  ;;  %v2256_v38 = vmul.f32 %v3792_v37, %v3792_v37  ;;  %v2224_v23 = vsel %vm671_vm2, %v3792_v37, 0.0 }
 0x338   : > { %2103 = vst.msk [vmem:[#allocation2 + $0x20] sm:$0xff] %vm671_vm2, %v2073_v26 }
 0x339   : > { %v2318_v26 = vsel %vm671_vm2, %v2256_v38, 0.0 }
 0x33a   : > { %v1850_v47 = vpop.permute.xlu1 %1849  ;;  %v1994_v18 = vpop.permute.xlu2 %1993 }
 0x33b   : > { %v1848_v34 = vpop.permute.xlu0 %1847  ;;  %v1914_v32 = vadd.f32 %v1850_v47, %v1794_v22  ;;  %v2076_v39 = vadd.f32 %v1994_v18, %v1956_v14 }
 0x33c   : > { %v1913_v50 = vadd.f32 %v1848_v34, %v1793_v28 }
 0x33d   : > { %1944 = vst.msk [vmem:[#allocation2 + $0xc8] sm:$0xff] %vm671_vm2, %v1914_v32 }
 0x33e   : > { %1943 = vst.msk [vmem:[#allocation2 + $0xc0] sm:$0xff] %vm671_vm2, %v1913_v50  ;;  %v1961_v50 = vld [vmem:[#allocation2 + $0x60] sm:$0xff] }
 0x33f   : > { %v3801_v52 = vld [vmem:[#allocation2 + $0x20] sm:$0xff]  ;;  %2106 = vst.msk [vmem:[#allocation2 + $0x38] sm:$0x7f] %vm766_vm3, %v2076_v39 }
 0x340   : > { %2165 = vst.msk [vmem:[%s3611_s16 + $0x20] sm:$0xff] %vm671_vm2, %v3801_v52 }
 0x342   : > { %v1980_v24 = vpop.permute.xlu1 %1979  ;;  %v2000_v16 = vpop.permute.xlu2 %1999 }
 0x343   : > { %v1854_v56 = vpop.permute.xlu0 %1853  ;;  %v2069_v29 = vadd.f32 %v1980_v24, %v1949_v4  ;;  %v2079_v20 = vadd.f32 %v2000_v16, %v1959_v44 }
 0x344   : > { %v1916_v54 = vadd.f32 %v1854_v56, %v1796_v5  ;;  %v1960_v5 = vld [vmem:[#allocation2 + $0x58] sm:$0x7f] }
 0x345   : > { %2099 = vst.msk [vmem:[#allocation2] sm:$0xff] %vm671_vm2, %v2069_v29 }
 0x346   : > { %v3808_v59 = vld [vmem:[#allocation2 + $0x38] sm:$0xff]  ;;  %1946 = vst.msk [vmem:[#allocation2 + $0xd8] sm:$0xff] %vm671_vm2, %v1916_v54 }
 0x347   : > { %2168 = vst.msk [vmem:[%s3611_s16 + $0x38] sm:$0xff] %vm671_vm2, %v3808_v59  ;;  %v2262_v47 = vmul.f32 %v3808_v59, %v3808_v59  ;;  %v2229_v28 = vsel %vm671_vm2, %v3808_v59, 0.0 }
 0x348   : > { %2109 = vst.msk [vmem:[#allocation2 + $0x50] sm:$0xff] %vm671_vm2, %v2079_v20  ;;  %v1969_v20 = vld [vmem:[#allocation2 + $0xa0] sm:$0xff] }
 0x349   : > { %v2323_v44 = vsel %vm671_vm2, %v2262_v47, 0.0  ;;  %v1967_v47 = vld [vmem:[#allocation2 + $0x90] sm:$0xff] }
 0x34a   : > { %v1986_v63 = vpop.permute.xlu1 %1985  ;;  %v2006_v42 = vpop.permute.xlu2 %2005 }
 0x34b   : > { %v1984_v60 = vpop.permute.xlu0 %1983  ;;  %v2072_v36 = vadd.f32 %v1986_v63, %v1952_v11  ;;  %v2082_v51 = vadd.f32 %v2006_v42, %v1962_v0  ;;  %v1963_v0 = vld [vmem:[#allocation2 + $0x70] sm:$0xff] }
 0x34c   : > { %v3815_v41 = vld [vmem:[#allocation2] sm:$0xff]  ;;  %v2071_v53 = vadd.f32 %v1984_v60, %v1951_v10  ;;  %v1964_v10 = vld [vmem:[#allocation2 + $0x78] sm:$0x7f] }
 0x34d   : > { %2161 = vst.msk [vmem:[%s3611_s16] sm:$0xff] %vm671_vm2, %v3815_v41 }
 0x34e   : > { %2101 = vst.msk [vmem:[#allocation2 + $0x10] sm:$0xff] %vm671_vm2, %v2071_v53 }
 0x34f   : > { %v3821_v1 = vld [vmem:[#allocation2 + $0x50] sm:$0xff]  ;;  %2102 = vst.msk [vmem:[#allocation2 + $0x18] sm:$0x7f] %vm766_vm3, %v2072_v36 }
 0x350   : > { %2171 = vst.msk [vmem:[%s3611_s16 + $0x50] sm:$0xff] %vm671_vm2, %v3821_v1 }
 0x351   : > { %2112 = vst.msk [vmem:[#allocation2 + $0x68] sm:$0x7f] %vm766_vm3, %v2082_v51 }
 0x352   : > { %v1992_v48 = vpop.permute.xlu1 %1991  ;;  %v2012_v58 = vpop.permute.xlu2 %2011 }
 0x353   : > { %v1990_v45 = vpop.permute.xlu0 %1989  ;;  %v2075_v3 = vadd.f32 %v1992_v48, %v1955_v15  ;;  %v2085_v27 = vadd.f32 %v2012_v58, %v1965_v33  ;;  %v1972_v58 = vld [vmem:[#allocation2 + $0xb8] sm:$0x7f]  ;;  %v1797_v33 = vld [vmem:[#allocation2 + $0xe0] sm:$0xff] }
 0x354   : > { %v2074_v30 = vadd.f32 %v1990_v45, %v1954_v43 }
 0x355   : > { %v3828_v19 = vld [vmem:[#allocation2 + $0x10] sm:$0xff]  ;;  %2105 = vst.msk [vmem:[#allocation2 + $0x30] sm:$0xff] %vm671_vm2, %v2075_v3 }
 0x356   : > { %2163 = vst.msk [vmem:[%s3611_s16 + $0x10] sm:$0xff] %vm671_vm2, %v3828_v19  ;;  %v2132_v9 = vld [vmem:[#allocation2 + $0x18] sm:$0xff]  ;;  %v2257_v38 = vmul.f32 %v3828_v19, %v3828_v19 }
 0x357   : > { %2164 = vst.msk [vmem:[%s3611_s16 + $0x18] sm:$0xff] %vm671_vm2, %v2132_v9  ;;  %v2258_v49 = vmul.f32 %v2132_v9, %v2132_v9  ;;  %v2225_v46 = vsel %vm671_vm2, %v2132_v9, 0.0 }
 0x358   : > { %v3836_v61 = vld [vmem:[#allocation2 + $0x68] sm:$0xff]  ;;  %2104 = vst.msk [vmem:[#allocation2 + $0x28] sm:$0x7f] %vm766_vm3, %v2074_v30  ;;  %v2226_v40 = vadd.f32 %v2225_v46, %v2224_v23  ;;  %v2255_v46 = vmul.f32 %v3815_v41, %v3815_v41  ;;  %v1968_v23 = vld [vmem:[#allocation2 + $0x98] sm:$0x7f] }
 0x359   : > { %2174 = vst.msk [vmem:[%s3611_s16 + $0x68] sm:$0xff] %vm671_vm2, %v3836_v61  ;;  %v2319_v35 = vsel %vm671_vm2, %v2258_v49, 0.0  ;;  %v1966_v49 = vld [vmem:[#allocation2 + $0x88] sm:$0x7f] }
 0x35a   : > { %2115 = vst.msk [vmem:[#allocation2 + $0x80] sm:$0xff] %vm671_vm2, %v2085_v27  ;;  %v1998_v6 = vpop.permute.xlu1 %1997  ;;  %v1858_v7 = vpop.permute.xlu2 %1857  ;;  %v2320_v37 = vadd.f32 %v2319_v35, %v2318_v26 }
 0x35b   : > { %v1996_v2 = vpop.permute.xlu0 %1995  ;;  %v2078_v21 = vadd.f32 %v1998_v6, %v1958_v12  ;;  %v1918_v8 = vadd.f32 %v1858_v7, %v1798_v57  ;;  %v1975_v7 = vld [vmem:[#allocation2 + $0xd0] sm:$0xff]  ;;  %v2194_v57 = vsel %vm671_vm2, %v3828_v19, 0.0  ;;  %v2259_v19 = vmul.f32 %v3801_v52, %v3801_v52 }
 0x35c   : > { %v3846_v55 = vld [vmem:[#allocation2 + $0x30] sm:$0xff]  ;;  %v2077_v31 = vadd.f32 %v1996_v2, %v1957_v13 }
 0x35d   : > { %2167 = vst.msk [vmem:[%s3611_s16 + $0x30] sm:$0xff] %vm671_vm2, %v3846_v55 }
 0x35e   : > { %2107 = vst.msk [vmem:[#allocation2 + $0x40] sm:$0xff] %vm671_vm2, %v2077_v31 }
 0x35f   : > { %v2134_v25 = vld [vmem:[#allocation2 + $0x28] sm:$0xff]  ;;  %2108 = vst.msk [vmem:[#allocation2 + $0x48] sm:$0x7f] %vm766_vm3, %v2078_v21 }
 0x360   : > { %2166 = vst.msk [vmem:[%s3611_s16 + $0x28] sm:$0xff] %vm671_vm2, %v2134_v25  ;;  %v2227_v22 = vsel %vm671_vm2, %v2134_v25, 0.0  ;;  %v2260_v14 = vmul.f32 %v2134_v25, %v2134_v25  ;;  %v2288_v25 = vsel %vm671_vm2, %v2257_v38, 0.0 }
 0x361   : > { %v2228_v18 = vadd.f32 %v2227_v22, %v2226_v40  ;;  %v3862_v34 = vld [vmem:[#allocation2 + $0x80] sm:$0xff]  ;;  %1948 = vst.msk [vmem:[#allocation2 + $0xe8] sm:$0xff] %vm671_vm2, %v1918_v8 }
 0x362   : > { %v2321_v32 = vsel %vm671_vm2, %v2260_v14, 0.0  ;;  %2177 = vst.msk [vmem:[%s3611_s16 + $0x80] sm:$0xff] %vm671_vm2, %v3862_v34  ;;  %v2004_v39 = vpop.permute.xlu1 %2003  ;;  %v2020_v24 = vpop.permute.xlu2 %2019 }
 0x363   : > { %v2322_v4 = vadd.f32 %v2321_v32, %v2320_v37  ;;  %v3871_v16 = vadd.f32 %v2229_v28, %v2228_v18  ;;  %v2002_v56 = vpop.permute.xlu0 %2001  ;;  %v2081_v29 = vadd.f32 %v2004_v39, %v1961_v50  ;;  %v2089_v11 = vadd.f32 %v2020_v24, %v1969_v20 }
 0x364   : > { %v2080_v54 = vadd.f32 %v2002_v56, %v1960_v5  ;;  %v2193_v37 = vsel %vm671_vm2, %v3815_v41, 0.0  ;;  %v2287_v28 = vsel %vm671_vm2, %v2255_v46, 0.0  ;;  %v2261_v39 = vmul.f32 %v3846_v55, %v3846_v55 }
 0x365   : > { %v3874_v59 = vld [vmem:[#allocation2 + $0x40] sm:$0xff]  ;;  %v3876_v63 = vadd.f32 %v2323_v44, %v2322_v4  ;;  %2111 = vst.msk [vmem:[#allocation2 + $0x60] sm:$0xff] %vm671_vm2, %v2081_v29  ;;  %v2195_v32 = vadd.f32 %v2194_v57, %v2193_v37  ;;  %v2289_v50 = vadd.f32 %v2288_v25, %v2287_v28  ;;  %v2196_v4 = vsel %vm671_vm2, %v3801_v52, 0.0 }
 0x366   : > { %2169 = vst.msk [vmem:[%s3611_s16 + $0x40] sm:$0xff] %vm671_vm2, %v3874_v59  ;;  %v3882_v42 = vld [vmem:[#allocation2 + $0x48] sm:$0xff]  ;;  %v2263_v24 = vmul.f32 %v3874_v59, %v3874_v59  ;;  %v2198_v56 = vsel %vm671_vm2, %v3846_v55, 0.0  ;;  %v2290_v29 = vsel %vm671_vm2, %v2259_v19, 0.0  ;;  %v2200_v52 = vsel %vm671_vm2, %v3874_v59, 0.0  ;;  %v1971_v59 = vld [vmem:[#allocation2 + $0xb0] sm:$0xff] }
 0x367   : > { %2170 = vst.msk [vmem:[%s3611_s16 + $0x48] sm:$0xff] %vm671_vm2, %v3882_v42  ;;  %v2197_v44 = vadd.f32 %v2196_v4, %v2195_v32  ;;  %v2291_v20 = vadd.f32 %v2290_v29, %v2289_v50  ;;  %v2268_v57 = vmul.f32 %v3836_v61, %v3836_v61  ;;  %v1973_v28 = vld [vmem:[#allocation2 + $0xc0] sm:$0xff] }
 0x368   : > { %2110 = vst.msk [vmem:[#allocation2 + $0x58] sm:$0x7f] %vm766_vm3, %v2080_v54  ;;  %v1978_v35 = vld [vmem:[#allocation2 + $0xe8] sm:$0x7f]  ;;  %v2292_v54 = vsel %vm671_vm2, %v2261_v39, 0.0 }
 0x369   : > { %2119 = vst.msk [vmem:[#allocation2 + $0xa0] sm:$0xff] %vm671_vm2, %v2089_v11  ;;  %v2199_v55 = vadd.f32 %v2198_v56, %v2197_v44  ;;  %v2329_v4 = vsel %vm671_vm2, %v2268_v57, 0.0  ;;  %v2208_v44 = vsel %vm671_vm2, %v3862_v34, 0.0 }
 0x36a   : > { %v2010_v60 = vpop.permute.xlu1 %2009  ;;  %v2026_v36 = vpop.permute.xlu2 %2025 }
 0x36b   : > { %v2008_v53 = vpop.permute.xlu0 %2007  ;;  %v2084_v51 = vadd.f32 %v2010_v60, %v1964_v10  ;;  %v2092_v45 = vadd.f32 %v2026_v36, %v1972_v58  ;;  %v2294_v60 = vsel %vm671_vm2, %v2263_v24, 0.0  ;;  %v2264_v10 = vmul.f32 %v3882_v42, %v3882_v42 }
 0x36c   : > { %v3889_v48 = vld [vmem:[#allocation2 + $0x60] sm:$0xff]  ;;  %v2083_v15 = vadd.f32 %v2008_v53, %v1963_v0  ;;  %v1970_v53 = vld [vmem:[#allocation2 + $0xa8] sm:$0x7f]  ;;  %v2265_v0 = vmul.f32 %v3821_v1, %v3821_v1 }
 0x36d   : > { %2173 = vst.msk [vmem:[%s3611_s16 + $0x60] sm:$0xff] %vm671_vm2, %v3889_v48 }
 0x36e   : > { %2113 = vst.msk [vmem:[#allocation2 + $0x70] sm:$0xff] %vm671_vm2, %v2083_v15  ;;  %v2296_v46 = vsel %vm671_vm2, %v2265_v0, 0.0 }
 0x36f   : > { %v3895_v43 = vld [vmem:[#allocation2 + $0x58] sm:$0xff]  ;;  %2114 = vst.msk [vmem:[#allocation2 + $0x78] sm:$0x7f] %vm766_vm3, %v2084_v51  ;;  %v2293_v51 = vadd.f32 %v2292_v54, %v2291_v20 }
 0x370   : > { %2172 = vst.msk [vmem:[%s3611_s16 + $0x58] sm:$0xff] %vm671_vm2, %v3895_v43  ;;  %v3901_v3 = vld [vmem:[#allocation2 + $0xa0] sm:$0xff] }
 0x371   : > { %2181 = vst.msk [vmem:[%s3611_s16 + $0xa0] sm:$0xff] %vm671_vm2, %v3901_v3 }
 0x372   : > { %2122 = vst.msk [vmem:[#allocation2 + $0xb8] sm:$0x7f] %vm766_vm3, %v2092_v45  ;;  %v1856_v30 = vpop.permute.xlu1 %1855  ;;  %v2032_v9 = vpop.permute.xlu2 %2031  ;;  %v2201_v45 = vadd.f32 %v2200_v52, %v2199_v55 }
 0x373   : > { %v2014_v27 = vpop.permute.xlu0 %2013  ;;  %v1917_v6 = vadd.f32 %v1856_v30, %v1797_v33  ;;  %v2095_v13 = vadd.f32 %v2032_v9, %v1975_v7  ;;  %v2266_v30 = vmul.f32 %v3895_v43, %v3895_v43  ;;  %v2267_v33 = vmul.f32 %v3889_v48, %v3889_v48 }
 0x374   : > { %v2086_v12 = vadd.f32 %v2014_v27, %v1966_v49  ;;  %v2295_v49 = vadd.f32 %v2294_v60, %v2293_v51  ;;  %v2231_v7 = vsel %vm671_vm2, %v3882_v42, 0.0  ;;  %v2233_v42 = vsel %vm671_vm2, %v3895_v43, 0.0 }
 0x375   : > { %v3907_v2 = vld [vmem:[#allocation2 + $0x70] sm:$0xff]  ;;  %1947 = vst.msk [vmem:[#allocation2 + $0xe0] sm:$0xff] %vm671_vm2, %v1917_v6  ;;  %v2232_v25 = vadd.f32 %v2231_v7, %v3871_v16 }
 0x376   : > { %2175 = vst.msk [vmem:[%s3611_s16 + $0x70] sm:$0xff] %vm671_vm2, %v3907_v2  ;;  %v3913_v21 = vld [vmem:[#allocation2 + $0x78] sm:$0xff]  ;;  %v2269_v38 = vmul.f32 %v3907_v2, %v3907_v2 }
 0x377   : > { %2176 = vst.msk [vmem:[%s3611_s16 + $0x78] sm:$0xff] %vm671_vm2, %v3913_v21  ;;  %v2234_v39 = vadd.f32 %v2233_v42, %v2232_v25  ;;  %v2237_v54 = vsel %vm671_vm2, %v3913_v21, 0.0 }
 0x378   : > { %2116 = vst.msk [vmem:[#allocation2 + $0x88] sm:$0x7f] %vm766_vm3, %v2086_v12  ;;  %v2202_v12 = vsel %vm671_vm2, %v3821_v1, 0.0  ;;  %v2204_v1 = vsel %vm671_vm2, %v3889_v48, 0.0  ;;  %v2206_v48 = vsel %vm671_vm2, %v3907_v2, 0.0  ;;  %v2300_v43 = vsel %vm671_vm2, %v2269_v38, 0.0 }
 0x379   : > { %v3923_v31 = vld [vmem:[#allocation2 + $0xb8] sm:$0xff]  ;;  %2125 = vst.msk [vmem:[#allocation2 + $0xd0] sm:$0xff] %vm671_vm2, %v2095_v13  ;;  %v2325_v13 = vsel %vm671_vm2, %v2264_v10, 0.0  ;;  %v2235_v2 = vsel %vm671_vm2, %v3836_v61, 0.0 }
 0x37a   : > { %2184 = vst.msk [vmem:[%s3611_s16 + $0xb8] sm:$0xff] %vm671_vm2, %v3923_v31  ;;  %v2018_v8 = vpop.permute.xlu1 %2017  ;;  %v2038_v40 = vpop.permute.xlu2 %2037  ;;  %v2236_v55 = vadd.f32 %v2235_v2, %v2234_v39 }
 0x37b   : > { %v2016_v26 = vpop.permute.xlu0 %2015  ;;  %v2088_v22 = vadd.f32 %v2018_v8, %v1968_v23  ;;  %v2098_v14 = vadd.f32 %v2038_v40, %v1978_v35  ;;  %v2271_v8 = vmul.f32 %v3862_v34, %v3862_v34  ;;  %v2327_v23 = vsel %vm671_vm2, %v2266_v30, 0.0 }
 0x37c   : > { %v2087_v18 = vadd.f32 %v2016_v26, %v1967_v47  ;;  %v2203_v35 = vadd.f32 %v2202_v12, %v2201_v45  ;;  %v2298_v40 = vsel %vm671_vm2, %v2267_v33, 0.0  ;;  %v2326_v26 = vadd.f32 %v2325_v13, %v3876_v63  ;;  %v1976_v12 = vld [vmem:[#allocation2 + $0xd8] sm:$0x7f]  ;;  %v1977_v7 = vld [vmem:[#allocation2 + $0xe0] sm:$0xff] }
 0x37d   : > { %2118 = vst.msk [vmem:[#allocation2 + $0x98] sm:$0x7f] %vm766_vm3, %v2088_v22  ;;  %v2297_v47 = vadd.f32 %v2296_v46, %v2295_v49  ;;  %v2302_v61 = vsel %vm671_vm2, %v2271_v8, 0.0  ;;  %v2275_v34 = vmul.f32 %v3901_v3, %v3901_v3  ;;  %v2238_v51 = vadd.f32 %v2237_v54, %v2236_v55 }
 0x37e   : > { %2117 = vst.msk [vmem:[#allocation2 + $0x90] sm:$0xff] %vm671_vm2, %v2087_v18  ;;  %v2205_v37 = vadd.f32 %v2204_v1, %v2203_v35  ;;  %v2270_v18 = vmul.f32 %v3913_v21, %v3913_v21  ;;  %v2328_v50 = vadd.f32 %v2327_v23, %v2326_v26  ;;  %v2212_v1 = vsel %vm671_vm2, %v3901_v3, 0.0 }
 0x37f   : > { %v3943_v41 = vld [vmem:[#allocation2 + $0x88] sm:$0xff]  ;;  %2128 = vst.msk [vmem:[#allocation2 + $0xe8] sm:$0x7f] %vm766_vm3, %v2098_v14  ;;  %v2299_v16 = vadd.f32 %v2298_v40, %v2297_v47  ;;  %v2285_v54 = vmul.f32 %v3645_v62, %v3645_v62 }
 0x380   : > { %2178 = vst.msk [vmem:[%s3611_s16 + $0x88] sm:$0xff] %vm671_vm2, %v3943_v41  ;;  %v3953_v5 = vld [vmem:[#allocation2 + $0xd0] sm:$0xff]  ;;  %v1974_v14 = vld [vmem:[#allocation2 + $0xc8] sm:$0x7f]  ;;  %v2207_v63 = vadd.f32 %v2206_v48, %v2205_v37  ;;  %v2331_v20 = vsel %vm671_vm2, %v2270_v18, 0.0  ;;  %v2272_v52 = vmul.f32 %v3943_v41, %v3943_v41  ;;  %v2330_v60 = vadd.f32 %v2329_v4, %v2328_v50 }
 0x381   : > { %2187 = vst.msk [vmem:[%s3611_s16 + $0xd0] sm:$0xff] %vm671_vm2, %v3953_v5  ;;  %v2301_v56 = vadd.f32 %v2300_v43, %v2299_v16  ;;  %v2239_v21 = vsel %vm671_vm2, %v3943_v41, 0.0  ;;  %v2306_v48 = vsel %vm671_vm2, %v2275_v34, 0.0  ;;  %v2281_v50 = vmul.f32 %v3953_v5, %v3953_v5 }
 0x382   : > { %v2024_v11 = vpop.permute.xlu1 %2023  ;;  %v2333_v33 = vsel %vm671_vm2, %v2272_v52, 0.0  ;;  %v2240_v13 = vadd.f32 %v2239_v21, %v2238_v51 }
 0x383   : > { %v2022_v36 = vpop.permute.xlu0 %2021  ;;  %v2091_v27 = vadd.f32 %v2024_v11, %v1971_v59  ;;  %v2303_v59 = vadd.f32 %v2302_v61, %v2301_v56  ;;  %v2312_v61 = vsel %vm671_vm2, %v2281_v50, 0.0 }
 0x384   : > { %v3967_v15 = vld [vmem:[#allocation2 + $0x98] sm:$0xff]  ;;  %v2090_v58 = vadd.f32 %v2022_v36, %v1970_v53  ;;  %v2209_v53 = vadd.f32 %v2208_v44, %v2207_v63  ;;  %v2245_v63 = vsel %vm671_vm2, %v3923_v31, 0.0 }
 0x385   : > { %v2147_v9 = vld [vmem:[#allocation2 + $0x90] sm:$0xff]  ;;  %2180 = vst.msk [vmem:[%s3611_s16 + $0x98] sm:$0xff] %vm671_vm2, %v3967_v15  ;;  %v2274_v0 = vmul.f32 %v3967_v15, %v3967_v15 }
 0x386   : > { %2179 = vst.msk [vmem:[%s3611_s16 + $0x90] sm:$0xff] %vm671_vm2, %v2147_v9  ;;  %v3978_v6 = vld [vmem:[#allocation2 + $0xe8] sm:$0xff]  ;;  %v2273_v29 = vmul.f32 %v2147_v9, %v2147_v9  ;;  %v2210_v10 = vsel %vm671_vm2, %v2147_v9, 0.0 }
 0x387   : > { %2190 = vst.msk [vmem:[%s3611_s16 + $0xe8] sm:$0xff] %vm671_vm2, %v3978_v6  ;;  %v2211_v9 = vadd.f32 %v2210_v10, %v2209_v53  ;;  %v2335_v23 = vsel %vm671_vm2, %v2274_v0, 0.0 }
 0x388   : > { %2120 = vst.msk [vmem:[#allocation2 + $0xa8] sm:$0x7f] %vm766_vm3, %v2090_v58  ;;  %v2332_v58 = vadd.f32 %v2331_v20, %v2330_v60  ;;  %v2304_v45 = vsel %vm671_vm2, %v2273_v29, 0.0  ;;  %v2286_v29 = vmul.f32 %v3614_v17, %v3614_v17 }
 0x389   : > { %2121 = vst.msk [vmem:[#allocation2 + $0xb0] sm:$0xff] %vm671_vm2, %v2091_v27  ;;  %v2241_v27 = vsel %vm671_vm2, %v3967_v15, 0.0  ;;  %v2305_v42 = vadd.f32 %v2304_v45, %v2303_v59  ;;  %v2213_v3 = vadd.f32 %v2212_v1, %v2211_v9  ;;  %v2251_v45 = vsel %vm671_vm2, %v3978_v6, 0.0 }
 0x38a   : > { %v2030_v22 = vpop.permute.xlu1 %2029  ;;  %v2334_v15 = vadd.f32 %v2333_v33, %v2332_v58  ;;  %v2242_v25 = vadd.f32 %v2241_v27, %v2240_v13  ;;  %v2222_v27 = vsel %vm671_vm2, %v3645_v62, 0.0 }
 0x38b   : > { %v2028_v19 = vpop.permute.xlu0 %2027  ;;  %v2094_v32 = vadd.f32 %v2030_v22, %v1974_v14 }
 0x38c   : > { %v2093_v24 = vadd.f32 %v2028_v19, %v1973_v28  ;;  %v2336_v14 = vadd.f32 %v2335_v23, %v2334_v15  ;;  %v2278_v19 = vmul.f32 %v3923_v31, %v3923_v31  ;;  %v2218_v31 = vsel %vm671_vm2, %v3953_v5, 0.0 }
 0x38d   : > { %2124 = vst.msk [vmem:[#allocation2 + $0xc8] sm:$0x7f] %vm766_vm3, %v2094_v32  ;;  %v2307_v32 = vadd.f32 %v2306_v48, %v2305_v42  ;;  %v2347_v42 = vsel %vm671_vm2, %v2286_v29, 0.0 }
 0x38e   : > { %2123 = vst.msk [vmem:[#allocation2 + $0xc0] sm:$0xff] %vm671_vm2, %v2093_v24  ;;  %v2339_v20 = vsel %vm671_vm2, %v2278_v19, 0.0 }
 0x38f   : > { %v2150_v11 = vld [vmem:[#allocation2 + $0xa8] sm:$0xff] }
 0x390   : > { %2182 = vst.msk [vmem:[%s3611_s16 + $0xa8] sm:$0xff] %vm671_vm2, %v2150_v11  ;;  %v2151_v36 = vld [vmem:[#allocation2 + $0xb0] sm:$0xff]  ;;  %v2276_v41 = vmul.f32 %v2150_v11, %v2150_v11  ;;  %v2243_v35 = vsel %vm671_vm2, %v2150_v11, 0.0 }
 0x391   : > { %2183 = vst.msk [vmem:[%s3611_s16 + $0xb0] sm:$0xff] %vm671_vm2, %v2151_v36  ;;  %v2277_v38 = vmul.f32 %v2151_v36, %v2151_v36  ;;  %v2214_v26 = vsel %vm671_vm2, %v2151_v36, 0.0  ;;  %v2244_v37 = vadd.f32 %v2243_v35, %v2242_v25  ;;  %v2284_v36 = vmul.f32 %v3978_v6, %v3978_v6 }
 0x392   : > { %v2036_v30 = vpop.permute.xlu1 %2035  ;;  %v2337_v22 = vsel %vm671_vm2, %v2276_v41, 0.0  ;;  %v2215_v28 = vadd.f32 %v2214_v26, %v2213_v3  ;;  %v2316_v6 = vsel %vm671_vm2, %v2285_v54, 0.0 }
 0x393   : > { %v2034_v49 = vpop.permute.xlu0 %2033  ;;  %v2097_v8 = vadd.f32 %v2036_v30, %v1977_v7  ;;  %v2308_v43 = vsel %vm671_vm2, %v2277_v38, 0.0  ;;  %v2338_v16 = vadd.f32 %v2337_v22, %v2336_v14  ;;  %v2246_v44 = vadd.f32 %v2245_v63, %v2244_v37 }
 0x394   : > { %v2154_v46 = vld [vmem:[#allocation2 + $0xc8] sm:$0xff]  ;;  %v2096_v57 = vadd.f32 %v2034_v49, %v1976_v12  ;;  %v2309_v2 = vadd.f32 %v2308_v43, %v2307_v32  ;;  %v2345_v7 = vsel %vm671_vm2, %v2284_v36, 0.0  ;;  %v2253_v38 = vsel %vm671_vm2, %v3614_v17, 0.0 }
 0x395   : > { %v2153_v40 = vld [vmem:[#allocation2 + $0xc0] sm:$0xff]  ;;  %2186 = vst.msk [vmem:[%s3611_s16 + $0xc8] sm:$0xff] %vm671_vm2, %v2154_v46  ;;  %v2280_v39 = vmul.f32 %v2154_v46, %v2154_v46  ;;  %v2247_v56 = vsel %vm671_vm2, %v2154_v46, 0.0  ;;  %v2340_v60 = vadd.f32 %v2339_v20, %v2338_v16 }
 0x396   : > { %2185 = vst.msk [vmem:[%s3611_s16 + $0xc0] sm:$0xff] %vm671_vm2, %v2153_v40  ;;  %v2279_v47 = vmul.f32 %v2153_v40, %v2153_v40  ;;  %v2216_v18 = vsel %vm671_vm2, %v2153_v40, 0.0  ;;  %v2248_v55 = vadd.f32 %v2247_v56, %v2246_v44 }
 0x397   : > { %2126 = vst.msk [vmem:[#allocation2 + $0xd8] sm:$0x7f] %vm766_vm3, %v2096_v57  ;;  %v2217_v4 = vadd.f32 %v2216_v18, %v2215_v28  ;;  %v2341_v11 = vsel %vm671_vm2, %v2280_v39, 0.0 }
 0x398   : > { %2127 = vst.msk [vmem:[#allocation2 + $0xe0] sm:$0xff] %vm671_vm2, %v2097_v8  ;;  %v2310_v24 = vsel %vm671_vm2, %v2279_v47, 0.0  ;;  %v2342_v51 = vadd.f32 %v2341_v11, %v2340_v60 }
 0x399   : > { %v2311_v52 = vadd.f32 %v2310_v24, %v2309_v2  ;;  %v2219_v0 = vadd.f32 %v2218_v31, %v2217_v4 }
 0x39b   : > { %v2313_v9 = vadd.f32 %v2312_v61, %v2311_v52 }
 0x39e   : > { %v2156_v10 = vld [vmem:[#allocation2 + $0xd8] sm:$0xff] }
 0x39f   : > { %2188 = vst.msk [vmem:[%s3611_s16 + $0xd8] sm:$0xff] %vm671_vm2, %v2156_v10  ;;  %v2249_v34 = vsel %vm671_vm2, %v2156_v10, 0.0  ;;  %v2282_v21 = vmul.f32 %v2156_v10, %v2156_v10  ;;  %v2157_v53 = vld [vmem:[#allocation2 + $0xe0] sm:$0xff] }
 0x3a0   : > { %v2250_v58 = vadd.f32 %v2249_v34, %v2248_v55  ;;  %2189 = vst.msk [vmem:[%s3611_s16 + $0xe0] sm:$0xff] %vm671_vm2, %v2157_v53  ;;  %v2220_v5 = vsel %vm671_vm2, %v2157_v53, 0.0  ;;  %v2283_v59 = vmul.f32 %v2157_v53, %v2157_v53 }
 0x3a1   : > { %v2343_v30 = vsel %vm671_vm2, %v2282_v21, 0.0  ;;  %v2221_v33 = vadd.f32 %v2220_v5, %v2219_v0 }
 0x3a2   : > { %v2344_v41 = vadd.f32 %v2343_v30, %v2342_v51  ;;  %v2252_v49 = vadd.f32 %v2251_v45, %v2250_v58  ;;  %v2314_v12 = vsel %vm671_vm2, %v2283_v59, 0.0 }
 0x3a3   : > { %v2223_v13 = vadd.f32 %v2222_v27, %v2221_v33  ;;  %v2315_v46 = vadd.f32 %v2314_v12, %v2313_v9 }
 0x3a4   : > { %v2254_v57 = vadd.f32 %v2253_v38, %v2252_v49  ;;  %v2346_v8 = vadd.f32 %v2345_v7, %v2344_v41 }
 0x3a5   : > { %v2317_v1 = vadd.f32 %v2316_v6, %v2315_v46  ;;  %v2349_v23 = vsel %vm671_vm2, %v2223_v13, 0.0 }
 0x3a6   : > { %v2348_v62 = vadd.f32 %v2347_v42, %v2346_v8  ;;  %v2350_v35 = vsel %vm671_vm2, %v2254_v57, 0.0 }
 0x3a7   : > { %v2351_v40 = vadd.f32 %v2350_v35, %v2349_v23  ;;  %v2360_v15 = vsel %vm671_vm2, %v2317_v1, 0.0 }
 0x3a8   : > { %v2361_v25 = vsel %vm671_vm2, %v2348_v62, 0.0 }
 0x3a9   : > { %v2352_v17 = vrot.slane %v2351_v40, 4  ;;  %v2362_v26 = vadd.f32 %v2361_v25, %v2360_v15 }
 0x3ab   : > { %v2353_v47 = vadd.f32 %v2352_v17, %v2351_v40  ;;  %v2363_v48 = vrot.slane %v2362_v26, 4 }
 0x3ad   : > { %v2354_v22 = vrot.slane %v2353_v47, 2  ;;  %v2364_v3 = vadd.f32 %v2363_v48, %v2362_v26 }
 0x3af   : > { %v2355_v14 = vadd.f32 %v2354_v22, %v2353_v47  ;;  %v2365_v37 = vrot.slane %v2364_v3, 2 }
 0x3b1   : > { %v2356_v43 = vrot.slane %v2355_v14, 1  ;;  %v2366_v18 = vadd.f32 %v2365_v37, %v2364_v3 }
 0x3b3   : > { %v2357_v19 = vadd.f32 %v2356_v43, %v2355_v14  ;;  %v2367_v28 = vrot.slane %v2366_v18, 1 }
 0x3b5   : > { %2359 = vst.msk [vmem:[%s235_s23] sm:$0x1] %vm2358_vm4, %v2357_v19  ;;  %v2368_v32 = vadd.f32 %v2367_v28, %v2366_v18 }
 0x3b7   : > { %2369 = vst.msk [vmem:[%s235_s23 + $0x1] sm:$0x1] %vm2358_vm4, %v2368_v32 }
 0x3b8 PF: > { %s16_s18 = sadd.s32 1, %s2526_s18  }
 0x3b9   : > { %p13_p4 = scmp.ge.s32.totalorder %s16_s18, 4  }
 0x3bb   :  { %15 = sbr.rel (!%p13_p4) target bundleno = 1 (0x1), region = 79 }

// kernel: dense_block_forward.11
= control target key start
LH: loop header
LB: loop body
LE: loop exit
PB: predicated region body
PF: predicated region fallthrough
CT: control target
= control target key end

     0   :  { %11 = vsyncpa [#allocation4], 0  ;;  %s4277_s0 = inlined_call_operand.vmem [shape: f32[2,16,16,32], index: 0, kind: input, shape index: {}]   ;;  %s4278_s1 = inlined_call_operand.vmem [shape: f32[1,32], index: 1, kind: input, shape index: {}]   ;;  %s4279_s2 = inlined_call_operand.vmem [shape: f32[1,32], index: 2, kind: input, shape index: {}]   ;;  %s4280_s3 = inlined_call_operand.vmem [shape: bf16[32,72], index: 3, kind: input, shape index: {}]   ;;  %s4281_s4 = inlined_call_operand.vmem [shape: f32[2,16,16,8], index: 4, kind: output, shape index: {0}]   ;;  %s4282_s5 = inlined_call_operand.hbm [shape: f32[2,2,8], index: 5, kind: output, shape index: {1}]  }
   0x1   :  { %13 = vsyncpa [#allocation4 + $0x1], 0  ;;  %s2676_s18 = smov 0   ;;  %s2678_s19 = smov 0  }
   0x2   :  { %s2680_s20 = smov 0   ;;  %s2682_s21 = smov 0  }
   0x3 LB: > { %s2697_s22 = sadd.s32 4294967295, %s2636_s21   ;;  %s2478_s23 = sadd.s32 4294967294, %s2636_s21   ;;  %s2636_s21 = sphi %s2682_s21, %s4401_s21   ;;  %s2632_s20 = sphi %s2680_s20, %s4400_s20   ;;  %s2628_s19 = sphi %s2678_s19, %s4399_s19   ;;  %s2624_s18 = sphi %s2676_s18, %s4398_s18  }
   0x4   : > { %s2701_s24 = sadd.s32 1, %s2636_s21   ;;  %s141_s25 = sadd.s32 1, %s2632_s20 }
   0x5   : > { %s138_s26 = ssub.s32 %s2636_s21, %s2701_s24  ;;  %p151_p0 = scmp.ne.s32.totalorder %s2632_s20, %s2628_s19 }
   0x6   : > { %p139_p1 = scmp.eq.s32.totalorder %s138_s26, 0  ;;  %p152_p2 = scmp.eq.s32.totalorder %s2697_s22, 1 }
   0x7   : > { %p157_p3 = scmp.ne.s32.totalorder %s2628_s19, %s2624_s18  ;;  %p158_p4 = scmp.eq.s32.totalorder %s2478_s23, 1 }
   0x8   : > { %s2712_s27 = scalar_select %p139_p1, %s2632_s20, %s141_s25  }
   0x9   : > { %p2714_p5 = por %p152_p2, %p151_p0  ;;  %p2718_p6 = por %p158_p4, %p157_p3 }
   0xa   : > { %p2481_p7 = scmp.ge.s32.totalorder %s2636_s21, 1  ;;  %p193_p8 = scmp.lt.s32.totalorder %s2636_s21, 3 }
   0xc   : > { %p194_p9 = pnand %p2481_p7, %p193_p8 }
   0xe   : > { %197 = sbr.rel (%p194_p9) target bundleno = 962 (0x3c2), region = 36 }
  0x13   : > { %v2518_v0 = vld [vmem:[%s4280_s3 + $0x8] sm:$0xff]  ;;  %p226_p10 = scmp.lt.s32.totalorder %s2697_s22, 1  ;;  %v2517_v1 = vld [vmem:[%s4280_s3] sm:$0xff]  ;;  %vm405_vm0 = vcmask 261120   ;;  %s2638_s23 = smov 96   ;;  %vm1006_vm1 = vcmask 1046528  }
  0x14   : > { %460 = vmatpush.bf16.msra.mxu0 %v2518_v0  ;;  %2519 = vmatpush.bf16.msra.mxu1 %v2518_v0  ;;  %v2737_v2 = vld [vmem:[%s4278_s1] ss:$0 sm:$0xff]  ;;  %s2639_s25 = smov 120   ;;  %s2640_s26 = smov 112   ;;  %vm671_vm2 = vcmask 64512   ;;  %vm766_vm3 = vcmask 63488  }
  0x15   : > { %s2732_s9 = scalar_select %p226_p10, %s2697_s22, 1  ;;  %2520 = vmatpush.bf16.msra.mxu2 %v2518_v0  ;;  %2521 = vmatpush.bf16.msra.mxu3 %v2518_v0  ;;  %v2750_v3 = vld [vmem:[%s4279_s2] ss:$0 sm:$0xff]  ;;  %vm2358_vm4 = vcmask 57344  }
  0x16   : > { %s2641_s30 = smov 104   ;;  %s2642_s6 = smov 88  }
  0x17   : > { %s2515_s12 = sshll.u32 %s2732_s9, 8  ;;  %s2643_s7 = smov 80  }
  0x18   : > { %s2745_s15 = scalar_lea.vmem %s4277_s0, %s2515_s12  ;;  %461 = vmatpush.bf16.msra.mxu0 %v2517_v1  ;;  %2522 = vmatpush.bf16.msra.mxu1 %v2517_v1  ;;  %s2644_s8 = smov 72  }
  0x19   : > { %v239_v4 = vld [vmem:[%s2745_s15] sm:$0xff]  ;;  %v240_v5 = vld [vmem:[%s2745_s15 + $0x8] sm:$0xff]  ;;  %2523 = vmatpush.bf16.msra.mxu2 %v2517_v1  ;;  %2524 = vmatpush.bf16.msra.mxu3 %v2517_v1  ;;  %v241_v34 = vld [vmem:[%s2745_s15 + $0x10] sm:$0xff]  ;;  %s3763_s13 = scalar_lea.vmem %s4281_s4, %s2515_s12  ;;  %s2645_s9 = smov 64  }
  0x1a   : > { %v247_v6 = vld [vmem:[%s2745_s15 + $0x40] sm:$0xff]  ;;  %v274_v7 = vmul.f32 %v2737_v2, %v239_v4  ;;  %v275_v8 = vmul.f32 %v2737_v2, %v240_v5  ;;  %v248_v9 = vld [vmem:[%s2745_s15 + $0x48] sm:$0xff]  ;;  %v242_v35 = vld [vmem:[%s2745_s15 + $0x18] sm:$0xff]  ;;  %v276_v44 = vmul.f32 %v2737_v2, %v241_v34  ;;  %s223_s12 = sand.u32 1, %s2628_s19   ;;  %s2594_s11 = scalar_lea.hbm %s4282_s5, 4 }
  0x1b   : > { %v282_v10 = vmul.f32 %v2737_v2, %v247_v6  ;;  %v255_v11 = vld [vmem:[%s2745_s15 + $0x80] sm:$0xff]  ;;  %v256_v12 = vld [vmem:[%s2745_s15 + $0x88] sm:$0xff]  ;;  %v283_v13 = vmul.f32 %v2737_v2, %v248_v9  ;;  %v249_v38 = vld [vmem:[%s2745_s15 + $0x50] sm:$0xff]  ;;  %v277_v45 = vmul.f32 %v2737_v2, %v242_v35  ;;  %s2482_s14 = sshll.u32 %s223_s12, 1 }
  0x1c   : > { %v290_v14 = vmul.f32 %v2737_v2, %v255_v11  ;;  %v291_v15 = vmul.f32 %v2737_v2, %v256_v12  ;;  %v263_v16 = vld [vmem:[%s2745_s15 + $0xc0] sm:$0xff]  ;;  %v264_v17 = vld [vmem:[%s2745_s15 + $0xc8] sm:$0xff]  ;;  %v309_v18 = vadd.f32 %v2750_v3, %v274_v7  ;;  %v310_v19 = vadd.f32 %v2750_v3, %v275_v8  ;;  %v250_v39 = vld [vmem:[%s2745_s15 + $0x58] sm:$0xff] }
  0x1d   : > { %v317_v20 = vadd.f32 %v2750_v3, %v282_v10  ;;  %v298_v21 = vmul.f32 %v2737_v2, %v263_v16  ;;  %v318_v22 = vadd.f32 %v2750_v3, %v283_v13  ;;  %v299_v25 = vmul.f32 %v2737_v2, %v264_v17  ;;  %v265_v43 = vld [vmem:[%s2745_s15 + $0xd0] sm:$0xff]  ;;  %v266_v46 = vld [vmem:[%s2745_s15 + $0xd8] sm:$0xff]  ;;  %v251_v13 = vld [vmem:[%s2745_s15 + $0x60] sm:$0xff] }
  0x1e   : > { %v325_v23 = vadd.f32 %v2750_v3, %v290_v14  ;;  %v326_v24 = vadd.f32 %v2750_v3, %v291_v15  ;;  %v341_v26 = vmax.f32 %v309_v18, 0.0  ;;  %v342_v27 = vmax.f32 %v310_v19, 0.0  ;;  %v257_v47 = vld [vmem:[%s2745_s15 + $0x90] sm:$0xff]  ;;  %v258_v48 = vld [vmem:[%s2745_s15 + $0x98] sm:$0xff]  ;;  %v243_v14 = vld [vmem:[%s2745_s15 + $0x20] sm:$0xff] }
  0x1f   : > { %v349_v28 = vmax.f32 %v317_v20, 0.0  ;;  %v333_v29 = vadd.f32 %v2750_v3, %v298_v21  ;;  %v350_v30 = vmax.f32 %v318_v22, 0.0  ;;  %v334_v33 = vadd.f32 %v2750_v3, %v299_v25  ;;  %v244_v15 = vld [vmem:[%s2745_s15 + $0x28] sm:$0xff]  ;;  %v259_v17 = vld [vmem:[%s2745_s15 + $0xa0] sm:$0xff] }
  0x20   : > { %v357_v31 = vmax.f32 %v325_v23, 0.0  ;;  %v358_v32 = vmax.f32 %v326_v24, 0.0  ;;  %v373_v36 = vpack.c.bf16 %v342_v27, %v341_v26  ;;  %v284_v50 = vmul.f32 %v2737_v2, %v249_v38  ;;  %v252_v16 = vld [vmem:[%s2745_s15 + $0x68] sm:$0xff]  ;;  %v267_v21 = vld [vmem:[%s2745_s15 + $0xe0] sm:$0xff] }
  0x21   : > { %v365_v37 = vmax.f32 %v333_v29, 0.0  ;;  %v377_v40 = vpack.c.bf16 %v350_v30, %v349_v28  ;;  %v366_v42 = vmax.f32 %v334_v33, 0.0  ;;  %v285_v51 = vmul.f32 %v2737_v2, %v250_v39  ;;  %v260_v18 = vld [vmem:[%s2745_s15 + $0xa8] sm:$0xff] }
  0x22   : > { %v381_v41 = vpack.c.bf16 %v358_v32, %v357_v31  ;;  %2495 = vmatmul.msk.bf16.vlgmr.msra.gmra.mxu0 %vm405_vm0, %v373_v36  ;;  %v300_v52 = vmul.f32 %v2737_v2, %v265_v43  ;;  %v301_v53 = vmul.f32 %v2737_v2, %v266_v46  ;;  %v292_v54 = vmul.f32 %v2737_v2, %v257_v47  ;;  %v268_v22 = vld [vmem:[%s2745_s15 + $0xe8] sm:$0xff] }
  0x23   : > { %2499 = vmatmul.msk.bf16.vlgmr.msra.gmra.mxu1 %vm405_vm0, %v377_v40  ;;  %v385_v49 = vpack.c.bf16 %v366_v42, %v365_v37  ;;  %v293_v55 = vmul.f32 %v2737_v2, %v258_v48  ;;  %v311_v56 = vadd.f32 %v2750_v3, %v276_v44  ;;  %v312_v57 = vadd.f32 %v2750_v3, %v277_v45 }
  0x24   : > { %2503 = vmatmul.msk.bf16.vlgmr.msra.gmra.mxu2 %vm405_vm0, %v381_v41  ;;  %v319_v58 = vadd.f32 %v2750_v3, %v284_v50  ;;  %v320_v59 = vadd.f32 %v2750_v3, %v285_v51  ;;  %v327_v60 = vadd.f32 %v2750_v3, %v292_v54  ;;  %v335_v62 = vadd.f32 %v2750_v3, %v300_v52  ;;  %v261_v50 = vld [vmem:[%s2745_s15 + $0xb0] sm:$0xff]  ;;  %v262_v51 = vld [vmem:[%s2745_s15 + $0xb8] sm:$0xff] }
  0x25   : > { %2507 = vmatmul.msk.bf16.vlgmr.msra.gmra.mxu3 %vm405_vm0, %v385_v49  ;;  %v328_v61 = vadd.f32 %v2750_v3, %v293_v55  ;;  %v336_v63 = vadd.f32 %v2750_v3, %v301_v53  ;;  %v343_v0 = vmax.f32 %v311_v56, 0.0  ;;  %v344_v1 = vmax.f32 %v312_v57, 0.0 }
  0x26   : > { %v351_v4 = vmax.f32 %v319_v58, 0.0  ;;  %v352_v5 = vmax.f32 %v320_v59, 0.0  ;;  %v359_v6 = vmax.f32 %v327_v60, 0.0  ;;  %v367_v8 = vmax.f32 %v335_v62, 0.0  ;;  %v253_v58 = vld [vmem:[%s2745_s15 + $0x70] sm:$0xff]  ;;  %v254_v59 = vld [vmem:[%s2745_s15 + $0x78] sm:$0xff] }
  0x27   : > { %v360_v7 = vmax.f32 %v328_v61, 0.0  ;;  %v368_v9 = vmax.f32 %v336_v63, 0.0  ;;  %v374_v10 = vpack.c.bf16 %v344_v1, %v343_v0  ;;  %v286_v20 = vmul.f32 %v2737_v2, %v251_v13 }
  0x28   : > { %v378_v11 = vpack.c.bf16 %v352_v5, %v351_v4  ;;  %v278_v23 = vmul.f32 %v2737_v2, %v243_v14  ;;  %v279_v24 = vmul.f32 %v2737_v2, %v244_v15  ;;  %v287_v25 = vmul.f32 %v2737_v2, %v252_v16  ;;  %v245_v5 = vld [vmem:[%s2745_s15 + $0x30] sm:$0xff] }
  0x29   : > { %v382_v12 = vpack.c.bf16 %v360_v7, %v359_v6  ;;  %v386_v19 = vpack.c.bf16 %v368_v9, %v367_v8  ;;  %v294_v26 = vmul.f32 %v2737_v2, %v259_v17  ;;  %v295_v27 = vmul.f32 %v2737_v2, %v260_v18  ;;  %v246_v6 = vld [vmem:[%s2745_s15 + $0x38] sm:$0xff] }
  0x2a   : > { %v302_v28 = vmul.f32 %v2737_v2, %v267_v21  ;;  %v303_v29 = vmul.f32 %v2737_v2, %v268_v22  ;;  %v313_v30 = vadd.f32 %v2750_v3, %v278_v23  ;;  %v314_v31 = vadd.f32 %v2750_v3, %v279_v24 }
  0x2b   : > { %v321_v32 = vadd.f32 %v2750_v3, %v286_v20  ;;  %v322_v33 = vadd.f32 %v2750_v3, %v287_v25  ;;  %v329_v34 = vadd.f32 %v2750_v3, %v294_v26  ;;  %v330_v35 = vadd.f32 %v2750_v3, %v295_v27 }
  0x2c   : > { %v337_v36 = vadd.f32 %v2750_v3, %v302_v28  ;;  %v338_v37 = vadd.f32 %v2750_v3, %v303_v29  ;;  %v345_v38 = vmax.f32 %v313_v30, 0.0  ;;  %v346_v39 = vmax.f32 %v314_v31, 0.0 }
  0x2d   : > { %v353_v40 = vmax.f32 %v321_v32, 0.0  ;;  %v354_v41 = vmax.f32 %v322_v33, 0.0  ;;  %v361_v42 = vmax.f32 %v329_v34, 0.0  ;;  %v362_v43 = vmax.f32 %v330_v35, 0.0 }
  0x2e   : > { %v369_v44 = vmax.f32 %v337_v36, 0.0  ;;  %v370_v45 = vmax.f32 %v338_v37, 0.0  ;;  %v375_v46 = vpack.c.bf16 %v346_v39, %v345_v38  ;;  %v296_v52 = vmul.f32 %v2737_v2, %v261_v50 }
  0x2f   : > { %v379_v47 = vpack.c.bf16 %v354_v41, %v353_v40  ;;  %v383_v48 = vpack.c.bf16 %v362_v43, %v361_v42  ;;  %v297_v53 = vmul.f32 %v2737_v2, %v262_v51  ;;  %v288_v61 = vmul.f32 %v2737_v2, %v253_v58 }
  0x30   : > { %v387_v49 = vpack.c.bf16 %v370_v45, %v369_v44  ;;  %v331_v54 = vadd.f32 %v2750_v3, %v296_v52  ;;  %v289_v62 = vmul.f32 %v2737_v2, %v254_v59  ;;  %v280_v7 = vmul.f32 %v2737_v2, %v245_v5 }
  0x31   : > { %v332_v55 = vadd.f32 %v2750_v3, %v297_v53  ;;  %v323_v63 = vadd.f32 %v2750_v3, %v288_v61  ;;  %v281_v8 = vmul.f32 %v2737_v2, %v246_v6 }
  0x32   : > { %2496 = vmatmul.msk.bf16.gmra.mxu0 %vm405_vm0, %v374_v10  ;;  %v363_v56 = vmax.f32 %v331_v54, 0.0  ;;  %v324_v0 = vadd.f32 %v2750_v3, %v289_v62  ;;  %v269_v10 = vld [vmem:[%s2745_s15 + $0xf0] sm:$0xff] }
  0x33   : > { %2500 = vmatmul.msk.bf16.gmra.mxu1 %vm405_vm0, %v378_v11  ;;  %v364_v57 = vmax.f32 %v332_v55, 0.0  ;;  %v355_v1 = vmax.f32 %v323_v63, 0.0  ;;  %v270_v11 = vld [vmem:[%s2745_s15 + $0xf8] sm:$0xff]  ;;  %v316_v13 = vadd.f32 %v2750_v3, %v281_v8  ;;  %v304_v14 = vmul.f32 %v2737_v2, %v269_v10  ;;  %s2512_s15 = sshll.u32 %s2697_s22, 1  ;;  %s2376_s22 = scalar_lea.sflag [#allocation4], %s223_s12 }
  0x34   : > { %2504 = vmatmul.msk.bf16.gmra.mxu2 %vm405_vm0, %v382_v12  ;;  %v356_v4 = vmax.f32 %v324_v0, 0.0  ;;  %v315_v12 = vadd.f32 %v2750_v3, %v280_v7  ;;  %v305_v15 = vmul.f32 %v2737_v2, %v270_v11 }
  0x35   : > { %2508 = vmatmul.msk.bf16.gmra.mxu3 %vm405_vm0, %v386_v19  ;;  %v384_v60 = vpack.c.bf16 %v364_v57, %v363_v56  ;;  %v348_v17 = vmax.f32 %v316_v13, 0.0  ;;  %v339_v18 = vadd.f32 %v2750_v3, %v304_v14 }
  0x36   : > { %v380_v9 = vpack.c.bf16 %v356_v4, %v355_v1  ;;  %v347_v16 = vmax.f32 %v315_v12, 0.0  ;;  %v340_v19 = vadd.f32 %v2750_v3, %v305_v15 }
  0x37   : > { %v371_v21 = vmax.f32 %v339_v18, 0.0 }
  0x38   : > { %v376_v20 = vpack.c.bf16 %v348_v17, %v347_v16  ;;  %v372_v22 = vmax.f32 %v340_v19, 0.0 }
  0x3a   : > { %v388_v23 = vpack.c.bf16 %v372_v22, %v371_v21 }
  0x42   : > { %2497 = vmatmul.msk.bf16.gmra.mxu0 %vm405_vm0, %v375_v46 }
  0x43   : > { %2501 = vmatmul.msk.bf16.gmra.mxu1 %vm405_vm0, %v379_v47 }
  0x44   : > { %2505 = vmatmul.msk.bf16.gmra.mxu2 %vm405_vm0, %v383_v48 }
  0x45   : > { %2509 = vmatmul.msk.bf16.gmra.mxu3 %vm405_vm0, %v387_v49 }
  0x52   : > { %2498 = vmatmul.msk.bf16.gmra.mxu0 %vm405_vm0, %v376_v20 }
  0x53   : > { %2502 = vmatmul.msk.bf16.gmra.mxu1 %vm405_vm0, %v380_v9 }
  0x54   : > { %2506 = vmatmul.msk.bf16.gmra.mxu2 %vm405_vm0, %v384_v60 }
  0x55   : > { %2510 = vmatmul.msk.bf16.gmra.mxu3 %vm405_vm0, %v388_v23 }
  0x9f   : > { %v2864_v24 = vpop.f32.mrf.mxu0 }
  0xa0   : > { %v2866_v25 = vpop.f32.mrf.mxu1  ;;  %575 = vrot.lane.b32.xlu0 %v2864_v24, %s2638_s23  ;;  %v1007_v34 = vrot.slane %v2864_v24, 1 }
  0xa1   : > { %842 = vrot.lane.b32.xlu1 %v2866_v25, %s2639_s25  ;;  %591 = vrot.lane.b32.xlu2 %v2866_v25, %s2638_s23  ;;  %v1019_v28 = vrot.slane %v2866_v25, 1 }
  0xa7   : > { %v2874_v2 = vpop.f32.mrf.mxu2  ;;  %v2902_v31 = vpop.f32.mrf.mxu0 }
  0xa8   : > { %v2876_v3 = vpop.f32.mrf.mxu3  ;;  %v2878_v26 = vpop.f32.mrf.mxu1  ;;  %v2919_v33 = vrot.slane %v2902_v31, 1 }
  0xa9   : > { %607 = vrot.lane.b32.xlu1 %v2874_v2, %s2638_s23  ;;  %826 = vrot.lane.b32.xlu2 %v2864_v24, %s2639_s25  ;;  %v2887_v27 = vrot.slane %v2878_v26, 1 }
  0xaa   : > { %623 = vrot.lane.b32.xlu0 %v2876_v3, %s2638_s23  ;;  %v2926_v36 = vsel %vm1006_vm1, %v1007_v34, %v2919_v33 }
  0xab   : > { %4338 = vst [vmem:[#allocation6_spill] sm:$0xff] %v2887_v27  ;;  %v2892_v29 = vsel %vm1006_vm1, %v1019_v28, %v2887_v27 }
  0xac   : > { %4339 = vst [vmem:[#allocation7_spill] sm:$0xff] %v2892_v29 }
  0xaf   : > { %v2910_v32 = vpop.f32.mrf.mxu2  ;;  %v2922_v35 = vpop.f32.mrf.mxu0 }
  0xb0   : > { %v2900_v30 = vpop.f32.mrf.mxu3  ;;  %v2934_v37 = vpop.f32.mrf.mxu1  ;;  %v1010_v48 = vrot.slane %v2922_v35, 1 }
  0xb1   : > { %1068 = vrot.lane.b32.xlu1 %v2892_v29, %s2640_s26  ;;  %874 = vrot.lane.b32.xlu2 %v2876_v3, %s2639_s25  ;;  %v1022_v42 = vrot.slane %v2934_v37, 1 }
  0xb2   : > { %858 = vrot.lane.b32.xlu0 %v2874_v2, %s2639_s25 }
  0xb7   : > { %v2950_v39 = vpop.f32.mrf.mxu2  ;;  %v2958_v40 = vpop.f32.mrf.mxu0 }
  0xb8   : > { %v2942_v38 = vpop.f32.mrf.mxu3  ;;  %v2960_v41 = vpop.f32.mrf.mxu1  ;;  %v2983_v45 = vrot.slane %v2958_v40, 1 }
  0xb9   : > { %625 = vrot.lane.b32.xlu1 %v2900_v30, %s2638_s23  ;;  %844 = vrot.lane.b32.xlu2 %v2878_v26, %s2639_s25  ;;  %v2970_v43 = vrot.slane %v2960_v41, 1 }
  0xba   : > { %577 = vrot.lane.b32.xlu0 %v2902_v31, %s2638_s23  ;;  %4342 = vst [vmem:[#allocation10_spill] sm:$0xff] %v2983_v45  ;;  %v2997_v49 = vsel %vm1006_vm1, %v1010_v48, %v2983_v45 }
  0xbb   : > { %4340 = vst [vmem:[#allocation8_spill] sm:$0xff] %v2970_v43  ;;  %v2974_v44 = vsel %vm1006_vm1, %v1022_v42, %v2970_v43 }
  0xbc   : > { %4341 = vst [vmem:[#allocation9_spill] sm:$0xff] %v2974_v44 }
  0xbd   : > { %4343 = vst [vmem:[#allocation11_spill] sm:$0xff] %v2997_v49 }
  0xbf   : > { %v2999_v50 = vpop.f32.mrf.mxu2  ;;  %v3009_v52 = vpop.f32.mrf.mxu0 }
  0xc0   : > { %v2985_v46 = vpop.f32.mrf.mxu3  ;;  %v3011_v53 = vpop.f32.mrf.mxu1  ;;  %v1013_v9 = vrot.slane %v3009_v52, 1 }
  0xc1   : > { %860 = vrot.lane.b32.xlu1 %v2910_v32, %s2639_s25  ;;  %1070 = vrot.lane.b32.xlu2 %v2887_v27, %s2640_s26  ;;  %v1025_v7 = vrot.slane %v3011_v53, 1 }
  0xc2   : > { %593 = vrot.lane.b32.xlu0 %v2878_v26, %s2638_s23 }
  0xc7   : > { %v3034_v59 = vpop.f32.mrf.mxu2  ;;  %v3050_v1 = vpop.f32.mrf.mxu0 }
  0xc8   : > { %v3021_v55 = vpop.f32.mrf.mxu3  ;;  %v3048_v0 = vpop.f32.mrf.mxu1  ;;  %v3070_v10 = vrot.slane %v3050_v1, 1 }
  0xc9   : > { %1052 = vrot.lane.b32.xlu2 %v2926_v36, %s2640_s26  ;;  %579 = vrot.lane.b32.xlu1 %v2922_v35, %s2638_s23  ;;  %v3066_v8 = vrot.slane %v3048_v0, 1 }
  0xca   : > { %828 = vrot.lane.b32.xlu0 %v2902_v31, %s2639_s25  ;;  %4345 = vst [vmem:[#allocation13_spill] sm:$0xff] %v3070_v10  ;;  %v3086_v14 = vsel %vm1006_vm1, %v1013_v9, %v3070_v10 }
  0xcb   : > { %4344 = vst [vmem:[#allocation12_spill] sm:$0xff] %v3066_v8  ;;  %v3076_v12 = vsel %vm1006_vm1, %v1025_v7, %v3066_v8 }
  0xcc   : > { %4346 = vst [vmem:[#allocation14_spill] sm:$0xff] %v3076_v12 }
  0xcd   : > { %4347 = vst [vmem:[#allocation15_spill] sm:$0xff] %v3086_v14 }
  0xcf   : > { %v3046_v63 = vpop.f32.mrf.mxu2  ;;  %v3101_v20 = vpop.f32.mrf.mxu0 }
  0xd0   : > { %v3078_v13 = vpop.f32.mrf.mxu1  ;;  %v3093_v18 = vpop.f32.mrf.mxu3 }
  0xd1   : > { %609 = vrot.lane.b32.xlu2 %v2910_v32, %s2638_s23  ;;  %595 = vrot.lane.b32.xlu1 %v2934_v37, %s2638_s23 }
  0xd2   : > { %1054 = vrot.lane.b32.xlu0 %v2919_v33, %s2640_s26 }
  0xd7   : > { %v3072_v11 = vpop.f32.mrf.mxu2 }
  0xd8   : > { %v3105_v21 = vpop.f32.mrf.mxu1 }
  0xd9   : > { %627 = vrot.lane.b32.xlu2 %v2942_v38, %s2638_s23  ;;  %830 = vrot.lane.b32.xlu1 %v2922_v35, %s2639_s25 }
  0xda   : > { %876 = vrot.lane.b32.xlu0 %v2900_v30, %s2639_s25 }
  0xdf   : > { %v3099_v19 = vpop.f32.mrf.mxu2 }
  0xe1   : > { %862 = vrot.lane.b32.xlu2 %v2950_v39, %s2639_s25  ;;  %878 = vrot.lane.b32.xlu1 %v2942_v38, %s2639_s25 }
  0xe2   : > { %846 = vrot.lane.b32.xlu0 %v2934_v37, %s2639_s25 }
  0xe9   : > { %597 = vrot.lane.b32.xlu2 %v2960_v41, %s2638_s23  ;;  %581 = vrot.lane.b32.xlu1 %v2958_v40, %s2638_s23 }
  0xea   : > { %611 = vrot.lane.b32.xlu0 %v2950_v39, %s2638_s23 }
  0xf1   : > { %832 = vrot.lane.b32.xlu2 %v2958_v40, %s2639_s25  ;;  %848 = vrot.lane.b32.xlu1 %v2960_v41, %s2639_s25 }
  0xf2   : > { %1072 = vrot.lane.b32.xlu0 %v2974_v44, %s2640_s26 }
  0xf9   : > { %1074 = vrot.lane.b32.xlu1 %v2970_v43, %s2640_s26  ;;  %1058 = vrot.lane.b32.xlu2 %v2983_v45, %s2640_s26 }
  0xfa   : > { %629 = vrot.lane.b32.xlu0 %v2985_v46, %s2638_s23 }
  0xfb   : > { %v592_v47 = vpop.permute.xlu2 %591 }
  0xfc   : > { %680 = vst.msk [vmem:[#allocation2 + $0x40] sm:$0xff] %vm671_vm2, %v592_v47 }
 0x101   : > { %880 = vrot.lane.b32.xlu2 %v2985_v46, %s2639_s25  ;;  %1056 = vrot.lane.b32.xlu1 %v2997_v49, %s2640_s26 }
 0x102   : > { %864 = vrot.lane.b32.xlu0 %v2999_v50, %s2639_s25 }
 0x103   : > { %v3007_v51 = vpop.permute.xlu2 %826 }
 0x109   : > { %613 = vrot.lane.b32.xlu1 %v2999_v50, %s2638_s23  ;;  %583 = vrot.lane.b32.xlu2 %v3009_v52, %s2638_s23 }
 0x10a   : > { %599 = vrot.lane.b32.xlu0 %v3011_v53, %s2638_s23 }
 0x10b   : > { %v3019_v54 = vpop.permute.xlu2 %874 }
 0x111   : > { %631 = vrot.lane.b32.xlu1 %v3021_v55, %s2638_s23  ;;  %850 = vrot.lane.b32.xlu2 %v3011_v53, %s2639_s25 }
 0x112   : > { %834 = vrot.lane.b32.xlu0 %v3009_v52, %s2639_s25  ;;  %v576_v56 = vpop.permute.xlu0 %575 }
 0x113   : > { %v3029_v57 = vpop.permute.xlu1 %842  ;;  %v3031_v58 = vpop.permute.xlu2 %844  ;;  %672 = vst.msk [vmem:[#allocation2] sm:$0xff] %vm671_vm2, %v576_v56 }
 0x119   : > { %866 = vrot.lane.b32.xlu1 %v3034_v59, %s2639_s25  ;;  %615 = vrot.lane.b32.xlu2 %v3034_v59, %s2638_s23 }
 0x11a   : > { %882 = vrot.lane.b32.xlu0 %v3021_v55, %s2639_s25 }
 0x11b   : > { %v608_v60 = vpop.permute.xlu1 %607  ;;  %v3042_v61 = vpop.permute.xlu2 %1070 }
 0x11c   : > { %688 = vst.msk [vmem:[#allocation2 + $0x80] sm:$0xff] %vm671_vm2, %v608_v60  ;;  %v624_v62 = vpop.permute.xlu0 %623 }
 0x11d   : > { %696 = vst.msk [vmem:[#allocation2 + $0xc0] sm:$0xff] %vm671_vm2, %v624_v62 }
 0x121   : > { %601 = vrot.lane.b32.xlu1 %v3048_v0, %s2638_s23  ;;  %585 = vrot.lane.b32.xlu2 %v3050_v1, %s2638_s23 }
 0x122   : > { %852 = vrot.lane.b32.xlu0 %v3048_v0, %s2639_s25 }
 0x123   : > { %v3058_v4 = vpop.permute.xlu1 %1068  ;;  %v3060_v5 = vpop.permute.xlu2 %1052 }
 0x124   : > { %v3062_v6 = vpop.permute.xlu0 %858 }
 0x129   : > { %836 = vrot.lane.b32.xlu1 %v3050_v1, %s2639_s25  ;;  %1076 = vrot.lane.b32.xlu2 %v3076_v12, %s2640_s26 }
 0x12a   : > { %1060 = vrot.lane.b32.xlu0 %v3086_v14, %s2640_s26 }
 0x12b   : > { %v626_v15 = vpop.permute.xlu1 %625  ;;  %v610_v16 = vpop.permute.xlu2 %609 }
 0x12c   : > { %697 = vst.msk [vmem:[#allocation2 + $0xc8] sm:$0xff] %vm671_vm2, %v626_v15  ;;  %v578_v17 = vpop.permute.xlu0 %577 }
 0x12d   : > { %673 = vst.msk [vmem:[#allocation2 + $0x8] sm:$0xff] %vm671_vm2, %v578_v17  ;;  %v3127_v17 = vpop.f32.mrf.mxu0 }
 0x12e   : > { %689 = vst.msk [vmem:[#allocation2 + $0x88] sm:$0xff] %vm671_vm2, %v610_v16 }
 0x131   : > { %633 = vrot.lane.b32.xlu2 %v3093_v18, %s2638_s23  ;;  %1062 = vrot.lane.b32.xlu1 %v3070_v10, %s2640_s26 }
 0x132   : > { %617 = vrot.lane.b32.xlu0 %v3046_v63, %s2638_s23 }
 0x133   : > { %v727_v22 = vld [vmem:[#allocation2 + $0xc1] sm:$0xff]  ;;  %v728_v23 = vld [vmem:[#allocation2 + $0xc9] sm:$0x7f]  ;;  %v3107_v28 = vpop.permute.xlu1 %860  ;;  %v628_v34 = vpop.permute.xlu2 %627 }
 0x134   : > { %v757_v42 = vadd.f32 %v727_v22, %v3072_v11  ;;  %v758_v47 = vadd.f32 %v728_v23, %v3099_v19  ;;  %v594_v48 = vpop.permute.xlu0 %593  ;;  %698 = vst.msk [vmem:[#allocation2 + $0xd0] sm:$0xff] %vm671_vm2, %v628_v34 }
 0x135   : > { %v719_v56 = vld [vmem:[#allocation2 + $0x81] sm:$0xff]  ;;  %v720_v60 = vld [vmem:[#allocation2 + $0x89] sm:$0x7f]  ;;  %681 = vst.msk [vmem:[#allocation2 + $0x48] sm:$0xff] %vm671_vm2, %v594_v48 }
 0x136   : > { %788 = vst.msk [vmem:[#allocation2 + $0xc1] sm:$0xff] %vm671_vm2, %v757_v42  ;;  %v749_v62 = vadd.f32 %v719_v56, %v3078_v13  ;;  %v750_v7 = vadd.f32 %v720_v60, %v3105_v21 }
 0x137   : > { %789 = vst.msk [vmem:[#allocation2 + $0xc9] sm:$0x7f] %vm766_vm3, %v758_v47  ;;  %v3136_v47 = vpop.f32.mrf.mxu3 }
 0x138   : > { %780 = vst.msk [vmem:[#allocation2 + $0x81] sm:$0xff] %vm671_vm2, %v749_v62 }
 0x139   : > { %781 = vst.msk [vmem:[#allocation2 + $0x89] sm:$0x7f] %vm766_vm3, %v750_v7  ;;  %868 = vrot.lane.b32.xlu2 %v3046_v63, %s2639_s25  ;;  %884 = vrot.lane.b32.xlu1 %v3093_v18, %s2639_s25 }
 0x13a   : > { %587 = vrot.lane.b32.xlu0 %v3101_v20, %s2638_s23 }
 0x13b   : > { %v3125_v9 = vpop.permute.xlu2 %862  ;;  %v580_v15 = vpop.permute.xlu1 %579 }
 0x13c   : > { %v711_v16 = vld [vmem:[#allocation2 + $0x41] sm:$0xff]  ;;  %v712_v22 = vld [vmem:[#allocation2 + $0x49] sm:$0x7f]  ;;  %v3129_v23 = vpop.permute.xlu0 %828  ;;  %674 = vst.msk [vmem:[#allocation2 + $0x10] sm:$0xff] %vm671_vm2, %v580_v15 }
 0x13d   : > { %v741_v34 = vadd.f32 %v711_v16, %v3101_v20  ;;  %v742_v42 = vadd.f32 %v712_v22, %v3127_v17 }
 0x13f   : > { %772 = vst.msk [vmem:[#allocation2 + $0x41] sm:$0xff] %vm671_vm2, %v741_v34 }
 0x140   : > { %773 = vst.msk [vmem:[#allocation2 + $0x49] sm:$0x7f] %vm766_vm3, %v742_v42 }
 0x141   : > { %603 = vrot.lane.b32.xlu2 %v3078_v13, %s2638_s23  ;;  %854 = vrot.lane.b32.xlu1 %v3078_v13, %s2639_s25 }
 0x142   : > { %635 = vrot.lane.b32.xlu0 %v3136_v47, %s2638_s23 }
 0x143   : > { %v598_v48 = vpop.permute.xlu2 %597  ;;  %v596_v56 = vpop.permute.xlu1 %595 }
 0x144   : > { %v3144_v60 = vpop.permute.xlu0 %1054  ;;  %683 = vst.msk [vmem:[#allocation2 + $0x58] sm:$0xff] %vm671_vm2, %v598_v48 }
 0x145   : > { %682 = vst.msk [vmem:[#allocation2 + $0x50] sm:$0xff] %vm671_vm2, %v596_v56 }
 0x149   : > { %619 = vrot.lane.b32.xlu1 %v3072_v11, %s2638_s23  ;;  %838 = vrot.lane.b32.xlu2 %v3101_v20, %s2639_s25 }
 0x14a   : > { %870 = vrot.lane.b32.xlu0 %v3072_v11, %s2639_s25 }
 0x14b   : > { %v714_v62 = vld [vmem:[#allocation2 + $0x59] sm:$0x7f]  ;;  %v3154_v7 = vpop.permute.xlu1 %830  ;;  %v3156_v15 = vpop.permute.xlu2 %832 }
 0x14c   : > { %v744_v16 = vadd.f32 %v714_v62, %v2878_v26  ;;  %v713_v22 = vld [vmem:[#allocation2 + $0x51] sm:$0xff]  ;;  %v3159_v34 = vpop.permute.xlu0 %876 }
 0x14d   : > { %v743_v42 = vadd.f32 %v713_v22, %v2866_v25  ;;  %v3177_v22 = vrot.slane %v3105_v21, 1 }
 0x14e   : > { %775 = vst.msk [vmem:[#allocation2 + $0x59] sm:$0x7f] %vm766_vm3, %v744_v16  ;;  %v1028_v16 = vrot.slane %v3078_v13, 1 }
 0x14f   : > { %774 = vst.msk [vmem:[#allocation2 + $0x51] sm:$0xff] %vm671_vm2, %v743_v42 }
 0x150   : > { %4348 = vst [vmem:[#allocation16_spill] sm:$0xff] %v3177_v22  ;;  %v3184_v44 = vsel %vm1006_vm1, %v1028_v16, %v3177_v22  ;;  %v3202_v16 = vpop.f32.mrf.mxu3 }
 0x151   : > { %856 = vrot.lane.b32.xlu2 %v3105_v21, %s2639_s25  ;;  %589 = vrot.lane.b32.xlu1 %v3127_v17, %s2638_s23  ;;  %4349 = vst [vmem:[#allocation17_spill] sm:$0xff] %v3184_v44 }
 0x152   : > { %605 = vrot.lane.b32.xlu0 %v3105_v21, %s2638_s23  ;;  %4351 = vst [vmem:[#allocation19_spill] sm:$0xff] %v3202_v16 }
 0x153   : > { %v3170_v48 = vpop.permute.xlu1 %878  ;;  %v3172_v56 = vpop.permute.xlu2 %1058 }
 0x154   : > { %v3174_v62 = vpop.permute.xlu0 %846 }
 0x156   : > { %v804_v42 = vld [vmem:[#allocation2 + $0x50] sm:$0xff]  ;;  %v805_v43 = vld [vmem:[#allocation2 + $0x58] sm:$0xff] }
 0x157   : > { %v924_v12 = vadd.f32 %v3029_v57, %v804_v42  ;;  %v925_v29 = vadd.f32 %v3031_v58, %v805_v43  ;;  %v3198_v58 = vrot.slane %v3127_v17, 1 }
 0x159   : > { %954 = vst.msk [vmem:[#allocation2 + $0x50] sm:$0xff] %vm671_vm2, %v924_v12  ;;  %1082 = vrot.lane.b32.xlu2 %v3177_v22, %s2640_s26  ;;  %1080 = vrot.lane.b32.xlu1 %v3184_v44, %s2640_s26  ;;  %v1016_v12 = vrot.slane %v3101_v20, 1 }
 0x15a   : > { %955 = vst.msk [vmem:[#allocation2 + $0x58] sm:$0xff] %vm671_vm2, %v925_v29  ;;  %840 = vrot.lane.b32.xlu0 %v3127_v17, %s2639_s25 }
 0x15b   : > { %v582_v57 = vpop.permute.xlu1 %581  ;;  %v3194_v42 = vpop.permute.xlu2 %880  ;;  %4350 = vst [vmem:[#allocation18_spill] sm:$0xff] %v3198_v58  ;;  %v3206_v29 = vsel %vm1006_vm1, %v1016_v12, %v3198_v58 }
 0x15c   : > { %v612_v43 = vpop.permute.xlu0 %611  ;;  %675 = vst.msk [vmem:[#allocation2 + $0x18] sm:$0xff] %vm671_vm2, %v582_v57 }
 0x15d   : > { %690 = vst.msk [vmem:[#allocation2 + $0x90] sm:$0xff] %vm671_vm2, %v612_v43 }
 0x15e   : > { %4352 = vst [vmem:[#allocation20_spill] sm:$0xff] %v3206_v29 }
 0x160   : > { %v984_v44 = vld [vmem:[#allocation2 + $0x50] sm:$0xff] }
 0x161   : > { %v985_v22 = vld [vmem:[#allocation2 + $0x58] sm:$0x7f]  ;;  %v1150_v27 = vadd.f32 %v3058_v4, %v984_v44  ;;  %637 = vrot.lane.b32.xlu1 %v3202_v16, %s2638_s23  ;;  %1064 = vrot.lane.b32.xlu2 %v3206_v29, %s2640_s26 }
 0x162   : > { %v1151_v57 = vadd.f32 %v3042_v61, %v985_v22  ;;  %1066 = vrot.lane.b32.xlu0 %v3198_v58, %s2640_s26  ;;  %v3239_v22 = vrot.slane %v2999_v50, 1  ;;  %v1031_v58 = vrot.slane %v2874_v2, 1 }
 0x163   : > { %1180 = vst.msk [vmem:[#allocation2 + $0x50] sm:$0xff] %vm671_vm2, %v1150_v27  ;;  %v705_v43 = vld [vmem:[#allocation2 + $0x11] sm:$0xff]  ;;  %v706_v10 = vld [vmem:[#allocation2 + $0x19] sm:$0x7f]  ;;  %v3217_v12 = vpop.permute.xlu1 %848  ;;  %v584_v49 = vpop.permute.xlu2 %583 }
 0x164   : > { %1181 = vst.msk [vmem:[#allocation2 + $0x58] sm:$0x7f] %vm766_vm3, %v1151_v57  ;;  %v735_v44 = vadd.f32 %v705_v43, %v2864_v24  ;;  %v736_v4 = vadd.f32 %v706_v10, %v2902_v31  ;;  %v3222_v14 = vpop.permute.xlu0 %1072  ;;  %v3243_v43 = vrot.slane %v2910_v32, 1 }
 0x165   : > { %676 = vst.msk [vmem:[#allocation2 + $0x20] sm:$0xff] %vm671_vm2, %v584_v49  ;;  %v1034_v49 = vrot.slane %v2950_v39, 1 }
 0x166   : > { %765 = vst.msk [vmem:[#allocation2 + $0x11] sm:$0xff] %vm671_vm2, %v735_v44 }
 0x167   : > { %767 = vst.msk [vmem:[#allocation2 + $0x19] sm:$0x7f] %vm766_vm3, %v736_v4  ;;  %v3251_v29 = vsel %vm1006_vm1, %v1034_v49, %v3239_v22 }
 0x168   : > { %4353 = vst [vmem:[#allocation21_spill] sm:$0xff] %v3243_v43 }
 0x169   : > { %872 = vrot.lane.b32.xlu1 %v3099_v19, %s2639_s25  ;;  %621 = vrot.lane.b32.xlu2 %v3099_v19, %s2638_s23  ;;  %4354 = vst [vmem:[#allocation22_spill] sm:$0xff] %v3251_v29  ;;  %s2389_s23 = scalar_lea.hbm %s4282_s5, %s2512_s15  ;;  %s225_s25 = scalar_lea.vmem [#allocation3], %s2482_s14 }
 0x16a   : > { %1078 = vrot.lane.b32.xlu0 %v3066_v8, %s2640_s26 }
 0x16b   : > { %v3233_v27 = vpop.permute.xlu1 %1074  ;;  %v3235_v61 = vpop.permute.xlu2 %850 }
 0x16c   : > { %v630_v10 = vpop.permute.xlu0 %629 }
 0x16d   : > { %v796_v57 = vld [vmem:[#allocation2 + $0x10] sm:$0xff]  ;;  %699 = vst.msk [vmem:[#allocation2 + $0xd8] sm:$0xff] %vm671_vm2, %v630_v10  ;;  %v3258_v10 = vsel %vm1006_vm1, %v1031_v58, %v3243_v43  ;;  %v3271_v58 = vrot.slane %v3046_v63, 1 }
 0x16e   : > { %v797_v44 = vld [vmem:[#allocation2 + $0x18] sm:$0xff]  ;;  %v916_v4 = vadd.f32 %v3007_v51, %v796_v57  ;;  %4355 = vst [vmem:[#allocation23_spill] sm:$0xff] %v3258_v10 }
 0x16f   : > { %v917_v8 = vadd.f32 %v3129_v23, %v797_v44  ;;  %4356 = vst [vmem:[#allocation24_spill] sm:$0xff] %v3271_v58 }
 0x170   : > { %946 = vst.msk [vmem:[#allocation2 + $0x10] sm:$0xff] %vm671_vm2, %v916_v4 }
 0x171   : > { %947 = vst.msk [vmem:[#allocation2 + $0x18] sm:$0xff] %vm671_vm2, %v917_v8  ;;  %1086 = vrot.lane.b32.xlu1 %v3243_v43, %s2640_s26  ;;  %1088 = vrot.lane.b32.xlu2 %v3251_v29, %s2640_s26  ;;  %v1037_v8 = vrot.slane %v3034_v59, 1 }
 0x172   : > { %1084 = vrot.lane.b32.xlu0 %v3258_v10, %s2640_s26 }
 0x173   : > { %v3264_v51 = vpop.permute.xlu1 %1056  ;;  %v616_v23 = vpop.permute.xlu2 %615 }
 0x174   : > { %v729_v49 = vld [vmem:[#allocation2 + $0xd1] sm:$0xff]  ;;  %v730_v57 = vld [vmem:[#allocation2 + $0xd9] sm:$0x7f]  ;;  %v3266_v44 = vpop.permute.xlu0 %864  ;;  %692 = vst.msk [vmem:[#allocation2 + $0xa0] sm:$0xff] %vm671_vm2, %v616_v23  ;;  %v3280_v23 = vsel %vm1006_vm1, %v1037_v8, %v3271_v58 }
 0x175   : > { %v759_v4 = vadd.f32 %v729_v49, %v2876_v3  ;;  %v760_v43 = vadd.f32 %v730_v57, %v2900_v30  ;;  %4357 = vst [vmem:[#allocation25_spill] sm:$0xff] %v3280_v23 }
 0x177   : > { %v976_v29 = vld [vmem:[#allocation2 + $0x10] sm:$0xff]  ;;  %790 = vst.msk [vmem:[#allocation2 + $0xd1] sm:$0xff] %vm671_vm2, %v759_v4 }
 0x178   : > { %v977_v10 = vld [vmem:[#allocation2 + $0x18] sm:$0x7f]  ;;  %v1142_v45 = vadd.f32 %v3060_v5, %v976_v29  ;;  %791 = vst.msk [vmem:[#allocation2 + $0xd9] sm:$0x7f] %vm766_vm3, %v760_v43 }
 0x179   : > { %v1143_v16 = vadd.f32 %v3144_v60, %v977_v10  ;;  %1092 = vrot.lane.b32.xlu1 %v3280_v23, %s2640_s26  ;;  %1094 = vrot.lane.b32.xlu2 %v3271_v58, %s2640_s26  ;;  %v3293_v60 = vrot.slane %v2900_v30, 1  ;;  %v3297_v10 = vrot.slane %v3099_v19, 1 }
 0x17a   : > { %1172 = vst.msk [vmem:[#allocation2 + $0x10] sm:$0xff] %vm671_vm2, %v1142_v45  ;;  %1090 = vrot.lane.b32.xlu0 %v3239_v22, %s2640_s26  ;;  %v1040_v45 = vrot.slane %v3072_v11, 1 }
 0x17b   : > { %1173 = vst.msk [vmem:[#allocation2 + $0x18] sm:$0x7f] %vm766_vm3, %v1143_v16  ;;  %v614_v5 = vpop.permute.xlu1 %613  ;;  %v586_v29 = vpop.permute.xlu2 %585  ;;  %v1043_v16 = vrot.slane %v2876_v3, 1 }
 0x17c   : > { %v600_v43 = vpop.permute.xlu0 %599  ;;  %691 = vst.msk [vmem:[#allocation2 + $0x98] sm:$0xff] %vm671_vm2, %v614_v5 }
 0x17d   : > { %4358 = vst [vmem:[#allocation26_spill] sm:$0xff] %v3293_v60  ;;  %v3306_v5 = vsel %vm1006_vm1, %v1043_v16, %v3293_v60 }
 0x17e   : > { %684 = vst.msk [vmem:[#allocation2 + $0x60] sm:$0xff] %vm671_vm2, %v600_v43  ;;  %v820_v49 = vld [vmem:[#allocation2 + $0xd0] sm:$0xff]  ;;  %v3313_v43 = vsel %vm1006_vm1, %v1040_v45, %v3297_v10 }
 0x17f   : > { %4359 = vst [vmem:[#allocation27_spill] sm:$0xff] %v3297_v10  ;;  %v821_v57 = vld [vmem:[#allocation2 + $0xd8] sm:$0xff]  ;;  %v940_v8 = vadd.f32 %v3019_v54, %v820_v49 }
 0x180   : > { %677 = vst.msk [vmem:[#allocation2 + $0x28] sm:$0xff] %vm671_vm2, %v586_v29  ;;  %v941_v4 = vadd.f32 %v3159_v34, %v821_v57 }
 0x181   : > { %4360 = vst [vmem:[#allocation28_spill] sm:$0xff] %v3306_v5  ;;  %1098 = vrot.lane.b32.xlu1 %v3297_v10, %s2640_s26  ;;  %1100 = vrot.lane.b32.xlu2 %v3306_v5, %s2640_s26 }
 0x182   : > { %970 = vst.msk [vmem:[#allocation2 + $0xd0] sm:$0xff] %vm671_vm2, %v940_v8  ;;  %1096 = vrot.lane.b32.xlu0 %v3313_v43, %s2640_s26  ;;  %v1046_v8 = vrot.slane %v2942_v38, 1 }
 0x183   : > { %4361 = vst [vmem:[#allocation29_spill] sm:$0xff] %v3313_v43  ;;  %v721_v54 = vld [vmem:[#allocation2 + $0x91] sm:$0xff]  ;;  %v722_v34 = vld [vmem:[#allocation2 + $0x99] sm:$0x7f]  ;;  %v632_v29 = vpop.permute.xlu1 %631  ;;  %v3320_v49 = vpop.permute.xlu2 %1076 }
 0x184   : > { %971 = vst.msk [vmem:[#allocation2 + $0xd8] sm:$0xff] %vm671_vm2, %v941_v4  ;;  %v751_v16 = vadd.f32 %v721_v54, %v2874_v2  ;;  %v752_v57 = vadd.f32 %v722_v34, %v2910_v32  ;;  %v3325_v45 = vpop.permute.xlu0 %834  ;;  %v3329_v4 = vrot.slane %v2985_v46, 1 }
 0x185   : > { %700 = vst.msk [vmem:[#allocation2 + $0xe0] sm:$0xff] %vm671_vm2, %v632_v29  ;;  %v3353_v29 = vrot.slane %v3093_v18, 1 }
 0x186   : > { %4362 = vst [vmem:[#allocation30_spill] sm:$0xff] %v3329_v4  ;;  %v3338_v54 = vsel %vm1006_vm1, %v1046_v8, %v3329_v4 }
 0x187   : > { %v707_v10 = vld [vmem:[#allocation2 + $0x21] sm:$0xff]  ;;  %v708_v5 = vld [vmem:[#allocation2 + $0x29] sm:$0x7f]  ;;  %782 = vst.msk [vmem:[#allocation2 + $0x91] sm:$0xff] %vm671_vm2, %v751_v16 }
 0x188   : > { %v737_v23 = vadd.f32 %v707_v10, %v2922_v35  ;;  %v738_v43 = vadd.f32 %v708_v5, %v2958_v40  ;;  %783 = vst.msk [vmem:[#allocation2 + $0x99] sm:$0x7f] %vm766_vm3, %v752_v57 }
 0x189   : > { %4363 = vst [vmem:[#allocation31_spill] sm:$0xff] %v3338_v54  ;;  %1104 = vrot.lane.b32.xlu1 %v3338_v54, %s2640_s26  ;;  %1106 = vrot.lane.b32.xlu2 %v3329_v4, %s2640_s26 }
 0x18a   : > { %768 = vst.msk [vmem:[#allocation2 + $0x21] sm:$0xff] %vm671_vm2, %v737_v23  ;;  %1102 = vrot.lane.b32.xlu0 %v3293_v60, %s2640_s26 }
 0x18b   : > { %769 = vst.msk [vmem:[#allocation2 + $0x29] sm:$0x7f] %vm766_vm3, %v738_v43  ;;  %v3347_v10 = vpop.permute.xlu1 %866  ;;  %v634_v5 = vpop.permute.xlu2 %633  ;;  %v1049_v43 = vrot.slane %v3021_v55, 1 }
 0x18c   : > { %v3349_v34 = vpop.permute.xlu0 %882  ;;  %701 = vst.msk [vmem:[#allocation2 + $0xe8] sm:$0xff] %vm671_vm2, %v634_v5 }
 0x18d   : > { %4364 = vst [vmem:[#allocation32_spill] sm:$0xff] %v3353_v29  ;;  %v3366_v58 = vsel %vm1006_vm1, %v1049_v43, %v3353_v29 }
 0x18e   : > { %v812_v23 = vld [vmem:[#allocation2 + $0x90] sm:$0xff] }
 0x18f   : > { %v813_v16 = vld [vmem:[#allocation2 + $0x98] sm:$0xff]  ;;  %v932_v57 = vadd.f32 %v3062_v6, %v812_v23 }
 0x190   : > { %v933_v8 = vadd.f32 %v3107_v28, %v813_v16 }
 0x191   : > { %v798_v54 = vld [vmem:[#allocation2 + $0x20] sm:$0xff]  ;;  %962 = vst.msk [vmem:[#allocation2 + $0x90] sm:$0xff] %vm671_vm2, %v932_v57  ;;  %1110 = vrot.lane.b32.xlu1 %v3353_v29, %s2640_s26  ;;  %1234 = vrot.lane.b32.xlu2 %v2864_v24, %s2641_s30 }
 0x192   : > { %v799_v4 = vld [vmem:[#allocation2 + $0x28] sm:$0xff]  ;;  %v918_v60 = vadd.f32 %v3154_v7, %v798_v54  ;;  %963 = vst.msk [vmem:[#allocation2 + $0x98] sm:$0xff] %vm671_vm2, %v933_v8  ;;  %1108 = vrot.lane.b32.xlu0 %v3366_v58, %s2640_s26  ;;  %s2391_s26 = sshll.u32 %s225_s25, 4  ;;  %s2392_s26 = int_to_ptr.vmem [resolvable:$true] %s2391_s26 }
 0x193   : > { %v919_v5 = vadd.f32 %v3156_v15, %v799_v4  ;;  %v731_v6 = vld [vmem:[#allocation2 + $0xe1] sm:$0xff]  ;;  %v732_v28 = vld [vmem:[#allocation2 + $0xe9] sm:$0x7f]  ;;  %v602_v7 = vpop.permute.xlu1 %601  ;;  %v3374_v15 = vpop.permute.xlu2 %868 }
 0x194   : > { %948 = vst.msk [vmem:[#allocation2 + $0x20] sm:$0xff] %vm671_vm2, %v918_v60  ;;  %v761_v4 = vadd.f32 %v731_v6, %v2942_v38  ;;  %v762_v54 = vadd.f32 %v732_v28, %v2985_v46  ;;  %v3379_v23 = vpop.permute.xlu0 %852 }
 0x195   : > { %949 = vst.msk [vmem:[#allocation2 + $0x28] sm:$0xff] %vm671_vm2, %v919_v5 }
 0x196   : > { %685 = vst.msk [vmem:[#allocation2 + $0x68] sm:$0xff] %vm671_vm2, %v602_v7 }
 0x197   : > { %792 = vst.msk [vmem:[#allocation2 + $0xe1] sm:$0xff] %vm671_vm2, %v761_v4 }
 0x198   : > { %793 = vst.msk [vmem:[#allocation2 + $0xe9] sm:$0x7f] %vm766_vm3, %v762_v54 }
 0x199   : > { %1238 = vrot.lane.b32.xlu1 %v2922_v35, %s2641_s30  ;;  %1240 = vrot.lane.b32.xlu2 %v2958_v40, %s2641_s30 }
 0x19a   : > { %1236 = vrot.lane.b32.xlu0 %v2902_v31, %s2641_s30 }
 0x19b   : > { %v978_v24 = vld [vmem:[#allocation2 + $0x20] sm:$0xff]  ;;  %v3391_v5 = vpop.permute.xlu1 %836  ;;  %v604_v6 = vpop.permute.xlu2 %603 }
 0x19c   : > { %v979_v60 = vld [vmem:[#allocation2 + $0x28] sm:$0x7f]  ;;  %v1144_v43 = vadd.f32 %v3264_v51, %v978_v24  ;;  %v3396_v4 = vpop.permute.xlu0 %1060  ;;  %686 = vst.msk [vmem:[#allocation2 + $0x70] sm:$0xff] %vm671_vm2, %v604_v6  ;;  %v802_v24 = vld [vmem:[#allocation2 + $0x40] sm:$0xff] }
 0x19d   : > { %v1145_v16 = vadd.f32 %v3172_v56, %v979_v60  ;;  %v715_v57 = vld [vmem:[#allocation2 + $0x61] sm:$0xff]  ;;  %v716_v8 = vld [vmem:[#allocation2 + $0x69] sm:$0x7f] }
 0x19e   : > { %1174 = vst.msk [vmem:[#allocation2 + $0x20] sm:$0xff] %vm671_vm2, %v1144_v43  ;;  %v745_v28 = vadd.f32 %v715_v57, %v2934_v37  ;;  %v746_v7 = vadd.f32 %v716_v8, %v2960_v41  ;;  %v822_v51 = vld [vmem:[#allocation2 + $0xe0] sm:$0xff] }
 0x19f   : > { %1175 = vst.msk [vmem:[#allocation2 + $0x28] sm:$0x7f] %vm766_vm3, %v1145_v16  ;;  %v823_v54 = vld [vmem:[#allocation2 + $0xe8] sm:$0xff]  ;;  %v942_v31 = vadd.f32 %v3170_v48, %v822_v51 }
 0x1a0   : > { %776 = vst.msk [vmem:[#allocation2 + $0x61] sm:$0xff] %vm671_vm2, %v745_v28  ;;  %v943_v56 = vadd.f32 %v3194_v42, %v823_v54 }
 0x1a1   : > { %777 = vst.msk [vmem:[#allocation2 + $0x69] sm:$0x7f] %vm766_vm3, %v746_v7  ;;  %1244 = vrot.lane.b32.xlu1 %v3050_v1, %s2641_s30  ;;  %1246 = vrot.lane.b32.xlu2 %v3101_v20, %s2641_s30 }
 0x1a2   : > { %973 = vst.msk [vmem:[#allocation2 + $0xe8] sm:$0xff] %vm671_vm2, %v943_v56  ;;  %1242 = vrot.lane.b32.xlu0 %v3009_v52, %s2641_s30 }
 0x1a3   : > { %972 = vst.msk [vmem:[#allocation2 + $0xe0] sm:$0xff] %vm671_vm2, %v942_v31  ;;  %v3412_v48 = vpop.permute.xlu1 %1062  ;;  %v839_v42 = vpop.permute.xlu2 %838 }
 0x1a4   : > { %v618_v60 = vpop.permute.xlu0 %617  ;;  %v922_v43 = vadd.f32 %v839_v42, %v802_v24 }
 0x1a5   : > { %693 = vst.msk [vmem:[#allocation2 + $0xa8] sm:$0xff] %vm671_vm2, %v618_v60 }
 0x1a6   : > { %952 = vst.msk [vmem:[#allocation2 + $0x40] sm:$0xff] %vm671_vm2, %v922_v43 }
 0x1a7   : > { %v806_v16 = vld [vmem:[#allocation2 + $0x60] sm:$0xff] }
 0x1a8   : > { %v807_v57 = vld [vmem:[#allocation2 + $0x68] sm:$0xff]  ;;  %v926_v8 = vadd.f32 %v3174_v62, %v806_v16 }
 0x1a9   : > { %v927_v6 = vadd.f32 %v3217_v12, %v807_v57  ;;  %1250 = vrot.lane.b32.xlu1 %v2866_v25, %s2641_s30  ;;  %1252 = vrot.lane.b32.xlu2 %v2878_v26, %s2641_s30  ;;  %v811_v62 = vld [vmem:[#allocation2 + $0x88] sm:$0xff]  ;;  %v810_v57 = vld [vmem:[#allocation2 + $0x80] sm:$0xff] }
 0x1aa   : > { %956 = vst.msk [vmem:[#allocation2 + $0x60] sm:$0xff] %vm671_vm2, %v926_v8  ;;  %1248 = vrot.lane.b32.xlu0 %v3127_v17, %s2641_s30 }
 0x1ab   : > { %957 = vst.msk [vmem:[#allocation2 + $0x68] sm:$0xff] %vm671_vm2, %v927_v6  ;;  %v3426_v28 = vpop.permute.xlu1 %884  ;;  %v857_v7 = vpop.permute.xlu2 %856 }
 0x1ac   : > { %v723_v51 = vld [vmem:[#allocation2 + $0xa1] sm:$0xff]  ;;  %v724_v54 = vld [vmem:[#allocation2 + $0xa9] sm:$0x7f]  ;;  %v931_v12 = vadd.f32 %v857_v7, %v811_v62  ;;  %v588_v31 = vpop.permute.xlu0 %587 }
 0x1ad   : > { %v753_v56 = vadd.f32 %v723_v51, %v2950_v39  ;;  %v754_v42 = vadd.f32 %v724_v54, %v2999_v50  ;;  %678 = vst.msk [vmem:[#allocation2 + $0x30] sm:$0xff] %vm671_vm2, %v588_v31 }
 0x1ae   : > { %961 = vst.msk [vmem:[#allocation2 + $0x88] sm:$0xff] %vm671_vm2, %v931_v12 }
 0x1af   : > { %784 = vst.msk [vmem:[#allocation2 + $0xa1] sm:$0xff] %vm671_vm2, %v753_v56 }
 0x1b0   : > { %785 = vst.msk [vmem:[#allocation2 + $0xa9] sm:$0x7f] %vm766_vm3, %v754_v42  ;;  %v982_v42 = vld [vmem:[#allocation2 + $0x40] sm:$0xff] }
 0x1b1   : > { %v986_v24 = vld [vmem:[#allocation2 + $0x60] sm:$0xff]  ;;  %1256 = vrot.lane.b32.xlu1 %v2960_v41, %s2641_s30  ;;  %1258 = vrot.lane.b32.xlu2 %v3011_v53, %s2641_s30 }
 0x1b2   : > { %v1152_v60 = vadd.f32 %v3222_v14, %v986_v24  ;;  %v987_v43 = vld [vmem:[#allocation2 + $0x68] sm:$0x7f]  ;;  %1254 = vrot.lane.b32.xlu0 %v2934_v37, %s2641_s30 }
 0x1b3   : > { %v1153_v16 = vadd.f32 %v3233_v27, %v987_v43  ;;  %v855_v8 = vpop.permute.xlu1 %854  ;;  %v1083_v6 = vpop.permute.xlu2 %1082 }
 0x1b4   : > { %1182 = vst.msk [vmem:[#allocation2 + $0x60] sm:$0xff] %vm671_vm2, %v1152_v60  ;;  %v930_v14 = vadd.f32 %v855_v8, %v810_v57  ;;  %v636_v62 = vpop.permute.xlu0 %635 }
 0x1b5   : > { %1183 = vst.msk [vmem:[#allocation2 + $0x68] sm:$0x7f] %vm766_vm3, %v1153_v16  ;;  %v991_v7 = vld [vmem:[#allocation2 + $0x88] sm:$0x7f] }
 0x1b6   : > { %702 = vst.msk [vmem:[#allocation2 + $0xf0] sm:$0xff] %vm671_vm2, %v636_v62  ;;  %v814_v51 = vld [vmem:[#allocation2 + $0xa0] sm:$0xff]  ;;  %v1157_v54 = vadd.f32 %v1083_v6, %v991_v7 }
 0x1b7   : > { %960 = vst.msk [vmem:[#allocation2 + $0x80] sm:$0xff] %vm671_vm2, %v930_v14  ;;  %v815_v27 = vld [vmem:[#allocation2 + $0xa8] sm:$0xff]  ;;  %v934_v12 = vadd.f32 %v3125_v9, %v814_v51 }
 0x1b8   : > { %v935_v31 = vadd.f32 %v3266_v44, %v815_v27  ;;  %1187 = vst.msk [vmem:[#allocation2 + $0x88] sm:$0x7f] %vm766_vm3, %v1157_v54  ;;  %v818_v44 = vld [vmem:[#allocation2 + $0xc0] sm:$0xff] }
 0x1b9   : > { %964 = vst.msk [vmem:[#allocation2 + $0xa0] sm:$0xff] %vm671_vm2, %v934_v12  ;;  %1262 = vrot.lane.b32.xlu1 %v3078_v13, %s2641_s30  ;;  %1264 = vrot.lane.b32.xlu2 %v3105_v21, %s2641_s30 }
 0x1ba   : > { %965 = vst.msk [vmem:[#allocation2 + $0xa8] sm:$0xff] %vm671_vm2, %v935_v31  ;;  %1260 = vrot.lane.b32.xlu0 %v3048_v0, %s2641_s30 }
 0x1bb   : > { %v620_v56 = vpop.permute.xlu1 %619  ;;  %v1065_v9 = vpop.permute.xlu2 %1064 }
 0x1bc   : > { %694 = vst.msk [vmem:[#allocation2 + $0xb0] sm:$0xff] %vm671_vm2, %v620_v56  ;;  %v871_v24 = vpop.permute.xlu0 %870  ;;  %v1148_v60 = vadd.f32 %v1065_v9, %v982_v42 }
 0x1bd   : > { %v938_v43 = vadd.f32 %v871_v24, %v818_v44 }
 0x1be   : > { %1178 = vst.msk [vmem:[#allocation2 + $0x40] sm:$0xff] %vm671_vm2, %v1148_v60 }
 0x1bf   : > { %968 = vst.msk [vmem:[#allocation2 + $0xc0] sm:$0xff] %vm671_vm2, %v938_v43  ;;  %v803_v43 = vld [vmem:[#allocation2 + $0x48] sm:$0xff] }
 0x1c1   : > { %1268 = vrot.lane.b32.xlu1 %v2910_v32, %s2641_s30  ;;  %1270 = vrot.lane.b32.xlu2 %v2950_v39, %s2641_s30 }
 0x1c2   : > { %1266 = vrot.lane.b32.xlu0 %v2874_v2, %s2641_s30 }
 0x1c3   : > { %v590_v16 = vpop.permute.xlu1 %589  ;;  %v622_v57 = vpop.permute.xlu2 %621 }
 0x1c4   : > { %v606_v8 = vpop.permute.xlu0 %605  ;;  %679 = vst.msk [vmem:[#allocation2 + $0x38] sm:$0xff] %vm671_vm2, %v590_v16 }
 0x1c5   : > { %687 = vst.msk [vmem:[#allocation2 + $0x78] sm:$0xff] %vm671_vm2, %v606_v8 }
 0x1c6   : > { %695 = vst.msk [vmem:[#allocation2 + $0xb8] sm:$0xff] %vm671_vm2, %v622_v57  ;;  %v990_v57 = vld [vmem:[#allocation2 + $0x80] sm:$0xff] }
 0x1c9   : > { %1274 = vrot.lane.b32.xlu1 %v3034_v59, %s2641_s30  ;;  %1276 = vrot.lane.b32.xlu2 %v3046_v63, %s2641_s30 }
 0x1ca   : > { %1272 = vrot.lane.b32.xlu0 %v2999_v50, %s2641_s30 }
 0x1cb   : > { %v709_v6 = vld [vmem:[#allocation2 + $0x31] sm:$0xff]  ;;  %v710_v14 = vld [vmem:[#allocation2 + $0x39] sm:$0x7f]  ;;  %v1081_v62 = vpop.permute.xlu1 %1080  ;;  %v1089_v7 = vpop.permute.xlu2 %1088 }
 0x1cc   : > { %v717_v51 = vld [vmem:[#allocation2 + $0x71] sm:$0xff]  ;;  %v718_v54 = vld [vmem:[#allocation2 + $0x79] sm:$0x7f]  ;;  %v739_v27 = vadd.f32 %v709_v6, %v3009_v52  ;;  %v841_v12 = vpop.permute.xlu0 %840  ;;  %v740_v42 = vadd.f32 %v710_v14, %v3050_v1  ;;  %v1156_v8 = vadd.f32 %v1081_v62, %v990_v57  ;;  %v994_v6 = vld [vmem:[#allocation2 + $0xa0] sm:$0xff] }
 0x1cd   : > { %v747_v31 = vadd.f32 %v717_v51, %v3011_v53  ;;  %v748_v56 = vadd.f32 %v718_v54, %v3048_v0  ;;  %v725_v9 = vld [vmem:[#allocation2 + $0xb1] sm:$0xff]  ;;  %v726_v44 = vld [vmem:[#allocation2 + $0xb9] sm:$0x7f]  ;;  %v923_v16 = vadd.f32 %v841_v12, %v803_v43  ;;  %v1160_v14 = vadd.f32 %v1089_v7, %v994_v6 }
 0x1ce   : > { %770 = vst.msk [vmem:[#allocation2 + $0x31] sm:$0xff] %vm671_vm2, %v739_v27  ;;  %v755_v24 = vadd.f32 %v725_v9, %v3034_v59  ;;  %v756_v60 = vadd.f32 %v726_v44, %v3046_v63 }
 0x1cf   : > { %778 = vst.msk [vmem:[#allocation2 + $0x71] sm:$0xff] %vm671_vm2, %v747_v31 }
 0x1d0   : > { %779 = vst.msk [vmem:[#allocation2 + $0x79] sm:$0x7f] %vm766_vm3, %v748_v56 }
 0x1d1   : > { %771 = vst.msk [vmem:[#allocation2 + $0x39] sm:$0x7f] %vm766_vm3, %v740_v42  ;;  %1280 = vrot.lane.b32.xlu1 %v3099_v19, %s2641_s30  ;;  %1282 = vrot.lane.b32.xlu2 %v2876_v3, %s2641_s30 }
 0x1d2   : > { %786 = vst.msk [vmem:[#allocation2 + $0xb1] sm:$0xff] %vm671_vm2, %v755_v24  ;;  %1278 = vrot.lane.b32.xlu0 %v3072_v11, %s2641_s30 }
 0x1d3   : > { %787 = vst.msk [vmem:[#allocation2 + $0xb9] sm:$0x7f] %vm766_vm3, %v756_v60  ;;  %v638_v51 = vpop.permute.xlu1 %637  ;;  %v3493_v54 = vpop.permute.xlu2 %1094  ;;  %v819_v60 = vld [vmem:[#allocation2 + $0xc8] sm:$0xff] }
 0x1d4   : > { %953 = vst.msk [vmem:[#allocation2 + $0x48] sm:$0xff] %vm671_vm2, %v923_v16  ;;  %v1067_v62 = vpop.permute.xlu0 %1066  ;;  %v1000_v16 = vld [vmem:[#allocation2 + $0xd0] sm:$0xff] }
 0x1d5   : > { %v800_v27 = vld [vmem:[#allocation2 + $0x30] sm:$0xff]  ;;  %1186 = vst.msk [vmem:[#allocation2 + $0x80] sm:$0xff] %vm671_vm2, %v1156_v8 }
 0x1d6   : > { %v808_v12 = vld [vmem:[#allocation2 + $0x70] sm:$0xff]  ;;  %v920_v31 = vadd.f32 %v3325_v45, %v800_v27  ;;  %1190 = vst.msk [vmem:[#allocation2 + $0xa0] sm:$0xff] %vm671_vm2, %v1160_v14 }
 0x1d7   : > { %v809_v7 = vld [vmem:[#allocation2 + $0x78] sm:$0xff]  ;;  %v928_v56 = vadd.f32 %v3235_v61, %v808_v12  ;;  %703 = vst.msk [vmem:[#allocation2 + $0xf8] sm:$0xff] %vm671_vm2, %v638_v51 }
 0x1d8   : > { %v929_v42 = vadd.f32 %v3379_v23, %v809_v7  ;;  %v801_v9 = vld [vmem:[#allocation2 + $0x38] sm:$0xff]  ;;  %950 = vst.msk [vmem:[#allocation2 + $0x30] sm:$0xff] %vm671_vm2, %v920_v31 }
 0x1d9   : > { %958 = vst.msk [vmem:[#allocation2 + $0x70] sm:$0xff] %vm671_vm2, %v928_v56  ;;  %v921_v44 = vadd.f32 %v3391_v5, %v801_v9  ;;  %1286 = vrot.lane.b32.xlu1 %v2942_v38, %s2641_s30  ;;  %1288 = vrot.lane.b32.xlu2 %v2985_v46, %s2641_s30  ;;  %v816_v45 = vld [vmem:[#allocation2 + $0xb0] sm:$0xff] }
 0x1da   : > { %959 = vst.msk [vmem:[#allocation2 + $0x78] sm:$0xff] %vm671_vm2, %v929_v42  ;;  %v817_v61 = vld [vmem:[#allocation2 + $0xb8] sm:$0xff]  ;;  %1284 = vrot.lane.b32.xlu0 %v2900_v30, %s2641_s30  ;;  %v936_v23 = vadd.f32 %v3347_v10, %v816_v45 }
 0x1db   : > { %951 = vst.msk [vmem:[#allocation2 + $0x38] sm:$0xff] %vm671_vm2, %v921_v44  ;;  %v937_v24 = vadd.f32 %v3374_v15, %v817_v61  ;;  %v983_v5 = vld [vmem:[#allocation2 + $0x48] sm:$0x7f]  ;;  %v873_v43 = vpop.permute.xlu1 %872  ;;  %v1101_v57 = vpop.permute.xlu2 %1100 }
 0x1dc   : > { %v1149_v8 = vadd.f32 %v1067_v62, %v983_v5  ;;  %v939_v6 = vadd.f32 %v873_v43, %v819_v60  ;;  %v1079_v14 = vpop.permute.xlu0 %1078  ;;  %v1166_v51 = vadd.f32 %v1101_v57, %v1000_v16  ;;  %966 = vst.msk [vmem:[#allocation2 + $0xb0] sm:$0xff] %vm671_vm2, %v936_v23  ;;  %v1003_v60 = vld [vmem:[#allocation2 + $0xe8] sm:$0x7f] }
 0x1dd   : > { %967 = vst.msk [vmem:[#allocation2 + $0xb8] sm:$0xff] %vm671_vm2, %v937_v24 }
 0x1de   : > { %v733_v27 = vld [vmem:[#allocation2 + $0xf1] sm:$0xff]  ;;  %v734_v12 = vld [vmem:[#allocation2 + $0xf9] sm:$0x7f]  ;;  %1179 = vst.msk [vmem:[#allocation2 + $0x48] sm:$0x7f] %vm766_vm3, %v1149_v8 }
 0x1df   : > { %v980_v10 = vld [vmem:[#allocation2 + $0x30] sm:$0xff]  ;;  %v763_v15 = vadd.f32 %v733_v27, %v3021_v55  ;;  %969 = vst.msk [vmem:[#allocation2 + $0xc8] sm:$0xff] %vm671_vm2, %v939_v6  ;;  %v764_v62 = vadd.f32 %v734_v12, %v3093_v18 }
 0x1e0   : > { %v988_v31 = vld [vmem:[#allocation2 + $0x70] sm:$0xff]  ;;  %v1146_v7 = vadd.f32 %v3396_v4, %v980_v10  ;;  %1196 = vst.msk [vmem:[#allocation2 + $0xd0] sm:$0xff] %vm671_vm2, %v1166_v51  ;;  %v993_v4 = vld [vmem:[#allocation2 + $0x98] sm:$0x7f] }
 0x1e1   : > { %v1154_v56 = vadd.f32 %v3320_v49, %v988_v31  ;;  %794 = vst.msk [vmem:[#allocation2 + $0xf1] sm:$0xff] %vm671_vm2, %v763_v15  ;;  %v989_v42 = vld [vmem:[#allocation2 + $0x78] sm:$0x7f]  ;;  %1292 = vrot.lane.b32.xlu1 %v3093_v18, %s2641_s30  ;;  %1294 = vrot.lane.b32.xlu2 %v3136_v47, %s2641_s30  ;;  %v992_v49 = vld [vmem:[#allocation2 + $0x90] sm:$0xff] }
 0x1e2   : > { %1176 = vst.msk [vmem:[#allocation2 + $0x30] sm:$0xff] %vm671_vm2, %v1146_v7  ;;  %v1155_v9 = vadd.f32 %v1079_v14, %v989_v42  ;;  %1290 = vrot.lane.b32.xlu0 %v3021_v55, %s2641_s30  ;;  %v981_v61 = vld [vmem:[#allocation2 + $0x38] sm:$0x7f]  ;;  %v4365_v14 = vld [vmem:[#allocation19_spill] sm:$0xff]  ;;  %v1202_v7 = vld [vmem:[#allocation2 + $0x1] sm:$0xff] }
 0x1e3   : > { %1184 = vst.msk [vmem:[#allocation2 + $0x70] sm:$0xff] %vm671_vm2, %v1154_v56  ;;  %v1087_v44 = vpop.permute.xlu1 %1086  ;;  %v1107_v45 = vpop.permute.xlu2 %1106  ;;  %v1147_v8 = vadd.f32 %v3412_v48, %v981_v61  ;;  %v996_v27 = vld [vmem:[#allocation2 + $0xb0] sm:$0xff] }
 0x1e4   : > { %795 = vst.msk [vmem:[#allocation2 + $0xf9] sm:$0x7f] %vm766_vm3, %v764_v62  ;;  %v997_v23 = vld [vmem:[#allocation2 + $0xb8] sm:$0x7f]  ;;  %v1159_v24 = vadd.f32 %v1087_v44, %v993_v4  ;;  %v1085_v5 = vpop.permute.xlu0 %1084  ;;  %v1169_v57 = vadd.f32 %v1107_v45, %v1003_v60  ;;  %v4367_v56 = vld [vmem:[#allocation15_spill] sm:$0xff]  ;;  %v998_v45 = vld [vmem:[#allocation2 + $0xc0] sm:$0xff] }
 0x1e5   : > { %v1163_v43 = vadd.f32 %v3493_v54, %v997_v23  ;;  %1185 = vst.msk [vmem:[#allocation2 + $0x78] sm:$0x7f] %vm766_vm3, %v1155_v9  ;;  %v1158_v16 = vadd.f32 %v1085_v5, %v992_v49  ;;  %v1205_v4 = vld [vmem:[#allocation2 + $0x19] sm:$0x7f]  ;;  %v4370_v60 = vld [vmem:[#allocation18_spill] sm:$0xff] }
 0x1e6   : > { %1189 = vst.msk [vmem:[#allocation2 + $0x98] sm:$0x7f] %vm766_vm3, %v1159_v24  ;;  %v999_v42 = vld [vmem:[#allocation2 + $0xc8] sm:$0x7f]  ;;  %v4369_v5 = vld [vmem:[#allocation20_spill] sm:$0xff] }
 0x1e7   : > { %1193 = vst.msk [vmem:[#allocation2 + $0xb8] sm:$0x7f] %vm766_vm3, %v1163_v43  ;;  %v4371_v43 = vld [vmem:[#allocation13_spill] sm:$0xff] }
 0x1e8   : > { %1188 = vst.msk [vmem:[#allocation2 + $0x90] sm:$0xff] %vm671_vm2, %v1158_v16  ;;  %v824_v6 = vld [vmem:[#allocation2 + $0xf0] sm:$0xff]  ;;  %v1002_v16 = vld [vmem:[#allocation2 + $0xe0] sm:$0xff] }
 0x1e9   : > { %1199 = vst.msk [vmem:[#allocation2 + $0xe8] sm:$0x7f] %vm766_vm3, %v1169_v57  ;;  %1429 = vrot.lane.b32.xlu1 %v2926_v36, %s2642_s6  ;;  %1431 = vrot.lane.b32.xlu2 %v2919_v33, %s2642_s6  ;;  %v944_v54 = vadd.f32 %v3349_v34, %v824_v6  ;;  %v995_v36 = vld [vmem:[#allocation2 + $0xa8] sm:$0x7f] }
 0x1ea   : > { %1296 = vrot.lane.b32.xlu0 %v4365_v14, %s2641_s30  ;;  %1177 = vst.msk [vmem:[#allocation2 + $0x38] sm:$0x7f] %vm766_vm3, %v1147_v8  ;;  %v4366_v34 = vld [vmem:[#allocation10_spill] sm:$0xff]  ;;  %s2393_s30 = sshll.u32 %s2389_s23, 4  ;;  %s2394_s30 = int_to_ptr.hbm [resolvable:$true] %s2393_s30 }
 0x1eb   : > { %v825_v48 = vld [vmem:[#allocation2 + $0xf8] sm:$0xff]  ;;  %v1093_v51 = vpop.permute.xlu1 %1092  ;;  %v1235_v12 = vpop.permute.xlu2 %1234  ;;  %974 = vst.msk [vmem:[#allocation2 + $0xf0] sm:$0xff] %vm671_vm2, %v944_v54 }
 0x1ec   : > { %v945_v10 = vadd.f32 %v3426_v28, %v825_v48  ;;  %v1162_v15 = vadd.f32 %v1093_v51, %v996_v27  ;;  %v1091_v31 = vpop.permute.xlu0 %1090  ;;  %v1330_v62 = vadd.f32 %v1235_v12, %v1202_v7  ;;  %v4368_v28 = vld [vmem:[#allocation11_spill] sm:$0xff]  ;;  %v1001_v48 = vld [vmem:[#allocation2 + $0xd8] sm:$0x7f] }
 0x1ed   : > { %v1161_v33 = vadd.f32 %v1091_v31, %v995_v36  ;;  %v4374_v36 = vld [vmem:[#allocation7_spill] sm:$0xff] }
 0x1ee   : > { %975 = vst.msk [vmem:[#allocation2 + $0xf8] sm:$0xff] %vm671_vm2, %v945_v10  ;;  %v4372_v10 = vld [vmem:[#allocation6_spill] sm:$0xff] }
 0x1ef   : > { %1192 = vst.msk [vmem:[#allocation2 + $0xb0] sm:$0xff] %vm671_vm2, %v1162_v15  ;;  %v4373_v15 = vld [vmem:[#allocation9_spill] sm:$0xff] }
 0x1f0   : > { %1191 = vst.msk [vmem:[#allocation2 + $0xa8] sm:$0x7f] %vm766_vm3, %v1161_v33 }
 0x1f1   : > { %1362 = vst.msk [vmem:[#allocation2 + $0x1] sm:$0xff] %vm671_vm2, %v1330_v62  ;;  %1435 = vrot.lane.b32.xlu1 %v4366_v34, %s2642_s6  ;;  %1437 = vrot.lane.b32.xlu2 %v4367_v56, %s2642_s6  ;;  %v1208_v8 = vld [vmem:[#allocation2 + $0x31] sm:$0xff]  ;;  %v1211_v62 = vld [vmem:[#allocation2 + $0x49] sm:$0x7f] }
 0x1f2   : > { %1433 = vrot.lane.b32.xlu0 %v4368_v28, %s2642_s6 }
 0x1f3   : > { %v1099_v9 = vpop.permute.xlu1 %1098  ;;  %v1241_v44 = vpop.permute.xlu2 %1240 }
 0x1f4   : > { %v1165_v49 = vadd.f32 %v1099_v9, %v999_v42  ;;  %v1097_v61 = vpop.permute.xlu0 %1096  ;;  %v1333_v23 = vadd.f32 %v1241_v44, %v1205_v4  ;;  %v1004_v9 = vld [vmem:[#allocation2 + $0xf0] sm:$0xff] }
 0x1f5   : > { %v1164_v24 = vadd.f32 %v1097_v61, %v998_v45  ;;  %v1005_v31 = vld [vmem:[#allocation2 + $0xf8] sm:$0x7f]  ;;  %v4375_v45 = vld [vmem:[#allocation14_spill] sm:$0xff] }
 0x1f6   : > { %1195 = vst.msk [vmem:[#allocation2 + $0xc8] sm:$0x7f] %vm766_vm3, %v1165_v49  ;;  %v4376_v61 = vld [vmem:[#allocation12_spill] sm:$0xff] }
 0x1f7   : > { %1194 = vst.msk [vmem:[#allocation2 + $0xc0] sm:$0xff] %vm671_vm2, %v1164_v24  ;;  %v1204_v24 = vld [vmem:[#allocation2 + $0x11] sm:$0xff] }
 0x1f8   : > { %1365 = vst.msk [vmem:[#allocation2 + $0x19] sm:$0x7f] %vm766_vm3, %v1333_v23  ;;  %v4377_v23 = vld [vmem:[#allocation8_spill] sm:$0xff] }
 0x1f9   : > { %1441 = vrot.lane.b32.xlu1 %v4369_v5, %s2642_s6  ;;  %1443 = vrot.lane.b32.xlu2 %v4370_v60, %s2642_s6 }
 0x1fa   : > { %1439 = vrot.lane.b32.xlu0 %v4371_v43, %s2642_s6 }
 0x1fb   : > { %v1105_v57 = vpop.permute.xlu1 %1104  ;;  %v1247_v6 = vpop.permute.xlu2 %1246 }
 0x1fc   : > { %v1168_v54 = vadd.f32 %v1105_v57, %v1002_v16  ;;  %v1103_v51 = vpop.permute.xlu0 %1102  ;;  %v1336_v27 = vadd.f32 %v1247_v6, %v1208_v8  ;;  %v1214_v57 = vld [vmem:[#allocation2 + $0x61] sm:$0xff] }
 0x1fd   : > { %v1167_v12 = vadd.f32 %v1103_v51, %v1001_v48 }
 0x1fe   : > { %1198 = vst.msk [vmem:[#allocation2 + $0xe0] sm:$0xff] %vm671_vm2, %v1168_v54  ;;  %v1203_v54 = vld [vmem:[#allocation2 + $0x9] sm:$0x7f] }
 0x1ff   : > { %1197 = vst.msk [vmem:[#allocation2 + $0xd8] sm:$0x7f] %vm766_vm3, %v1167_v12  ;;  %v4378_v12 = vld [vmem:[#allocation16_spill] sm:$0xff] }
 0x200   : > { %1368 = vst.msk [vmem:[#allocation2 + $0x31] sm:$0xff] %vm671_vm2, %v1336_v27 }
 0x201   : > { %1447 = vrot.lane.b32.xlu1 %v4372_v10, %s2642_s6  ;;  %1449 = vrot.lane.b32.xlu2 %v4373_v15, %s2642_s6 }
 0x202   : > { %1445 = vrot.lane.b32.xlu0 %v4374_v36, %s2642_s6 }
 0x203   : > { %v1111_v7 = vpop.permute.xlu1 %1110  ;;  %v1253_v33 = vpop.permute.xlu2 %1252 }
 0x204   : > { %v1171_v42 = vadd.f32 %v1111_v7, %v1005_v31  ;;  %v1109_v4 = vpop.permute.xlu0 %1108  ;;  %v1339_v44 = vadd.f32 %v1253_v33, %v1211_v62  ;;  %v4379_v31 = vld [vmem:[#allocation23_spill] sm:$0xff]  ;;  %v4380_v7 = vld [vmem:[#allocation17_spill] sm:$0xff] }
 0x205   : > { %v1170_v49 = vadd.f32 %v1109_v4, %v1004_v9  ;;  %v1207_v33 = vld [vmem:[#allocation2 + $0x29] sm:$0x7f] }
 0x206   : > { %1201 = vst.msk [vmem:[#allocation2 + $0xf8] sm:$0x7f] %vm766_vm3, %v1171_v42  ;;  %v1217_v42 = vld [vmem:[#allocation2 + $0x79] sm:$0x7f] }
 0x207   : > { %1200 = vst.msk [vmem:[#allocation2 + $0xf0] sm:$0xff] %vm671_vm2, %v1170_v49 }
 0x208   : > { %1371 = vst.msk [vmem:[#allocation2 + $0x49] sm:$0x7f] %vm766_vm3, %v1339_v44  ;;  %v1206_v44 = vld [vmem:[#allocation2 + $0x21] sm:$0xff] }
 0x209   : > { %1453 = vrot.lane.b32.xlu1 %v4375_v45, %s2642_s6  ;;  %1455 = vrot.lane.b32.xlu2 %v4376_v61, %s2642_s6 }
 0x20a   : > { %1451 = vrot.lane.b32.xlu0 %v4377_v23, %s2642_s6 }
 0x20b   : > { %v1239_v16 = vpop.permute.xlu1 %1238  ;;  %v1259_v8 = vpop.permute.xlu2 %1258 }
 0x20c   : > { %v1332_v6 = vadd.f32 %v1239_v16, %v1204_v24  ;;  %v1237_v48 = vpop.permute.xlu0 %1236  ;;  %v1342_v51 = vadd.f32 %v1259_v8, %v1214_v57  ;;  %v4381_v57 = vld [vmem:[#allocation22_spill] sm:$0xff]  ;;  %v4382_v8 = vld [vmem:[#allocation21_spill] sm:$0xff] }
 0x20d   : > { %v1331_v27 = vadd.f32 %v1237_v48, %v1203_v54  ;;  %v1210_v54 = vld [vmem:[#allocation2 + $0x41] sm:$0xff]  ;;  %v1220_v48 = vld [vmem:[#allocation2 + $0x91] sm:$0xff] }
 0x20e   : > { %1364 = vst.msk [vmem:[#allocation2 + $0x11] sm:$0xff] %vm671_vm2, %v1332_v6 }
 0x20f   : > { %1363 = vst.msk [vmem:[#allocation2 + $0x9] sm:$0x7f] %vm766_vm3, %v1331_v27 }
 0x210   : > { %1374 = vst.msk [vmem:[#allocation2 + $0x61] sm:$0xff] %vm671_vm2, %v1342_v51 }
 0x211   : > { %1459 = vrot.lane.b32.xlu1 %v4378_v12, %s2642_s6  ;;  %1461 = vrot.lane.b32.xlu2 %v4379_v31, %s2642_s6 }
 0x212   : > { %1457 = vrot.lane.b32.xlu0 %v4380_v7, %s2642_s6 }
 0x213   : > { %v1245_v62 = vpop.permute.xlu1 %1244  ;;  %v1265_v9 = vpop.permute.xlu2 %1264 }
 0x214   : > { %v1335_v4 = vadd.f32 %v1245_v62, %v1207_v33  ;;  %v1243_v49 = vpop.permute.xlu0 %1242  ;;  %v1345_v24 = vadd.f32 %v1265_v9, %v1217_v42  ;;  %v1209_v33 = vld [vmem:[#allocation2 + $0x39] sm:$0x7f] }
 0x215   : > { %v1334_v16 = vadd.f32 %v1243_v49, %v1206_v44  ;;  %v4384_v44 = vld [vmem:[#allocation29_spill] sm:$0xff] }
 0x216   : > { %1367 = vst.msk [vmem:[#allocation2 + $0x29] sm:$0x7f] %vm766_vm3, %v1335_v4  ;;  %v4383_v4 = vld [vmem:[#allocation24_spill] sm:$0xff]  ;;  %v4385_v49 = vld [vmem:[#allocation25_spill] sm:$0xff] }
 0x217   : > { %1366 = vst.msk [vmem:[#allocation2 + $0x21] sm:$0xff] %vm671_vm2, %v1334_v16 }
 0x218   : > { %1377 = vst.msk [vmem:[#allocation2 + $0x79] sm:$0x7f] %vm766_vm3, %v1345_v24  ;;  %v1213_v24 = vld [vmem:[#allocation2 + $0x59] sm:$0x7f] }
 0x219   : > { %1465 = vrot.lane.b32.xlu1 %v4381_v57, %s2642_s6  ;;  %1467 = vrot.lane.b32.xlu2 %v3239_v22, %s2642_s6 }
 0x21a   : > { %1463 = vrot.lane.b32.xlu0 %v4382_v8, %s2642_s6 }
 0x21b   : > { %v1251_v6 = vpop.permute.xlu1 %1250  ;;  %v1271_v51 = vpop.permute.xlu2 %1270 }
 0x21c   : > { %v1338_v27 = vadd.f32 %v1251_v6, %v1210_v54  ;;  %v1249_v62 = vpop.permute.xlu0 %1248  ;;  %v1348_v42 = vadd.f32 %v1271_v51, %v1220_v48  ;;  %v1223_v6 = vld [vmem:[#allocation2 + $0xa9] sm:$0x7f]  ;;  %v1212_v51 = vld [vmem:[#allocation2 + $0x51] sm:$0xff] }
 0x21d   : > { %v1337_v9 = vadd.f32 %v1249_v62, %v1209_v33 }
 0x21e   : > { %1370 = vst.msk [vmem:[#allocation2 + $0x41] sm:$0xff] %vm671_vm2, %v1338_v27 }
 0x21f   : > { %1369 = vst.msk [vmem:[#allocation2 + $0x39] sm:$0x7f] %vm766_vm3, %v1337_v9  ;;  %v4387_v9 = vld [vmem:[#allocation26_spill] sm:$0xff] }
 0x220   : > { %1380 = vst.msk [vmem:[#allocation2 + $0x91] sm:$0xff] %vm671_vm2, %v1348_v42  ;;  %v4386_v42 = vld [vmem:[#allocation28_spill] sm:$0xff] }
 0x221   : > { %1471 = vrot.lane.b32.xlu1 %v4383_v4, %s2642_s6  ;;  %1473 = vrot.lane.b32.xlu2 %v4384_v44, %s2642_s6  ;;  %v1226_v44 = vld [vmem:[#allocation2 + $0xc1] sm:$0xff] }
 0x222   : > { %1469 = vrot.lane.b32.xlu0 %v4385_v49, %s2642_s6  ;;  %v4388_v49 = vld [vmem:[#allocation27_spill] sm:$0xff] }
 0x223   : > { %v1257_v16 = vpop.permute.xlu1 %1256  ;;  %v1277_v54 = vpop.permute.xlu2 %1276 }
 0x224   : > { %v1341_v48 = vadd.f32 %v1257_v16, %v1213_v24  ;;  %v1255_v27 = vpop.permute.xlu0 %1254  ;;  %v1351_v33 = vadd.f32 %v1277_v54, %v1223_v6  ;;  %v1216_v16 = vld [vmem:[#allocation2 + $0x71] sm:$0xff] }
 0x225   : > { %v1340_v62 = vadd.f32 %v1255_v27, %v1212_v51  ;;  %v1215_v51 = vld [vmem:[#allocation2 + $0x69] sm:$0x7f] }
 0x226   : > { %1373 = vst.msk [vmem:[#allocation2 + $0x59] sm:$0x7f] %vm766_vm3, %v1341_v48 }
 0x227   : > { %1372 = vst.msk [vmem:[#allocation2 + $0x51] sm:$0xff] %vm671_vm2, %v1340_v62 }
 0x228   : > { %1383 = vst.msk [vmem:[#allocation2 + $0xa9] sm:$0x7f] %vm766_vm3, %v1351_v33  ;;  %v4389_v33 = vld [vmem:[#allocation30_spill] sm:$0xff] }
 0x229   : > { %1477 = vrot.lane.b32.xlu1 %v4386_v42, %s2642_s6  ;;  %1479 = vrot.lane.b32.xlu2 %v4387_v9, %s2642_s6  ;;  %v1229_v9 = vld [vmem:[#allocation2 + $0xd9] sm:$0x7f] }
 0x22a   : > { %1475 = vrot.lane.b32.xlu0 %v4388_v49, %s2642_s6  ;;  %v4390_v49 = vld [vmem:[#allocation31_spill] sm:$0xff] }
 0x22b   : > { %v1263_v24 = vpop.permute.xlu1 %1262  ;;  %v1283_v6 = vpop.permute.xlu2 %1282 }
 0x22c   : > { %v1344_v54 = vadd.f32 %v1263_v24, %v1216_v16  ;;  %v1261_v48 = vpop.permute.xlu0 %1260  ;;  %v1354_v27 = vadd.f32 %v1283_v6, %v1226_v44  ;;  %v1219_v24 = vld [vmem:[#allocation2 + $0x89] sm:$0x7f]  ;;  %v3634_v6 = vrot.slane %v4365_v14, 1 }
 0x22d   : > { %v1343_v62 = vadd.f32 %v1261_v48, %v1215_v51  ;;  %v1218_v51 = vld [vmem:[#allocation2 + $0x81] sm:$0xff] }
 0x22e   : > { %1376 = vst.msk [vmem:[#allocation2 + $0x71] sm:$0xff] %vm671_vm2, %v1344_v54 }
 0x22f   : > { %1375 = vst.msk [vmem:[#allocation2 + $0x69] sm:$0x7f] %vm766_vm3, %v1343_v62  ;;  %v1426_v62 = vrot.slane %v3136_v47, 1 }
 0x230   : > { %1386 = vst.msk [vmem:[#allocation2 + $0xc1] sm:$0xff] %vm671_vm2, %v1354_v27 }
 0x231   : > { %1483 = vrot.lane.b32.xlu1 %v4389_v33, %s2642_s6  ;;  %1485 = vrot.lane.b32.xlu2 %v3366_v58, %s2642_s6 }
 0x232   : > { %1481 = vrot.lane.b32.xlu0 %v4390_v49, %s2642_s6  ;;  %v3642_v49 = vsel %vm1006_vm1, %v1426_v62, %v3634_v6 }
 0x233   : > { %v1269_v16 = vpop.permute.xlu1 %1268  ;;  %v1289_v44 = vpop.permute.xlu2 %1288 }
 0x234   : > { %v1347_v54 = vadd.f32 %v1269_v16, %v1219_v24  ;;  %v1267_v48 = vpop.permute.xlu0 %1266  ;;  %v1357_v27 = vadd.f32 %v1289_v44, %v1229_v9  ;;  %v1222_v24 = vld [vmem:[#allocation2 + $0xa1] sm:$0xff]  ;;  %v1232_v16 = vld [vmem:[#allocation2 + $0xf1] sm:$0xff] }
 0x235   : > { %v1346_v33 = vadd.f32 %v1267_v48, %v1218_v51 }
 0x236   : > { %1379 = vst.msk [vmem:[#allocation2 + $0x89] sm:$0x7f] %vm766_vm3, %v1347_v54  ;;  %v1221_v54 = vld [vmem:[#allocation2 + $0x99] sm:$0x7f] }
 0x237   : > { %1378 = vst.msk [vmem:[#allocation2 + $0x81] sm:$0xff] %vm671_vm2, %v1346_v33 }
 0x238   : > { %1389 = vst.msk [vmem:[#allocation2 + $0xd9] sm:$0x7f] %vm766_vm3, %v1357_v27 }
 0x239   : > { %1489 = vrot.lane.b32.xlu1 %v3642_v49, %s2642_s6  ;;  %1491 = vrot.lane.b32.xlu2 %v3634_v6, %s2642_s6 }
 0x23a   : > { %1487 = vrot.lane.b32.xlu0 %v3353_v29, %s2642_s6  ;;  %v1403_v29 = vld [vmem:[#allocation2 + $0x48] sm:$0x7f]  ;;  %s2588_s6 = sshra.s32 %s2394_s30, 4  ;;  %s2589_s6 = int_to_ptr.hbm [resolvable:$true] %s2588_s6 }
 0x23b   : > { %v1275_v9 = vpop.permute.xlu1 %1274  ;;  %v1295_v44 = vpop.permute.xlu2 %1294  ;;  %p2595_p0 = scmp.lt.s32.totalorder %s2589_s6, %s4282_s5 }
 0x23c   : > { %v1350_v33 = vadd.f32 %v1275_v9, %v1222_v24  ;;  %v1273_v51 = vpop.permute.xlu0 %1272  ;;  %v1360_v48 = vadd.f32 %v1295_v44, %v1232_v16  ;;  %v1225_v9 = vld [vmem:[#allocation2 + $0xb9] sm:$0x7f]  ;;  %v1395_v24 = vld [vmem:[#allocation2 + $0x8] sm:$0x7f] }
 0x23d   : > { %v1349_v27 = vadd.f32 %v1273_v51, %v1221_v54  ;;  %v1224_v54 = vld [vmem:[#allocation2 + $0xb1] sm:$0xff] }
 0x23e   : > { %1382 = vst.msk [vmem:[#allocation2 + $0xa1] sm:$0xff] %vm671_vm2, %v1350_v33 }
 0x23f   : > { %1381 = vst.msk [vmem:[#allocation2 + $0x99] sm:$0x7f] %vm766_vm3, %v1349_v27 }
 0x240   : > { %1392 = vst.msk [vmem:[#allocation2 + $0xf1] sm:$0xff] %vm671_vm2, %v1360_v48 }
 0x241   : > { %1621 = vrot.lane.b32.xlu1 %v2958_v40, %s2643_s7  ;;  %1623 = vrot.lane.b32.xlu2 %v3009_v52, %s2643_s7 }
 0x242   : > { %1619 = vrot.lane.b32.xlu0 %v2922_v35, %s2643_s7 }
 0x243   : > { %v1281_v62 = vpop.permute.xlu1 %1280  ;;  %v1432_v16 = vpop.permute.xlu2 %1431 }
 0x244   : > { %v1353_v44 = vadd.f32 %v1281_v62, %v1225_v9  ;;  %v1279_v33 = vpop.permute.xlu0 %1278  ;;  %v1526_v51 = vadd.f32 %v1432_v16, %v1395_v24  ;;  %v1228_v62 = vld [vmem:[#allocation2 + $0xd1] sm:$0xff]  ;;  %v1398_v9 = vld [vmem:[#allocation2 + $0x20] sm:$0xff] }
 0x245   : > { %v1352_v27 = vadd.f32 %v1279_v33, %v1224_v54  ;;  %v1227_v33 = vld [vmem:[#allocation2 + $0xc9] sm:$0x7f] }
 0x246   : > { %1385 = vst.msk [vmem:[#allocation2 + $0xb9] sm:$0x7f] %vm766_vm3, %v1353_v44 }
 0x247   : > { %1384 = vst.msk [vmem:[#allocation2 + $0xb1] sm:$0xff] %vm671_vm2, %v1352_v27 }
 0x248   : > { %1558 = vst.msk [vmem:[#allocation2 + $0x8] sm:$0x7f] %vm766_vm3, %v1526_v51 }
 0x249   : > { %1627 = vrot.lane.b32.xlu1 %v3101_v20, %s2643_s7  ;;  %1629 = vrot.lane.b32.xlu2 %v3127_v17, %s2643_s7 }
 0x24a   : > { %1625 = vrot.lane.b32.xlu0 %v3050_v1, %s2643_s7 }
 0x24b   : > { %v1287_v48 = vpop.permute.xlu1 %1286  ;;  %v1438_v24 = vpop.permute.xlu2 %1437 }
 0x24c   : > { %v1356_v16 = vadd.f32 %v1287_v48, %v1228_v62  ;;  %v1285_v44 = vpop.permute.xlu0 %1284  ;;  %v1529_v54 = vadd.f32 %v1438_v24, %v1398_v9  ;;  %v1231_v48 = vld [vmem:[#allocation2 + $0xe9] sm:$0x7f]  ;;  %v1401_v62 = vld [vmem:[#allocation2 + $0x38] sm:$0x7f] }
 0x24d   : > { %v1355_v27 = vadd.f32 %v1285_v44, %v1227_v33 }
 0x24e   : > { %1388 = vst.msk [vmem:[#allocation2 + $0xd1] sm:$0xff] %vm671_vm2, %v1356_v16  ;;  %v1230_v16 = vld [vmem:[#allocation2 + $0xe1] sm:$0xff] }
 0x24f   : > { %1387 = vst.msk [vmem:[#allocation2 + $0xc9] sm:$0x7f] %vm766_vm3, %v1355_v27 }
 0x250   : > { %1561 = vst.msk [vmem:[#allocation2 + $0x20] sm:$0xff] %vm671_vm2, %v1529_v54 }
 0x251   : > { %1633 = vrot.lane.b32.xlu1 %v2878_v26, %s2643_s7  ;;  %1635 = vrot.lane.b32.xlu2 %v2934_v37, %s2643_s7 }
 0x252   : > { %1631 = vrot.lane.b32.xlu0 %v2866_v25, %s2643_s7 }
 0x253   : > { %v1293_v51 = vpop.permute.xlu1 %1292  ;;  %v1444_v9 = vpop.permute.xlu2 %1443 }
 0x254   : > { %v1359_v24 = vadd.f32 %v1293_v51, %v1231_v48  ;;  %v1291_v33 = vpop.permute.xlu0 %1290  ;;  %v1532_v44 = vadd.f32 %v1444_v9, %v1401_v62  ;;  %v1394_v51 = vld [vmem:[#allocation2] sm:$0xff]  ;;  %v1404_v48 = vld [vmem:[#allocation2 + $0x50] sm:$0xff] }
 0x255   : > { %v1358_v27 = vadd.f32 %v1291_v33, %v1230_v16  ;;  %v1233_v33 = vld [vmem:[#allocation2 + $0xf9] sm:$0x7f] }
 0x256   : > { %1391 = vst.msk [vmem:[#allocation2 + $0xe9] sm:$0x7f] %vm766_vm3, %v1359_v24 }
 0x257   : > { %1390 = vst.msk [vmem:[#allocation2 + $0xe1] sm:$0xff] %vm671_vm2, %v1358_v27 }
 0x258   : > { %1564 = vst.msk [vmem:[#allocation2 + $0x38] sm:$0x7f] %vm766_vm3, %v1532_v44 }
 0x259   : > { %1639 = vrot.lane.b32.xlu1 %v3011_v53, %s2643_s7  ;;  %1641 = vrot.lane.b32.xlu2 %v3048_v0, %s2643_s7 }
 0x25a   : > { %1637 = vrot.lane.b32.xlu0 %v2960_v41, %s2643_s7 }
 0x25b   : > { %v1430_v54 = vpop.permute.xlu1 %1429  ;;  %v1450_v62 = vpop.permute.xlu2 %1449 }
 0x25c   : > { %v1525_v9 = vadd.f32 %v1430_v54, %v1394_v51  ;;  %v1297_v24 = vpop.permute.xlu0 %1296  ;;  %v1535_v16 = vadd.f32 %v1450_v62, %v1404_v48  ;;  %v1397_v54 = vld [vmem:[#allocation2 + $0x18] sm:$0x7f]  ;;  %v1407_v51 = vld [vmem:[#allocation2 + $0x68] sm:$0x7f] }
 0x25d   : > { %v1361_v27 = vadd.f32 %v1297_v24, %v1233_v33  ;;  %v1396_v33 = vld [vmem:[#allocation2 + $0x10] sm:$0xff] }
 0x25e   : > { %1557 = vst.msk [vmem:[#allocation2] sm:$0xff] %vm671_vm2, %v1525_v9 }
 0x25f   : > { %1393 = vst.msk [vmem:[#allocation2 + $0xf9] sm:$0x7f] %vm766_vm3, %v1361_v27 }
 0x260   : > { %1567 = vst.msk [vmem:[#allocation2 + $0x50] sm:$0xff] %vm671_vm2, %v1535_v16 }
 0x261   : > { %1645 = vrot.lane.b32.xlu1 %v3105_v21, %s2643_s7  ;;  %1647 = vrot.lane.b32.xlu2 %v2874_v2, %s2643_s7 }
 0x262   : > { %1643 = vrot.lane.b32.xlu0 %v3078_v13, %s2643_s7 }
 0x263   : > { %v1436_v44 = vpop.permute.xlu1 %1435  ;;  %v1456_v48 = vpop.permute.xlu2 %1455 }
 0x264   : > { %v1528_v62 = vadd.f32 %v1436_v44, %v1397_v54  ;;  %v1434_v9 = vpop.permute.xlu0 %1433  ;;  %v1538_v24 = vadd.f32 %v1456_v48, %v1407_v51  ;;  %v1400_v44 = vld [vmem:[#allocation2 + $0x30] sm:$0xff]  ;;  %v1410_v54 = vld [vmem:[#allocation2 + $0x80] sm:$0xff]  ;;  %v1399_v48 = vld [vmem:[#allocation2 + $0x28] sm:$0x7f] }
 0x265   : > { %v1527_v27 = vadd.f32 %v1434_v9, %v1396_v33 }
 0x266   : > { %1560 = vst.msk [vmem:[#allocation2 + $0x18] sm:$0x7f] %vm766_vm3, %v1528_v62 }
 0x267   : > { %1559 = vst.msk [vmem:[#allocation2 + $0x10] sm:$0xff] %vm671_vm2, %v1527_v27 }
 0x268   : > { %1570 = vst.msk [vmem:[#allocation2 + $0x68] sm:$0x7f] %vm766_vm3, %v1538_v24 }
 0x269   : > { %1651 = vrot.lane.b32.xlu1 %v2950_v39, %s2643_s7  ;;  %1653 = vrot.lane.b32.xlu2 %v2999_v50, %s2643_s7 }
 0x26a   : > { %1649 = vrot.lane.b32.xlu0 %v2910_v32, %s2643_s7 }
 0x26b   : > { %v1442_v16 = vpop.permute.xlu1 %1441  ;;  %v1462_v51 = vpop.permute.xlu2 %1461 }
 0x26c   : > { %v1440_v33 = vpop.permute.xlu0 %1439  ;;  %v1531_v62 = vadd.f32 %v1442_v16, %v1400_v44  ;;  %v1541_v9 = vadd.f32 %v1462_v51, %v1410_v54  ;;  %v1413_v16 = vld [vmem:[#allocation2 + $0x98] sm:$0x7f]  ;;  %v1402_v51 = vld [vmem:[#allocation2 + $0x40] sm:$0xff] }
 0x26d   : > { %v1530_v27 = vadd.f32 %v1440_v33, %v1399_v48 }
 0x26e   : > { %1563 = vst.msk [vmem:[#allocation2 + $0x30] sm:$0xff] %vm671_vm2, %v1531_v62 }
 0x26f   : > { %1562 = vst.msk [vmem:[#allocation2 + $0x28] sm:$0x7f] %vm766_vm3, %v1530_v27  ;;  %v1406_v27 = vld [vmem:[#allocation2 + $0x60] sm:$0xff] }
 0x270   : > { %1573 = vst.msk [vmem:[#allocation2 + $0x80] sm:$0xff] %vm671_vm2, %v1541_v9 }
 0x271   : > { %1657 = vrot.lane.b32.xlu1 %v3046_v63, %s2643_s7  ;;  %1659 = vrot.lane.b32.xlu2 %v3072_v11, %s2643_s7 }
 0x272   : > { %1655 = vrot.lane.b32.xlu0 %v3034_v59, %s2643_s7 }
 0x273   : > { %v1448_v24 = vpop.permute.xlu1 %1447  ;;  %v1468_v44 = vpop.permute.xlu2 %1467 }
 0x274   : > { %v1446_v54 = vpop.permute.xlu0 %1445  ;;  %v1534_v48 = vadd.f32 %v1448_v24, %v1403_v29  ;;  %v1544_v33 = vadd.f32 %v1468_v44, %v1413_v16  ;;  %v1416_v29 = vld [vmem:[#allocation2 + $0xb0] sm:$0xff]  ;;  %v1405_v16 = vld [vmem:[#allocation2 + $0x58] sm:$0x7f] }
 0x275   : > { %v1533_v62 = vadd.f32 %v1446_v54, %v1402_v51 }
 0x276   : > { %1566 = vst.msk [vmem:[#allocation2 + $0x48] sm:$0x7f] %vm766_vm3, %v1534_v48 }
 0x277   : > { %1565 = vst.msk [vmem:[#allocation2 + $0x40] sm:$0xff] %vm671_vm2, %v1533_v62  ;;  %v1409_v62 = vld [vmem:[#allocation2 + $0x78] sm:$0x7f] }
 0x278   : > { %1576 = vst.msk [vmem:[#allocation2 + $0x98] sm:$0x7f] %vm766_vm3, %v1544_v33 }
 0x279   : > { %1663 = vrot.lane.b32.xlu1 %v2876_v3, %s2643_s7  ;;  %1665 = vrot.lane.b32.xlu2 %v2900_v30, %s2643_s7 }
 0x27a   : > { %1661 = vrot.lane.b32.xlu0 %v3099_v19, %s2643_s7 }
 0x27b   : > { %v1454_v9 = vpop.permute.xlu1 %1453  ;;  %v1474_v24 = vpop.permute.xlu2 %1473 }
 0x27c   : > { %v1452_v44 = vpop.permute.xlu0 %1451  ;;  %v1537_v54 = vadd.f32 %v1454_v9, %v1406_v27  ;;  %v1547_v51 = vadd.f32 %v1474_v24, %v1416_v29  ;;  %v1419_v9 = vld [vmem:[#allocation2 + $0xc8] sm:$0x7f]  ;;  %v1408_v29 = vld [vmem:[#allocation2 + $0x70] sm:$0xff] }
 0x27d   : > { %v1536_v48 = vadd.f32 %v1452_v44, %v1405_v16 }
 0x27e   : > { %1569 = vst.msk [vmem:[#allocation2 + $0x60] sm:$0xff] %vm671_vm2, %v1537_v54 }
 0x27f   : > { %1568 = vst.msk [vmem:[#allocation2 + $0x58] sm:$0x7f] %vm766_vm3, %v1536_v48  ;;  %v1412_v48 = vld [vmem:[#allocation2 + $0x90] sm:$0xff] }
 0x280   : > { %1579 = vst.msk [vmem:[#allocation2 + $0xb0] sm:$0xff] %vm671_vm2, %v1547_v51 }
 0x281   : > { %1669 = vrot.lane.b32.xlu1 %v2985_v46, %s2643_s7  ;;  %1671 = vrot.lane.b32.xlu2 %v3021_v55, %s2643_s7 }
 0x282   : > { %1667 = vrot.lane.b32.xlu0 %v2942_v38, %s2643_s7 }
 0x283   : > { %v1460_v33 = vpop.permute.xlu1 %1459  ;;  %v1480_v27 = vpop.permute.xlu2 %1479 }
 0x284   : > { %v1458_v24 = vpop.permute.xlu0 %1457  ;;  %v1540_v16 = vadd.f32 %v1460_v33, %v1409_v62  ;;  %v1550_v44 = vadd.f32 %v1480_v27, %v1419_v9  ;;  %v1422_v33 = vld [vmem:[#allocation2 + $0xe0] sm:$0xff]  ;;  %v1411_v9 = vld [vmem:[#allocation2 + $0x88] sm:$0x7f] }
 0x285   : > { %v1539_v54 = vadd.f32 %v1458_v24, %v1408_v29 }
 0x286   : > { %1572 = vst.msk [vmem:[#allocation2 + $0x78] sm:$0x7f] %vm766_vm3, %v1540_v16 }
 0x287   : > { %1571 = vst.msk [vmem:[#allocation2 + $0x70] sm:$0xff] %vm671_vm2, %v1539_v54  ;;  %v1415_v54 = vld [vmem:[#allocation2 + $0xa8] sm:$0x7f] }
 0x288   : > { %1582 = vst.msk [vmem:[#allocation2 + $0xc8] sm:$0x7f] %vm766_vm3, %v1550_v44 }
 0x289   : > { %1675 = vrot.lane.b32.xlu1 %v3136_v47, %s2643_s7  ;;  %1677 = vrot.lane.b32.xlu2 %v4365_v14, %s2643_s7 }
 0x28a   : > { %1673 = vrot.lane.b32.xlu0 %v3093_v18, %s2643_s7  ;;  %s2590_s7 = scalar_lea.hbm %s2589_s6, 2 }
 0x28b   : > { %v1466_v51 = vpop.permute.xlu1 %1465  ;;  %v1486_v62 = vpop.permute.xlu2 %1485  ;;  %p2591_p11 = scmp.ne.s32.totalorder %s2589_s6, %s2590_s7  ;;  %p2596_p1 = scmp.lt.s32.totalorder %s2594_s11, %s2590_s7 }
 0x28c   : > { %v1464_v27 = vpop.permute.xlu0 %1463  ;;  %v1543_v29 = vadd.f32 %v1466_v51, %v1412_v48  ;;  %v1553_v24 = vadd.f32 %v1486_v62, %v1422_v33  ;;  %v1425_v51 = vld [vmem:[#allocation2 + $0xf8] sm:$0x7f]  ;;  %v1414_v62 = vld [vmem:[#allocation2 + $0xa0] sm:$0xff] }
 0x28d   : > { %v1542_v16 = vadd.f32 %v1464_v27, %v1411_v9  ;;  %p2592_p12 = pnand %p2591_p11, %p2714_p5  ;;  %p2597_p2 = por %p2596_p1, %p2595_p0 }
 0x28e   : > { %1575 = vst.msk [vmem:[#allocation2 + $0x90] sm:$0xff] %vm671_vm2, %v1543_v29 }
 0x28f   : > { %1574 = vst.msk [vmem:[#allocation2 + $0x88] sm:$0x7f] %vm766_vm3, %v1542_v16  ;;  %p2593_p13 = pneg %p2592_p12 }
 0x290   : > { %1585 = vst.msk [vmem:[#allocation2 + $0xe0] sm:$0xff] %vm671_vm2, %v1553_v24 }
 0x291   : > { %1801 = vrot.lane.b32.xlu1 %v2958_v40, %s2644_s8  ;;  %1803 = vrot.lane.b32.xlu2 %v3009_v52, %s2644_s8  ;;  %v1418_v40 = vld [vmem:[#allocation2 + $0xc0] sm:$0xff]  ;;  %v1591_v52 = vld [vmem:[#allocation2 + $0x11] sm:$0xff]  ;;  %p2598_p3 = pnand %p2597_p2, %p2593_p13 }
 0x292   : > { %1799 = vrot.lane.b32.xlu0 %v2922_v35, %s2644_s8 }
 0x293   : > { %v1472_v44 = vpop.permute.xlu1 %1471  ;;  %v1492_v48 = vpop.permute.xlu2 %1491 }
 0x294   : > { %v1470_v33 = vpop.permute.xlu0 %1469  ;;  %v1546_v9 = vadd.f32 %v1472_v44, %v1415_v54  ;;  %v1556_v27 = vadd.f32 %v1492_v48, %v1425_v51  ;;  %v1417_v44 = vld [vmem:[#allocation2 + $0xb8] sm:$0x7f] }
 0x295   : > { %v1545_v29 = vadd.f32 %v1470_v33, %v1414_v62  ;;  %v1594_v33 = vld [vmem:[#allocation2 + $0x29] sm:$0x7f] }
 0x296   : > { %1578 = vst.msk [vmem:[#allocation2 + $0xa8] sm:$0x7f] %vm766_vm3, %v1546_v9 }
 0x297   : > { %1577 = vst.msk [vmem:[#allocation2 + $0xa0] sm:$0xff] %vm671_vm2, %v1545_v29 }
 0x298   : > { %1588 = vst.msk [vmem:[#allocation2 + $0xf8] sm:$0x7f] %vm766_vm3, %v1556_v27  ;;  %v1420_v27 = vld [vmem:[#allocation2 + $0xd0] sm:$0xff] }
 0x299   : > { %1807 = vrot.lane.b32.xlu1 %v3101_v20, %s2644_s8  ;;  %1809 = vrot.lane.b32.xlu2 %v3127_v17, %s2644_s8  ;;  %v1421_v17 = vld [vmem:[#allocation2 + $0xd8] sm:$0x7f] }
 0x29a   : > { %1805 = vrot.lane.b32.xlu0 %v3050_v1, %s2644_s8 }
 0x29b   : > { %v1478_v35 = vpop.permute.xlu1 %1477  ;;  %v1624_v24 = vpop.permute.xlu2 %1623 }
 0x29c   : > { %v1476_v16 = vpop.permute.xlu0 %1475  ;;  %v1549_v54 = vadd.f32 %v1478_v35, %v1418_v40  ;;  %v1711_v51 = vadd.f32 %v1624_v24, %v1591_v52  ;;  %v1597_v52 = vld [vmem:[#allocation2 + $0x41] sm:$0xff] }
 0x29d   : > { %v1548_v48 = vadd.f32 %v1476_v16, %v1417_v44  ;;  %v1423_v16 = vld [vmem:[#allocation2 + $0xe8] sm:$0x7f] }
 0x29e   : > { %1581 = vst.msk [vmem:[#allocation2 + $0xc0] sm:$0xff] %vm671_vm2, %v1549_v54 }
 0x29f   : > { %1580 = vst.msk [vmem:[#allocation2 + $0xb8] sm:$0x7f] %vm766_vm3, %v1548_v48  ;;  %v3767_v1 = vld [vmem:[#allocation2 + $0xf8] sm:$0xff] }
 0x2a0   : > { %1741 = vst.msk [vmem:[#allocation2 + $0x11] sm:$0xff] %vm671_vm2, %v1711_v51 }
 0x2a1   : > { %1813 = vrot.lane.b32.xlu1 %v2878_v26, %s2644_s8  ;;  %1815 = vrot.lane.b32.xlu2 %v2934_v37, %s2644_s8  ;;  %2192 = vst.msk [vmem:[%s3763_s13 + $0xf8] sm:$0xff] %vm671_vm2, %v3767_v1  ;;  %v1424_v26 = vld [vmem:[#allocation2 + $0xf0] sm:$0xff] }
 0x2a2   : > { %1811 = vrot.lane.b32.xlu0 %v2866_v25, %s2644_s8 }
 0x2a3   : > { %v1484_v20 = vpop.permute.xlu1 %1483  ;;  %v1630_v62 = vpop.permute.xlu2 %1629 }
 0x2a4   : > { %v1482_v9 = vpop.permute.xlu0 %1481  ;;  %v1552_v29 = vadd.f32 %v1484_v20, %v1421_v17  ;;  %v1714_v35 = vadd.f32 %v1630_v62, %v1594_v33  ;;  %v1589_v17 = vld [vmem:[#allocation2 + $0x1] sm:$0xff] }
 0x2a5   : > { %v1551_v40 = vadd.f32 %v1482_v9, %v1420_v27 }
 0x2a6   : > { %1584 = vst.msk [vmem:[#allocation2 + $0xd8] sm:$0x7f] %vm766_vm3, %v1552_v29 }
 0x2a7   : > { %1583 = vst.msk [vmem:[#allocation2 + $0xd0] sm:$0xff] %vm671_vm2, %v1551_v40  ;;  %v1592_v40 = vld [vmem:[#allocation2 + $0x19] sm:$0x7f] }
 0x2a8   : > { %1744 = vst.msk [vmem:[#allocation2 + $0x29] sm:$0x7f] %vm766_vm3, %v1714_v35 }
 0x2a9   : > { %1819 = vrot.lane.b32.xlu1 %v3011_v53, %s2644_s8  ;;  %1821 = vrot.lane.b32.xlu2 %v3048_v0, %s2644_s8  ;;  %v1590_v53 = vld [vmem:[#allocation2 + $0x9] sm:$0x7f]  ;;  %v1600_v0 = vld [vmem:[#allocation2 + $0x59] sm:$0x7f] }
 0x2aa   : > { %1817 = vrot.lane.b32.xlu0 %v2960_v41, %s2644_s8 }
 0x2ab   : > { %v1490_v25 = vpop.permute.xlu1 %1489  ;;  %v1636_v37 = vpop.permute.xlu2 %1635 }
 0x2ac   : > { %v1488_v24 = vpop.permute.xlu0 %1487  ;;  %v1555_v44 = vadd.f32 %v1490_v25, %v1424_v26  ;;  %v1717_v54 = vadd.f32 %v1636_v37, %v1597_v52 }
 0x2ad   : > { %v1554_v51 = vadd.f32 %v1488_v24, %v1423_v16  ;;  %v1595_v16 = vld [vmem:[#allocation2 + $0x31] sm:$0xff] }
 0x2ae   : > { %1587 = vst.msk [vmem:[#allocation2 + $0xf0] sm:$0xff] %vm671_vm2, %v1555_v44 }
 0x2af   : > { %1586 = vst.msk [vmem:[#allocation2 + $0xe8] sm:$0x7f] %vm766_vm3, %v1554_v51 }
 0x2b0   : > { %1747 = vst.msk [vmem:[#allocation2 + $0x41] sm:$0xff] %vm671_vm2, %v1717_v54 }
 0x2b1   : > { %1825 = vrot.lane.b32.xlu1 %v3105_v21, %s2644_s8  ;;  %1827 = vrot.lane.b32.xlu2 %v2874_v2, %s2644_s8  ;;  %v1603_v21 = vld [vmem:[#allocation2 + $0x71] sm:$0xff] }
 0x2b2   : > { %1823 = vrot.lane.b32.xlu0 %v3078_v13, %s2644_s8  ;;  %v1593_v13 = vld [vmem:[#allocation2 + $0x21] sm:$0xff] }
 0x2b3   : > { %v1622_v41 = vpop.permute.xlu1 %1621  ;;  %v1642_v48 = vpop.permute.xlu2 %1641 }
 0x2b4   : > { %v1620_v20 = vpop.permute.xlu0 %1619  ;;  %v1710_v33 = vadd.f32 %v1622_v41, %v1590_v53  ;;  %v1720_v62 = vadd.f32 %v1642_v48, %v1600_v0  ;;  %v1598_v0 = vld [vmem:[#allocation2 + $0x49] sm:$0x7f] }
 0x2b5   : > { %v1709_v9 = vadd.f32 %v1620_v20, %v1589_v17  ;;  %v3798_v27 = vld [vmem:[#allocation2 + $0xf0] sm:$0xff] }
 0x2b6   : > { %1740 = vst.msk [vmem:[#allocation2 + $0x9] sm:$0x7f] %vm766_vm3, %v1710_v33 }
 0x2b7   : > { %1739 = vst.msk [vmem:[#allocation2 + $0x1] sm:$0xff] %vm671_vm2, %v1709_v9  ;;  %v1601_v9 = vld [vmem:[#allocation2 + $0x61] sm:$0xff] }
 0x2b8   : > { %1750 = vst.msk [vmem:[#allocation2 + $0x59] sm:$0x7f] %vm766_vm3, %v1720_v62 }
 0x2b9   : > { %1831 = vrot.lane.b32.xlu1 %v2950_v39, %s2644_s8  ;;  %1833 = vrot.lane.b32.xlu2 %v2999_v50, %s2644_s8  ;;  %2191 = vst.msk [vmem:[%s3763_s13 + $0xf0] sm:$0xff] %vm671_vm2, %v3798_v27  ;;  %v1596_v39 = vld [vmem:[#allocation2 + $0x39] sm:$0x7f]  ;;  %v1606_v50 = vld [vmem:[#allocation2 + $0x89] sm:$0x7f] }
 0x2ba   : > { %1829 = vrot.lane.b32.xlu0 %v2910_v32, %s2644_s8 }
 0x2bb   : > { %v1628_v2 = vpop.permute.xlu1 %1627  ;;  %v1648_v29 = vpop.permute.xlu2 %1647 }
 0x2bc   : > { %v1626_v35 = vpop.permute.xlu0 %1625  ;;  %v1713_v25 = vadd.f32 %v1628_v2, %v1593_v13  ;;  %v1723_v26 = vadd.f32 %v1648_v29, %v1603_v21 }
 0x2bd   : > { %v1712_v37 = vadd.f32 %v1626_v35, %v1592_v40  ;;  %v1604_v40 = vld [vmem:[#allocation2 + $0x79] sm:$0x7f] }
 0x2be   : > { %1743 = vst.msk [vmem:[#allocation2 + $0x21] sm:$0xff] %vm671_vm2, %v1713_v25 }
 0x2bf   : > { %1742 = vst.msk [vmem:[#allocation2 + $0x19] sm:$0x7f] %vm766_vm3, %v1712_v37 }
 0x2c0   : > { %1753 = vst.msk [vmem:[#allocation2 + $0x71] sm:$0xff] %vm671_vm2, %v1723_v26 }
 0x2c1   : > { %1837 = vrot.lane.b32.xlu1 %v3046_v63, %s2644_s8  ;;  %1839 = vrot.lane.b32.xlu2 %v3072_v11, %s2644_s8  ;;  %v1599_v63 = vld [vmem:[#allocation2 + $0x51] sm:$0xff]  ;;  %v1609_v11 = vld [vmem:[#allocation2 + $0xa1] sm:$0xff] }
 0x2c2   : > { %1835 = vrot.lane.b32.xlu0 %v3034_v59, %s2644_s8 }
 0x2c3   : > { %v1634_v32 = vpop.permute.xlu1 %1633  ;;  %v1654_v52 = vpop.permute.xlu2 %1653 }
 0x2c4   : > { %v1632_v24 = vpop.permute.xlu0 %1631  ;;  %v1716_v44 = vadd.f32 %v1634_v32, %v1596_v39  ;;  %v1726_v54 = vadd.f32 %v1654_v52, %v1606_v50  ;;  %v1607_v50 = vld [vmem:[#allocation2 + $0x91] sm:$0xff] }
 0x2c5   : > { %v1715_v51 = vadd.f32 %v1632_v24, %v1595_v16 }
 0x2c6   : > { %1746 = vst.msk [vmem:[#allocation2 + $0x39] sm:$0x7f] %vm766_vm3, %v1716_v44 }
 0x2c7   : > { %1745 = vst.msk [vmem:[#allocation2 + $0x31] sm:$0xff] %vm671_vm2, %v1715_v51  ;;  %v1610_v51 = vld [vmem:[#allocation2 + $0xa9] sm:$0x7f] }
 0x2c8   : > { %1756 = vst.msk [vmem:[#allocation2 + $0x89] sm:$0x7f] %vm766_vm3, %v1726_v54 }
 0x2c9   : > { %1843 = vrot.lane.b32.xlu1 %v2876_v3, %s2644_s8  ;;  %1845 = vrot.lane.b32.xlu2 %v2900_v30, %s2644_s8  ;;  %v1602_v30 = vld [vmem:[#allocation2 + $0x69] sm:$0x7f] }
 0x2ca   : > { %1841 = vrot.lane.b32.xlu0 %v3099_v19, %s2644_s8  ;;  %v1612_v19 = vld [vmem:[#allocation2 + $0xb9] sm:$0x7f] }
 0x2cb   : > { %v1640_v59 = vpop.permute.xlu1 %1639  ;;  %v1660_v41 = vpop.permute.xlu2 %1659 }
 0x2cc   : > { %v1638_v53 = vpop.permute.xlu0 %1637  ;;  %v1719_v48 = vadd.f32 %v1640_v59, %v1599_v63  ;;  %v1729_v20 = vadd.f32 %v1660_v41, %v1609_v11 }
 0x2cd   : > { %v1718_v17 = vadd.f32 %v1638_v53, %v1598_v0  ;;  %v1613_v0 = vld [vmem:[#allocation2 + $0xc1] sm:$0xff] }
 0x2ce   : > { %1749 = vst.msk [vmem:[#allocation2 + $0x51] sm:$0xff] %vm671_vm2, %v1719_v48 }
 0x2cf   : > { %1748 = vst.msk [vmem:[#allocation2 + $0x49] sm:$0x7f] %vm766_vm3, %v1718_v17 }
 0x2d0   : > { %1759 = vst.msk [vmem:[#allocation2 + $0xa1] sm:$0xff] %vm671_vm2, %v1729_v20 }
 0x2d1   : > { %1849 = vrot.lane.b32.xlu1 %v2985_v46, %s2644_s8  ;;  %1851 = vrot.lane.b32.xlu2 %v3021_v55, %s2644_s8  ;;  %v1605_v46 = vld [vmem:[#allocation2 + $0x81] sm:$0xff]  ;;  %v1615_v55 = vld [vmem:[#allocation2 + $0xd1] sm:$0xff] }
 0x2d2   : > { %1847 = vrot.lane.b32.xlu0 %v2942_v38, %s2644_s8 }
 0x2d3   : > { %v1646_v3 = vpop.permute.xlu1 %1645  ;;  %v1666_v33 = vpop.permute.xlu2 %1665 }
 0x2d4   : > { %v1644_v62 = vpop.permute.xlu0 %1643  ;;  %v1722_v2 = vadd.f32 %v1646_v3, %v1602_v30  ;;  %v1732_v13 = vadd.f32 %v1666_v33, %v1612_v19  ;;  %v1777_v3 = vld [vmem:[#allocation2 + $0x40] sm:$0xff]  ;;  %v1616_v19 = vld [vmem:[#allocation2 + $0xd9] sm:$0x7f] }
 0x2d5   : > { %v1721_v21 = vadd.f32 %v1644_v62, %v1601_v9 }
 0x2d6   : > { %1752 = vst.msk [vmem:[#allocation2 + $0x69] sm:$0x7f] %vm766_vm3, %v1722_v2 }
 0x2d7   : > { %1751 = vst.msk [vmem:[#allocation2 + $0x61] sm:$0xff] %vm671_vm2, %v1721_v21  ;;  %v1769_v21 = vld [vmem:[#allocation2] sm:$0xff] }
 0x2d8   : > { %1762 = vst.msk [vmem:[#allocation2 + $0xb9] sm:$0x7f] %vm766_vm3, %v1732_v13 }
 0x2d9   : > { %1979 = vrot.lane.b32.xlu1 %v4368_v28, %s2645_s9  ;;  %1981 = vrot.lane.b32.xlu2 %v4366_v34, %s2645_s9  ;;  %v1608_v34 = vld [vmem:[#allocation2 + $0x99] sm:$0x7f]  ;;  %v1618_v28 = vld [vmem:[#allocation2 + $0xe9] sm:$0x7f] }
 0x2da   : > { %1853 = vrot.lane.b32.xlu0 %v3093_v18, %s2644_s8 }
 0x2db   : > { %v1652_v38 = vpop.permute.xlu1 %1651  ;;  %v1672_v29 = vpop.permute.xlu2 %1671 }
 0x2dc   : > { %v1650_v35 = vpop.permute.xlu0 %1649  ;;  %v1725_v25 = vadd.f32 %v1652_v38, %v1605_v46  ;;  %v1735_v26 = vadd.f32 %v1672_v29, %v1615_v55 }
 0x2dd   : > { %v1724_v37 = vadd.f32 %v1650_v35, %v1604_v40  ;;  %v1772_v40 = vld [vmem:[#allocation2 + $0x18] sm:$0xff] }
 0x2de   : > { %1755 = vst.msk [vmem:[#allocation2 + $0x81] sm:$0xff] %vm671_vm2, %v1725_v25 }
 0x2df   : > { %1754 = vst.msk [vmem:[#allocation2 + $0x79] sm:$0x7f] %vm766_vm3, %v1724_v37 }
 0x2e0   : > { %1765 = vst.msk [vmem:[#allocation2 + $0xd1] sm:$0xff] %vm671_vm2, %v1735_v26 }
 0x2e1   : > { %1985 = vrot.lane.b32.xlu1 %v4371_v43, %s2645_s9  ;;  %1987 = vrot.lane.b32.xlu2 %v4369_v5, %s2645_s9  ;;  %v1611_v5 = vld [vmem:[#allocation2 + $0xb1] sm:$0xff] }
 0x2e2   : > { %1983 = vrot.lane.b32.xlu0 %v4367_v56, %s2645_s9  ;;  %v1771_v43 = vld [vmem:[#allocation2 + $0x10] sm:$0xff] }
 0x2e3   : > { %v1658_v18 = vpop.permute.xlu1 %1657  ;;  %v1678_v32 = vpop.permute.xlu2 %1677 }
 0x2e4   : > { %v1656_v39 = vpop.permute.xlu0 %1655  ;;  %v1728_v52 = vadd.f32 %v1658_v18, %v1608_v34  ;;  %v1738_v24 = vadd.f32 %v1678_v32, %v1618_v28  ;;  %v1776_v18 = vld [vmem:[#allocation2 + $0x38] sm:$0xff] }
 0x2e5   : > { %v1727_v16 = vadd.f32 %v1656_v39, %v1607_v50  ;;  %v1786_v34 = vld [vmem:[#allocation2 + $0x88] sm:$0xff]  ;;  %v1775_v39 = vld [vmem:[#allocation2 + $0x30] sm:$0xff] }
 0x2e6   : > { %1758 = vst.msk [vmem:[#allocation2 + $0x99] sm:$0x7f] %vm766_vm3, %v1728_v52 }
 0x2e7   : > { %1757 = vst.msk [vmem:[#allocation2 + $0x91] sm:$0xff] %vm671_vm2, %v1727_v16  ;;  %v4394_v16 = vld [vmem:[#allocation27_spill] sm:$0xff] }
 0x2e8   : > { %1768 = vst.msk [vmem:[#allocation2 + $0xe9] sm:$0x7f] %vm766_vm3, %v1738_v24 }
 0x2e9   : > { %1991 = vrot.lane.b32.xlu1 %v4374_v36, %s2645_s9  ;;  %1993 = vrot.lane.b32.xlu2 %v4372_v10, %s2645_s9  ;;  %v1614_v10 = vld [vmem:[#allocation2 + $0xc9] sm:$0x7f] }
 0x2ea   : > { %1989 = vrot.lane.b32.xlu0 %v4370_v60, %s2645_s9  ;;  %v1774_v36 = vld [vmem:[#allocation2 + $0x28] sm:$0xff] }
 0x2eb   : > { %v1664_v56 = vpop.permute.xlu1 %1663  ;;  %v1804_v44 = vpop.permute.xlu2 %1803 }
 0x2ec   : > { %v1662_v54 = vpop.permute.xlu0 %1661  ;;  %v1731_v59 = vadd.f32 %v1664_v56, %v1611_v5  ;;  %v1891_v63 = vadd.f32 %v1804_v44, %v1771_v43  ;;  %v1779_v5 = vld [vmem:[#allocation2 + $0x50] sm:$0xff]  ;;  %v1789_v43 = vld [vmem:[#allocation2 + $0xa0] sm:$0xff] }
 0x2ed   : > { %v1730_v11 = vadd.f32 %v1662_v54, %v1610_v51  ;;  %v1778_v51 = vld [vmem:[#allocation2 + $0x48] sm:$0xff] }
 0x2ee   : > { %1761 = vst.msk [vmem:[#allocation2 + $0xb1] sm:$0xff] %vm671_vm2, %v1731_v59 }
 0x2ef   : > { %1760 = vst.msk [vmem:[#allocation2 + $0xa9] sm:$0x7f] %vm766_vm3, %v1730_v11 }
 0x2f0   : > { %1921 = vst.msk [vmem:[#allocation2 + $0x10] sm:$0xff] %vm671_vm2, %v1891_v63 }
 0x2f1   : > { %1997 = vrot.lane.b32.xlu1 %v4377_v23, %s2645_s9  ;;  %1999 = vrot.lane.b32.xlu2 %v4375_v45, %s2645_s9  ;;  %v1617_v45 = vld [vmem:[#allocation2 + $0xe1] sm:$0xff] }
 0x2f2   : > { %1995 = vrot.lane.b32.xlu0 %v4373_v15, %s2645_s9 }
 0x2f3   : > { %v1670_v60 = vpop.permute.xlu1 %1669  ;;  %v1810_v41 = vpop.permute.xlu2 %1809 }
 0x2f4   : > { %v1668_v53 = vpop.permute.xlu0 %1667  ;;  %v1734_v48 = vadd.f32 %v1670_v60, %v1614_v10  ;;  %v1894_v20 = vadd.f32 %v1810_v41, %v1774_v36  ;;  %v4396_v60 = vld [vmem:[#allocation31_spill] sm:$0xff] }
 0x2f5   : > { %v1733_v17 = vadd.f32 %v1668_v53, %v1613_v0  ;;  %v1782_v36 = vld [vmem:[#allocation2 + $0x68] sm:$0xff]  ;;  %v1792_v41 = vld [vmem:[#allocation2 + $0xb8] sm:$0xff] }
 0x2f6   : > { %1764 = vst.msk [vmem:[#allocation2 + $0xc9] sm:$0x7f] %vm766_vm3, %v1734_v48  ;;  %v1781_v48 = vld [vmem:[#allocation2 + $0x60] sm:$0xff] }
 0x2f7   : > { %1763 = vst.msk [vmem:[#allocation2 + $0xc1] sm:$0xff] %vm671_vm2, %v1733_v17 }
 0x2f8   : > { %1924 = vst.msk [vmem:[#allocation2 + $0x28] sm:$0xff] %vm671_vm2, %v1894_v20 }
 0x2f9   : > { %2003 = vrot.lane.b32.xlu1 %v4380_v7, %s2645_s9  ;;  %2005 = vrot.lane.b32.xlu2 %v4378_v12, %s2645_s9  ;;  %v1770_v12 = vld [vmem:[#allocation2 + $0x8] sm:$0xff]  ;;  %v1780_v7 = vld [vmem:[#allocation2 + $0x58] sm:$0xff] }
 0x2fa   : > { %2001 = vrot.lane.b32.xlu0 %v4376_v61, %s2645_s9 }
 0x2fb   : > { %v1676_v15 = vpop.permute.xlu1 %1675  ;;  %v1816_v23 = vpop.permute.xlu2 %1815 }
 0x2fc   : > { %v1674_v30 = vpop.permute.xlu0 %1673  ;;  %v1737_v33 = vadd.f32 %v1676_v15, %v1617_v45  ;;  %v1897_v62 = vadd.f32 %v1816_v23, %v1777_v3  ;;  %v1785_v23 = vld [vmem:[#allocation2 + $0x80] sm:$0xff]  ;;  %v1795_v3 = vld [vmem:[#allocation2 + $0xd0] sm:$0xff] }
 0x2fd   : > { %v1736_v9 = vadd.f32 %v1674_v30, %v1616_v19 }
 0x2fe   : > { %1767 = vst.msk [vmem:[#allocation2 + $0xe1] sm:$0xff] %vm671_vm2, %v1737_v33  ;;  %v1784_v33 = vld [vmem:[#allocation2 + $0x78] sm:$0xff] }
 0x2ff   : > { %1766 = vst.msk [vmem:[#allocation2 + $0xd9] sm:$0x7f] %vm766_vm3, %v1736_v9 }
 0x300   : > { %1927 = vst.msk [vmem:[#allocation2 + $0x40] sm:$0xff] %vm671_vm2, %v1897_v62 }
 0x301   : > { %2009 = vrot.lane.b32.xlu1 %v4382_v8, %s2645_s9  ;;  %2011 = vrot.lane.b32.xlu2 %v4381_v57, %s2645_s9  ;;  %v1773_v57 = vld [vmem:[#allocation2 + $0x20] sm:$0xff]  ;;  %v1783_v8 = vld [vmem:[#allocation2 + $0x70] sm:$0xff] }
 0x302   : > { %2007 = vrot.lane.b32.xlu0 %v4379_v31, %s2645_s9 }
 0x303   : > { %v1802_v61 = vpop.permute.xlu1 %1801  ;;  %v1822_v2 = vpop.permute.xlu2 %1821 }
 0x304   : > { %v1800_v13 = vpop.permute.xlu0 %1799  ;;  %v1890_v38 = vadd.f32 %v1802_v61, %v1770_v12  ;;  %v1900_v46 = vadd.f32 %v1822_v2, %v1780_v7 }
 0x305   : > { %v1889_v55 = vadd.f32 %v1800_v13, %v1769_v21  ;;  %v1787_v13 = vld [vmem:[#allocation2 + $0x90] sm:$0xff] }
 0x306   : > { %1920 = vst.msk [vmem:[#allocation2 + $0x8] sm:$0xff] %vm671_vm2, %v1890_v38 }
 0x307   : > { %1919 = vst.msk [vmem:[#allocation2] sm:$0xff] %vm671_vm2, %v1889_v55 }
 0x308   : > { %1930 = vst.msk [vmem:[#allocation2 + $0x58] sm:$0xff] %vm671_vm2, %v1900_v46 }
 0x309   : > { %1855 = vrot.lane.b32.xlu1 %v3136_v47, %s2644_s8  ;;  %1857 = vrot.lane.b32.xlu2 %v4365_v14, %s2644_s8  ;;  %v4391_v47 = vld [vmem:[#allocation29_spill] sm:$0xff] }
 0x30a   : > { %2013 = vrot.lane.b32.xlu0 %v3239_v22, %s2645_s9  ;;  %v4392_v22 = vld [vmem:[#allocation25_spill] sm:$0xff] }
 0x30b   : > { %v1808_v31 = vpop.permute.xlu1 %1807  ;;  %v1828_v29 = vpop.permute.xlu2 %1827 }
 0x30c   : > { %v1806_v35 = vpop.permute.xlu0 %1805  ;;  %v1893_v25 = vadd.f32 %v1808_v31, %v1773_v57  ;;  %v1903_v26 = vadd.f32 %v1828_v29, %v1783_v8  ;;  %v1791_v31 = vld [vmem:[#allocation2 + $0xb0] sm:$0xff]  ;;  %v1790_v29 = vld [vmem:[#allocation2 + $0xa8] sm:$0xff] }
 0x30d   : > { %v1892_v37 = vadd.f32 %v1806_v35, %v1772_v40  ;;  %v1950_v12 = vld [vmem:[#allocation2 + $0x8] sm:$0x7f] }
 0x30e   : > { %1923 = vst.msk [vmem:[#allocation2 + $0x20] sm:$0xff] %vm671_vm2, %v1893_v25 }
 0x30f   : > { %1922 = vst.msk [vmem:[#allocation2 + $0x18] sm:$0xff] %vm671_vm2, %v1892_v37 }
 0x310   : > { %1933 = vst.msk [vmem:[#allocation2 + $0x70] sm:$0xff] %vm671_vm2, %v1903_v26 }
 0x311   : > { %2017 = vrot.lane.b32.xlu1 %v4383_v4, %s2645_s9  ;;  %2019 = vrot.lane.b32.xlu2 %v4391_v47, %s2645_s9  ;;  %v4393_v4 = vld [vmem:[#allocation26_spill] sm:$0xff] }
 0x312   : > { %2015 = vrot.lane.b32.xlu0 %v4392_v22, %s2645_s9  ;;  %v1794_v22 = vld [vmem:[#allocation2 + $0xc8] sm:$0xff] }
 0x313   : > { %v1814_v14 = vpop.permute.xlu1 %1813  ;;  %v1834_v28 = vpop.permute.xlu2 %1833 }
 0x314   : > { %v1812_v32 = vpop.permute.xlu0 %1811  ;;  %v1896_v50 = vadd.f32 %v1814_v14, %v1776_v18  ;;  %v1906_v52 = vadd.f32 %v1834_v28, %v1786_v34  ;;  %v1793_v28 = vld [vmem:[#allocation2 + $0xc0] sm:$0xff] }
 0x315   : > { %v1895_v24 = vadd.f32 %v1812_v32, %v1775_v39  ;;  %v1953_v40 = vld [vmem:[#allocation2 + $0x20] sm:$0xff] }
 0x316   : > { %1926 = vst.msk [vmem:[#allocation2 + $0x38] sm:$0xff] %vm671_vm2, %v1896_v50 }
 0x317   : > { %1925 = vst.msk [vmem:[#allocation2 + $0x30] sm:$0xff] %vm671_vm2, %v1895_v24 }
 0x318   : > { %1936 = vst.msk [vmem:[#allocation2 + $0x88] sm:$0xff] %vm671_vm2, %v1906_v52 }
 0x319   : > { %2023 = vrot.lane.b32.xlu1 %v4386_v42, %s2645_s9  ;;  %2025 = vrot.lane.b32.xlu2 %v4393_v4, %s2645_s9  ;;  %v4395_v42 = vld [vmem:[#allocation30_spill] sm:$0xff] }
 0x31a   : > { %2021 = vrot.lane.b32.xlu0 %v4394_v16, %s2645_s9  ;;  %v1949_v4 = vld [vmem:[#allocation2] sm:$0xff] }
 0x31b   : > { %v1820_v56 = vpop.permute.xlu1 %1819  ;;  %v1840_v44 = vpop.permute.xlu2 %1839 }
 0x31c   : > { %v1818_v54 = vpop.permute.xlu0 %1817  ;;  %v1899_v59 = vadd.f32 %v1820_v56, %v1779_v5  ;;  %v1909_v63 = vadd.f32 %v1840_v44, %v1789_v43  ;;  %v1796_v5 = vld [vmem:[#allocation2 + $0xd8] sm:$0xff] }
 0x31d   : > { %v1898_v11 = vadd.f32 %v1818_v54, %v1778_v51  ;;  %v1956_v14 = vld [vmem:[#allocation2 + $0x38] sm:$0x7f] }
 0x31e   : > { %1929 = vst.msk [vmem:[#allocation2 + $0x50] sm:$0xff] %vm671_vm2, %v1899_v59 }
 0x31f   : > { %1928 = vst.msk [vmem:[#allocation2 + $0x48] sm:$0xff] %vm671_vm2, %v1898_v11  ;;  %v1952_v11 = vld [vmem:[#allocation2 + $0x18] sm:$0x7f] }
 0x320   : > { %1939 = vst.msk [vmem:[#allocation2 + $0xa0] sm:$0xff] %vm671_vm2, %v1909_v63 }
 0x321   : > { %2029 = vrot.lane.b32.xlu1 %v4395_v42, %s2645_s9  ;;  %2031 = vrot.lane.b32.xlu2 %v3366_v58, %s2645_s9  ;;  %v4397_v58 = vld [vmem:[#allocation32_spill] sm:$0xff] }
 0x322   : > { %2027 = vrot.lane.b32.xlu0 %v4396_v60, %s2645_s9 }
 0x323   : > { %v1826_v10 = vpop.permute.xlu1 %1825  ;;  %v1846_v53 = vpop.permute.xlu2 %1845 }
 0x324   : > { %v1824_v0 = vpop.permute.xlu0 %1823  ;;  %v1902_v20 = vadd.f32 %v1826_v10, %v1782_v36  ;;  %v1912_v17 = vadd.f32 %v1846_v53, %v1792_v41  ;;  %v1951_v10 = vld [vmem:[#allocation2 + $0x10] sm:$0xff] }
 0x325   : > { %v1901_v15 = vadd.f32 %v1824_v0, %v1781_v48  ;;  %v1959_v44 = vld [vmem:[#allocation2 + $0x50] sm:$0xff] }
 0x326   : > { %1932 = vst.msk [vmem:[#allocation2 + $0x68] sm:$0xff] %vm671_vm2, %v1902_v20 }
 0x327   : > { %1931 = vst.msk [vmem:[#allocation2 + $0x60] sm:$0xff] %vm671_vm2, %v1901_v15  ;;  %v1955_v15 = vld [vmem:[#allocation2 + $0x30] sm:$0xff] }
 0x328   : > { %1942 = vst.msk [vmem:[#allocation2 + $0xb8] sm:$0xff] %vm671_vm2, %v1912_v17 }
 0x329   : > { %2035 = vrot.lane.b32.xlu1 %v3642_v49, %s2645_s9  ;;  %2037 = vrot.lane.b32.xlu2 %v3634_v6, %s2645_s9  ;;  %v1788_v6 = vld [vmem:[#allocation2 + $0x98] sm:$0xff] }
 0x32a   : > { %2033 = vrot.lane.b32.xlu0 %v4397_v58, %s2645_s9 }
 0x32b   : > { %v1832_v45 = vpop.permute.xlu1 %1831  ;;  %v1852_v30 = vpop.permute.xlu2 %1851 }
 0x32c   : > { %v1830_v19 = vpop.permute.xlu0 %1829  ;;  %v1905_v62 = vadd.f32 %v1832_v45, %v1785_v23  ;;  %v1915_v9 = vadd.f32 %v1852_v30, %v1795_v3  ;;  %v1954_v23 = vld [vmem:[#allocation2 + $0x28] sm:$0x7f] }
 0x32d   : > { %v1904_v61 = vadd.f32 %v1830_v19, %v1784_v33  ;;  %v1962_v0 = vld [vmem:[#allocation2 + $0x68] sm:$0x7f] }
 0x32e   : > { %1935 = vst.msk [vmem:[#allocation2 + $0x80] sm:$0xff] %vm671_vm2, %v1905_v62 }
 0x32f   : > { %1934 = vst.msk [vmem:[#allocation2 + $0x78] sm:$0xff] %vm671_vm2, %v1904_v61 }
 0x330   : > { %1945 = vst.msk [vmem:[#allocation2 + $0xd0] sm:$0xff] %vm671_vm2, %v1915_v9 }
 0x333   : > { %v1838_v49 = vpop.permute.xlu1 %1837  ;;  %v1982_v7 = vpop.permute.xlu2 %1981 }
 0x334   : > { %v1836_v2 = vpop.permute.xlu0 %1835  ;;  %v1908_v21 = vadd.f32 %v1838_v49, %v1788_v6  ;;  %v2070_v38 = vadd.f32 %v1982_v7, %v1950_v12  ;;  %v1958_v6 = vld [vmem:[#allocation2 + $0x48] sm:$0x7f] }
 0x335   : > { %v1907_v46 = vadd.f32 %v1836_v2, %v1787_v13  ;;  %v1965_v19 = vld [vmem:[#allocation2 + $0x80] sm:$0xff] }
 0x336   : > { %1938 = vst.msk [vmem:[#allocation2 + $0x98] sm:$0xff] %vm671_vm2, %v1908_v21  ;;  %v1957_v13 = vld [vmem:[#allocation2 + $0x40] sm:$0xff] }
 0x337   : > { %1937 = vst.msk [vmem:[#allocation2 + $0x90] sm:$0xff] %vm671_vm2, %v1907_v46 }
 0x338   : > { %2100 = vst.msk [vmem:[#allocation2 + $0x8] sm:$0x7f] %vm766_vm3, %v2070_v38 }
 0x33b   : > { %v1844_v55 = vpop.permute.xlu1 %1843  ;;  %v1988_v57 = vpop.permute.xlu2 %1987 }
 0x33c   : > { %v1842_v8 = vpop.permute.xlu0 %1841  ;;  %v1911_v35 = vadd.f32 %v1844_v55, %v1791_v31  ;;  %v2073_v26 = vadd.f32 %v1988_v57, %v1953_v40  ;;  %v1798_v31 = vld [vmem:[#allocation2 + $0xe8] sm:$0xff] }
 0x33d   : > { %v1910_v25 = vadd.f32 %v1842_v8, %v1790_v29 }
 0x33e   : > { %1941 = vst.msk [vmem:[#allocation2 + $0xb0] sm:$0xff] %vm671_vm2, %v1911_v35 }
 0x33f   : > { %v3944_v37 = vld [vmem:[#allocation2 + $0x8] sm:$0xff]  ;;  %1940 = vst.msk [vmem:[#allocation2 + $0xa8] sm:$0xff] %vm671_vm2, %v1910_v25 }
 0x340   : > { %2162 = vst.msk [vmem:[%s3763_s13 + $0x8] sm:$0xff] %vm671_vm2, %v3944_v37  ;;  %v2256_v57 = vmul.f32 %v3944_v37, %v3944_v37  ;;  %v2224_v29 = vsel %vm671_vm2, %v3944_v37, 0.0 }
 0x341   : > { %2103 = vst.msk [vmem:[#allocation2 + $0x20] sm:$0xff] %vm671_vm2, %v2073_v26 }
 0x343   : > { %v1850_v47 = vpop.permute.xlu1 %1849  ;;  %v1994_v18 = vpop.permute.xlu2 %1993 }
 0x344   : > { %v1848_v34 = vpop.permute.xlu0 %1847  ;;  %v1914_v32 = vadd.f32 %v1850_v47, %v1794_v22  ;;  %v2076_v39 = vadd.f32 %v1994_v18, %v1956_v14  ;;  %v2318_v14 = vsel %vm671_vm2, %v2256_v57, 0.0 }
 0x345   : > { %v1913_v50 = vadd.f32 %v1848_v34, %v1793_v28  ;;  %v1961_v28 = vld [vmem:[#allocation2 + $0x60] sm:$0xff] }
 0x346   : > { %1944 = vst.msk [vmem:[#allocation2 + $0xc8] sm:$0xff] %vm671_vm2, %v1914_v32 }
 0x347   : > { %1943 = vst.msk [vmem:[#allocation2 + $0xc0] sm:$0xff] %vm671_vm2, %v1913_v50 }
 0x348   : > { %v3953_v52 = vld [vmem:[#allocation2 + $0x20] sm:$0xff]  ;;  %2106 = vst.msk [vmem:[#allocation2 + $0x38] sm:$0x7f] %vm766_vm3, %v2076_v39 }
 0x349   : > { %2165 = vst.msk [vmem:[%s3763_s13 + $0x20] sm:$0xff] %vm671_vm2, %v3953_v52 }
 0x34b   : > { %v1980_v24 = vpop.permute.xlu1 %1979  ;;  %v2000_v16 = vpop.permute.xlu2 %1999 }
 0x34c   : > { %v1854_v56 = vpop.permute.xlu0 %1853  ;;  %v2069_v43 = vadd.f32 %v1980_v24, %v1949_v4  ;;  %v2079_v51 = vadd.f32 %v2000_v16, %v1959_v44  ;;  %v1960_v16 = vld [vmem:[#allocation2 + $0x58] sm:$0x7f] }
 0x34d   : > { %v1916_v54 = vadd.f32 %v1854_v56, %v1796_v5  ;;  %v1969_v5 = vld [vmem:[#allocation2 + $0xa0] sm:$0xff] }
 0x34e   : > { %2099 = vst.msk [vmem:[#allocation2] sm:$0xff] %vm671_vm2, %v2069_v43 }
 0x34f   : > { %v3960_v59 = vld [vmem:[#allocation2 + $0x38] sm:$0xff]  ;;  %1946 = vst.msk [vmem:[#allocation2 + $0xd8] sm:$0xff] %vm671_vm2, %v1916_v54 }
 0x350   : > { %2168 = vst.msk [vmem:[%s3763_s13 + $0x38] sm:$0xff] %vm671_vm2, %v3960_v59  ;;  %v2262_v18 = vmul.f32 %v3960_v59, %v3960_v59  ;;  %v2229_v39 = vsel %vm671_vm2, %v3960_v59, 0.0 }
 0x351   : > { %2109 = vst.msk [vmem:[#allocation2 + $0x50] sm:$0xff] %vm671_vm2, %v2079_v51 }
 0x353   : > { %v1986_v63 = vpop.permute.xlu1 %1985  ;;  %v2006_v42 = vpop.permute.xlu2 %2005 }
 0x354   : > { %v1984_v60 = vpop.permute.xlu0 %1983  ;;  %v2072_v36 = vadd.f32 %v1986_v63, %v1952_v11  ;;  %v2082_v48 = vadd.f32 %v2006_v42, %v1962_v0  ;;  %v2323_v11 = vsel %vm671_vm2, %v2262_v18, 0.0  ;;  %v1963_v0 = vld [vmem:[#allocation2 + $0x70] sm:$0xff] }
 0x355   : > { %v3967_v41 = vld [vmem:[#allocation2] sm:$0xff]  ;;  %v2071_v53 = vadd.f32 %v1984_v60, %v1951_v10  ;;  %v1964_v10 = vld [vmem:[#allocation2 + $0x78] sm:$0x7f] }
 0x356   : > { %2161 = vst.msk [vmem:[%s3763_s13] sm:$0xff] %vm671_vm2, %v3967_v41 }
 0x357   : > { %2101 = vst.msk [vmem:[#allocation2 + $0x10] sm:$0xff] %vm671_vm2, %v2071_v53 }
 0x358   : > { %v3973_v20 = vld [vmem:[#allocation2 + $0x50] sm:$0xff]  ;;  %2102 = vst.msk [vmem:[#allocation2 + $0x18] sm:$0x7f] %vm766_vm3, %v2072_v36 }
 0x359   : > { %2171 = vst.msk [vmem:[%s3763_s13 + $0x50] sm:$0xff] %vm671_vm2, %v3973_v20 }
 0x35a   : > { %2112 = vst.msk [vmem:[#allocation2 + $0x68] sm:$0x7f] %vm766_vm3, %v2082_v48 }
 0x35b   : > { %v1992_v17 = vpop.permute.xlu1 %1991  ;;  %v2012_v58 = vpop.permute.xlu2 %2011 }
 0x35c   : > { %v1990_v45 = vpop.permute.xlu0 %1989  ;;  %v2075_v3 = vadd.f32 %v1992_v17, %v1955_v15  ;;  %v2085_v62 = vadd.f32 %v2012_v58, %v1965_v19  ;;  %v1972_v17 = vld [vmem:[#allocation2 + $0xb8] sm:$0x7f]  ;;  %v1797_v19 = vld [vmem:[#allocation2 + $0xe0] sm:$0xff] }
 0x35d   : > { %v2074_v30 = vadd.f32 %v1990_v45, %v1954_v23 }
 0x35e   : > { %v3980_v33 = vld [vmem:[#allocation2 + $0x10] sm:$0xff]  ;;  %2105 = vst.msk [vmem:[#allocation2 + $0x30] sm:$0xff] %vm671_vm2, %v2075_v3 }
 0x35f   : > { %2163 = vst.msk [vmem:[%s3763_s13 + $0x10] sm:$0xff] %vm671_vm2, %v3980_v33  ;;  %v2132_v9 = vld [vmem:[#allocation2 + $0x18] sm:$0xff] }
 0x360   : > { %2164 = vst.msk [vmem:[%s3763_s13 + $0x18] sm:$0xff] %vm671_vm2, %v2132_v9  ;;  %v2258_v7 = vmul.f32 %v2132_v9, %v2132_v9  ;;  %v2225_v38 = vsel %vm671_vm2, %v2132_v9, 0.0 }
 0x361   : > { %2104 = vst.msk [vmem:[#allocation2 + $0x28] sm:$0x7f] %vm766_vm3, %v2074_v30  ;;  %v3989_v61 = vld [vmem:[#allocation2 + $0x68] sm:$0xff]  ;;  %v2226_v40 = vadd.f32 %v2225_v38, %v2224_v29  ;;  %v2255_v38 = vmul.f32 %v3967_v41, %v3967_v41  ;;  %v2193_v29 = vsel %vm671_vm2, %v3967_v41, 0.0 }
 0x362   : > { %2115 = vst.msk [vmem:[#allocation2 + $0x80] sm:$0xff] %vm671_vm2, %v2085_v62  ;;  %v2319_v25 = vsel %vm671_vm2, %v2258_v7, 0.0  ;;  %v2257_v7 = vmul.f32 %v3980_v33, %v3980_v33 }
 0x363   : > { %v1998_v49 = vpop.permute.xlu1 %1997  ;;  %v1858_v12 = vpop.permute.xlu2 %1857  ;;  %2174 = vst.msk [vmem:[%s3763_s13 + $0x68] sm:$0xff] %vm671_vm2, %v3989_v61  ;;  %v2320_v50 = vadd.f32 %v2319_v25, %v2318_v14 }
 0x364   : > { %v1996_v2 = vpop.permute.xlu0 %1995  ;;  %v2078_v21 = vadd.f32 %v1998_v49, %v1958_v6  ;;  %v1918_v8 = vadd.f32 %v1858_v12, %v1798_v31  ;;  %v1966_v49 = vld [vmem:[#allocation2 + $0x88] sm:$0x7f]  ;;  %v1975_v12 = vld [vmem:[#allocation2 + $0xd0] sm:$0xff]  ;;  %v2194_v31 = vsel %vm671_vm2, %v3980_v33, 0.0 }
 0x365   : > { %v3996_v46 = vld [vmem:[#allocation2 + $0x30] sm:$0xff]  ;;  %v2077_v55 = vadd.f32 %v1996_v2, %v1957_v13  ;;  %v2195_v33 = vadd.f32 %v2194_v31, %v2193_v29 }
 0x366   : > { %2167 = vst.msk [vmem:[%s3763_s13 + $0x30] sm:$0xff] %vm671_vm2, %v3996_v46  ;;  %v2261_v25 = vmul.f32 %v3996_v46, %v3996_v46 }
 0x367   : > { %2107 = vst.msk [vmem:[#allocation2 + $0x40] sm:$0xff] %vm671_vm2, %v2077_v55 }
 0x368   : > { %v2134_v35 = vld [vmem:[#allocation2 + $0x28] sm:$0xff]  ;;  %2108 = vst.msk [vmem:[#allocation2 + $0x48] sm:$0x7f] %vm766_vm3, %v2078_v21 }
 0x369   : > { %2166 = vst.msk [vmem:[%s3763_s13 + $0x28] sm:$0xff] %vm671_vm2, %v2134_v35  ;;  %v2260_v26 = vmul.f32 %v2134_v35, %v2134_v35  ;;  %v4010_v47 = vld [vmem:[#allocation2 + $0x80] sm:$0xff]  ;;  %v2227_v22 = vsel %vm671_vm2, %v2134_v35, 0.0  ;;  %v2259_v35 = vmul.f32 %v3953_v52, %v3953_v52 }
 0x36a   : > { %1948 = vst.msk [vmem:[#allocation2 + $0xe8] sm:$0xff] %vm671_vm2, %v1918_v8  ;;  %v2228_v37 = vadd.f32 %v2227_v22, %v2226_v40  ;;  %v2288_v8 = vsel %vm671_vm2, %v2257_v7, 0.0  ;;  %v2287_v40 = vsel %vm671_vm2, %v2255_v38, 0.0  ;;  %v1968_v22 = vld [vmem:[#allocation2 + $0x98] sm:$0x7f] }
 0x36b   : > { %v2004_v34 = vpop.permute.xlu1 %2003  ;;  %v2020_v32 = vpop.permute.xlu2 %2019  ;;  %2177 = vst.msk [vmem:[%s3763_s13 + $0x80] sm:$0xff] %vm671_vm2, %v4010_v47  ;;  %v2321_v24 = vsel %vm671_vm2, %v2260_v26, 0.0  ;;  %v2289_v41 = vadd.f32 %v2288_v8, %v2287_v40 }
 0x36c   : > { %v2002_v4 = vpop.permute.xlu0 %2001  ;;  %v2081_v56 = vadd.f32 %v2004_v34, %v1961_v28  ;;  %v4023_v43 = vadd.f32 %v2229_v39, %v2228_v37  ;;  %v2089_v54 = vadd.f32 %v2020_v32, %v1969_v5  ;;  %v2322_v51 = vadd.f32 %v2321_v24, %v2320_v50  ;;  %v1967_v34 = vld [vmem:[#allocation2 + $0x90] sm:$0xff] }
 0x36d   : > { %v2080_v44 = vadd.f32 %v2002_v4, %v1960_v16  ;;  %v2196_v24 = vsel %vm671_vm2, %v3953_v52, 0.0  ;;  %v2198_v4 = vsel %vm671_vm2, %v3996_v46, 0.0  ;;  %v2290_v16 = vsel %vm671_vm2, %v2259_v35, 0.0 }
 0x36e   : > { %v4025_v63 = vld [vmem:[#allocation2 + $0x40] sm:$0xff]  ;;  %2111 = vst.msk [vmem:[#allocation2 + $0x60] sm:$0xff] %vm671_vm2, %v2081_v56  ;;  %v4034_v42 = vadd.f32 %v2323_v11, %v2322_v51  ;;  %v2197_v56 = vadd.f32 %v2196_v24, %v2195_v33  ;;  %v2292_v5 = vsel %vm671_vm2, %v2261_v25, 0.0  ;;  %v2208_v24 = vsel %vm671_vm2, %v4010_v47, 0.0 }
 0x36f   : > { %2169 = vst.msk [vmem:[%s3763_s13 + $0x40] sm:$0xff] %vm671_vm2, %v4025_v63  ;;  %v4032_v59 = vld [vmem:[#allocation2 + $0x48] sm:$0xff]  ;;  %v2263_v39 = vmul.f32 %v4025_v63, %v4025_v63  ;;  %v2200_v51 = vsel %vm671_vm2, %v4025_v63, 0.0 }
 0x370   : > { %2110 = vst.msk [vmem:[#allocation2 + $0x58] sm:$0x7f] %vm766_vm3, %v2080_v44  ;;  %v2199_v46 = vadd.f32 %v2198_v4, %v2197_v56  ;;  %v2231_v38 = vsel %vm671_vm2, %v4032_v59, 0.0  ;;  %v2235_v4 = vsel %vm671_vm2, %v3989_v61, 0.0 }
 0x371   : > { %2119 = vst.msk [vmem:[#allocation2 + $0xa0] sm:$0xff] %vm671_vm2, %v2089_v54  ;;  %v1978_v14 = vld [vmem:[#allocation2 + $0xe8] sm:$0x7f]  ;;  %v2291_v54 = vadd.f32 %v2290_v16, %v2289_v41  ;;  %v2294_v11 = vsel %vm671_vm2, %v2263_v39, 0.0  ;;  %v2232_v33 = vadd.f32 %v2231_v38, %v4023_v43 }
 0x372   : > { %2170 = vst.msk [vmem:[%s3763_s13 + $0x48] sm:$0xff] %vm671_vm2, %v4032_v59 }
 0x373   : > { %v2010_v60 = vpop.permute.xlu1 %2009  ;;  %v2026_v36 = vpop.permute.xlu2 %2025 }
 0x374   : > { %v2008_v53 = vpop.permute.xlu0 %2007  ;;  %v2084_v48 = vadd.f32 %v2010_v60, %v1964_v10  ;;  %v2092_v45 = vadd.f32 %v2026_v36, %v1972_v17  ;;  %v2265_v60 = vmul.f32 %v3973_v20, %v3973_v20  ;;  %v2293_v10 = vadd.f32 %v2292_v5, %v2291_v54  ;;  %v1970_v17 = vld [vmem:[#allocation2 + $0xa8] sm:$0x7f] }
 0x375   : > { %v4041_v15 = vld [vmem:[#allocation2 + $0x60] sm:$0xff]  ;;  %v2083_v58 = vadd.f32 %v2008_v53, %v1963_v0  ;;  %v2201_v36 = vadd.f32 %v2200_v51, %v2199_v46  ;;  %v1971_v0 = vld [vmem:[#allocation2 + $0xb0] sm:$0xff] }
 0x376   : > { %2173 = vst.msk [vmem:[%s3763_s13 + $0x60] sm:$0xff] %vm671_vm2, %v4041_v15  ;;  %v2267_v63 = vmul.f32 %v4041_v15, %v4041_v15  ;;  %v2296_v7 = vsel %vm671_vm2, %v2265_v60, 0.0 }
 0x377   : > { %2113 = vst.msk [vmem:[#allocation2 + $0x70] sm:$0xff] %vm671_vm2, %v2083_v58  ;;  %v4047_v23 = vld [vmem:[#allocation2 + $0x58] sm:$0xff] }
 0x378   : > { %2114 = vst.msk [vmem:[#allocation2 + $0x78] sm:$0x7f] %vm766_vm3, %v2084_v48  ;;  %v4050_v3 = vld [vmem:[#allocation2 + $0xa0] sm:$0xff]  ;;  %v2298_v31 = vsel %vm671_vm2, %v2267_v63, 0.0  ;;  %v2233_v35 = vsel %vm671_vm2, %v4047_v23, 0.0 }
 0x379   : > { %2122 = vst.msk [vmem:[#allocation2 + $0xb8] sm:$0x7f] %vm766_vm3, %v2092_v45  ;;  %v2295_v45 = vadd.f32 %v2294_v11, %v2293_v10  ;;  %v2212_v10 = vsel %vm671_vm2, %v4050_v3, 0.0 }
 0x37a   : > { %2172 = vst.msk [vmem:[%s3763_s13 + $0x58] sm:$0xff] %vm671_vm2, %v4047_v23 }
 0x37b   : > { %v1856_v30 = vpop.permute.xlu1 %1855  ;;  %v2032_v62 = vpop.permute.xlu2 %2031  ;;  %2181 = vst.msk [vmem:[%s3763_s13 + $0xa0] sm:$0xff] %vm671_vm2, %v4050_v3  ;;  %v2297_v8 = vadd.f32 %v2296_v7, %v2295_v45 }
 0x37c   : > { %v2014_v9 = vpop.permute.xlu0 %2013  ;;  %v1917_v6 = vadd.f32 %v1856_v30, %v1797_v19  ;;  %v2095_v13 = vadd.f32 %v2032_v62, %v1975_v12  ;;  %v2264_v19 = vmul.f32 %v4032_v59, %v4032_v59  ;;  %v2204_v12 = vsel %vm671_vm2, %v4041_v15, 0.0 }
 0x37d   : > { %v2086_v2 = vadd.f32 %v2014_v9, %v1966_v49  ;;  %v2202_v9 = vsel %vm671_vm2, %v3973_v20, 0.0  ;;  %v2266_v20 = vmul.f32 %v4047_v23, %v4047_v23  ;;  %v2299_v25 = vadd.f32 %v2298_v31, %v2297_v8 }
 0x37e   : > { %v4061_v21 = vld [vmem:[#allocation2 + $0x70] sm:$0xff]  ;;  %1947 = vst.msk [vmem:[#allocation2 + $0xe0] sm:$0xff] %vm671_vm2, %v1917_v6  ;;  %v2325_v40 = vsel %vm671_vm2, %v2264_v19, 0.0 }
 0x37f   : > { %2175 = vst.msk [vmem:[%s3763_s13 + $0x70] sm:$0xff] %vm671_vm2, %v4061_v21  ;;  %v4069_v55 = vld [vmem:[#allocation2 + $0x78] sm:$0xff]  ;;  %v2269_v62 = vmul.f32 %v4061_v21, %v4061_v21  ;;  %v2206_v15 = vsel %vm671_vm2, %v4061_v21, 0.0  ;;  %v2271_v21 = vmul.f32 %v4010_v47, %v4010_v47  ;;  %v2327_v41 = vsel %vm671_vm2, %v2266_v20, 0.0 }
 0x380   : > { %2116 = vst.msk [vmem:[#allocation2 + $0x88] sm:$0x7f] %vm766_vm3, %v2086_v2  ;;  %v4074_v57 = vld [vmem:[#allocation2 + $0xb8] sm:$0xff]  ;;  %v2326_v43 = vadd.f32 %v2325_v40, %v4034_v42  ;;  %v2270_v16 = vmul.f32 %v4069_v55, %v4069_v55  ;;  %v2275_v42 = vmul.f32 %v4050_v3, %v4050_v3 }
 0x381   : > { %2125 = vst.msk [vmem:[#allocation2 + $0xd0] sm:$0xff] %vm671_vm2, %v2095_v13  ;;  %v2203_v13 = vadd.f32 %v2202_v9, %v2201_v36  ;;  %v2300_v59 = vsel %vm671_vm2, %v2269_v62, 0.0  ;;  %v2302_v51 = vsel %vm671_vm2, %v2271_v21, 0.0 }
 0x382   : > { %2176 = vst.msk [vmem:[%s3763_s13 + $0x78] sm:$0xff] %vm671_vm2, %v4069_v55  ;;  %v2301_v39 = vadd.f32 %v2300_v59, %v2299_v25  ;;  %v2328_v46 = vadd.f32 %v2327_v41, %v2326_v43 }
 0x383   : > { %v2018_v26 = vpop.permute.xlu1 %2017  ;;  %v2038_v37 = vpop.permute.xlu2 %2037  ;;  %2184 = vst.msk [vmem:[%s3763_s13 + $0xb8] sm:$0xff] %vm671_vm2, %v4074_v57  ;;  %v2205_v29 = vadd.f32 %v2204_v12, %v2203_v13  ;;  %v2306_v12 = vsel %vm671_vm2, %v2275_v42, 0.0  ;;  %v1976_v13 = vld [vmem:[#allocation2 + $0xd8] sm:$0x7f] }
 0x384   : > { %v2016_v18 = vpop.permute.xlu0 %2015  ;;  %v2088_v28 = vadd.f32 %v2018_v26, %v1968_v22  ;;  %v2098_v32 = vadd.f32 %v2038_v37, %v1978_v14  ;;  %v1974_v22 = vld [vmem:[#allocation2 + $0xc8] sm:$0x7f]  ;;  %v2268_v37 = vmul.f32 %v3989_v61, %v3989_v61  ;;  %v2237_v61 = vsel %vm671_vm2, %v4069_v55, 0.0 }
 0x385   : > { %v2087_v50 = vadd.f32 %v2016_v18, %v1967_v34  ;;  %v2207_v14 = vadd.f32 %v2206_v15, %v2205_v29  ;;  %v1973_v34 = vld [vmem:[#allocation2 + $0xc0] sm:$0xff]  ;;  %v2303_v63 = vadd.f32 %v2302_v51, %v2301_v39  ;;  %v2285_v51 = vmul.f32 %v3798_v27, %v3798_v27 }
 0x386   : > { %2118 = vst.msk [vmem:[#allocation2 + $0x98] sm:$0x7f] %vm766_vm3, %v2088_v28  ;;  %v1977_v62 = vld [vmem:[#allocation2 + $0xe0] sm:$0xff] }
 0x387   : > { %2117 = vst.msk [vmem:[#allocation2 + $0x90] sm:$0xff] %vm671_vm2, %v2087_v50  ;;  %v4101_v44 = vld [vmem:[#allocation2 + $0x88] sm:$0xff]  ;;  %v2209_v47 = vadd.f32 %v2208_v24, %v2207_v14 }
 0x388   : > { %2128 = vst.msk [vmem:[#allocation2 + $0xe8] sm:$0x7f] %vm766_vm3, %v2098_v32  ;;  %v4106_v52 = vld [vmem:[#allocation2 + $0xd0] sm:$0xff]  ;;  %v2234_v32 = vadd.f32 %v2233_v35, %v2232_v33  ;;  %v2272_v11 = vmul.f32 %v4101_v44, %v4101_v44  ;;  %v2239_v55 = vsel %vm671_vm2, %v4101_v44, 0.0 }
 0x389   : > { %2178 = vst.msk [vmem:[%s3763_s13 + $0x88] sm:$0xff] %vm671_vm2, %v4101_v44 }
 0x38a   : > { %2187 = vst.msk [vmem:[%s3763_s13 + $0xd0] sm:$0xff] %vm671_vm2, %v4106_v52  ;;  %v2236_v36 = vadd.f32 %v2235_v4, %v2234_v32  ;;  %v2333_v7 = vsel %vm671_vm2, %v2272_v11, 0.0  ;;  %v2245_v4 = vsel %vm671_vm2, %v4074_v57, 0.0 }
 0x38b   : > { %v2024_v53 = vpop.permute.xlu1 %2023 }
 0x38c   : > { %v2022_v48 = vpop.permute.xlu0 %2021  ;;  %v2091_v58 = vadd.f32 %v2024_v53, %v1971_v0  ;;  %v2329_v53 = vsel %vm671_vm2, %v2268_v37, 0.0 }
 0x38d   : > { %v2090_v30 = vadd.f32 %v2022_v48, %v1970_v17  ;;  %v4126_v6 = vld [vmem:[#allocation2 + $0x98] sm:$0xff]  ;;  %v2331_v17 = vsel %vm671_vm2, %v2270_v16, 0.0  ;;  %v2330_v19 = vadd.f32 %v2329_v53, %v2328_v46 }
 0x38e   : > { %2121 = vst.msk [vmem:[#allocation2 + $0xb0] sm:$0xff] %vm671_vm2, %v2091_v58  ;;  %v2147_v49 = vld [vmem:[#allocation2 + $0x90] sm:$0xff]  ;;  %v2274_v48 = vmul.f32 %v4126_v6, %v4126_v6  ;;  %v2238_v58 = vadd.f32 %v2237_v61, %v2236_v36  ;;  %v2241_v9 = vsel %vm671_vm2, %v4126_v6, 0.0 }
 0x38f   : > { %2120 = vst.msk [vmem:[#allocation2 + $0xa8] sm:$0x7f] %vm766_vm3, %v2090_v30  ;;  %v4132_v2 = vld [vmem:[#allocation2 + $0xe8] sm:$0xff]  ;;  %v2273_v23 = vmul.f32 %v2147_v49, %v2147_v49  ;;  %v2210_v54 = vsel %vm671_vm2, %v2147_v49, 0.0  ;;  %v2332_v15 = vadd.f32 %v2331_v17, %v2330_v19 }
 0x390   : > { %2179 = vst.msk [vmem:[%s3763_s13 + $0x90] sm:$0xff] %vm671_vm2, %v2147_v49  ;;  %v2211_v0 = vadd.f32 %v2210_v54, %v2209_v47  ;;  %v2240_v31 = vadd.f32 %v2239_v55, %v2238_v58  ;;  %v2335_v59 = vsel %vm671_vm2, %v2274_v48, 0.0  ;;  %v2218_v54 = vsel %vm671_vm2, %v4106_v52, 0.0 }
 0x391   : > { %2180 = vst.msk [vmem:[%s3763_s13 + $0x98] sm:$0xff] %vm671_vm2, %v4126_v6  ;;  %v2304_v60 = vsel %vm671_vm2, %v2273_v23, 0.0  ;;  %v2222_v58 = vsel %vm671_vm2, %v3798_v27, 0.0 }
 0x392   : > { %2190 = vst.msk [vmem:[%s3763_s13 + $0xe8] sm:$0xff] %vm671_vm2, %v4132_v2  ;;  %v2305_v30 = vadd.f32 %v2304_v60, %v2303_v63  ;;  %v2213_v29 = vadd.f32 %v2212_v10, %v2211_v0  ;;  %v2242_v33 = vadd.f32 %v2241_v9, %v2240_v31 }
 0x393   : > { %v2030_v26 = vpop.permute.xlu1 %2029 }
 0x394   : > { %v2028_v18 = vpop.permute.xlu0 %2027  ;;  %v2094_v28 = vadd.f32 %v2030_v26, %v1974_v22  ;;  %v2307_v21 = vadd.f32 %v2306_v12, %v2305_v30  ;;  %v2334_v26 = vadd.f32 %v2333_v7, %v2332_v15  ;;  %v2316_v7 = vsel %vm671_vm2, %v2285_v51, 0.0 }
 0x395   : > { %v2093_v50 = vadd.f32 %v2028_v18, %v1973_v34  ;;  %v2151_v5 = vld [vmem:[#allocation2 + $0xb0] sm:$0xff]  ;;  %v2278_v18 = vmul.f32 %v4074_v57, %v4074_v57  ;;  %v2281_v34 = vmul.f32 %v4106_v52, %v4106_v52  ;;  %v2284_v57 = vmul.f32 %v4132_v2, %v4132_v2 }
 0x396   : > { %2124 = vst.msk [vmem:[#allocation2 + $0xc8] sm:$0x7f] %vm766_vm3, %v2094_v28  ;;  %v2150_v56 = vld [vmem:[#allocation2 + $0xa8] sm:$0xff]  ;;  %v2277_v45 = vmul.f32 %v2151_v5, %v2151_v5  ;;  %v2214_v20 = vsel %vm671_vm2, %v2151_v5, 0.0  ;;  %v2336_v28 = vadd.f32 %v2335_v59, %v2334_v26 }
 0x397   : > { %2123 = vst.msk [vmem:[#allocation2 + $0xc0] sm:$0xff] %vm671_vm2, %v2093_v50  ;;  %v2276_v49 = vmul.f32 %v2150_v56, %v2150_v56  ;;  %v2243_v35 = vsel %vm671_vm2, %v2150_v56, 0.0  ;;  %v2215_v22 = vadd.f32 %v2214_v20, %v2213_v29  ;;  %v2339_v46 = vsel %vm671_vm2, %v2278_v18, 0.0 }
 0x398   : > { %2182 = vst.msk [vmem:[%s3763_s13 + $0xa8] sm:$0xff] %vm671_vm2, %v2150_v56  ;;  %v2308_v25 = vsel %vm671_vm2, %v2277_v45, 0.0  ;;  %v2244_v41 = vadd.f32 %v2243_v35, %v2242_v33  ;;  %v2286_v56 = vmul.f32 %v3767_v1, %v3767_v1  ;;  %v2312_v11 = vsel %vm671_vm2, %v2281_v34, 0.0 }
 0x399   : > { %2183 = vst.msk [vmem:[%s3763_s13 + $0xb0] sm:$0xff] %vm671_vm2, %v2151_v5  ;;  %v2337_v23 = vsel %vm671_vm2, %v2276_v49, 0.0  ;;  %v2309_v43 = vadd.f32 %v2308_v25, %v2307_v21 }
 0x39a   : > { %v2338_v24 = vadd.f32 %v2337_v23, %v2336_v28  ;;  %v2246_v42 = vadd.f32 %v2245_v4, %v2244_v41  ;;  %v2347_v15 = vsel %vm671_vm2, %v2286_v56, 0.0 }
 0x39b   : > { %v2036_v3 = vpop.permute.xlu1 %2035 }
 0x39c   : > { %v2034_v44 = vpop.permute.xlu0 %2033  ;;  %v2097_v38 = vadd.f32 %v2036_v3, %v1977_v62  ;;  %v2340_v53 = vadd.f32 %v2339_v46, %v2338_v24  ;;  %v2251_v62 = vsel %vm671_vm2, %v4132_v2, 0.0 }
 0x39d   : > { %v2096_v8 = vadd.f32 %v2034_v44, %v1976_v13  ;;  %v2154_v40 = vld [vmem:[#allocation2 + $0xc8] sm:$0xff]  ;;  %v2253_v13 = vsel %vm671_vm2, %v3767_v1, 0.0 }
 0x39e   : > { %2127 = vst.msk [vmem:[#allocation2 + $0xe0] sm:$0xff] %vm671_vm2, %v2097_v38  ;;  %v2153_v6 = vld [vmem:[#allocation2 + $0xc0] sm:$0xff]  ;;  %v2280_v39 = vmul.f32 %v2154_v40, %v2154_v40  ;;  %v2247_v16 = vsel %vm671_vm2, %v2154_v40, 0.0  ;;  %v2345_v38 = vsel %vm671_vm2, %v2284_v57, 0.0 }
 0x39f   : > { %2126 = vst.msk [vmem:[#allocation2 + $0xd8] sm:$0x7f] %vm766_vm3, %v2096_v8  ;;  %v2216_v14 = vsel %vm671_vm2, %v2153_v6, 0.0  ;;  %v2279_v37 = vmul.f32 %v2153_v6, %v2153_v6  ;;  %v2248_v36 = vadd.f32 %v2247_v16, %v2246_v42 }
 0x3a0   : > { %2185 = vst.msk [vmem:[%s3763_s13 + $0xc0] sm:$0xff] %vm671_vm2, %v2153_v6  ;;  %v2217_v32 = vadd.f32 %v2216_v14, %v2215_v22  ;;  %v2341_v60 = vsel %vm671_vm2, %v2280_v39, 0.0 }
 0x3a1   : > { %2186 = vst.msk [vmem:[%s3763_s13 + $0xc8] sm:$0xff] %vm671_vm2, %v2154_v40  ;;  %v2310_v50 = vsel %vm671_vm2, %v2279_v37, 0.0  ;;  %v2342_v19 = vadd.f32 %v2341_v60, %v2340_v53 }
 0x3a2   : > { %v2311_v5 = vadd.f32 %v2310_v50, %v2309_v43  ;;  %v2219_v61 = vadd.f32 %v2218_v54, %v2217_v32 }
 0x3a4   : > { %v2313_v17 = vadd.f32 %v2312_v11, %v2311_v5 }
 0x3a5   : > { %v2157_v47 = vld [vmem:[#allocation2 + $0xe0] sm:$0xff] }
 0x3a6   : > { %v2156_v10 = vld [vmem:[#allocation2 + $0xd8] sm:$0xff]  ;;  %2189 = vst.msk [vmem:[%s3763_s13 + $0xe0] sm:$0xff] %vm671_vm2, %v2157_v47  ;;  %v2220_v52 = vsel %vm671_vm2, %v2157_v47, 0.0  ;;  %v2283_v63 = vmul.f32 %v2157_v47, %v2157_v47 }
 0x3a7   : > { %2188 = vst.msk [vmem:[%s3763_s13 + $0xd8] sm:$0xff] %vm671_vm2, %v2156_v10  ;;  %v2221_v0 = vadd.f32 %v2220_v52, %v2219_v61  ;;  %v2249_v55 = vsel %vm671_vm2, %v2156_v10, 0.0  ;;  %v2282_v48 = vmul.f32 %v2156_v10, %v2156_v10 }
 0x3a8   : > { %v2250_v45 = vadd.f32 %v2249_v55, %v2248_v36  ;;  %v2314_v30 = vsel %vm671_vm2, %v2283_v63, 0.0 }
 0x3a9   : > { %v2223_v3 = vadd.f32 %v2222_v58, %v2221_v0  ;;  %v2315_v9 = vadd.f32 %v2314_v30, %v2313_v17  ;;  %v2343_v49 = vsel %vm671_vm2, %v2282_v48, 0.0 }
 0x3aa   : > { %v2252_v12 = vadd.f32 %v2251_v62, %v2250_v45  ;;  %v2344_v44 = vadd.f32 %v2343_v49, %v2342_v19 }
 0x3ab   : > { %v2317_v27 = vadd.f32 %v2316_v7, %v2315_v9  ;;  %v2349_v8 = vsel %vm671_vm2, %v2223_v3, 0.0 }
 0x3ac   : > { %v2254_v20 = vadd.f32 %v2253_v13, %v2252_v12  ;;  %v2346_v31 = vadd.f32 %v2345_v38, %v2344_v44 }
 0x3ad   : > { %v2360_v59 = vsel %vm671_vm2, %v2317_v27, 0.0 }
 0x3ae   : > { %v2348_v2 = vadd.f32 %v2347_v15, %v2346_v31  ;;  %v2350_v29 = vsel %vm671_vm2, %v2254_v20, 0.0 }
 0x3af   : > { %v2351_v35 = vadd.f32 %v2350_v29, %v2349_v8 }
 0x3b0   : > { %v2361_v6 = vsel %vm671_vm2, %v2348_v2, 0.0 }
 0x3b1   : > { %v2352_v1 = vrot.slane %v2351_v35, 4  ;;  %v2362_v40 = vadd.f32 %v2361_v6, %v2360_v59 }
 0x3b3   : > { %v2353_v33 = vadd.f32 %v2352_v1, %v2351_v35  ;;  %v2363_v21 = vrot.slane %v2362_v40, 4 }
 0x3b5   : > { %v2354_v25 = vrot.slane %v2353_v33, 2  ;;  %v2364_v26 = vadd.f32 %v2363_v21, %v2362_v40 }
 0x3b7   : > { %v2355_v22 = vadd.f32 %v2354_v25, %v2353_v33  ;;  %v2365_v14 = vrot.slane %v2364_v26, 2 }
 0x3b9   : > { %v2356_v37 = vrot.slane %v2355_v22, 1  ;;  %v2366_v23 = vadd.f32 %v2365_v14, %v2364_v26 }
 0x3bb   : > { %v2357_v41 = vadd.f32 %v2356_v37, %v2355_v22  ;;  %v2367_v18 = vrot.slane %v2366_v23, 1 }
 0x3bd   : > { %2359 = vst.msk [vmem:[%s225_s25] sm:$0x1] %vm2358_vm4, %v2357_v41  ;;  %v2368_v34 = vadd.f32 %v2367_v18, %v2366_v23 }
 0x3bf   : > { %2369 = vst.msk [vmem:[%s225_s25 + $0x1] sm:$0x1] %vm2358_vm4, %v2368_v34 }
 0x3c0   : > { %2601 = shalt.err (!%p2598_p3)
}
 0x3c1   : > { %2525 = dma.vmem_to_hbm [thread:$0]  (%p2714_p5), %s2392_s26, 32, %s2394_s30, %s2376_s22  }
 0x3c2 PF: > { %p2531_p4 = scmp.ge.s32.totalorder %s2636_s21, 2  ;;  %s2413_s12 = sand.u32 1, %s2624_s18  }
 0x3c3   : > { %s2414_s14 = scalar_lea.sflag [#allocation4], %s2413_s12 }
 0x3c4   : > { %p2528_p7 = pnand %p2531_p4, %p2718_p6 }
 0x3c6   : > { %p2529_p8 = pneg %p2528_p7 }
 0x3c8   : > { %2619 = dma.done.wait (%p2529_p8), %s2414_s14, 32  }
 0x3c9   : > { %2621 = vsyncadd (%p2529_p8), %s2414_s14, 4294967264  ;;  %p16_p9 = scmp.ge.s32.totalorder %s2701_s24, 4   ;;  %s4398_s18 = smov %s2628_s19 }
 0x3ca   : > { %s4399_s19 = smov %s2632_s20  ;;  %s4400_s20 = smov %s2712_s27 }
 0x3cb   : > { %s4401_s21 = smov %s2701_s24  ;;  %18 = sbr.rel (!%p16_p9) target bundleno = 3 (0x3), region = 84 }
 0x3d0   :  { %2420 = vsyncpa [#allocation4], 1 }
 0x3d1   :  { %2422 = vsyncpa [#allocation4 + $0x1], 1 }

</bundles_post_ra>
